<compile_context>
chip_gen: v7x
topology: tpu7x:2x2x1
jax: 0.10.0
libtpu: 0.0.40
codegen_flags: <defaults>
</compile_context>

<pallas_src>
import jax
import jax.numpy as jnp
from jax.experimental import pallas as pl
from jax.experimental.pallas import tpu as pltpu

_MXU_DTYPE = jnp.bfloat16    # MXU operand dtype (weights + activation slabs)
_ACT_DTYPE = jnp.bfloat16    # inter-block activation carry dtype
_EPS = 1e-5


# ----------------------------------------------------------------------------
# Fused residual-block kernel (one sample per grid step)
# ----------------------------------------------------------------------------
def _make_block_kernel(H, W, Cin, Cout, pp, has_skip_conv):
    """Builds the fused block kernel.  pp == 1 means no pooling (const block)."""
    Ho, Wo = H // pp, W // pp
    HW, HoWo = H * W, Ho * Wo
    inv_hw = 1.0 / float(HW)
    inv_pool = 1.0 / float(pp * pp)

    def conv3x3(pad_ref, w_ref, cin, cout):
        # 9 per-tap whole-image matmuls: (H*W, cin) x (cin, cout), f32 accumulate.
        # Conv bias omitted: a per-channel shift is cancelled by the IN mean sub.
        acc = jnp.zeros((HW, cout), jnp.float32)
        for dy in range(3):
            for dx in range(3):
                tap = pad_ref[pl.ds(dy, H), pl.ds(dx, W), :].reshape(HW, cin)
                acc = acc + jnp.dot(tap, w_ref[dy * 3 + dx],
                                    preferred_element_type=jnp.float32)
        return acc                                   # (H*W, cout) f32

    def cond_in_relu(acc, g_ref, be_ref):
        # Two-pass (mean-centred) class-conditional instance norm + ReLU (f32 VPU).
        mean = jnp.sum(acc, axis=0, keepdims=True) * inv_hw          # (1, C)
        cen = acc - mean
        var = jnp.sum(cen * cen, axis=0, keepdims=True) * inv_hw
        xhat = cen * jax.lax.rsqrt(var + _EPS)
        y = g_ref[0].astype(jnp.float32) * xhat + be_ref[0].astype(jnp.float32)
        return jnp.maximum(y, 0.0)                   # (H*W, C) f32

    def avg_pool(v_flat):
        # (H*W, C) -> (Ho*Wo, C): reshape-and-add over the pp x pp window (VPU).
        C = v_flat.shape[-1]
        t = v_flat.reshape(Ho, pp, W, C)
        rows = t[:, 0, :, :]
        for i in range(1, pp):
            rows = rows + t[:, i, :, :]              # (Ho, W, C)
        t = rows.reshape(Ho, Wo, pp, C)
        cols = t[:, :, 0, :]
        for j in range(1, pp):
            cols = cols + t[:, :, j, :]              # (Ho, Wo, C)
        return cols.reshape(HoWo, C) * inv_pool

    def zero_border(ref, hh, ww, c):
        # Zero only the 1-pixel halo border; re-done every step so it stays
        # correct when the "parallel" batch axis is split across TensorCores.
        z_row = jnp.zeros((1, ww + 2, c), ref.dtype)
        ref[pl.ds(0, 1), :, :] = z_row
        ref[pl.ds(hh + 1, 1), :, :] = z_row
        z_col = jnp.zeros((hh, 1, c), ref.dtype)
        ref[pl.ds(1, hh), pl.ds(0, 1), :] = z_col
        ref[pl.ds(1, hh), pl.ds(ww + 1, 1), :] = z_col

    def kernel(x_ref, w1_ref, g1_ref, be1_ref, w2_ref, g2_ref, be2_ref, *rest):
        idx = 0
        ws_ref = bs_ref = None
        if has_skip_conv:
            ws_ref, bs_ref = rest[idx], rest[idx + 1]
            idx += 2
        o_ref, xpad_ref, hpad_ref = rest[idx], rest[idx + 1], rest[idx + 2]

        # ---- in-kernel halo pad of the input (no XLA pad / HBM round trip) ----
        zero_border(xpad_ref, H, W, Cin)
        xpad_ref[pl.ds(1, H), pl.ds(1, W), :] = x_ref[0]

        # ---- conv1 -> cond-IN -> ReLU -----------------------------------------
        h1 = cond_in_relu(conv3x3(xpad_ref, w1_ref, Cin, Cout), g1_ref, be1_ref)

        # re-pad h1 inside VMEM as bf16 for conv2 (halved scratch + store traffic)
        zero_border(hpad_ref, H, W, Cout)
        hpad_ref[pl.ds(1, H), pl.ds(1, W), :] = (
            h1.reshape(H, W, Cout).astype(hpad_ref.dtype))

        # ---- conv2 -> cond-IN -> ReLU -----------------------------------------
        h2 = cond_in_relu(conv3x3(hpad_ref, w2_ref, Cout, Cout), g2_ref, be2_ref)

        # ---- pooling + skip + residual add ------------------------------------
        x_flat = x_ref[0].astype(jnp.float32).reshape(HW, Cin)
        if pp == 1:
            main = h2
            if has_skip_conv:
                skip = jnp.dot(x_flat.astype(_MXU_DTYPE), ws_ref[...],
                               preferred_element_type=jnp.float32) \
                       + bs_ref[...].astype(jnp.float32)
            else:
                skip = x_flat                        # identity (Cin == Cout)
        else:
            main = avg_pool(h2)
            xs = avg_pool(x_flat)                    # pool first: commutes with 1x1
            if has_skip_conv:
                skip = jnp.dot(xs.astype(_MXU_DTYPE), ws_ref[...],
                               preferred_element_type=jnp.float32) \
                       + bs_ref[...].astype(jnp.float32)
            else:
                skip = xs                            # identity (Cin == Cout required)

        # single full-slab store
        o_ref[0, :, :] = (main + skip).astype(o_ref.dtype)

    return kernel


def _block_cost(N, H, W, Cin, Cout, pp, has_skip_conv):
    hw = H * W
    howo = hw // (pp * pp)
    flops = 2 * N * hw * 9 * Cout * (Cin + Cout)                    # two 3x3 convs
    flops += 2 * N * hw * Cout * 8                                  # IN/ReLU/pool/add (VPU)
    if has_skip_conv:
        flops += 2 * N * howo * Cin * Cout                          # 1x1 skip conv
    bytes_accessed = 2 * N * (hw * Cin + howo * Cout)               # bf16 activations
    bytes_accessed += 2 * (9 * Cin * Cout + 9 * Cout * Cout
                           + (Cin * Cout if has_skip_conv else 0))  # bf16 weights
    bytes_accessed += 4 * (4 * N * Cout + (Cout if has_skip_conv else 0))
    return pl.CostEstimate(flops=int(flops),
                           transcendentals=int(2 * N * Cout),
                           bytes_accessed=int(bytes_accessed))


def _vmem_budget_bytes(H, W, Cin, Cout, pp):
    Ho, Wo = H // pp, W // pp
    pad = 2 * (H + 2) * (W + 2) * (Cin + Cout)                  # bf16 halo scratch
    io = 2 * 2 * (H * W * Cin + Ho * Wo * Cout)                 # double-buffered bf16 I/O
    wts = 2 * 2 * (9 * Cin * Cout + 9 * Cout * Cout + Cin * Cout + Cout)
    vals = 4 * 8 * H * W * max(Cin, Cout)                       # f32 value temporaries
    return pad + io + wts + vals


# ----------------------------------------------------------------------------
# Wrapper: one pallas_call per residual block
# ----------------------------------------------------------------------------
def _run_block(params, x, class_idx, pp):
    # x: (N, H, W, Cin) bf16 NHWC;  class_idx: (N,) int32
    N, H, W, Cin = x.shape
    Cout = params["g1"].shape[-1]
    has_skip_conv = "ws" in params
    if H % pp or W % pp:
        raise ValueError(f"H={H}, W={W} must be divisible by pooling_factor={pp}")
    if pp > 1 and not has_skip_conv and Cin != Cout:
        raise ValueError("pooling block without skip conv requires Cin == Cout")
    Ho, Wo = H // pp, W // pp

    g1 = params["g1"][class_idx][:, None, :]                    # (N, 1, Cout) f32
    be1 = params["be1"][class_idx][:, None, :]
    g2 = params["g2"][class_idx][:, None, :]
    be2 = params["be2"][class_idx][:, None, :]

    per_n4 = lambda n: (n, 0, 0, 0)
    per_n3 = lambda n: (n, 0, 0)
    full3 = lambda n: (0, 0, 0)
    full2 = lambda n: (0, 0)

    in_specs = [
        pl.BlockSpec((1, H, W, Cin), per_n4),
        pl.BlockSpec((9, Cin, Cout), full3),
        pl.BlockSpec((1, 1, Cout), per_n3),
        pl.BlockSpec((1, 1, Cout), per_n3),
        pl.BlockSpec((9, Cout, Cout), full3),
        pl.BlockSpec((1, 1, Cout), per_n3),
        pl.BlockSpec((1, 1, Cout), per_n3),
    ]
    args = [x, params["w1"], g1, be1, params["w2"], g2, be2]
    if has_skip_conv:
        in_specs += [pl.BlockSpec((Cin, Cout), full2),
                     pl.BlockSpec((1, Cout), full2)]
        args += [params["ws"], params["bs"]]

    kernel = _make_block_kernel(H, W, Cin, Cout, pp, has_skip_conv)
    vmem_limit = int(min(64 << 20, max(32 << 20,
                                       2 * _vmem_budget_bytes(H, W, Cin, Cout, pp))))

    out = pl.pallas_call(
        kernel,
        out_shape=jax.ShapeDtypeStruct((N, Ho * Wo, Cout), _ACT_DTYPE),
        grid=(N,),
        in_specs=in_specs,
        out_specs=pl.BlockSpec((1, Ho * Wo, Cout), per_n3),
        scratch_shapes=[pltpu.VMEM((H + 2, W + 2, Cin), _MXU_DTYPE),
                        pltpu.VMEM((H + 2, W + 2, Cout), _MXU_DTYPE)],
        compiler_params=pltpu.CompilerParams(
            dimension_semantics=("parallel",),
            vmem_limit_bytes=vmem_limit),
        cost_estimate=_block_cost(N, H, W, Cin, Cout, pp, has_skip_conv),
    )(*args)
    # free (metadata-only) reshape back to NHWC for the next block
    return out.reshape(N, Ho, Wo, Cout)


# ----------------------------------------------------------------------------
# Parameter init (deterministic, synthetic)
# ----------------------------------------------------------------------------
def _init_conv(key, kh, kw, cin, cout):
    scale = 1.0 / float(kh * kw * cin) ** 0.5
    wkey, bkey = jax.random.split(key)
    w = jax.random.uniform(wkey, (kh, kw, cin, cout), jnp.float32, -scale, scale)
    b = jax.random.uniform(bkey, (cout,), jnp.float32, -scale, scale)
    return w, b


def _init_block_params(key, cin, cout, num_classes, with_skip_conv):
    ks = jax.random.split(key, 8)
    # Conv biases before instance norm are exactly cancelled by the mean
    # subtraction, so they are dropped (semantics unchanged).
    w1, _ = _init_conv(ks[0], 3, 3, cin, cout)
    w2, _ = _init_conv(ks[1], 3, 3, cout, cout)
    params = {
        # Tap order (dy-major, dx) must match the in-kernel 9-tap loop order.
        "w1": w1.reshape(9, cin, cout).astype(_MXU_DTYPE),
        "w2": w2.reshape(9, cout, cout).astype(_MXU_DTYPE),
        "g1": 1.0 + 0.1 * jax.random.normal(ks[2], (num_classes, cout), jnp.float32),
        "be1": 0.1 * jax.random.normal(ks[3], (num_classes, cout), jnp.float32),
        "g2": 1.0 + 0.1 * jax.random.normal(ks[4], (num_classes, cout), jnp.float32),
        "be2": 0.1 * jax.random.normal(ks[5], (num_classes, cout), jnp.float32),
    }
    if with_skip_conv:
        ws, bs = _init_conv(ks[6], 1, 1, cin, cout)
        params["ws"] = ws.reshape(cin, cout).astype(_MXU_DTYPE)
        params["bs"] = bs.reshape(1, cout)
    return params


# ----------------------------------------------------------------------------
# Encoder (forward semantics mirror the PyTorch module)
# ----------------------------------------------------------------------------
class Encoder:
    """JAX/Pallas port of the PyTorch Encoder (SequentialConditional of Res blocks)."""

    def __init__(self, input_channels, down_blocks, const_blocks, num_classes,
                 pooling_factor=2, first_out_channels=32,
                 down_channel_multiplier=2, const_channel_multiplier=1, *,
                 key=jax.random.PRNGKey(42)):
        self.pooling_factor = pooling_factor
        self.blocks = []
        keys = jax.random.split(key, down_blocks + const_blocks)
        ki = 0
        out_channels = first_out_channels
        in_channels = input_channels
        for i in range(down_blocks):
            if i != 0:
                in_channels = out_channels
                out_channels *= down_channel_multiplier
            self.blocks.append(
                ("down",
                 _init_block_params(keys[ki], in_channels, out_channels,
                                    num_classes, with_skip_conv=True)))
            ki += 1
        for _ in range(const_blocks):
            in_channels = out_channels
            out_channels *= const_channel_multiplier
            self.blocks.append(
                ("const",
                 _init_block_params(keys[ki], in_channels, out_channels,
                                    num_classes,
                                    with_skip_conv=(in_channels != out_channels))))
            ki += 1

    def __call__(self, x_nchw, class_idx):
        # NCHW (PyTorch) -> NHWC (channels in the lane dim); bf16 between blocks.
        x = jnp.transpose(x_nchw, (0, 2, 3, 1)).astype(_ACT_DTYPE)
        class_idx = class_idx.astype(jnp.int32)
        for kind, params in self.blocks:
            pp = self.pooling_factor if kind == "down" else 1
            x = _run_block(params, x, class_idx, pp)
        # back to NCHW / f32 for parity with the PyTorch module output convention
        return jnp.transpose(x, (0, 3, 1, 2)).astype(jnp.float32)


# ----------------------------------------------------------------------------
# Demo
# ----------------------------------------------------------------------------
if __name__ == "__main__":
    key = jax.random.PRNGKey(0)
    xkey, _ = jax.random.split(key)
    # small shapes: batch=2, channels=4, spatial=16
    x = jax.random.normal(xkey, (2, 4, 16, 16), jnp.float32)          # NCHW input
    class_idx = jnp.array([0, 2], dtype=jnp.int32)

    enc = Encoder(input_channels=4, down_blocks=2, const_blocks=1, num_classes=3,
                  pooling_factor=2, first_out_channels=8,
                  down_channel_multiplier=2, const_channel_multiplier=1)

    out = enc(x, class_idx)
    jax.block_until_ready(out)
    assert out.shape == (2, 16, 4, 4), out.shape
    assert bool(jnp.all(jnp.isfinite(out)))
    print("KERNEL_OK")
</pallas_src>

<mosaic_0001>
module attributes {stable_mosaic.version = 11 : i64} {
  func.func @kernel(%arg0: i32, %arg1: memref<1x16x16x4xbf16, #tpu.memory_space<vmem>>, %arg2: memref<9x4x8xbf16, #tpu.memory_space<vmem>>, %arg3: memref<1x1x8xf32, #tpu.memory_space<vmem>>, %arg4: memref<1x1x8xf32, #tpu.memory_space<vmem>>, %arg5: memref<9x8x8xbf16, #tpu.memory_space<vmem>>, %arg6: memref<1x1x8xf32, #tpu.memory_space<vmem>>, %arg7: memref<1x1x8xf32, #tpu.memory_space<vmem>>, %arg8: memref<4x8xbf16, #tpu.memory_space<vmem>>, %arg9: memref<1x8xf32, #tpu.memory_space<vmem>>, %arg10: memref<1x64x8xbf16, #tpu.memory_space<vmem>>, %arg11: memref<18x18x4xbf16, #tpu.memory_space<vmem>>, %arg12: memref<18x18x8xbf16, #tpu.memory_space<vmem>>) attributes {dimension_semantics = [#tpu.dimension_semantics<parallel>], iteration_bounds = array<i64: 2>, scalar_prefetch = 0 : i64, scratch_operands = 2 : i64, tpu.core_type = #tpu.core_type<tc>, window_params = [{transform_indices = @transform_0, window_bounds = array<i64: 1, 16, 16, 4>}, {pipeline_mode = #tpu.pipeline_mode<synchronous>, transform_indices = @transform_1, window_bounds = array<i64: 9, 4, 8>}, {transform_indices = @transform_2, window_bounds = array<i64: 1, 1, 8>}, {transform_indices = @transform_3, window_bounds = array<i64: 1, 1, 8>}, {pipeline_mode = #tpu.pipeline_mode<synchronous>, transform_indices = @transform_4, window_bounds = array<i64: 9, 8, 8>}, {transform_indices = @transform_5, window_bounds = array<i64: 1, 1, 8>}, {transform_indices = @transform_6, window_bounds = array<i64: 1, 1, 8>}, {pipeline_mode = #tpu.pipeline_mode<synchronous>, transform_indices = @transform_7, window_bounds = array<i64: 4, 8>}, {pipeline_mode = #tpu.pipeline_mode<synchronous>, transform_indices = @transform_8, window_bounds = array<i64: 1, 8>}, {transform_indices = @transform_9, window_bounds = array<i64: 1, 64, 8>}]} {
    %cst = arith.constant 0.000000e+00 : bf16
    %0 = vector.broadcast %cst : bf16 to vector<1x18x4xbf16>
    %c0 = arith.constant 0 : index
    %c0_0 = arith.constant 0 : index
    %c0_1 = arith.constant 0 : index
    %1 = vector.load %arg11[%c0, %c0_0, %c0_1] : memref<18x18x4xbf16, #tpu.memory_space<vmem>>, vector<1x18x4xbf16>
    tpu.vector_store %arg11[%c0, %c0_0, %c0_1], %0 {strides = array<i32>} : memref<18x18x4xbf16, #tpu.memory_space<vmem>>, vector<1x18x4xbf16>,
    %c17 = arith.constant 17 : index
    %c0_2 = arith.constant 0 : index
    %c0_3 = arith.constant 0 : index
    %2 = vector.load %arg11[%c17, %c0_2, %c0_3] : memref<18x18x4xbf16, #tpu.memory_space<vmem>>, vector<1x18x4xbf16>
    tpu.vector_store %arg11[%c17, %c0_2, %c0_3], %0 {strides = array<i32>} : memref<18x18x4xbf16, #tpu.memory_space<vmem>>, vector<1x18x4xbf16>,
    %cst_4 = arith.constant 0.000000e+00 : bf16
    %3 = vector.broadcast %cst_4 : bf16 to vector<16x1x4xbf16>
    %c1 = arith.constant 1 : index
    %c0_5 = arith.constant 0 : index
    %c0_6 = arith.constant 0 : index
    %4 = vector.load %arg11[%c1, %c0_5, %c0_6] : memref<18x18x4xbf16, #tpu.memory_space<vmem>>, vector<16x1x4xbf16>
    tpu.vector_store %arg11[%c1, %c0_5, %c0_6], %3 {strides = array<i32>} : memref<18x18x4xbf16, #tpu.memory_space<vmem>>, vector<16x1x4xbf16>,
    %c1_7 = arith.constant 1 : index
    %c17_8 = arith.constant 17 : index
    %c0_9 = arith.constant 0 : index
    %5 = vector.load %arg11[%c1_7, %c17_8, %c0_9] : memref<18x18x4xbf16, #tpu.memory_space<vmem>>, vector<16x1x4xbf16>
    tpu.vector_store %arg11[%c1_7, %c17_8, %c0_9], %3 {strides = array<i32>} : memref<18x18x4xbf16, #tpu.memory_space<vmem>>, vector<16x1x4xbf16>,
    %c0_10 = arith.constant 0 : index
    %c0_11 = arith.constant 0 : index
    %c0_12 = arith.constant 0 : index
    %c0_13 = arith.constant 0 : index
    %6 = vector.load %arg1[%c0_10, %c0_11, %c0_12, %c0_13] : memref<1x16x16x4xbf16, #tpu.memory_space<vmem>>, vector<1x16x16x4xbf16>
    %7 = vector.shape_cast %6 : vector<1x16x16x4xbf16> to vector<16x16x4xbf16>
    %c1_14 = arith.constant 1 : index
    %c1_15 = arith.constant 1 : index
    %c0_16 = arith.constant 0 : index
    %8 = vector.load %arg11[%c1_14, %c1_15, %c0_16] : memref<18x18x4xbf16, #tpu.memory_space<vmem>>, vector<16x16x4xbf16>
    tpu.vector_store %arg11[%c1_14, %c1_15, %c0_16], %7 {strides = array<i32>} : memref<18x18x4xbf16, #tpu.memory_space<vmem>>, vector<16x16x4xbf16>,
    %cst_17 = arith.constant 0.000000e+00 : f32
    %9 = vector.broadcast %cst_17 : f32 to vector<256x8xf32>
    %c0_18 = arith.constant 0 : index
    %c0_19 = arith.constant 0 : index
    %c0_20 = arith.constant 0 : index
    %10 = vector.load %arg11[%c0_18, %c0_19, %c0_20] : memref<18x18x4xbf16, #tpu.memory_space<vmem>>, vector<16x16x4xbf16>
    %11 = vector.shape_cast %10 : vector<16x16x4xbf16> to vector<256x4xbf16>
    %c0_21 = arith.constant 0 : index
    %c0_22 = arith.constant 0 : index
    %c0_23 = arith.constant 0 : index
    %12 = vector.load %arg2[%c0_21, %c0_22, %c0_23] : memref<9x4x8xbf16, #tpu.memory_space<vmem>>, vector<1x4x8xbf16>
    %13 = vector.shape_cast %12 : vector<1x4x8xbf16> to vector<4x8xbf16>
    %cst_24 = arith.constant dense<0.000000e+00> : vector<256x8xf32>
    %14 = tpu.matmul %11, %13, %cst_24 {dimension_numbers = #tpu.dot_dimension_numbers<[1], [0], [0], [1], [0, 0, 1, 1], [], []>} : vector<256x4xbf16>, vector<4x8xbf16>, vector<256x8xf32> -> vector<256x8xf32>
    %15 = arith.addf %9, %14 : vector<256x8xf32>
    %c0_25 = arith.constant 0 : index
    %c1_26 = arith.constant 1 : index
    %c0_27 = arith.constant 0 : index
    %16 = vector.load %arg11[%c0_25, %c1_26, %c0_27] : memref<18x18x4xbf16, #tpu.memory_space<vmem>>, vector<16x16x4xbf16>
    %17 = vector.shape_cast %16 : vector<16x16x4xbf16> to vector<256x4xbf16>
    %c1_28 = arith.constant 1 : index
    %c0_29 = arith.constant 0 : index
    %c0_30 = arith.constant 0 : index
    %18 = vector.load %arg2[%c1_28, %c0_29, %c0_30] : memref<9x4x8xbf16, #tpu.memory_space<vmem>>, vector<1x4x8xbf16>
    %19 = vector.shape_cast %18 : vector<1x4x8xbf16> to vector<4x8xbf16>
    %cst_31 = arith.constant dense<0.000000e+00> : vector<256x8xf32>
    %20 = tpu.matmul %17, %19, %cst_31 {dimension_numbers = #tpu.dot_dimension_numbers<[1], [0], [0], [1], [0, 0, 1, 1], [], []>} : vector<256x4xbf16>, vector<4x8xbf16>, vector<256x8xf32> -> vector<256x8xf32>
    %21 = arith.addf %15, %20 : vector<256x8xf32>
    %c0_32 = arith.constant 0 : index
    %c2 = arith.constant 2 : index
    %c0_33 = arith.constant 0 : index
    %22 = vector.load %arg11[%c0_32, %c2, %c0_33] : memref<18x18x4xbf16, #tpu.memory_space<vmem>>, vector<16x16x4xbf16>
    %23 = vector.shape_cast %22 : vector<16x16x4xbf16> to vector<256x4xbf16>
    %c2_34 = arith.constant 2 : index
    %c0_35 = arith.constant 0 : index
    %c0_36 = arith.constant 0 : index
    %24 = vector.load %arg2[%c2_34, %c0_35, %c0_36] : memref<9x4x8xbf16, #tpu.memory_space<vmem>>, vector<1x4x8xbf16>
    %25 = vector.shape_cast %24 : vector<1x4x8xbf16> to vector<4x8xbf16>
    %cst_37 = arith.constant dense<0.000000e+00> : vector<256x8xf32>
    %26 = tpu.matmul %23, %25, %cst_37 {dimension_numbers = #tpu.dot_dimension_numbers<[1], [0], [0], [1], [0, 0, 1, 1], [], []>} : vector<256x4xbf16>, vector<4x8xbf16>, vector<256x8xf32> -> vector<256x8xf32>
    %27 = arith.addf %21, %26 : vector<256x8xf32>
    %c1_38 = arith.constant 1 : index
    %c0_39 = arith.constant 0 : index
    %c0_40 = arith.constant 0 : index
    %28 = vector.load %arg11[%c1_38, %c0_39, %c0_40] : memref<18x18x4xbf16, #tpu.memory_space<vmem>>, vector<16x16x4xbf16>
    %29 = vector.shape_cast %28 : vector<16x16x4xbf16> to vector<256x4xbf16>
    %c3 = arith.constant 3 : index
    %c0_41 = arith.constant 0 : index
    %c0_42 = arith.constant 0 : index
    %30 = vector.load %arg2[%c3, %c0_41, %c0_42] : memref<9x4x8xbf16, #tpu.memory_space<vmem>>, vector<1x4x8xbf16>
    %31 = vector.shape_cast %30 : vector<1x4x8xbf16> to vector<4x8xbf16>
    %cst_43 = arith.constant dense<0.000000e+00> : vector<256x8xf32>
    %32 = tpu.matmul %29, %31, %cst_43 {dimension_numbers = #tpu.dot_dimension_numbers<[1], [0], [0], [1], [0, 0, 1, 1], [], []>} : vector<256x4xbf16>, vector<4x8xbf16>, vector<256x8xf32> -> vector<256x8xf32>
    %33 = arith.addf %27, %32 : vector<256x8xf32>
    %c1_44 = arith.constant 1 : index
    %c1_45 = arith.constant 1 : index
    %c0_46 = arith.constant 0 : index
    %34 = vector.load %arg11[%c1_44, %c1_45, %c0_46] : memref<18x18x4xbf16, #tpu.memory_space<vmem>>, vector<16x16x4xbf16>
    %35 = vector.shape_cast %34 : vector<16x16x4xbf16> to vector<256x4xbf16>
    %c4 = arith.constant 4 : index
    %c0_47 = arith.constant 0 : index
    %c0_48 = arith.constant 0 : index
    %36 = vector.load %arg2[%c4, %c0_47, %c0_48] : memref<9x4x8xbf16, #tpu.memory_space<vmem>>, vector<1x4x8xbf16>
    %37 = vector.shape_cast %36 : vector<1x4x8xbf16> to vector<4x8xbf16>
    %cst_49 = arith.constant dense<0.000000e+00> : vector<256x8xf32>
    %38 = tpu.matmul %35, %37, %cst_49 {dimension_numbers = #tpu.dot_dimension_numbers<[1], [0], [0], [1], [0, 0, 1, 1], [], []>} : vector<256x4xbf16>, vector<4x8xbf16>, vector<256x8xf32> -> vector<256x8xf32>
    %39 = arith.addf %33, %38 : vector<256x8xf32>
    %c1_50 = arith.constant 1 : index
    %c2_51 = arith.constant 2 : index
    %c0_52 = arith.constant 0 : index
    %40 = vector.load %arg11[%c1_50, %c2_51, %c0_52] : memref<18x18x4xbf16, #tpu.memory_space<vmem>>, vector<16x16x4xbf16>
    %41 = vector.shape_cast %40 : vector<16x16x4xbf16> to vector<256x4xbf16>
    %c5 = arith.constant 5 : index
    %c0_53 = arith.constant 0 : index
    %c0_54 = arith.constant 0 : index
    %42 = vector.load %arg2[%c5, %c0_53, %c0_54] : memref<9x4x8xbf16, #tpu.memory_space<vmem>>, vector<1x4x8xbf16>
    %43 = vector.shape_cast %42 : vector<1x4x8xbf16> to vector<4x8xbf16>
    %cst_55 = arith.constant dense<0.000000e+00> : vector<256x8xf32>
    %44 = tpu.matmul %41, %43, %cst_55 {dimension_numbers = #tpu.dot_dimension_numbers<[1], [0], [0], [1], [0, 0, 1, 1], [], []>} : vector<256x4xbf16>, vector<4x8xbf16>, vector<256x8xf32> -> vector<256x8xf32>
    %45 = arith.addf %39, %44 : vector<256x8xf32>
    %c2_56 = arith.constant 2 : index
    %c0_57 = arith.constant 0 : index
    %c0_58 = arith.constant 0 : index
    %46 = vector.load %arg11[%c2_56, %c0_57, %c0_58] : memref<18x18x4xbf16, #tpu.memory_space<vmem>>, vector<16x16x4xbf16>
    %47 = vector.shape_cast %46 : vector<16x16x4xbf16> to vector<256x4xbf16>
    %c6 = arith.constant 6 : index
    %c0_59 = arith.constant 0 : index
    %c0_60 = arith.constant 0 : index
    %48 = vector.load %arg2[%c6, %c0_59, %c0_60] : memref<9x4x8xbf16, #tpu.memory_space<vmem>>, vector<1x4x8xbf16>
    %49 = vector.shape_cast %48 : vector<1x4x8xbf16> to vector<4x8xbf16>
    %cst_61 = arith.constant dense<0.000000e+00> : vector<256x8xf32>
    %50 = tpu.matmul %47, %49, %cst_61 {dimension_numbers = #tpu.dot_dimension_numbers<[1], [0], [0], [1], [0, 0, 1, 1], [], []>} : vector<256x4xbf16>, vector<4x8xbf16>, vector<256x8xf32> -> vector<256x8xf32>
    %51 = arith.addf %45, %50 : vector<256x8xf32>
    %c2_62 = arith.constant 2 : index
    %c1_63 = arith.constant 1 : index
    %c0_64 = arith.constant 0 : index
    %52 = vector.load %arg11[%c2_62, %c1_63, %c0_64] : memref<18x18x4xbf16, #tpu.memory_space<vmem>>, vector<16x16x4xbf16>
    %53 = vector.shape_cast %52 : vector<16x16x4xbf16> to vector<256x4xbf16>
    %c7 = arith.constant 7 : index
    %c0_65 = arith.constant 0 : index
    %c0_66 = arith.constant 0 : index
    %54 = vector.load %arg2[%c7, %c0_65, %c0_66] : memref<9x4x8xbf16, #tpu.memory_space<vmem>>, vector<1x4x8xbf16>
    %55 = vector.shape_cast %54 : vector<1x4x8xbf16> to vector<4x8xbf16>
    %cst_67 = arith.constant dense<0.000000e+00> : vector<256x8xf32>
    %56 = tpu.matmul %53, %55, %cst_67 {dimension_numbers = #tpu.dot_dimension_numbers<[1], [0], [0], [1], [0, 0, 1, 1], [], []>} : vector<256x4xbf16>, vector<4x8xbf16>, vector<256x8xf32> -> vector<256x8xf32>
    %57 = arith.addf %51, %56 : vector<256x8xf32>
    %c2_68 = arith.constant 2 : index
    %c2_69 = arith.constant 2 : index
    %c0_70 = arith.constant 0 : index
    %58 = vector.load %arg11[%c2_68, %c2_69, %c0_70] : memref<18x18x4xbf16, #tpu.memory_space<vmem>>, vector<16x16x4xbf16>
    %59 = vector.shape_cast %58 : vector<16x16x4xbf16> to vector<256x4xbf16>
    %c8 = arith.constant 8 : index
    %c0_71 = arith.constant 0 : index
    %c0_72 = arith.constant 0 : index
    %60 = vector.load %arg2[%c8, %c0_71, %c0_72] : memref<9x4x8xbf16, #tpu.memory_space<vmem>>, vector<1x4x8xbf16>
    %61 = vector.shape_cast %60 : vector<1x4x8xbf16> to vector<4x8xbf16>
    %cst_73 = arith.constant dense<0.000000e+00> : vector<256x8xf32>
    %62 = tpu.matmul %59, %61, %cst_73 {dimension_numbers = #tpu.dot_dimension_numbers<[1], [0], [0], [1], [0, 0, 1, 1], [], []>} : vector<256x4xbf16>, vector<4x8xbf16>, vector<256x8xf32> -> vector<256x8xf32>
    %63 = arith.addf %57, %62 : vector<256x8xf32>
    %cst_74 = arith.constant dense<0.000000e+00> : vector<8xf32>
    %64 = vector.multi_reduction <add>, %63, %cst_74 [0] : vector<256x8xf32> to vector<8xf32>
    %65 = vector.shape_cast %64 : vector<8xf32> to vector<1x8xf32>
    %cst_75 = arith.constant 3.906250e-03 : f32
    %66 = vector.broadcast %cst_75 : f32 to vector<1x8xf32>
    %67 = arith.mulf %65, %66 : vector<1x8xf32>
    %68 = vector.broadcast %67 : vector<1x8xf32> to vector<256x8xf32>
    %69 = arith.subf %63, %68 : vector<256x8xf32>
    %70 = arith.mulf %69, %69 : vector<256x8xf32>
    %cst_76 = arith.constant dense<0.000000e+00> : vector<8xf32>
    %71 = vector.multi_reduction <add>, %70, %cst_76 [0] : vector<256x8xf32> to vector<8xf32>
    %72 = vector.shape_cast %71 : vector<8xf32> to vector<1x8xf32>
    %cst_77 = arith.constant 3.906250e-03 : f32
    %73 = vector.broadcast %cst_77 : f32 to vector<1x8xf32>
    %74 = arith.mulf %72, %73 : vector<1x8xf32>
    %cst_78 = arith.constant 9.99999974E-6 : f32
    %75 = vector.broadcast %cst_78 : f32 to vector<1x8xf32>
    %76 = arith.addf %74, %75 : vector<1x8xf32>
    %77 = math.rsqrt %76 : vector<1x8xf32>
    %78 = vector.broadcast %77 : vector<1x8xf32> to vector<256x8xf32>
    %79 = arith.mulf %69, %78 : vector<256x8xf32>
    %c0_79 = arith.constant 0 : index
    %c0_80 = arith.constant 0 : index
    %c0_81 = arith.constant 0 : index
    %80 = vector.load %arg3[%c0_79, %c0_80, %c0_81] : memref<1x1x8xf32, #tpu.memory_space<vmem>>, vector<1x1x8xf32>
    %81 = vector.shape_cast %80 : vector<1x1x8xf32> to vector<1x8xf32>
    %82 = vector.broadcast %81 : vector<1x8xf32> to vector<256x8xf32>
    %83 = arith.mulf %82, %79 : vector<256x8xf32>
    %c0_82 = arith.constant 0 : index
    %c0_83 = arith.constant 0 : index
    %c0_84 = arith.constant 0 : index
    %84 = vector.load %arg4[%c0_82, %c0_83, %c0_84] : memref<1x1x8xf32, #tpu.memory_space<vmem>>, vector<1x1x8xf32>
    %85 = vector.shape_cast %84 : vector<1x1x8xf32> to vector<1x8xf32>
    %86 = vector.broadcast %85 : vector<1x8xf32> to vector<256x8xf32>
    %87 = arith.addf %83, %86 : vector<256x8xf32>
    %cst_85 = arith.constant 0.000000e+00 : f32
    %88 = vector.broadcast %cst_85 : f32 to vector<256x8xf32>
    %89 = arith.maximumf %87, %88 : vector<256x8xf32>
    %cst_86 = arith.constant 0.000000e+00 : bf16
    %90 = vector.broadcast %cst_86 : bf16 to vector<1x18x8xbf16>
    %c0_87 = arith.constant 0 : index
    %c0_88 = arith.constant 0 : index
    %c0_89 = arith.constant 0 : index
    %91 = vector.load %arg12[%c0_87, %c0_88, %c0_89] : memref<18x18x8xbf16, #tpu.memory_space<vmem>>, vector<1x18x8xbf16>
    tpu.vector_store %arg12[%c0_87, %c0_88, %c0_89], %90 {strides = array<i32>} : memref<18x18x8xbf16, #tpu.memory_space<vmem>>, vector<1x18x8xbf16>,
    %c17_90 = arith.constant 17 : index
    %c0_91 = arith.constant 0 : index
    %c0_92 = arith.constant 0 : index
    %92 = vector.load %arg12[%c17_90, %c0_91, %c0_92] : memref<18x18x8xbf16, #tpu.memory_space<vmem>>, vector<1x18x8xbf16>
    tpu.vector_store %arg12[%c17_90, %c0_91, %c0_92], %90 {strides = array<i32>} : memref<18x18x8xbf16, #tpu.memory_space<vmem>>, vector<1x18x8xbf16>,
    %cst_93 = arith.constant 0.000000e+00 : bf16
    %93 = vector.broadcast %cst_93 : bf16 to vector<16x1x8xbf16>
    %c1_94 = arith.constant 1 : index
    %c0_95 = arith.constant 0 : index
    %c0_96 = arith.constant 0 : index
    %94 = vector.load %arg12[%c1_94, %c0_95, %c0_96] : memref<18x18x8xbf16, #tpu.memory_space<vmem>>, vector<16x1x8xbf16>
    tpu.vector_store %arg12[%c1_94, %c0_95, %c0_96], %93 {strides = array<i32>} : memref<18x18x8xbf16, #tpu.memory_space<vmem>>, vector<16x1x8xbf16>,
    %c1_97 = arith.constant 1 : index
    %c17_98 = arith.constant 17 : index
    %c0_99 = arith.constant 0 : index
    %95 = vector.load %arg12[%c1_97, %c17_98, %c0_99] : memref<18x18x8xbf16, #tpu.memory_space<vmem>>, vector<16x1x8xbf16>
    tpu.vector_store %arg12[%c1_97, %c17_98, %c0_99], %93 {strides = array<i32>} : memref<18x18x8xbf16, #tpu.memory_space<vmem>>, vector<16x1x8xbf16>,
    %96 = vector.shape_cast %89 : vector<256x8xf32> to vector<16x16x8xf32>
    %97 = arith.truncf %96 : vector<16x16x8xf32> to vector<16x16x8xbf16>
    %c1_100 = arith.constant 1 : index
    %c1_101 = arith.constant 1 : index
    %c0_102 = arith.constant 0 : index
    %98 = vector.load %arg12[%c1_100, %c1_101, %c0_102] : memref<18x18x8xbf16, #tpu.memory_space<vmem>>, vector<16x16x8xbf16>
    tpu.vector_store %arg12[%c1_100, %c1_101, %c0_102], %97 {strides = array<i32>} : memref<18x18x8xbf16, #tpu.memory_space<vmem>>, vector<16x16x8xbf16>,
    %cst_103 = arith.constant 0.000000e+00 : f32
    %99 = vector.broadcast %cst_103 : f32 to vector<256x8xf32>
    %c0_104 = arith.constant 0 : index
    %c0_105 = arith.constant 0 : index
    %c0_106 = arith.constant 0 : index
    %100 = vector.load %arg12[%c0_104, %c0_105, %c0_106] : memref<18x18x8xbf16, #tpu.memory_space<vmem>>, vector<16x16x8xbf16>
    %101 = vector.shape_cast %100 : vector<16x16x8xbf16> to vector<256x8xbf16>
    %c0_107 = arith.constant 0 : index
    %c0_108 = arith.constant 0 : index
    %c0_109 = arith.constant 0 : index
    %102 = vector.load %arg5[%c0_107, %c0_108, %c0_109] : memref<9x8x8xbf16, #tpu.memory_space<vmem>>, vector<1x8x8xbf16>
    %103 = vector.shape_cast %102 : vector<1x8x8xbf16> to vector<8x8xbf16>
    %cst_110 = arith.constant dense<0.000000e+00> : vector<256x8xf32>
    %104 = tpu.matmul %101, %103, %cst_110 {dimension_numbers = #tpu.dot_dimension_numbers<[1], [0], [0], [1], [0, 0, 1, 1], [], []>} : vector<256x8xbf16>, vector<8x8xbf16>, vector<256x8xf32> -> vector<256x8xf32>
    %105 = arith.addf %99, %104 : vector<256x8xf32>
    %c0_111 = arith.constant 0 : index
    %c1_112 = arith.constant 1 : index
    %c0_113 = arith.constant 0 : index
    %106 = vector.load %arg12[%c0_111, %c1_112, %c0_113] : memref<18x18x8xbf16, #tpu.memory_space<vmem>>, vector<16x16x8xbf16>
    %107 = vector.shape_cast %106 : vector<16x16x8xbf16> to vector<256x8xbf16>
    %c1_114 = arith.constant 1 : index
    %c0_115 = arith.constant 0 : index
    %c0_116 = arith.constant 0 : index
    %108 = vector.load %arg5[%c1_114, %c0_115, %c0_116] : memref<9x8x8xbf16, #tpu.memory_space<vmem>>, vector<1x8x8xbf16>
    %109 = vector.shape_cast %108 : vector<1x8x8xbf16> to vector<8x8xbf16>
    %cst_117 = arith.constant dense<0.000000e+00> : vector<256x8xf32>
    %110 = tpu.matmul %107, %109, %cst_117 {dimension_numbers = #tpu.dot_dimension_numbers<[1], [0], [0], [1], [0, 0, 1, 1], [], []>} : vector<256x8xbf16>, vector<8x8xbf16>, vector<256x8xf32> -> vector<256x8xf32>
    %111 = arith.addf %105, %110 : vector<256x8xf32>
    %c0_118 = arith.constant 0 : index
    %c2_119 = arith.constant 2 : index
    %c0_120 = arith.constant 0 : index
    %112 = vector.load %arg12[%c0_118, %c2_119, %c0_120] : memref<18x18x8xbf16, #tpu.memory_space<vmem>>, vector<16x16x8xbf16>
    %113 = vector.shape_cast %112 : vector<16x16x8xbf16> to vector<256x8xbf16>
    %c2_121 = arith.constant 2 : index
    %c0_122 = arith.constant 0 : index
    %c0_123 = arith.constant 0 : index
    %114 = vector.load %arg5[%c2_121, %c0_122, %c0_123] : memref<9x8x8xbf16, #tpu.memory_space<vmem>>, vector<1x8x8xbf16>
    %115 = vector.shape_cast %114 : vector<1x8x8xbf16> to vector<8x8xbf16>
    %cst_124 = arith.constant dense<0.000000e+00> : vector<256x8xf32>
    %116 = tpu.matmul %113, %115, %cst_124 {dimension_numbers = #tpu.dot_dimension_numbers<[1], [0], [0], [1], [0, 0, 1, 1], [], []>} : vector<256x8xbf16>, vector<8x8xbf16>, vector<256x8xf32> -> vector<256x8xf32>
    %117 = arith.addf %111, %116 : vector<256x8xf32>
    %c1_125 = arith.constant 1 : index
    %c0_126 = arith.constant 0 : index
    %c0_127 = arith.constant 0 : index
    %118 = vector.load %arg12[%c1_125, %c0_126, %c0_127] : memref<18x18x8xbf16, #tpu.memory_space<vmem>>, vector<16x16x8xbf16>
    %119 = vector.shape_cast %118 : vector<16x16x8xbf16> to vector<256x8xbf16>
    %c3_128 = arith.constant 3 : index
    %c0_129 = arith.constant 0 : index
    %c0_130 = arith.constant 0 : index
    %120 = vector.load %arg5[%c3_128, %c0_129, %c0_130] : memref<9x8x8xbf16, #tpu.memory_space<vmem>>, vector<1x8x8xbf16>
    %121 = vector.shape_cast %120 : vector<1x8x8xbf16> to vector<8x8xbf16>
    %cst_131 = arith.constant dense<0.000000e+00> : vector<256x8xf32>
    %122 = tpu.matmul %119, %121, %cst_131 {dimension_numbers = #tpu.dot_dimension_numbers<[1], [0], [0], [1], [0, 0, 1, 1], [], []>} : vector<256x8xbf16>, vector<8x8xbf16>, vector<256x8xf32> -> vector<256x8xf32>
    %123 = arith.addf %117, %122 : vector<256x8xf32>
    %c1_132 = arith.constant 1 : index
    %c1_133 = arith.constant 1 : index
    %c0_134 = arith.constant 0 : index
    %124 = vector.load %arg12[%c1_132, %c1_133, %c0_134] : memref<18x18x8xbf16, #tpu.memory_space<vmem>>, vector<16x16x8xbf16>
    %125 = vector.shape_cast %124 : vector<16x16x8xbf16> to vector<256x8xbf16>
    %c4_135 = arith.constant 4 : index
    %c0_136 = arith.constant 0 : index
    %c0_137 = arith.constant 0 : index
    %126 = vector.load %arg5[%c4_135, %c0_136, %c0_137] : memref<9x8x8xbf16, #tpu.memory_space<vmem>>, vector<1x8x8xbf16>
    %127 = vector.shape_cast %126 : vector<1x8x8xbf16> to vector<8x8xbf16>
    %cst_138 = arith.constant dense<0.000000e+00> : vector<256x8xf32>
    %128 = tpu.matmul %125, %127, %cst_138 {dimension_numbers = #tpu.dot_dimension_numbers<[1], [0], [0], [1], [0, 0, 1, 1], [], []>} : vector<256x8xbf16>, vector<8x8xbf16>, vector<256x8xf32> -> vector<256x8xf32>
    %129 = arith.addf %123, %128 : vector<256x8xf32>
    %c1_139 = arith.constant 1 : index
    %c2_140 = arith.constant 2 : index
    %c0_141 = arith.constant 0 : index
    %130 = vector.load %arg12[%c1_139, %c2_140, %c0_141] : memref<18x18x8xbf16, #tpu.memory_space<vmem>>, vector<16x16x8xbf16>
    %131 = vector.shape_cast %130 : vector<16x16x8xbf16> to vector<256x8xbf16>
    %c5_142 = arith.constant 5 : index
    %c0_143 = arith.constant 0 : index
    %c0_144 = arith.constant 0 : index
    %132 = vector.load %arg5[%c5_142, %c0_143, %c0_144] : memref<9x8x8xbf16, #tpu.memory_space<vmem>>, vector<1x8x8xbf16>
    %133 = vector.shape_cast %132 : vector<1x8x8xbf16> to vector<8x8xbf16>
    %cst_145 = arith.constant dense<0.000000e+00> : vector<256x8xf32>
    %134 = tpu.matmul %131, %133, %cst_145 {dimension_numbers = #tpu.dot_dimension_numbers<[1], [0], [0], [1], [0, 0, 1, 1], [], []>} : vector<256x8xbf16>, vector<8x8xbf16>, vector<256x8xf32> -> vector<256x8xf32>
    %135 = arith.addf %129, %134 : vector<256x8xf32>
    %c2_146 = arith.constant 2 : index
    %c0_147 = arith.constant 0 : index
    %c0_148 = arith.constant 0 : index
    %136 = vector.load %arg12[%c2_146, %c0_147, %c0_148] : memref<18x18x8xbf16, #tpu.memory_space<vmem>>, vector<16x16x8xbf16>
    %137 = vector.shape_cast %136 : vector<16x16x8xbf16> to vector<256x8xbf16>
    %c6_149 = arith.constant 6 : index
    %c0_150 = arith.constant 0 : index
    %c0_151 = arith.constant 0 : index
    %138 = vector.load %arg5[%c6_149, %c0_150, %c0_151] : memref<9x8x8xbf16, #tpu.memory_space<vmem>>, vector<1x8x8xbf16>
    %139 = vector.shape_cast %138 : vector<1x8x8xbf16> to vector<8x8xbf16>
    %cst_152 = arith.constant dense<0.000000e+00> : vector<256x8xf32>
    %140 = tpu.matmul %137, %139, %cst_152 {dimension_numbers = #tpu.dot_dimension_numbers<[1], [0], [0], [1], [0, 0, 1, 1], [], []>} : vector<256x8xbf16>, vector<8x8xbf16>, vector<256x8xf32> -> vector<256x8xf32>
    %141 = arith.addf %135, %140 : vector<256x8xf32>
    %c2_153 = arith.constant 2 : index
    %c1_154 = arith.constant 1 : index
    %c0_155 = arith.constant 0 : index
    %142 = vector.load %arg12[%c2_153, %c1_154, %c0_155] : memref<18x18x8xbf16, #tpu.memory_space<vmem>>, vector<16x16x8xbf16>
    %143 = vector.shape_cast %142 : vector<16x16x8xbf16> to vector<256x8xbf16>
    %c7_156 = arith.constant 7 : index
    %c0_157 = arith.constant 0 : index
    %c0_158 = arith.constant 0 : index
    %144 = vector.load %arg5[%c7_156, %c0_157, %c0_158] : memref<9x8x8xbf16, #tpu.memory_space<vmem>>, vector<1x8x8xbf16>
    %145 = vector.shape_cast %144 : vector<1x8x8xbf16> to vector<8x8xbf16>
    %cst_159 = arith.constant dense<0.000000e+00> : vector<256x8xf32>
    %146 = tpu.matmul %143, %145, %cst_159 {dimension_numbers = #tpu.dot_dimension_numbers<[1], [0], [0], [1], [0, 0, 1, 1], [], []>} : vector<256x8xbf16>, vector<8x8xbf16>, vector<256x8xf32> -> vector<256x8xf32>
    %147 = arith.addf %141, %146 : vector<256x8xf32>
    %c2_160 = arith.constant 2 : index
    %c2_161 = arith.constant 2 : index
    %c0_162 = arith.constant 0 : index
    %148 = vector.load %arg12[%c2_160, %c2_161, %c0_162] : memref<18x18x8xbf16, #tpu.memory_space<vmem>>, vector<16x16x8xbf16>
    %149 = vector.shape_cast %148 : vector<16x16x8xbf16> to vector<256x8xbf16>
    %c8_163 = arith.constant 8 : index
    %c0_164 = arith.constant 0 : index
    %c0_165 = arith.constant 0 : index
    %150 = vector.load %arg5[%c8_163, %c0_164, %c0_165] : memref<9x8x8xbf16, #tpu.memory_space<vmem>>, vector<1x8x8xbf16>
    %151 = vector.shape_cast %150 : vector<1x8x8xbf16> to vector<8x8xbf16>
    %cst_166 = arith.constant dense<0.000000e+00> : vector<256x8xf32>
    %152 = tpu.matmul %149, %151, %cst_166 {dimension_numbers = #tpu.dot_dimension_numbers<[1], [0], [0], [1], [0, 0, 1, 1], [], []>} : vector<256x8xbf16>, vector<8x8xbf16>, vector<256x8xf32> -> vector<256x8xf32>
    %153 = arith.addf %147, %152 : vector<256x8xf32>
    %cst_167 = arith.constant dense<0.000000e+00> : vector<8xf32>
    %154 = vector.multi_reduction <add>, %153, %cst_167 [0] : vector<256x8xf32> to vector<8xf32>
    %155 = vector.shape_cast %154 : vector<8xf32> to vector<1x8xf32>
    %cst_168 = arith.constant 3.906250e-03 : f32
    %156 = vector.broadcast %cst_168 : f32 to vector<1x8xf32>
    %157 = arith.mulf %155, %156 : vector<1x8xf32>
    %158 = vector.broadcast %157 : vector<1x8xf32> to vector<256x8xf32>
    %159 = arith.subf %153, %158 : vector<256x8xf32>
    %160 = arith.mulf %159, %159 : vector<256x8xf32>
    %cst_169 = arith.constant dense<0.000000e+00> : vector<8xf32>
    %161 = vector.multi_reduction <add>, %160, %cst_169 [0] : vector<256x8xf32> to vector<8xf32>
    %162 = vector.shape_cast %161 : vector<8xf32> to vector<1x8xf32>
    %cst_170 = arith.constant 3.906250e-03 : f32
    %163 = vector.broadcast %cst_170 : f32 to vector<1x8xf32>
    %164 = arith.mulf %162, %163 : vector<1x8xf32>
    %cst_171 = arith.constant 9.99999974E-6 : f32
    %165 = vector.broadcast %cst_171 : f32 to vector<1x8xf32>
    %166 = arith.addf %164, %165 : vector<1x8xf32>
    %167 = math.rsqrt %166 : vector<1x8xf32>
    %168 = vector.broadcast %167 : vector<1x8xf32> to vector<256x8xf32>
    %169 = arith.mulf %159, %168 : vector<256x8xf32>
    %c0_172 = arith.constant 0 : index
    %c0_173 = arith.constant 0 : index
    %c0_174 = arith.constant 0 : index
    %170 = vector.load %arg6[%c0_172, %c0_173, %c0_174] : memref<1x1x8xf32, #tpu.memory_space<vmem>>, vector<1x1x8xf32>
    %171 = vector.shape_cast %170 : vector<1x1x8xf32> to vector<1x8xf32>
    %172 = vector.broadcast %171 : vector<1x8xf32> to vector<256x8xf32>
    %173 = arith.mulf %172, %169 : vector<256x8xf32>
    %c0_175 = arith.constant 0 : index
    %c0_176 = arith.constant 0 : index
    %c0_177 = arith.constant 0 : index
    %174 = vector.load %arg7[%c0_175, %c0_176, %c0_177] : memref<1x1x8xf32, #tpu.memory_space<vmem>>, vector<1x1x8xf32>
    %175 = vector.shape_cast %174 : vector<1x1x8xf32> to vector<1x8xf32>
    %176 = vector.broadcast %175 : vector<1x8xf32> to vector<256x8xf32>
    %177 = arith.addf %173, %176 : vector<256x8xf32>
    %cst_178 = arith.constant 0.000000e+00 : f32
    %178 = vector.broadcast %cst_178 : f32 to vector<256x8xf32>
    %179 = arith.maximumf %177, %178 : vector<256x8xf32>
    %c0_179 = arith.constant 0 : index
    %c0_180 = arith.constant 0 : index
    %c0_181 = arith.constant 0 : index
    %c0_182 = arith.constant 0 : index
    %180 = vector.load %arg1[%c0_179, %c0_180, %c0_181, %c0_182] : memref<1x16x16x4xbf16, #tpu.memory_space<vmem>>, vector<1x16x16x4xbf16>
    %181 = vector.shape_cast %180 : vector<1x16x16x4xbf16> to vector<16x16x4xbf16>
    %182 = arith.extf %181 : vector<16x16x4xbf16> to vector<16x16x4xf32>
    %183 = vector.shape_cast %182 : vector<16x16x4xf32> to vector<256x4xf32>
    %184 = vector.shape_cast %179 : vector<256x8xf32> to vector<8x2x16x8xf32>
    %185 = vector.extract_strided_slice %184 {offsets = [0, 0, 0, 0], sizes = [8, 1, 16, 8], strides = [1, 1, 1, 1]} : vector<8x2x16x8xf32> to vector<8x1x16x8xf32>
    %186 = vector.shape_cast %185 : vector<8x1x16x8xf32> to vector<8x16x8xf32>
    %187 = vector.extract_strided_slice %184 {offsets = [0, 1, 0, 0], sizes = [8, 1, 16, 8], strides = [1, 1, 1, 1]} : vector<8x2x16x8xf32> to vector<8x1x16x8xf32>
    %188 = vector.shape_cast %187 : vector<8x1x16x8xf32> to vector<8x16x8xf32>
    %189 = arith.addf %186, %188 : vector<8x16x8xf32>
    %190 = vector.shape_cast %189 : vector<8x16x8xf32> to vector<8x8x2x8xf32>
    %191 = vector.extract_strided_slice %190 {offsets = [0, 0, 0, 0], sizes = [8, 8, 1, 8], strides = [1, 1, 1, 1]} : vector<8x8x2x8xf32> to vector<8x8x1x8xf32>
    %192 = vector.shape_cast %191 : vector<8x8x1x8xf32> to vector<8x8x8xf32>
    %193 = vector.extract_strided_slice %190 {offsets = [0, 0, 1, 0], sizes = [8, 8, 1, 8], strides = [1, 1, 1, 1]} : vector<8x8x2x8xf32> to vector<8x8x1x8xf32>
    %194 = vector.shape_cast %193 : vector<8x8x1x8xf32> to vector<8x8x8xf32>
    %195 = arith.addf %192, %194 : vector<8x8x8xf32>
    %196 = vector.shape_cast %195 : vector<8x8x8xf32> to vector<64x8xf32>
    %cst_183 = arith.constant 2.500000e-01 : f32
    %197 = vector.broadcast %cst_183 : f32 to vector<64x8xf32>
    %198 = arith.mulf %196, %197 : vector<64x8xf32>
    %199 = vector.shape_cast %183 : vector<256x4xf32> to vector<8x2x16x4xf32>
    %200 = vector.extract_strided_slice %199 {offsets = [0, 0, 0, 0], sizes = [8, 1, 16, 4], strides = [1, 1, 1, 1]} : vector<8x2x16x4xf32> to vector<8x1x16x4xf32>
    %201 = vector.shape_cast %200 : vector<8x1x16x4xf32> to vector<8x16x4xf32>
    %202 = vector.extract_strided_slice %199 {offsets = [0, 1, 0, 0], sizes = [8, 1, 16, 4], strides = [1, 1, 1, 1]} : vector<8x2x16x4xf32> to vector<8x1x16x4xf32>
    %203 = vector.shape_cast %202 : vector<8x1x16x4xf32> to vector<8x16x4xf32>
    %204 = arith.addf %201, %203 : vector<8x16x4xf32>
    %205 = vector.shape_cast %204 : vector<8x16x4xf32> to vector<8x8x2x4xf32>
    %206 = vector.extract_strided_slice %205 {offsets = [0, 0, 0, 0], sizes = [8, 8, 1, 4], strides = [1, 1, 1, 1]} : vector<8x8x2x4xf32> to vector<8x8x1x4xf32>
    %207 = vector.shape_cast %206 : vector<8x8x1x4xf32> to vector<8x8x4xf32>
    %208 = vector.extract_strided_slice %205 {offsets = [0, 0, 1, 0], sizes = [8, 8, 1, 4], strides = [1, 1, 1, 1]} : vector<8x8x2x4xf32> to vector<8x8x1x4xf32>
    %209 = vector.shape_cast %208 : vector<8x8x1x4xf32> to vector<8x8x4xf32>
    %210 = arith.addf %207, %209 : vector<8x8x4xf32>
    %211 = vector.shape_cast %210 : vector<8x8x4xf32> to vector<64x4xf32>
    %cst_184 = arith.constant 2.500000e-01 : f32
    %212 = vector.broadcast %cst_184 : f32 to vector<64x4xf32>
    %213 = arith.mulf %211, %212 : vector<64x4xf32>
    %214 = arith.truncf %213 : vector<64x4xf32> to vector<64x4xbf16>
    %c0_185 = arith.constant 0 : index
    %c0_186 = arith.constant 0 : index
    %215 = vector.load %arg8[%c0_185, %c0_186] : memref<4x8xbf16, #tpu.memory_space<vmem>>, vector<4x8xbf16>
    %cst_187 = arith.constant dense<0.000000e+00> : vector<64x8xf32>
    %216 = tpu.matmul %214, %215, %cst_187 {dimension_numbers = #tpu.dot_dimension_numbers<[1], [0], [0], [1], [0, 0, 1, 1], [], []>} : vector<64x4xbf16>, vector<4x8xbf16>, vector<64x8xf32> -> vector<64x8xf32>
    %c0_188 = arith.constant 0 : index
    %c0_189 = arith.constant 0 : index
    %217 = vector.load %arg9[%c0_188, %c0_189] : memref<1x8xf32, #tpu.memory_space<vmem>>, vector<1x8xf32>
    %218 = vector.broadcast %217 : vector<1x8xf32> to vector<64x8xf32>
    %219 = arith.addf %216, %218 : vector<64x8xf32>
    %220 = arith.addf %198, %219 : vector<64x8xf32>
    %221 = arith.truncf %220 : vector<64x8xf32> to vector<64x8xbf16>
    %c0_190 = arith.constant 0 : index
    %c0_191 = arith.constant 0 : index
    %c0_192 = arith.constant 0 : index
    %222 = vector.load %arg10[%c0_190, %c0_191, %c0_192] : memref<1x64x8xbf16, #tpu.memory_space<vmem>>, vector<1x64x8xbf16>
    %223 = vector.shape_cast %222 : vector<1x64x8xbf16> to vector<64x8xbf16>
    %224 = vector.shape_cast %221 : vector<64x8xbf16> to vector<1x64x8xbf16>
    tpu.vector_store %arg10[%c0_190, %c0_191, %c0_192], %224 {strides = array<i32>} : memref<1x64x8xbf16, #tpu.memory_space<vmem>>, vector<1x64x8xbf16>,
    return
  }
  func.func @transform_0(%arg0: i32) -> (i32, i32, i32, i32) {
    %c0_i32 = arith.constant 0 : i32
    %c0_i32_0 = arith.constant 0 : i32
    %c0_i32_1 = arith.constant 0 : i32
    %c0_i32_2 = arith.constant 0 : i32
    return %arg0, %c0_i32, %c0_i32_0, %c0_i32_1 : i32, i32, i32, i32
  }
  func.func @transform_1(%arg0: i32) -> (i32, i32, i32) {
    %c0_i32 = arith.constant 0 : i32
    %c0_i32_0 = arith.constant 0 : i32
    %c0_i32_1 = arith.constant 0 : i32
    %c0_i32_2 = arith.constant 0 : i32
    return %c0_i32, %c0_i32_0, %c0_i32_1 : i32, i32, i32
  }
  func.func @transform_2(%arg0: i32) -> (i32, i32, i32) {
    %c0_i32 = arith.constant 0 : i32
    %c0_i32_0 = arith.constant 0 : i32
    %c0_i32_1 = arith.constant 0 : i32
    return %arg0, %c0_i32, %c0_i32_0 : i32, i32, i32
  }
  func.func @transform_3(%arg0: i32) -> (i32, i32, i32) {
    %c0_i32 = arith.constant 0 : i32
    %c0_i32_0 = arith.constant 0 : i32
    %c0_i32_1 = arith.constant 0 : i32
    return %arg0, %c0_i32, %c0_i32_0 : i32, i32, i32
  }
  func.func @transform_4(%arg0: i32) -> (i32, i32, i32) {
    %c0_i32 = arith.constant 0 : i32
    %c0_i32_0 = arith.constant 0 : i32
    %c0_i32_1 = arith.constant 0 : i32
    %c0_i32_2 = arith.constant 0 : i32
    return %c0_i32, %c0_i32_0, %c0_i32_1 : i32, i32, i32
  }
  func.func @transform_5(%arg0: i32) -> (i32, i32, i32) {
    %c0_i32 = arith.constant 0 : i32
    %c0_i32_0 = arith.constant 0 : i32
    %c0_i32_1 = arith.constant 0 : i32
    return %arg0, %c0_i32, %c0_i32_0 : i32, i32, i32
  }
  func.func @transform_6(%arg0: i32) -> (i32, i32, i32) {
    %c0_i32 = arith.constant 0 : i32
    %c0_i32_0 = arith.constant 0 : i32
    %c0_i32_1 = arith.constant 0 : i32
    return %arg0, %c0_i32, %c0_i32_0 : i32, i32, i32
  }
  func.func @transform_7(%arg0: i32) -> (i32, i32) {
    %c0_i32 = arith.constant 0 : i32
    %c0_i32_0 = arith.constant 0 : i32
    %c0_i32_1 = arith.constant 0 : i32
    return %c0_i32, %c0_i32_0 : i32, i32
  }
  func.func @transform_8(%arg0: i32) -> (i32, i32) {
    %c0_i32 = arith.constant 0 : i32
    %c0_i32_0 = arith.constant 0 : i32
    %c0_i32_1 = arith.constant 0 : i32
    return %c0_i32, %c0_i32_0 : i32, i32
  }
  func.func @transform_9(%arg0: i32) -> (i32, i32, i32) {
    %c0_i32 = arith.constant 0 : i32
    %c0_i32_0 = arith.constant 0 : i32
    %c0_i32_1 = arith.constant 0 : i32
    return %arg0, %c0_i32, %c0_i32_0 : i32, i32, i32
  }
}

</mosaic_0001>

<bundles_post_ra>
// kernel: tpu_custom_call.1
= control target key start
LH: loop header
LB: loop body
LE: loop exit
PB: predicated region body
PF: predicated region fallthrough
CT: control target
= control target key end

     0   :  { %s16876_s30 = smov 0   ;;  %s22217_s0 = inlined_call_operand.vmem [shape: bf16[2,16,16,4], index: 0, kind: input, shape index: {}]   ;;  %s22218_s1 = inlined_call_operand.vmem [shape: bf16[9,4,8], index: 1, kind: input, shape index: {}]   ;;  %s22219_s2 = inlined_call_operand.vmem [shape: f32[2,1,8], index: 2, kind: input, shape index: {}]   ;;  %s22220_s3 = inlined_call_operand.vmem [shape: f32[2,1,8], index: 3, kind: input, shape index: {}]   ;;  %s22221_s4 = inlined_call_operand.vmem [shape: bf16[9,8,8], index: 4, kind: input, shape index: {}]   ;;  %s22222_s5 = inlined_call_operand.vmem [shape: f32[2,1,8], index: 5, kind: input, shape index: {}]   ;;  %s22223_s6 = inlined_call_operand.vmem [shape: f32[2,1,8], index: 6, kind: input, shape index: {}]   ;;  %s22224_s7 = inlined_call_operand.vmem [shape: bf16[4,8], index: 7, kind: input, shape index: {}]   ;;  %s22225_s8 = inlined_call_operand.vmem [shape: f32[1,8], index: 8, kind: input, shape index: {}]   ;;  %s22226_s9 = inlined_call_operand.vmem [shape: bf16[2,64,8], index: 9, kind: output, shape index: {}]  }
   0x1 LB: > { %s14108_s10 = sadd.s32 4294967295, %s16822_s30   ;;  %p14112_p0 = scmp.ge.s32.totalorder %s16822_s30, 1  ;;  %s16822_s30 = sphi %s16876_s30, %s19_s30  }
   0x2   : > { %p319_p1 = scmp.lt.s32.totalorder %s16822_s30, 3 }
   0x4   : > { %p320_p2 = pnand %p14112_p0, %p319_p1 }
   0x6   : > { %323 = sbr.rel (%p320_p2) target bundleno = 2234 (0x8ba), region = 56 }
   0xd   : > { %v14117_v0 = vld [vmem:[%s22218_s1 + $0x2] sm:$0x3]  ;;  %vm1504_vm0 = vcmask 1041408   ;;  %vm390_vm1 = vcmask 27648   ;;  %vm393_vm2 = vcmask 24576   ;;  %v22227_v2 = vmov 0  }
   0xe   : > { %16664 = vmatprep.subr.msk.bf16.mxu0 %vm1504_vm0, %v14117_v0  ;;  %v1506_v1 = vsel %vm1504_vm0, %v14117_v0, 0  ;;  %391 = vst.msk [vmem:[#allocation2] sm:$0xf] %vm390_vm1, %v22227_v2  ;;  %392 = vst.msk [vmem:[#allocation2 + $0x4] sm:$0xf] %vm390_vm1, %v22227_v2  ;;  %16665 = vmatprep.subr.msk.bf16.mxu1 %vm1504_vm0, %v14117_v0  ;;  %vm5876_vm6 = vcmask 60416  }
   0xf   : > { %394 = vst.msk [vmem:[#allocation2 + $0x8] sm:$0x1] %vm393_vm2, %v22227_v2  ;;  %vm401_vm3 = vsmask.f32 256  ;;  %vm451_vm4 = vsmask.f32 7938  ;;  %15529 = vmatpush3.bf16.msra.mxu0 %v1506_v1  ;;  %16151 = vmatpush3.bf16.msra.mxu1 %v1506_v1 }
  0x10   : > { %396 = vst.msk [vmem:[#allocation2 + $0xcc] sm:$0xf] %vm390_vm1, %v22227_v2  ;;  %397 = vst.msk [vmem:[#allocation2 + $0xd0] sm:$0xf] %vm390_vm1, %v22227_v2  ;;  %p367_p3 = scmp.lt.s32.totalorder %s14108_s10, 1  ;;  %vm1455_vm11 = vcmask 31744  }
  0x11   : > { %398 = vst.msk [vmem:[#allocation2 + $0xd4] sm:$0x1] %vm393_vm2, %v22227_v2  ;;  %vm16904_vm5 = vmand %vm393_vm2, %vm401_vm3  ;;  %v16927_v5 = vld [vmem:[%s22218_s1] sm:$0x3]  ;;  %v403_v6 = vld [vmem:[#allocation2 + $0xc] sm:$0x1] }
  0x12   : > { %vm16912_vm7 = vmand %vm393_vm2, %vm451_vm4  ;;  %5877 = vst.msk [vmem:[#allocation3] sm:$0xf] %vm5876_vm6, %v22227_v2  ;;  %vm1018_vm8 = vsmask.f32 3328  ;;  %16666 = vmatprep.subr.msk.bf16.mxu0 %vm1504_vm0, %v16927_v5  ;;  %s22795_s10 = smov (!%p367_p3, %s14108_s10), 1  ;;  %v404_v7 = vsel %vm16904_vm5, 0, %v403_v6 }
  0x13   : > { %5878 = vst.msk [vmem:[#allocation3 + $0x4] sm:$0xf] %vm5876_vm6, %v22227_v2  ;;  %5882 = vst.msk [vmem:[#allocation3 + $0xcc] sm:$0xf] %vm5876_vm6, %v22227_v2  ;;  %v453_v8 = vld [vmem:[#allocation2 + $0x14] sm:$0x1]  ;;  %s374_s21 = scalar_lea.vmem %s22219_s2, %s22795_s10  ;;  %s377_s24 = scalar_lea.vmem %s22220_s3, %s22795_s10 }
  0x14   : > { %5883 = vst.msk [vmem:[#allocation3 + $0xd0] sm:$0xf] %vm5876_vm6, %v22227_v2  ;;  %405 = vst [vmem:[#allocation2 + $0xc] sm:$0x1] %v404_v7  ;;  %v454_v9 = vsel %vm16912_vm7, 0, %v453_v8  ;;  %s15040_s15 = sshll.u32 %s22795_s10, 7  ;;  %s21797_s28 = scalar_lea.vmem %s22222_s5, %s22795_s10 }
  0x15   : > { %v406_v10 = vld [vmem:[#allocation2 + $0x18] sm:$0x1]  ;;  %v456_v11 = vld [vmem:[#allocation2 + $0x20] sm:$0x1]  ;;  %455 = vst [vmem:[#allocation2 + $0x14] sm:$0x1] %v454_v9  ;;  %s16947_s18 = scalar_lea.vmem %s22217_s0, %s15040_s15  ;;  %vm16956_vm12 = vmand %vm390_vm1, %vm451_vm4  ;;  %s21817_s12 = scalar_lea.vmem %s22223_s6, %s22795_s10 }
  0x16   : > { %v407_v12 = vsel %vm16904_vm5, 0, %v406_v10  ;;  %v457_v13 = vsel %vm16912_vm7, 0, %v456_v11  ;;  %v409_v14 = vld [vmem:[#allocation2 + $0x24] sm:$0x1]  ;;  %vm1019_vm9 = vsmask.f32 7440 }
  0x17   : > { %vm533_vm10 = vsmask.f32 4368  ;;  %408 = vst [vmem:[#allocation2 + $0x18] sm:$0x1] %v407_v12  ;;  %458 = vst [vmem:[#allocation2 + $0x20] sm:$0x1] %v457_v13 }
  0x18   : > { %v410_v15 = vsel %vm16904_vm5, 0, %v409_v14  ;;  %v969_v16 = vld [vmem:[#allocation2] sm:$0xf]  ;;  %v970_v17 = vld [vmem:[#allocation2 + $0x4] sm:$0xf]  ;;  %vm16963_vm13 = vmor %vm1018_vm8, %vm1019_vm9  ;;  %v22382_v44 = vmov 0 }
  0x19   : > { %v1002_v18 = vld [vmem:[#allocation2 + $0x8] sm:$0x1]  ;;  %411 = vst [vmem:[#allocation2 + $0x24] sm:$0x1] %v410_v15  ;;  %v1022_v19 = vshrl.u32 %v969_v16, 16  ;;  %v1025_v20 = vshll.u32 %v969_v16, 16  ;;  %vm16969_vm14 = vmor %vm401_vm3, %vm533_vm10 }
  0x1a   : > { %v1031_v21 = vshll.u32 %v970_v17, 16  ;;  %v1035_v22 = vshrl.u32 %v970_v17, 16  ;;  %v501_v23 = vld [vmem:[%s16947_s18] sm:$0xf]  ;;  %v1041_v24 = vshll.u32 %v1002_v18, 16  ;;  %v22383_v44 = vsel %vm16963_vm13, 4294967295, %v22382_v44  ;;  %vm19363_vm10 = vmand %vm5876_vm6, %vm451_vm4 }
  0x1b   : > { %v502_v25 = vld [vmem:[%s16947_s18 + $0x4] sm:$0xf]  ;;  %v536_v26 = vshrl.u32 %v501_v23, 16  ;;  %v539_v27 = vshll.u32 %v501_v23, 16  ;;  %v1024_v28 = vrot.slane %v1022_v19, 4  ;;  %v1027_v29 = vrot.slane %v1025_v20, 5 }
  0x1c   : > { %v1033_v30 = vrot.slane %v1031_v21, 5  ;;  %v1037_v31 = vrot.slane %v1035_v22, 4  ;;  %v503_v32 = vld [vmem:[%s16947_s18 + $0x8] sm:$0xf]  ;;  %v1043_v33 = vrot.slane %v1041_v24, 5  ;;  %v544_v35 = vshrl.u32 %v502_v25, 16 }
  0x1d   : > { %v538_v34 = vrot.slane %v536_v26, 7  ;;  %v547_v36 = vshll.u32 %v502_v25, 16  ;;  %v1028_v38 = vor.u32 %v1027_v29, %v1024_v28  ;;  %v857_v40 = vld [vmem:[#allocation2 + $0xc] sm:$0xf]  ;;  %v553_v42 = vshrl.u32 %v503_v32, 16  ;;  %22384 = vst [vmem:[#allocation4_spill] sm:$0xff] %v22383_v44 }
  0x1e   : > { %v1038_v39 = vor.u32 %v1037_v31, %v1033_v30  ;;  %v504_v41 = vld [vmem:[%s16947_s18 + $0xc] sm:$0xf]  ;;  %v556_v43 = vshll.u32 %v503_v32, 16  ;;  %v546_v47 = vrot.slane %v544_v35, 7  ;;  %v22385_v52 = vmov 0  ;;  %s15041_s13 = sshll.u32 %s22795_s10, 5 }
  0x1f   : > { %v541_v45 = vor.u32 %v539_v27, %v538_v34  ;;  %v542_v46 = vrot.slane %v538_v34, 4  ;;  %v561_v48 = vshrl.u32 %v504_v41, 16  ;;  %v459_v49 = vld [vmem:[#allocation2 + $0x2c] sm:$0x1]  ;;  %v1029_v50 = vrot.slane %v1028_v38, 4  ;;  %s21948_s10 = scalar_lea.vmem %s22226_s9, %s15041_s13 }
  0x20   : > { %v1039_v51 = vrot.slane %v1038_v39, 4  ;;  %v22386_v52 = vsel %vm16969_vm14, 4294967295, %v22385_v52  ;;  %v861_v53 = vld [vmem:[#allocation2 + $0x14] sm:$0x1]  ;;  %v555_v54 = vrot.slane %v553_v42, 7  ;;  %v564_v55 = vshll.u32 %v504_v41, 16 }
  0x21   : > { %22387 = vst [vmem:[#allocation5_spill] sm:$0xff] %v22386_v52  ;;  %v549_v56 = vor.u32 %v547_v36, %v546_v47  ;;  %v551_v57 = vrot.slane %v546_v47, 4  ;;  %v858_v58 = vsel %vm16956_vm12, %v541_v45, %v857_v40  ;;  %v563_v59 = vrot.slane %v561_v48, 7  ;;  %v864_v60 = vld [vmem:[#allocation2 + $0x18] sm:$0xf] }
  0x22   : > { %v505_v61 = vld [vmem:[%s16947_s18 + $0x10] sm:$0xf]  ;;  %v1034_v62 = vsel %vm16963_vm13, %v1029_v50, %v1033_v30  ;;  %v1044_v63 = vsel %vm16963_vm13, %v1039_v51, %v1043_v33  ;;  %859 = vst [vmem:[#allocation2 + $0xc] sm:$0xf] %v858_v58  ;;  %v558_v0 = vor.u32 %v556_v43, %v555_v54  ;;  %v559_v1 = vrot.slane %v555_v54, 4 }
  0x23   : > { %v506_v6 = vld [vmem:[%s16947_s18 + $0x14] sm:$0xf]  ;;  %v412_v7 = vld [vmem:[#allocation2 + $0x30] sm:$0x1]  ;;  %v14118_v8 = vcombine.low %v1034_v62, %v1044_v63  ;;  %v550_v9 = vsel %vm16969_vm14, %v542_v46, %v549_v56  ;;  %v862_v10 = vsel %vm16904_vm5, %v551_v57, %v861_v53  ;;  %v566_v11 = vor.u32 %v564_v55, %v563_v59  ;;  %v868_v12 = vld [vmem:[#allocation2 + $0x20] sm:$0x1] }
  0x24   : > { %v462_v13 = vld [vmem:[#allocation2 + $0x38] sm:$0x1]  ;;  %860 = vst.msk [vmem:[#allocation2 + $0x10] sm:$0xf] %vm390_vm1, %v550_v9  ;;  %863 = vst [vmem:[#allocation2 + $0x14] sm:$0x1] %v862_v10  ;;  %v865_v16 = vsel %vm16956_vm12, %v558_v0, %v864_v60 }
  0x25   : > { %v507_v14 = vld [vmem:[%s16947_s18 + $0x18] sm:$0xf]  ;;  %v568_v15 = vrot.slane %v563_v59, 4  ;;  %v460_v17 = vsel %vm16912_vm7, 0, %v459_v49  ;;  %v570_v18 = vshrl.u32 %v505_v61, 16  ;;  %15530 = vmatprep.mubr.msk.bf16.mxu0 %vm1455_vm11, %v14118_v8  ;;  %v567_v20 = vsel %vm16969_vm14, %v559_v1, %v566_v11 }
  0x26   : > { %v508_v19 = vld [vmem:[%s16947_s18 + $0x1c] sm:$0xf]  ;;  %866 = vst [vmem:[#allocation2 + $0x18] sm:$0xf] %v865_v16  ;;  %461 = vst [vmem:[#allocation2 + $0x2c] sm:$0x1] %v460_v17 }
  0x27   : > { %v573_v21 = vshll.u32 %v505_v61, 16  ;;  %v578_v22 = vshrl.u32 %v506_v6, 16  ;;  %v581_v23 = vshll.u32 %v506_v6, 16  ;;  %v415_v24 = vld [vmem:[#allocation2 + $0x3c] sm:$0x1]  ;;  %v869_v25 = vsel %vm16904_vm5, %v568_v15, %v868_v12 }
  0x28   : > { %867 = vst.msk [vmem:[#allocation2 + $0x1c] sm:$0xf] %vm390_vm1, %v567_v20  ;;  %v572_v26 = vrot.slane %v570_v18, 7  ;;  %v871_v27 = vld [vmem:[#allocation2 + $0x24] sm:$0xf]  ;;  %v413_v28 = vsel %vm16904_vm5, 0, %v412_v7 }
  0x29   : > { %v463_v29 = vsel %vm16912_vm7, 0, %v462_v13  ;;  %870 = vst [vmem:[#allocation2 + $0x20] sm:$0x1] %v869_v25  ;;  %v580_v30 = vrot.slane %v578_v22, 7  ;;  %414 = vst [vmem:[#allocation2 + $0x30] sm:$0x1] %v413_v28 }
  0x2a   : > { %464 = vst [vmem:[#allocation2 + $0x38] sm:$0x1] %v463_v29  ;;  %v587_v31 = vshrl.u32 %v507_v14, 16  ;;  %v590_v32 = vshll.u32 %v507_v14, 16  ;;  %v595_v33 = vshrl.u32 %v508_v19, 16  ;;  %v575_v35 = vor.u32 %v573_v21, %v572_v26 }
  0x2b   : > { %v465_v34 = vld [vmem:[#allocation2 + $0x44] sm:$0x1]  ;;  %v576_v36 = vrot.slane %v572_v26, 4  ;;  %v416_v38 = vsel %vm16904_vm5, 0, %v415_v24  ;;  %v17004_v39 = vld [vmem:[#allocation2 + $0xc] sm:$0xf]  ;;  %v583_v40 = vor.u32 %v581_v23, %v580_v30 }
  0x2c   : > { %v589_v41 = vrot.slane %v587_v31, 7  ;;  %v17006_v42 = vrot.slane %v595_v33, 7  ;;  %v598_v43 = vshll.u32 %v508_v19, 16  ;;  %417 = vst [vmem:[#allocation2 + $0x3c] sm:$0x1] %v416_v38  ;;  %v1046_v45 = vshrl.u32 %v17004_v39, 16 }
  0x2d   : > { %v1049_v46 = vshll.u32 %v17004_v39, 16  ;;  %v872_v47 = vsel %vm16956_vm12, %v575_v35, %v871_v27  ;;  %v466_v48 = vsel %vm16912_vm7, 0, %v465_v34  ;;  %v17014_v49 = vld [vmem:[#allocation2 + $0x10] sm:$0xf]  ;;  %v1003_v50 = vld [vmem:[#allocation2 + $0x14] sm:$0x1]  ;;  %v584_v53 = vsel %vm16969_vm14, %v576_v36, %v583_v40 }
  0x2e   : > { %v17018_v51 = vsel %vm1504_vm0, %v16927_v5, 0  ;;  %v585_v54 = vrot.slane %v580_v30, 4  ;;  %873 = vst [vmem:[#allocation2 + $0x24] sm:$0xf] %v872_v47  ;;  %v592_v55 = vor.u32 %v590_v32, %v589_v41  ;;  %467 = vst [vmem:[#allocation2 + $0x44] sm:$0x1] %v466_v48  ;;  %v600_v0 = vor.u32 %v598_v43, %v17006_v42 }
  0x2f   : > { %v1048_v56 = vrot.slane %v1046_v45, 4  ;;  %v1051_v57 = vrot.slane %v1049_v46, 5  ;;  %v1055_v58 = vshll.u32 %v17014_v49, 16  ;;  %v1059_v59 = vshrl.u32 %v17014_v49, 16  ;;  %v973_v60 = vld [vmem:[#allocation2 + $0x18] sm:$0xf] }
  0x30   : > { %874 = vst.msk [vmem:[#allocation2 + $0x28] sm:$0xf] %vm390_vm1, %v584_v53  ;;  %v1065_v61 = vshll.u32 %v1003_v50, 16  ;;  %v974_v62 = vld [vmem:[#allocation2 + $0x1c] sm:$0xf]  ;;  %v1070_v5 = vshrl.u32 %v973_v60, 16 }
  0x31   : > { %v593_v63 = vrot.slane %v589_v41, 4  ;;  %v1052_v1 = vor.u32 %v1051_v57, %v1048_v56  ;;  %v1057_v6 = vrot.slane %v1055_v58, 5  ;;  %v1061_v7 = vrot.slane %v1059_v59, 4  ;;  %v1004_v8 = vld [vmem:[#allocation2 + $0x20] sm:$0x1] }
  0x32   : > { %v1073_v9 = vshll.u32 %v973_v60, 16  ;;  %v1067_v10 = vrot.slane %v1065_v61, 5  ;;  %v1072_v11 = vrot.slane %v1070_v5, 4  ;;  %v1079_v12 = vshll.u32 %v974_v62, 16  ;;  %v875_v14 = vld [vmem:[#allocation2 + $0x2c] sm:$0x1] }
  0x33   : > { %v1083_v13 = vshrl.u32 %v974_v62, 16  ;;  %v1053_v15 = vrot.slane %v1052_v1, 4  ;;  %v1062_v16 = vor.u32 %v1061_v7, %v1057_v6  ;;  %v1089_v18 = vshll.u32 %v1004_v8, 16  ;;  %v878_v28 = vld [vmem:[#allocation2 + $0x30] sm:$0xf] }
  0x34   : > { %v1075_v17 = vrot.slane %v1073_v9, 5  ;;  %v1081_v19 = vrot.slane %v1079_v12, 5  ;;  %v876_v21 = vsel %vm16904_vm5, %v585_v54, %v875_v14  ;;  %v601_v22 = vsel %vm16969_vm14, %v593_v63, %v600_v0  ;;  %v509_v29 = vld [vmem:[%s16947_s18 + $0x20] sm:$0xf]  ;;  %v882_v41 = vld [vmem:[#allocation2 + $0x38] sm:$0x1] }
  0x35   : > { %v1085_v20 = vrot.slane %v1083_v13, 4  ;;  %v1058_v23 = vsel %vm16963_vm13, %v1053_v15, %v1057_v6  ;;  %v1063_v24 = vrot.slane %v1062_v16, 4  ;;  %v1091_v26 = vrot.slane %v1089_v18, 5  ;;  %877 = vst [vmem:[#allocation2 + $0x2c] sm:$0x1] %v876_v21 }
  0x36   : > { %v1076_v25 = vor.u32 %v1075_v17, %v1072_v11  ;;  %v975_v27 = vld [vmem:[#allocation2 + $0x24] sm:$0xf]  ;;  %881 = vst.msk [vmem:[#allocation2 + $0x34] sm:$0xf] %vm390_vm1, %v601_v22  ;;  %v602_v34 = vrot.slane %v17006_v42, 4  ;;  %v879_v42 = vsel %vm16956_vm12, %v592_v55, %v878_v28  ;;  %v604_v59 = vshrl.u32 %v509_v29, 16 }
  0x37   : > { %v1086_v30 = vor.u32 %v1085_v20, %v1081_v19  ;;  %v976_v31 = vld [vmem:[#allocation2 + $0x28] sm:$0xf]  ;;  %v1094_v32 = vshrl.u32 %v975_v27, 16  ;;  %v1097_v33 = vshll.u32 %v975_v27, 16  ;;  %v1068_v35 = vsel %vm16963_vm13, %v1063_v24, %v1067_v10  ;;  %v510_v48 = vld [vmem:[%s16947_s18 + $0x24] sm:$0xf] }
  0x38   : > { %v1077_v36 = vrot.slane %v1076_v25, 4  ;;  %v1103_v38 = vshll.u32 %v976_v31, 16  ;;  %v1107_v40 = vshrl.u32 %v976_v31, 16  ;;  %v14119_v43 = vcombine.low %v1058_v23, %v1068_v35  ;;  %880 = vst [vmem:[#allocation2 + $0x30] sm:$0xf] %v879_v42 }
  0x39   : > { %v1087_v45 = vrot.slane %v1086_v30, 4  ;;  %v1096_v46 = vrot.slane %v1094_v32, 4  ;;  %v1099_v47 = vrot.slane %v1097_v33, 5  ;;  %v883_v58 = vsel %vm16904_vm5, %v602_v34, %v882_v41  ;;  %v418_v63 = vld [vmem:[#allocation2 + $0x48] sm:$0x1] }
  0x3a   : > { %v1082_v50 = vsel %vm16963_vm13, %v1077_v36, %v1081_v19  ;;  %v1105_v53 = vrot.slane %v1103_v38, 5  ;;  %v1109_v54 = vrot.slane %v1107_v40, 4  ;;  %15531 = vmatmul.mubr.msk.bf16.vlgmr.msra.gmra.mrb[0].mxu0 %vm1455_vm11, %v14119_v43  ;;  %884 = vst [vmem:[#allocation2 + $0x38] sm:$0x1] %v883_v58  ;;  %v607_v62 = vshll.u32 %v509_v29, 16 }
  0x3b   : > { %v1092_v56 = vsel %vm16963_vm13, %v1087_v45, %v1091_v26  ;;  %v1100_v57 = vor.u32 %v1099_v47, %v1096_v46  ;;  %15563 = vmatpush3.bf16.msra.mxu0 %v17018_v51  ;;  %v612_v5 = vshrl.u32 %v510_v48, 16  ;;  %v468_v55 = vld [vmem:[#allocation2 + $0x50] sm:$0x1]  ;;  %v606_v7 = vrot.slane %v604_v59, 7  ;;  %v885_v12 = vld [vmem:[#allocation2 + $0x3c] sm:$0xf] }
  0x3c   : > { %v14120_v60 = vcombine.low %v1082_v50, %v1092_v56  ;;  %v1110_v61 = vor.u32 %v1109_v54, %v1105_v53  ;;  %v1005_v0 = vld [vmem:[#allocation2 + $0x2c] sm:$0x1]  ;;  %v14151_v8 = vcombine.low %v17004_v39, %v17014_v49  ;;  %v511_v17 = vld [vmem:[%s16947_s18 + $0x28] sm:$0xf]  ;;  %v615_v21 = vshll.u32 %v510_v48, 16 }
  0x3d   : > { %v1101_v1 = vrot.slane %v1100_v57, 4  ;;  %v978_v6 = vld [vmem:[#allocation2 + $0x34] sm:$0xf]  ;;  %v1113_v10 = vshll.u32 %v1005_v0, 16  ;;  %v609_v14 = vor.u32 %v607_v62, %v606_v7  ;;  %v610_v15 = vrot.slane %v606_v7, 4 }
  0x3e   : > { %15534 = vmatprep.mubr.msk.bf16.mxu0 %vm1455_vm11, %v14120_v60  ;;  %v1111_v9 = vrot.slane %v1110_v61, 4  ;;  %v1127_v51 = vshll.u32 %v978_v6, 16  ;;  %v1131_v11 = vshrl.u32 %v978_v6, 16  ;;  %v614_v16 = vrot.slane %v612_v5, 7  ;;  %v889_v22 = vld [vmem:[#allocation2 + $0x44] sm:$0x1] }
  0x3f   : > { %v1106_v13 = vsel %vm16963_vm13, %v1101_v1, %v1105_v53  ;;  %v1115_v18 = vrot.slane %v1113_v10, 5  ;;  %v886_v24 = vsel %vm16956_vm12, %v609_v14, %v885_v12  ;;  %v419_v25 = vsel %vm16904_vm5, 0, %v418_v63  ;;  %v512_v27 = vld [vmem:[%s16947_s18 + $0x2c] sm:$0xf]  ;;  %v977_v29 = vld [vmem:[#allocation2 + $0x30] sm:$0xf] }
  0x40   : > { %v17054_v19 = vrot.slane %v1127_v51, 5  ;;  %v1133_v20 = vrot.slane %v1131_v11, 4  ;;  %v619_v23 = vrot.slane %v614_v16, 4  ;;  %v469_v26 = vsel %vm16912_vm7, 0, %v468_v55  ;;  %887 = vst [vmem:[#allocation2 + $0x3c] sm:$0xf] %v886_v24 }
  0x41   : > { %v1116_v28 = vsel %vm16963_vm13, %v1111_v9, %v1115_v18  ;;  %v617_v31 = vor.u32 %v615_v21, %v614_v16  ;;  %420 = vst [vmem:[#allocation2 + $0x48] sm:$0x1] %v419_v25  ;;  %470 = vst [vmem:[#allocation2 + $0x50] sm:$0x1] %v469_v26  ;;  %v621_v32 = vshrl.u32 %v511_v17, 16  ;;  %v1118_v36 = vshrl.u32 %v977_v29, 16 }
  0x42   : > { %v1134_v30 = vor.u32 %v1133_v20, %v17054_v19  ;;  %v421_v33 = vld [vmem:[#allocation2 + $0x54] sm:$0x1]  ;;  %v14121_v34 = vcombine.low %v1106_v13, %v1116_v28  ;;  %v1006_v35 = vld [vmem:[#allocation2 + $0x38] sm:$0x1]  ;;  %v1121_v38 = vshll.u32 %v977_v29, 16  ;;  %v890_v40 = vsel %vm16904_vm5, %v619_v23, %v889_v22 }
  0x43   : > { %v471_v41 = vld [vmem:[#allocation2 + $0x5c] sm:$0x1]  ;;  %v1137_v45 = vshll.u32 %v1006_v35, 16  ;;  %v618_v46 = vsel %vm16969_vm14, %v610_v15, %v617_v31  ;;  %891 = vst [vmem:[#allocation2 + $0x44] sm:$0x1] %v890_v40  ;;  %v623_v47 = vrot.slane %v621_v32, 7 }
  0x44   : > { %v1135_v43 = vrot.slane %v1134_v30, 4  ;;  %v513_v48 = vld [vmem:[%s16947_s18 + $0x30] sm:$0xf]  ;;  %15535 = vmatmul.mubr.msk.bf16.gmra.mrb[4].mxu0 %vm1455_vm11, %v14121_v34  ;;  %v1120_v50 = vrot.slane %v1118_v36, 4  ;;  %v1123_v53 = vrot.slane %v1121_v38, 5  ;;  %v624_v54 = vshll.u32 %v511_v17, 16 }
  0x45   : > { %888 = vst.msk [vmem:[#allocation2 + $0x40] sm:$0xf] %vm390_vm1, %v618_v46  ;;  %v629_v42 = vshrl.u32 %v512_v27, 16  ;;  %v514_v56 = vld [vmem:[%s16947_s18 + $0x34] sm:$0xf]  ;;  %v1139_v57 = vrot.slane %v1137_v45, 5 }
  0x46   : > { %v627_v58 = vrot.slane %v623_v47, 4  ;;  %v632_v59 = vshll.u32 %v512_v27, 16  ;;  %v422_v60 = vsel %vm16904_vm5, 0, %v421_v33  ;;  %v1124_v61 = vor.u32 %v1123_v53, %v1120_v50  ;;  %v424_v22 = vld [vmem:[#allocation2 + $0x60] sm:$0x1] }
  0x47   : > { %v626_v62 = vor.u32 %v624_v54, %v623_v47  ;;  %v631_v5 = vrot.slane %v629_v42, 7  ;;  %423 = vst [vmem:[#allocation2 + $0x54] sm:$0x1] %v422_v60  ;;  %v472_v63 = vsel %vm16912_vm7, 0, %v471_v41  ;;  %v638_v55 = vshrl.u32 %v513_v48, 16 }
  0x48   : > { %473 = vst [vmem:[#allocation2 + $0x5c] sm:$0x1] %v472_v63  ;;  %v641_v0 = vshll.u32 %v513_v48, 16  ;;  %v646_v1 = vshrl.u32 %v514_v56, 16  ;;  %v1125_v6 = vrot.slane %v1124_v61, 4  ;;  %v1140_v7 = vsel %vm16963_vm13, %v1135_v43, %v1139_v57 }
  0x49   : > { %v979_v9 = vld [vmem:[#allocation2 + $0x3c] sm:$0xf]  ;;  %v634_v10 = vor.u32 %v632_v59, %v631_v5  ;;  %v636_v51 = vrot.slane %v631_v5, 4  ;;  %v892_v11 = vld [vmem:[#allocation2 + $0x48] sm:$0xf]  ;;  %v640_v16 = vrot.slane %v638_v55, 7 }
  0x4a   : > { %v1142_v12 = vshrl.u32 %v979_v9, 16  ;;  %v1145_v13 = vshll.u32 %v979_v9, 16  ;;  %v893_v14 = vsel %vm16956_vm12, %v626_v62, %v892_v11  ;;  %v896_v15 = vld [vmem:[#allocation2 + $0x50] sm:$0x1]  ;;  %v1130_v17 = vsel %vm16963_vm13, %v1125_v6, %v17054_v19  ;;  %v1007_v18 = vld [vmem:[#allocation2 + $0x44] sm:$0x1] }
  0x4b   : > { %v635_v20 = vsel %vm16969_vm14, %v627_v58, %v634_v10  ;;  %894 = vst [vmem:[#allocation2 + $0x48] sm:$0xf] %v893_v14  ;;  %v897_v21 = vsel %vm16904_vm5, %v636_v51, %v896_v15  ;;  %v474_v23 = vld [vmem:[#allocation2 + $0x68] sm:$0x1]  ;;  %v14122_v24 = vcombine.low %v1130_v17, %v1140_v7  ;;  %v648_v28 = vrot.slane %v646_v1, 7 }
  0x4c   : > { %v980_v25 = vld [vmem:[#allocation2 + $0x40] sm:$0xf]  ;;  %v1144_v26 = vrot.slane %v1142_v12, 4  ;;  %v1147_v27 = vrot.slane %v1145_v13, 5  ;;  %895 = vst.msk [vmem:[#allocation2 + $0x4c] sm:$0xf] %vm390_vm1, %v635_v20  ;;  %v643_v33 = vor.u32 %v641_v0, %v640_v16 }
  0x4d   : > { %898 = vst [vmem:[#allocation2 + $0x50] sm:$0x1] %v897_v21  ;;  %v515_v29 = vld [vmem:[%s16947_s18 + $0x38] sm:$0xf]  ;;  %v516_v19 = vld [vmem:[%s16947_s18 + $0x3c] sm:$0xf]  ;;  %15538 = vmatprep.mubr.msk.bf16.mxu0 %vm1455_vm11, %v14122_v24 }
  0x4e   : > { %v1151_v30 = vshll.u32 %v980_v25, 16  ;;  %v1155_v31 = vshrl.u32 %v980_v25, 16  ;;  %v1161_v32 = vshll.u32 %v1007_v18, 16  ;;  %v427_v34 = vld [vmem:[#allocation2 + $0x6c] sm:$0x1]  ;;  %v1148_v35 = vor.u32 %v1147_v27, %v1144_v26 }
  0x4f   : > { %v644_v36 = vrot.slane %v640_v16, 4  ;;  %v649_v38 = vshll.u32 %v514_v56, 16  ;;  %v653_v40 = vrot.slane %v648_v28, 4  ;;  %v899_v41 = vld [vmem:[#allocation2 + $0x54] sm:$0xf]  ;;  %v425_v48 = vsel %vm16904_vm5, 0, %v424_v22 }
  0x50   : > { %v1153_v43 = vrot.slane %v1151_v30, 5  ;;  %v1157_v45 = vrot.slane %v1155_v31, 4  ;;  %v900_v46 = vsel %vm16956_vm12, %v643_v33, %v899_v41  ;;  %v903_v47 = vld [vmem:[#allocation2 + $0x5c] sm:$0x1]  ;;  %v1149_v50 = vrot.slane %v1148_v35, 4 }
  0x51   : > { %v651_v53 = vor.u32 %v649_v38, %v648_v28  ;;  %901 = vst [vmem:[#allocation2 + $0x54] sm:$0xf] %v900_v46  ;;  %v904_v54 = vsel %vm16904_vm5, %v653_v40, %v903_v47  ;;  %426 = vst [vmem:[#allocation2 + $0x60] sm:$0x1] %v425_v48  ;;  %v475_v42 = vsel %vm16912_vm7, 0, %v474_v23  ;;  %v1163_v57 = vrot.slane %v1161_v32, 5 }
  0x52   : > { %v1158_v56 = vor.u32 %v1157_v45, %v1153_v43  ;;  %905 = vst [vmem:[#allocation2 + $0x5c] sm:$0x1] %v904_v54  ;;  %476 = vst [vmem:[#allocation2 + $0x68] sm:$0x1] %v475_v42  ;;  %v655_v58 = vshrl.u32 %v515_v29, 16  ;;  %v663_v59 = vshrl.u32 %v516_v19, 16  ;;  %v1154_v55 = vsel %vm16963_vm13, %v1149_v50, %v1153_v43 }
  0x53   : > { %v17101_v60 = vld [vmem:[#allocation2 + $0x48] sm:$0xf]  ;;  %v652_v61 = vsel %vm16969_vm14, %v644_v36, %v651_v53  ;;  %v658_v62 = vshll.u32 %v515_v29, 16  ;;  %v666_v5 = vshll.u32 %v516_v19, 16  ;;  %v428_v63 = vsel %vm16904_vm5, 0, %v427_v34 }
  0x54   : > { %v1159_v0 = vrot.slane %v1158_v56, 4  ;;  %v17109_v1 = vld [vmem:[#allocation2 + $0x4c] sm:$0xf]  ;;  %v1008_v6 = vld [vmem:[#allocation2 + $0x50] sm:$0x1]  ;;  %v1166_v7 = vshrl.u32 %v17101_v60, 16 }
  0x55   : > { %902 = vst.msk [vmem:[#allocation2 + $0x58] sm:$0xf] %vm390_vm1, %v652_v61  ;;  %429 = vst [vmem:[#allocation2 + $0x6c] sm:$0x1] %v428_v63  ;;  %v1169_v9 = vshll.u32 %v17101_v60, 16  ;;  %v1175_v10 = vshll.u32 %v17109_v1, 16 }
  0x56   : > { %v1179_v51 = vshrl.u32 %v17109_v1, 16  ;;  %v1185_v11 = vshll.u32 %v1008_v6, 16  ;;  %v1164_v12 = vsel %vm16963_vm13, %v1159_v0, %v1163_v57  ;;  %v1168_v13 = vrot.slane %v1166_v7, 4  ;;  %v17121_v21 = vld [vmem:[%s22218_s1 + $0x4] sm:$0x3] }
  0x57   : > { %v657_v14 = vrot.slane %v655_v58, 7  ;;  %v665_v15 = vrot.slane %v663_v59, 7  ;;  %v14123_v16 = vcombine.low %v1154_v55, %v1164_v12  ;;  %v1171_v17 = vrot.slane %v1169_v9, 5  ;;  %16667 = vmatprep.subr.msk.bf16.mxu0 %vm1504_vm0, %v17121_v21  ;;  %v477_v38 = vld [vmem:[#allocation2 + $0x74] sm:$0x1] }
  0x58   : > { %v1177_v18 = vrot.slane %v1175_v10, 5  ;;  %v1181_v20 = vrot.slane %v1179_v51, 4  ;;  %v1187_v22 = vrot.slane %v1185_v11, 5  ;;  %v17123_v23 = vld [vmem:[#allocation2 + $0x54] sm:$0xf]  ;;  %v478_v59 = vsel %vm16912_vm7, 0, %v477_v38 }
  0x59   : > { %v660_v24 = vor.u32 %v658_v62, %v657_v14  ;;  %v661_v25 = vrot.slane %v657_v14, 4  ;;  %v668_v26 = vor.u32 %v666_v5, %v665_v15  ;;  %v906_v27 = vld [vmem:[#allocation2 + $0x60] sm:$0xf]  ;;  %15539 = vmatmul.mubr.msk.bf16.gmra.mrb[8].mxu0 %vm1455_vm11, %v14123_v16  ;;  %v1172_v28 = vor.u32 %v1171_v17, %v1168_v13  ;;  %v1009_v19 = vld [vmem:[#allocation2 + $0x5c] sm:$0x1] }
  0x5a   : > { %v1182_v29 = vor.u32 %v1181_v20, %v1177_v18  ;;  %v1190_v30 = vshrl.u32 %v17123_v23, 16  ;;  %v1193_v31 = vshll.u32 %v17123_v23, 16  ;;  %v910_v32 = vld [vmem:[#allocation2 + $0x68] sm:$0x1]  ;;  %v1209_v33 = vshll.u32 %v1009_v19, 16 }
  0x5b   : > { %v669_v34 = vsel %vm16969_vm14, %v661_v25, %v668_v26  ;;  %v670_v35 = vrot.slane %v665_v15, 4  ;;  %v907_v36 = vsel %vm16956_vm12, %v660_v24, %v906_v27  ;;  %v517_v40 = vld [vmem:[%s16947_s18 + $0x40] sm:$0xf]  ;;  %v1173_v41 = vrot.slane %v1172_v28, 4  ;;  %v518_v42 = vld [vmem:[%s16947_s18 + $0x44] sm:$0xf] }
  0x5c   : > { %v1183_v43 = vrot.slane %v1182_v29, 4  ;;  %v17135_v45 = vld [vmem:[#allocation2 + $0x58] sm:$0xf]  ;;  %v1192_v46 = vrot.slane %v1190_v30, 4  ;;  %v1195_v47 = vrot.slane %v1193_v31, 5  ;;  %v1211_v53 = vrot.slane %v1209_v33, 5 }
  0x5d   : > { %908 = vst [vmem:[#allocation2 + $0x60] sm:$0xf] %v907_v36  ;;  %909 = vst.msk [vmem:[#allocation2 + $0x64] sm:$0xf] %vm390_vm1, %v669_v34  ;;  %v1199_v48 = vshll.u32 %v17135_v45, 16  ;;  %v1203_v50 = vshrl.u32 %v17135_v45, 16  ;;  %v911_v54 = vsel %vm16904_vm5, %v670_v35, %v910_v32  ;;  %v1178_v56 = vsel %vm16963_vm13, %v1173_v41, %v1177_v18 }
  0x5e   : > { %v1188_v57 = vsel %vm16963_vm13, %v1183_v43, %v1187_v22  ;;  %v1196_v58 = vor.u32 %v1195_v47, %v1192_v46  ;;  %912 = vst [vmem:[#allocation2 + $0x68] sm:$0x1] %v911_v54  ;;  %v430_v61 = vld [vmem:[#allocation2 + $0x78] sm:$0x1]  ;;  %v480_v62 = vld [vmem:[#allocation2 + $0x80] sm:$0x1] }
  0x5f   : > { %v14124_v5 = vcombine.low %v1178_v56, %v1188_v57  ;;  %v1201_v63 = vrot.slane %v1199_v48, 5  ;;  %v1205_v55 = vrot.slane %v1203_v50, 4  ;;  %479 = vst [vmem:[#allocation2 + $0x74] sm:$0x1] %v478_v59  ;;  %v672_v0 = vshrl.u32 %v517_v40, 16 }
  0x60   : > { %v519_v6 = vld [vmem:[%s16947_s18 + $0x48] sm:$0xf]  ;;  %v1197_v7 = vrot.slane %v1196_v58, 4  ;;  %v675_v9 = vshll.u32 %v517_v40, 16  ;;  %v680_v10 = vshrl.u32 %v518_v42, 16  ;;  %v683_v51 = vshll.u32 %v518_v42, 16 }
  0x61   : > { %15542 = vmatprep.mubr.msk.bf16.mxu0 %vm1455_vm11, %v14124_v5  ;;  %v1206_v11 = vor.u32 %v1205_v55, %v1201_v63  ;;  %v674_v12 = vrot.slane %v672_v0, 7  ;;  %v431_v13 = vsel %vm16904_vm5, 0, %v430_v61  ;;  %v481_v14 = vsel %vm16912_vm7, 0, %v480_v62  ;;  %v913_v16 = vld [vmem:[#allocation2 + $0x6c] sm:$0xf] }
  0x62   : > { %v682_v15 = vrot.slane %v680_v10, 7  ;;  %432 = vst [vmem:[#allocation2 + $0x78] sm:$0x1] %v431_v13  ;;  %482 = vst [vmem:[#allocation2 + $0x80] sm:$0x1] %v481_v14  ;;  %v689_v17 = vshrl.u32 %v519_v6, 16  ;;  %v1202_v20 = vsel %vm16963_vm13, %v1197_v7, %v1201_v63 }
  0x63   : > { %v692_v18 = vshll.u32 %v519_v6, 16  ;;  %v1207_v22 = vrot.slane %v1206_v11, 4  ;;  %v677_v26 = vor.u32 %v675_v9, %v674_v12  ;;  %v678_v27 = vrot.slane %v674_v12, 4  ;;  %v520_v31 = vld [vmem:[%s16947_s18 + $0x4c] sm:$0xf] }
  0x64   : > { %v17157_v24 = vld [vmem:[#allocation2 + $0x60] sm:$0xf]  ;;  %v17159_v25 = vld [vmem:[#allocation2 + $0x64] sm:$0xf]  ;;  %v685_v34 = vor.u32 %v683_v51, %v682_v15  ;;  %v687_v35 = vrot.slane %v682_v15, 4  ;;  %v691_v58 = vrot.slane %v689_v17, 7 }
  0x65   : > { %v1214_v28 = vshrl.u32 %v17157_v24, 16  ;;  %v1217_v29 = vshll.u32 %v17157_v24, 16  ;;  %v1223_v19 = vshll.u32 %v17159_v25, 16  ;;  %v1227_v30 = vshrl.u32 %v17159_v25, 16  ;;  %v17168_v33 = vld [vmem:[#allocation2 + $0x68] sm:$0x1] }
  0x66   : > { %v1212_v32 = vsel %vm16963_vm13, %v1207_v22, %v1211_v53  ;;  %v914_v36 = vsel %vm16956_vm12, %v677_v26, %v913_v16  ;;  %v433_v38 = vld [vmem:[#allocation2 + $0x84] sm:$0x1]  ;;  %v917_v47 = vld [vmem:[#allocation2 + $0x74] sm:$0x1]  ;;  %v483_v48 = vld [vmem:[#allocation2 + $0x8c] sm:$0x1]  ;;  %v686_v54 = vsel %vm16969_vm14, %v678_v27, %v685_v34  ;;  %v694_v7 = vor.u32 %v692_v18, %v691_v58 }
  0x67   : > { %v14125_v40 = vcombine.low %v1202_v20, %v1212_v32  ;;  %v1216_v41 = vrot.slane %v1214_v28, 4  ;;  %v1219_v43 = vrot.slane %v1217_v29, 5  ;;  %v1225_v46 = vrot.slane %v1223_v19, 5  ;;  %915 = vst [vmem:[#allocation2 + $0x6c] sm:$0xf] %v914_v36 }
  0x68   : > { %v1229_v50 = vrot.slane %v1227_v30, 4  ;;  %v1233_v53 = vshll.u32 %v17168_v33, 16  ;;  %v918_v42 = vsel %vm16904_vm5, %v687_v35, %v917_v47  ;;  %v521_v56 = vld [vmem:[%s16947_s18 + $0x50] sm:$0xf]  ;;  %916 = vst.msk [vmem:[#allocation2 + $0x70] sm:$0xf] %vm390_vm1, %v686_v54 }
  0x69   : > { %15543 = vmatmul.mubr.msk.bf16.gmra.mrb[12].mxu0 %vm1455_vm11, %v14125_v40  ;;  %v1220_v57 = vor.u32 %v1219_v43, %v1216_v41  ;;  %919 = vst [vmem:[#allocation2 + $0x74] sm:$0x1] %v918_v42  ;;  %v697_v59 = vshrl.u32 %v520_v31, 16  ;;  %v700_v61 = vshll.u32 %v520_v31, 16  ;;  %v920_v63 = vld [vmem:[#allocation2 + $0x78] sm:$0xf] }
  0x6a   : > { %v1230_v62 = vor.u32 %v1229_v50, %v1225_v46  ;;  %v1235_v5 = vrot.slane %v1233_v53, 5  ;;  %v434_v55 = vsel %vm16904_vm5, 0, %v433_v38  ;;  %v522_v0 = vld [vmem:[%s16947_s18 + $0x54] sm:$0xf]  ;;  %v695_v9 = vrot.slane %v691_v58, 4 }
  0x6b   : > { %v1221_v6 = vrot.slane %v1220_v57, 4  ;;  %v699_v10 = vrot.slane %v697_v59, 7  ;;  %435 = vst [vmem:[#allocation2 + $0x84] sm:$0x1] %v434_v55  ;;  %v484_v11 = vsel %vm16912_vm7, 0, %v483_v48  ;;  %v706_v12 = vshrl.u32 %v521_v56, 16 }
  0x6c   : > { %v1231_v51 = vrot.slane %v1230_v62, 4  ;;  %v709_v13 = vshll.u32 %v521_v56, 16  ;;  %v921_v17 = vsel %vm16956_vm12, %v694_v7, %v920_v63  ;;  %v924_v20 = vld [vmem:[#allocation2 + $0x80] sm:$0x1]  ;;  %485 = vst [vmem:[#allocation2 + $0x8c] sm:$0x1] %v484_v11 }
  0x6d   : > { %v1226_v14 = vsel %vm16963_vm13, %v1221_v6, %v1225_v46  ;;  %v702_v15 = vor.u32 %v700_v61, %v699_v10  ;;  %v704_v16 = vrot.slane %v699_v10, 4  ;;  %v436_v18 = vld [vmem:[#allocation2 + $0x90] sm:$0x1]  ;;  %922 = vst [vmem:[#allocation2 + $0x78] sm:$0xf] %v921_v17  ;;  %v708_v27 = vrot.slane %v706_v12, 7 }
  0x6e   : > { %v1236_v22 = vsel %vm16963_vm13, %v1231_v51, %v1235_v5  ;;  %v17191_v26 = vld [vmem:[#allocation2 + $0x6c] sm:$0xf]  ;;  %v714_v28 = vshrl.u32 %v522_v0, 16  ;;  %v717_v29 = vshll.u32 %v522_v0, 16  ;;  %v486_v34 = vld [vmem:[#allocation2 + $0x98] sm:$0x1] }
  0x6f   : > { %v14126_v19 = vcombine.low %v1226_v14, %v1236_v22  ;;  %v1238_v30 = vshrl.u32 %v17191_v26, 16  ;;  %v1241_v31 = vshll.u32 %v17191_v26, 16  ;;  %v703_v32 = vsel %vm16969_vm14, %v695_v9, %v702_v15  ;;  %v523_v35 = vld [vmem:[%s16947_s18 + $0x58] sm:$0xf]  ;;  %v17198_v36 = vld [vmem:[#allocation2 + $0x70] sm:$0xf] }
  0x70   : > { %v17200_v38 = vld [vmem:[#allocation2 + $0x74] sm:$0x1]  ;;  %923 = vst.msk [vmem:[#allocation2 + $0x7c] sm:$0xf] %vm390_vm1, %v703_v32  ;;  %v925_v40 = vsel %vm16904_vm5, %v704_v16, %v924_v20  ;;  %v711_v41 = vor.u32 %v709_v13, %v708_v27  ;;  %v712_v43 = vrot.slane %v708_v27, 4  ;;  %v716_v46 = vrot.slane %v714_v28, 7 }
  0x71   : > { %15546 = vmatprep.mubr.msk.bf16.mxu0 %vm1455_vm11, %v14126_v19  ;;  %v1240_v47 = vrot.slane %v1238_v30, 4  ;;  %v1243_v48 = vrot.slane %v1241_v31, 5  ;;  %v1247_v50 = vshll.u32 %v17198_v36, 16  ;;  %v1251_v53 = vshrl.u32 %v17198_v36, 16  ;;  %926 = vst [vmem:[#allocation2 + $0x80] sm:$0x1] %v925_v40 }
  0x72   : > { %v17209_v54 = vld [vmem:[%s16947_s18 + $0x5c] sm:$0xf]  ;;  %v1257_v42 = vshll.u32 %v17200_v38, 16  ;;  %v719_v56 = vor.u32 %v717_v29, %v716_v46  ;;  %v721_v57 = vrot.slane %v716_v46, 4  ;;  %v927_v58 = vld [vmem:[#allocation2 + $0x84] sm:$0xf] }
  0x73   : > { %v437_v59 = vsel %vm16904_vm5, 0, %v436_v18  ;;  %v439_v61 = vld [vmem:[#allocation2 + $0x9c] sm:$0x1]  ;;  %v1244_v62 = vor.u32 %v1243_v48, %v1240_v47  ;;  %v1249_v5 = vrot.slane %v1247_v50, 5  ;;  %v1253_v63 = vrot.slane %v1251_v53, 4 }
  0x74   : > { %v928_v55 = vsel %vm16956_vm12, %v711_v41, %v927_v58  ;;  %438 = vst [vmem:[#allocation2 + $0x90] sm:$0x1] %v437_v59  ;;  %v1259_v0 = vrot.slane %v1257_v42, 5  ;;  %v720_v6 = vsel %vm16969_vm14, %v712_v43, %v719_v56  ;;  %v931_v7 = vld [vmem:[#allocation2 + $0x8c] sm:$0x1]  ;;  %v487_v9 = vsel %vm16912_vm7, 0, %v486_v34 }
  0x75   : > { %929 = vst [vmem:[#allocation2 + $0x84] sm:$0xf] %v928_v55  ;;  %v723_v10 = vshrl.u32 %v523_v35, 16  ;;  %v1245_v51 = vrot.slane %v1244_v62, 4  ;;  %v1254_v11 = vor.u32 %v1253_v63, %v1249_v5  ;;  %v17220_v12 = vld [vmem:[#allocation2 + $0x78] sm:$0xf]  ;;  %v932_v13 = vsel %vm16904_vm5, %v721_v57, %v931_v7 }
  0x76   : > { %930 = vst.msk [vmem:[#allocation2 + $0x88] sm:$0xf] %vm390_vm1, %v720_v6  ;;  %488 = vst [vmem:[#allocation2 + $0x98] sm:$0x1] %v487_v9  ;;  %v726_v14 = vshll.u32 %v523_v35, 16  ;;  %v1262_v15 = vshrl.u32 %v17220_v12, 16 }
  0x77   : > { %v1265_v16 = vshll.u32 %v17220_v12, 16  ;;  %933 = vst [vmem:[#allocation2 + $0x8c] sm:$0x1] %v932_v13  ;;  %v725_v17 = vrot.slane %v723_v10, 7  ;;  %v731_v20 = vshrl.u32 %v17209_v54, 16  ;;  %v1250_v22 = vsel %vm16963_vm13, %v1245_v51, %v1249_v5 }
  0x78   : > { %v489_v18 = vld [vmem:[#allocation2 + $0xa4] sm:$0x1]  ;;  %v1255_v27 = vrot.slane %v1254_v11, 4  ;;  %v17230_v28 = vld [vmem:[#allocation2 + $0x7c] sm:$0xf]  ;;  %v734_v29 = vshll.u32 %v17209_v54, 16 }
  0x79   : > { %v440_v19 = vsel %vm16904_vm5, 0, %v439_v61  ;;  %v17235_v30 = vld [vmem:[#allocation2 + $0x80] sm:$0x1]  ;;  %v1264_v31 = vrot.slane %v1262_v15, 4  ;;  %v1267_v32 = vrot.slane %v1265_v16, 5  ;;  %v1271_v34 = vshll.u32 %v17230_v28, 16 }
  0x7a   : > { %v1275_v35 = vshrl.u32 %v17230_v28, 16  ;;  %441 = vst [vmem:[#allocation2 + $0x9c] sm:$0x1] %v440_v19  ;;  %v1260_v40 = vsel %vm16963_vm13, %v1255_v27, %v1259_v0  ;;  %v1281_v41 = vshll.u32 %v17235_v30, 16  ;;  %v728_v43 = vor.u32 %v726_v14, %v725_v17  ;;  %v525_v61 = vld [vmem:[%s16947_s18 + $0x60] sm:$0xf] }
  0x7b   : > { %v729_v46 = vrot.slane %v725_v17, 4  ;;  %v14127_v47 = vcombine.low %v1250_v22, %v1260_v40  ;;  %v1268_v48 = vor.u32 %v1267_v32, %v1264_v31  ;;  %v1273_v50 = vrot.slane %v1271_v34, 5  ;;  %v934_v54 = vld [vmem:[#allocation2 + $0x90] sm:$0xf]  ;;  %v526_v27 = vld [vmem:[%s16947_s18 + $0x64] sm:$0xf] }
  0x7c   : > { %v1277_v53 = vrot.slane %v1275_v35, 4  ;;  %v1283_v42 = vrot.slane %v1281_v41, 5  ;;  %v17242_v56 = vld [vmem:[#allocation2 + $0x84] sm:$0xf]  ;;  %v733_v57 = vrot.slane %v731_v20, 7  ;;  %v935_v58 = vsel %vm16956_vm12, %v728_v43, %v934_v54 }
  0x7d   : > { %v490_v59 = vsel %vm16912_vm7, 0, %v489_v18  ;;  %15547 = vmatmul.mubr.msk.bf16.gmra.mrb[16].mxu0 %vm1455_vm11, %v14127_v47  ;;  %v1269_v62 = vrot.slane %v1268_v48, 4  ;;  %v17250_v63 = vld [vmem:[#allocation2 + $0x88] sm:$0xf]  ;;  %v1286_v55 = vshrl.u32 %v17242_v56, 16  ;;  %v1289_v0 = vshll.u32 %v17242_v56, 16 }
  0x7e   : > { %v1278_v5 = vor.u32 %v1277_v53, %v1273_v50  ;;  %936 = vst [vmem:[#allocation2 + $0x90] sm:$0xf] %v935_v58  ;;  %491 = vst [vmem:[#allocation2 + $0xa4] sm:$0x1] %v490_v59  ;;  %v17254_v6 = vld [vmem:[#allocation2 + $0x8c] sm:$0x1]  ;;  %v736_v10 = vor.u32 %v734_v29, %v733_v57 }
  0x7f   : > { %v1295_v7 = vshll.u32 %v17250_v63, 16  ;;  %v1299_v9 = vshrl.u32 %v17250_v63, 16  ;;  %v738_v51 = vrot.slane %v733_v57, 4  ;;  %v1274_v11 = vsel %vm16963_vm13, %v1269_v62, %v1273_v50  ;;  %v938_v16 = vld [vmem:[#allocation2 + $0x98] sm:$0x1] }
  0x80   : > { %v1279_v13 = vrot.slane %v1278_v5, 4  ;;  %v1288_v14 = vrot.slane %v1286_v55, 4  ;;  %v1291_v15 = vrot.slane %v1289_v0, 5  ;;  %v1305_v18 = vshll.u32 %v17254_v6, 16  ;;  %v3505_v3 = vld [vmem:[#allocation2 + $0x30] sm:$0xe] }
  0x81   : > { %v1297_v17 = vrot.slane %v1295_v7, 5  ;;  %v1301_v20 = vrot.slane %v1299_v9, 4  ;;  %v737_v22 = vsel %vm16969_vm14, %v729_v46, %v736_v10  ;;  %v939_v31 = vsel %vm16904_vm5, %v738_v51, %v938_v16  ;;  %v442_v9 = vld [vmem:[#allocation2 + $0xa8] sm:$0x1]  ;;  %v528_v16 = vld [vmem:[%s16947_s18 + $0x6c] sm:$0xf] }
  0x82   : > { %v1284_v19 = vsel %vm16963_vm13, %v1279_v13, %v1283_v42  ;;  %v1292_v29 = vor.u32 %v1291_v15, %v1288_v14  ;;  %937 = vst.msk [vmem:[#allocation2 + $0x94] sm:$0xf] %vm390_vm1, %v737_v22  ;;  %v740_v32 = vshrl.u32 %v525_v61, 16  ;;  %v1307_v40 = vrot.slane %v1305_v18, 5  ;;  %940 = vst [vmem:[#allocation2 + $0x98] sm:$0x1] %v939_v31 }
  0x83   : > { %v14128_v34 = vcombine.low %v1274_v11, %v1284_v19  ;;  %v1302_v35 = vor.u32 %v1301_v20, %v1297_v17  ;;  %v743_v41 = vshll.u32 %v525_v61, 16  ;;  %v2021_v43 = vrot.slane %v17014_v49, 5  ;;  %v941_v42 = vld [vmem:[#allocation2 + $0x9c] sm:$0xf]  ;;  %v527_v10 = vld [vmem:[%s16947_s18 + $0x68] sm:$0xf] }
  0x84   : > { %v1293_v47 = vrot.slane %v1292_v29, 4  ;;  %v742_v46 = vrot.slane %v740_v32, 7  ;;  %v748_v48 = vshrl.u32 %v526_v27, 16  ;;  %v751_v54 = vshll.u32 %v526_v27, 16  ;;  %v445_v19 = vld [vmem:[#allocation2 + $0xb4] sm:$0x1] }
  0x85   : > { %15550 = vmatprep.mubr.msk.bf16.mxu0 %vm1455_vm11, %v14128_v34  ;;  %v1303_v50 = vrot.slane %v1302_v35, 4  ;;  %v17271_v53 = vld [vmem:[#allocation2 + $0x90] sm:$0xf]  ;;  %v14158_v57 = vcombine.low %v17157_v24, %v17159_v25  ;;  %v14159_v7 = vcombine.low %v17191_v26, %v17198_v36  ;;  %v945_v15 = vld [vmem:[#allocation2 + $0xa4] sm:$0x1]  ;;  %v14160_v22 = vcombine.low %v17220_v12, %v17230_v28 }
  0x86   : > { %v1298_v58 = vsel %vm16963_vm13, %v1293_v47, %v1297_v17  ;;  %v1310_v59 = vshrl.u32 %v17271_v53, 16  ;;  %v1313_v61 = vshll.u32 %v17271_v53, 16  ;;  %v745_v62 = vor.u32 %v743_v41, %v742_v46  ;;  %v530_v41 = vld [vmem:[%s16947_s18 + $0x74] sm:$0xf] }
  0x87   : > { %v1308_v5 = vsel %vm16963_vm13, %v1303_v50, %v1307_v40  ;;  %v746_v55 = vrot.slane %v742_v46, 4  ;;  %v750_v0 = vrot.slane %v748_v48, 7  ;;  %v14161_v27 = vcombine.low %v17242_v56, %v17250_v63  ;;  %v529_v40 = vld [vmem:[%s16947_s18 + $0x70] sm:$0xf]  ;;  %v1961_v56 = vld [vmem:[#allocation2] sm:$0xe] }
  0x88   : > { %v14129_v51 = vcombine.low %v1298_v58, %v1308_v5  ;;  %v1312_v11 = vrot.slane %v1310_v59, 4  ;;  %v1315_v13 = vrot.slane %v1313_v61, 5  ;;  %v942_v14 = vsel %vm16956_vm12, %v745_v62, %v941_v42 }
  0x89   : > { %v17287_v17 = vld [vmem:[#allocation2 + $0x94] sm:$0xf]  ;;  %v753_v20 = vor.u32 %v751_v54, %v750_v0  ;;  %v755_v18 = vrot.slane %v750_v0, 4  ;;  %943 = vst [vmem:[#allocation2 + $0x9c] sm:$0xf] %v942_v14  ;;  %v443_v50 = vsel %vm16904_vm5, 0, %v442_v9 }
  0x8a   : > { %15551 = vmatmul.mubr.msk.bf16.gmra.mrb[20].mxu0 %vm1455_vm11, %v14129_v51  ;;  %v17294_v29 = vld [vmem:[#allocation2 + $0x98] sm:$0x1]  ;;  %v1316_v31 = vor.u32 %v1315_v13, %v1312_v11  ;;  %v1319_v32 = vshll.u32 %v17287_v17, 16  ;;  %v1323_v34 = vshrl.u32 %v17287_v17, 16  ;;  %v14162_v35 = vcombine.low %v17271_v53, %v17287_v17  ;;  %444 = vst [vmem:[#allocation2 + $0xa8] sm:$0x1] %v443_v50 }
  0x8b   : > { %v1329_v47 = vshll.u32 %v17294_v29, 16  ;;  %v754_v46 = vsel %vm16969_vm14, %v746_v55, %v753_v20  ;;  %v946_v48 = vsel %vm16904_vm5, %v755_v18, %v945_v15  ;;  %v757_v59 = vshrl.u32 %v527_v10, 16 }
  0x8c   : > { %v1317_v54 = vrot.slane %v1316_v31, 4  ;;  %v1321_v42 = vrot.slane %v1319_v32, 5  ;;  %v1325_v58 = vrot.slane %v1323_v34, 4  ;;  %944 = vst.msk [vmem:[#allocation2 + $0xa0] sm:$0xf] %vm390_vm1, %v754_v46  ;;  %v760_v62 = vshll.u32 %v527_v10, 16 }
  0x8d   : > { %947 = vst [vmem:[#allocation2 + $0xa4] sm:$0x1] %v946_v48  ;;  %v1331_v61 = vrot.slane %v1329_v47, 5  ;;  %v765_v5 = vshrl.u32 %v528_v16, 16  ;;  %v768_v0 = vshll.u32 %v528_v16, 16  ;;  %v759_v55 = vrot.slane %v757_v59, 7 }
  0x8e   : > { %v1326_v51 = vor.u32 %v1325_v58, %v1321_v42  ;;  %v446_v11 = vsel %vm16904_vm5, 0, %v445_v19  ;;  %v1322_v9 = vsel %vm16963_vm13, %v1317_v54, %v1321_v42  ;;  %v774_v14 = vshrl.u32 %v529_v40, 16 }
  0x8f   : > { %v17314_v13 = vrot.slane %v765_v5, 7  ;;  %447 = vst [vmem:[#allocation2 + $0xb4] sm:$0x1] %v446_v11  ;;  %v782_v15 = vshrl.u32 %v530_v41, 16  ;;  %v762_v31 = vor.u32 %v760_v62, %v759_v55  ;;  %v763_v10 = vrot.slane %v759_v55, 4 }
  0x90   : > { %v1327_v20 = vrot.slane %v1326_v51, 4  ;;  %v17316_v18 = vld [vmem:[#allocation2 + $0x9c] sm:$0xf]  ;;  %v777_v32 = vshll.u32 %v529_v40, 16  ;;  %v785_v47 = vshll.u32 %v530_v41, 16  ;;  %v776_v48 = vrot.slane %v774_v14, 7 }
  0x91   : > { %v1334_v16 = vshrl.u32 %v17316_v18, 16  ;;  %v1337_v34 = vshll.u32 %v17316_v18, 16  ;;  %v770_v19 = vor.u32 %v768_v0, %v17314_v13  ;;  %v17323_v50 = vrot.slane %v782_v15, 7  ;;  %v948_v51 = vld [vmem:[#allocation2 + $0xa8] sm:$0xf] }
  0x92   : > { %v1332_v46 = vsel %vm16963_vm13, %v1327_v20, %v1331_v61  ;;  %vm2009_vm15 = vcmask 1042432   ;;  %v949_v11 = vsel %vm16956_vm12, %v762_v31, %v948_v51  ;;  %v780_v14 = vrot.slane %v776_v48, 4 }
  0x93   : > { %v14130_v54 = vcombine.low %v1322_v9, %v1332_v46  ;;  %v17325_v42 = vld [vmem:[#allocation2 + $0xa0] sm:$0xf]  ;;  %v1336_v40 = vrot.slane %v1334_v16, 4  ;;  %v1339_v59 = vrot.slane %v1337_v34, 5  ;;  %v771_v62 = vsel %vm16969_vm14, %v763_v10, %v770_v19  ;;  %950 = vst [vmem:[#allocation2 + $0xa8] sm:$0xf] %v949_v11 }
  0x94   : > { %v17327_v58 = vld [vmem:[#allocation2 + $0xa4] sm:$0x1]  ;;  %v1343_v5 = vshll.u32 %v17325_v42, 16  ;;  %v1347_v41 = vshrl.u32 %v17325_v42, 16  ;;  %v14163_v0 = vcombine.low %v17316_v18, %v17325_v42  ;;  %951 = vst.msk [vmem:[#allocation2 + $0xac] sm:$0xf] %vm390_vm1, %v771_v62  ;;  %v779_v9 = vor.u32 %v777_v32, %v776_v48 }
  0x95   : > { %v1353_v61 = vshll.u32 %v17327_v58, 16  ;;  %15554 = vmatprep.mubr.msk.bf16.mxu0 %vm1455_vm11, %v14130_v54  ;;  %v1340_v55 = vor.u32 %v1339_v59, %v1336_v40  ;;  %v787_v10 = vor.u32 %v785_v47, %v17323_v50  ;;  %v1962_v34 = vld [vmem:[#allocation2 + $0xc] sm:$0xe]  ;;  %v16781_v19 = vld [vmem:[#allocation2 + $0x14] sm:$0x1]  ;;  %vm2010_vm2 = vcmask 1046532  }
  0x96   : > { %v1345_v15 = vrot.slane %v1343_v5, 5  ;;  %v1349_v20 = vrot.slane %v1347_v41, 4  ;;  %v955_v16 = vld [vmem:[#allocation2 + $0xb4] sm:$0xf]  ;;  %v2024_v46 = vrot.slane %v16781_v19, 5  ;;  %vm17346_vm8 = vmor %vm2009_vm15, %vm2010_vm2  ;;  %v22388_v32 = vmov 0 }
  0x97   : > { %v1341_v2 = vrot.slane %v1340_v55, 4  ;;  %v956_v62 = vsel %vm16956_vm12, %v779_v9, %v955_v16  ;;  %v1355_v40 = vrot.slane %v1353_v61, 5  ;;  %v788_v31 = vsel %vm16969_vm14, %v780_v14, %v787_v10  ;;  %v16782_v55 = vld [vmem:[#allocation2] sm:$0xf]  ;;  %v17367_v11 = vld [vmem:[#allocation2 + $0x4] sm:$0xf] }
  0x98   : > { %v1350_v54 = vor.u32 %v1349_v20, %v1345_v15  ;;  %957 = vst [vmem:[#allocation2 + $0xb4] sm:$0xf] %v956_v62  ;;  %v22389_v32 = vsel %vm17346_vm8, 4294967295, %v22388_v32  ;;  %958 = vst.msk [vmem:[#allocation2 + $0xb8] sm:$0xf] %vm390_vm1, %v788_v31  ;;  %v14183_v47 = vrot.slane %v1962_v34, 9  ;;  %v14150_v9 = vcombine.low %v16782_v55, %v17367_v11 }
  0x99   : > { %22390 = vst [vmem:[#allocation6_spill] sm:$0xff] %v22389_v32  ;;  %v2023_v48 = vrot.slane %v2021_v43, 4  ;;  %v1346_v59 = vsel %vm16963_vm13, %v1341_v2, %v1345_v15  ;;  %v17374_v15 = vld [vmem:[#allocation2 + $0x1c] sm:$0xf]  ;;  %v17380_v10 = vld [vmem:[%s22218_s1 + $0x6] sm:$0x3] }
  0x9a   : > { %v1351_v5 = vrot.slane %v1350_v54, 4  ;;  %v17359_v41 = vsel %vm17346_vm8, %v14183_v47, %v2021_v43  ;;  %v16784_v43 = vld [vmem:[#allocation2 + $0x18] sm:$0xf]  ;;  %v1969_v16 = vld [vmem:[#allocation2 + $0x60] sm:$0xe]  ;;  %v2223_v34 = vsel %vm1504_vm0, %v17121_v21, 0 }
  0x9b   : > { %v17363_v61 = vsel %vm17346_vm8, %v2023_v48, %v2024_v46  ;;  %v14152_v20 = vcombine.low %v16784_v43, %v17374_v15  ;;  %v1970_v19 = vld [vmem:[#allocation2 + $0x6c] sm:$0xe]  ;;  %v1971_v46 = vld [vmem:[#allocation2 + $0x78] sm:$0xe]  ;;  %v14190_v62 = vrot.slane %v1969_v16, 9  ;;  %v2070_v54 = vrot.slane %v17159_v25, 5 }
  0x9c   : > { %v1356_v51 = vsel %vm16963_vm13, %v1351_v5, %v1355_v40  ;;  %v14200_v2 = vcombine.low %v17359_v41, %v17363_v61  ;;  %v2073_v40 = vrot.slane %v17168_v33, 5  ;;  %v1972_v31 = vld [vmem:[#allocation2 + $0x84] sm:$0xe]  ;;  %v14191_v39 = vrot.slane %v1970_v19, 9  ;;  %v1974_v19 = vld [vmem:[#allocation2 + $0x9c] sm:$0xe] }
  0x9d   : > { %v14131_v14 = vcombine.low %v1346_v59, %v1356_v51  ;;  %v17395_v21 = vsel %vm17346_vm8, %v14190_v62, %v2070_v54  ;;  %v2072_v47 = vrot.slane %v2070_v54, 4  ;;  %v2077_v49 = vrot.slane %v17198_v36, 5  ;;  %v16786_v48 = vld [vmem:[#allocation2 + $0x24] sm:$0xf]  ;;  %v17398_v59 = vld [vmem:[#allocation2 + $0x28] sm:$0xf] }
  0x9e   : > { %v14153_v5 = vcombine.low %v16786_v48, %v17398_v59  ;;  %v2080_v33 = vrot.slane %v17200_v38, 5  ;;  %v14192_v51 = vrot.slane %v1971_v46, 9  ;;  %v2084_v55 = vrot.slane %v17230_v28, 5  ;;  %v492_v48 = vld [vmem:[#allocation2 + $0xb0] sm:$0x1] }
  0x9f   : > { %15555 = vmatmul.mubr.msk.bf16.gmra.mrb[24].mxu0 %vm1455_vm11, %v14131_v14  ;;  %v16789_v14 = vld [vmem:[#allocation2 + $0x30] sm:$0xf]  ;;  %v17412_v16 = vsel %vm17346_vm8, %v14191_v39, %v2077_v49  ;;  %v2087_v54 = vrot.slane %v17235_v30, 5  ;;  %v2091_v39 = vrot.slane %v17250_v63, 5  ;;  %v2098_v30 = vrot.slane %v17287_v17, 5 }
  0xa0   : > { %15564 = vmatprep.mubr.msk.bf16.mxu0 %vm1455_vm11, %v14150_v9  ;;  %v17403_v9 = vld [vmem:[#allocation2 + $0x34] sm:$0xf]  ;;  %v17418_v46 = vsel %vm17346_vm8, %v14192_v51, %v2084_v55  ;;  %v2086_v62 = vrot.slane %v2084_v55, 4  ;;  %v17515_v26 = vld [vmem:[#allocation2 + $0xac] sm:$0xf]  ;;  %v2014_v36 = vrot.slane %v17367_v11, 5 }
  0xa1   : > { %v14154_v43 = vcombine.low %v16789_v14, %v17403_v9  ;;  %v495_v14 = vld [vmem:[#allocation2 + $0xbc] sm:$0x1]  ;;  %v997_v12 = vld [vmem:[#allocation2 + $0xa8] sm:$0xf]  ;;  %v1966_v41 = vld [vmem:[#allocation2 + $0x3c] sm:$0xe] }
  0xa2   : > { %v17431_v51 = vsel %vm17346_vm8, %v2086_v62, %v2087_v54  ;;  %v2100_v62 = vrot.slane %v2098_v30, 4  ;;  %v14195_v54 = vrot.slane %v1974_v19, 9  ;;  %v14164_v53 = vcombine.low %v997_v12, %v17515_v26  ;;  %v16796_v61 = vld [vmem:[#allocation2 + $0x4c] sm:$0xf] }
  0xa3   : > { %vm7046_vm9 = vcmask 1043456   ;;  %vm13070_vm15 = vcmask 1046534   ;;  %vm13073_vm2 = vcmask 1047559  }
  0xa7   : > { %15565 = vmatmul.mubr.msk.bf16.vlgmr.msra.gmra.mrb[0].mxu0 %vm1455_vm11, %v14151_v8  ;;  %v1973_v8 = vld [vmem:[#allocation2 + $0x90] sm:$0xe] }
  0xa8   : > { %15597 = vmatpush3.bf16.msra.mxu0 %v2223_v34  ;;  %15568 = vmatprep.mubr.msk.bf16.mxu0 %vm1455_vm11, %v14152_v20  ;;  %v17408_v20 = vsel %vm17346_vm8, %v2072_v47, %v2073_v40  ;;  %v2079_v34 = vrot.slane %v2077_v49, 4  ;;  %v14193_v47 = vrot.slane %v1972_v31, 9  ;;  %v2094_v49 = vrot.slane %v17254_v6, 5 }
  0xa9   : > { %16668 = vmatprep.subr.msk.bf16.mxu0 %vm1504_vm0, %v17380_v10  ;;  %v14207_v38 = vcombine.low %v17395_v21, %v17408_v20  ;;  %v14194_v55 = vrot.slane %v1973_v8, 9  ;;  %v2093_v6 = vrot.slane %v2091_v39, 4 }
  0xaa   : > { %v17423_v40 = vsel %vm17346_vm8, %v2079_v34, %v2080_v33  ;;  %v17439_v31 = vsel %vm17346_vm8, %v14193_v47, %v2091_v39  ;;  %v2101_v34 = vrot.slane %v17294_v29, 5  ;;  %v2108_v47 = vrot.slane %v17327_v58, 5 }
  0xab   : > { %v17445_v8 = vsel %vm17346_vm8, %v14194_v55, %v2098_v30  ;;  %v17450_v33 = vsel %vm17346_vm8, %v2093_v6, %v2094_v49  ;;  %v493_v29 = vsel %vm16912_vm7, 0, %v492_v48  ;;  %v16790_v49 = vld [vmem:[#allocation2 + $0x3c] sm:$0xf]  ;;  %v17465_v30 = vld [vmem:[#allocation2 + $0x40] sm:$0xf]  ;;  %v496_v6 = vsel %vm16912_vm7, 0, %v495_v14 }
  0xac   : > { %v17459_v39 = vsel %vm17346_vm8, %v2100_v62, %v2101_v34  ;;  %494 = vst [vmem:[#allocation2 + $0xb0] sm:$0x1] %v493_v29  ;;  %v14155_v58 = vcombine.low %v16790_v49, %v17465_v30  ;;  %v14156_v34 = vcombine.low %v17101_v60, %v17109_v1  ;;  %497 = vst [vmem:[#allocation2 + $0xbc] sm:$0x1] %v496_v6  ;;  %v789_v14 = vrot.slane %v17323_v50, 4 }
  0xad   : > { %v14211_v48 = vcombine.low %v17445_v8, %v17459_v39  ;;  %v14157_v1 = vcombine.low %v17123_v23, %v17135_v45  ;;  %v448_v23 = vld [vmem:[#allocation2 + $0xc0] sm:$0x1]  ;;  %v531_v50 = vld [vmem:[%s16947_s18 + $0x78] sm:$0xf]  ;;  %v498_v8 = vld [vmem:[#allocation2 + $0xc8] sm:$0x1] }
  0xae   : > { %v449_v45 = vsel %vm16904_vm5, 0, %v448_v23  ;;  %v791_v24 = vshrl.u32 %v531_v50, 16 }
  0xaf   : > { %15569 = vmatmul.mubr.msk.bf16.gmra.mrb[4].mxu0 %vm1455_vm11, %v14153_v5  ;;  %v2105_v5 = vrot.slane %v17325_v42, 5  ;;  %450 = vst [vmem:[#allocation2 + $0xc0] sm:$0x1] %v449_v45 }
  0xb0   : > { %15572 = vmatprep.mubr.msk.bf16.mxu0 %vm1455_vm11, %v14154_v43  ;;  %v14210_v43 = vcombine.low %v17439_v31, %v17450_v33  ;;  %v793_v28 = vrot.slane %v791_v24, 7 }
  0xb1   : > { %v17463_v19 = vsel %vm17346_vm8, %v14195_v54, %v2105_v5  ;;  %v2107_v55 = vrot.slane %v2105_v5, 4  ;;  %v772_v5 = vrot.slane %v17314_v13, 4 }
  0xb3   : > { %v17476_v62 = vsel %vm17346_vm8, %v2107_v55, %v2108_v47  ;;  %v952_v29 = vld [vmem:[#allocation2 + $0xb0] sm:$0x1]  ;;  %v959_v47 = vld [vmem:[#allocation2 + $0xbc] sm:$0x1] }
  0xb4   : > { %v14212_v54 = vcombine.low %v17463_v19, %v17476_v62  ;;  %v953_v60 = vsel %vm16904_vm5, %v772_v5, %v952_v29  ;;  %v960_v13 = vsel %vm16904_vm5, %v789_v14, %v959_v47  ;;  %v532_v55 = vld [vmem:[%s16947_s18 + $0x7c] sm:$0xf]  ;;  %v999_v14 = vld [vmem:[#allocation2 + $0xb4] sm:$0xf]  ;;  %v17532_v29 = vld [vmem:[#allocation2 + $0xb8] sm:$0xf] }
  0xb5   : > { %954 = vst [vmem:[#allocation2 + $0xb0] sm:$0x1] %v953_v60  ;;  %961 = vst [vmem:[#allocation2 + $0xbc] sm:$0x1] %v960_v13  ;;  %v799_v25 = vshrl.u32 %v532_v55, 16  ;;  %v2028_v47 = vrot.slane %v17374_v15, 5  ;;  %v14165_v13 = vcombine.low %v999_v14, %v17532_v29 }
  0xb6   : > { %v962_v17 = vld [vmem:[#allocation2 + $0xc0] sm:$0xf]  ;;  %v1964_v15 = vld [vmem:[#allocation2 + $0x24] sm:$0xe]  ;;  %v14187_v14 = vrot.slane %v1966_v41, 9  ;;  %v2119_v21 = vrot.slane %v17532_v29, 5 }
  0xb7   : > { %15573 = vmatmul.mubr.msk.bf16.gmra.mrb[8].mxu0 %vm1455_vm11, %v14155_v58  ;;  %v16792_v58 = vld [vmem:[#allocation2 + $0x8] sm:$0x1]  ;;  %v2030_v42 = vrot.slane %v2028_v47, 4  ;;  %v16697_v29 = vld [vmem:[#allocation2 + $0xc] sm:$0xff]  }
  0xb8   : > { %15576 = vmatprep.mubr.msk.bf16.mxu0 %vm1455_vm11, %v14156_v34  ;;  %v2017_v6 = vrot.slane %v16792_v58, 5  ;;  %v2016_v34 = vrot.slane %v2014_v36, 4  ;;  %v2121_v33 = vrot.slane %v2119_v21, 4  ;;  %v16699_v41 = vld [vmem:[#allocation2 + $0x24] sm:$0xff]  }
  0xba   : > { %v2018_v37 = vsel %vm17346_vm8, %v2016_v34, %v2017_v6  ;;  %v17553_v6 = vld [vmem:[%s22218_s1 + $0x8] sm:$0x3] }
  0xbb   : > { %v1967_v34 = vld [vmem:[#allocation2 + $0x48] sm:$0xe]  ;;  %v3307_v4 = vsel %vm1504_vm0, %v17553_v6, 0 }
  0xbf   : > { %15577 = vmatmul.mubr.msk.bf16.gmra.mrb[12].mxu0 %vm1455_vm11, %v14157_v1  ;;  %v1963_v1 = vld [vmem:[#allocation2 + $0x18] sm:$0xe] }
  0xc0   : > { %15580 = vmatprep.mubr.msk.bf16.mxu0 %vm1455_vm11, %v14158_v57  ;;  %v794_v57 = vshll.u32 %v531_v50, 16  ;;  %v14184_v18 = vrot.slane %v1963_v1, 9  ;;  %v2035_v50 = vrot.slane %v17398_v59, 5 }
  0xc2   : > { %v796_v63 = vor.u32 %v794_v57, %v793_v28  ;;  %v2037_v57 = vrot.slane %v2035_v50, 4 }
  0xc4   : > { %v963_v5 = vsel %vm16956_vm12, %v796_v63, %v962_v17  ;;  %v2581_v63 = vsel %vm1504_vm0, %v17380_v10, 0  ;;  %vm13061_vm12 = vcmask 1043459  }
  0xc5   : > { %964 = vst [vmem:[#allocation2 + $0xc0] sm:$0xf] %v963_v5 }
  0xc7   : > { %15581 = vmatmul.mubr.msk.bf16.gmra.mrb[16].mxu0 %vm1455_vm11, %v14159_v7  ;;  %v17518_v7 = vrot.slane %v799_v25, 7  ;;  %v2042_v25 = vrot.slane %v17403_v9, 5 }
  0xc8   : > { %15584 = vmatprep.mubr.msk.bf16.mxu0 %vm1455_vm11, %v14160_v22  ;;  %v802_v22 = vshll.u32 %v532_v55, 16  ;;  %v2029_v55 = vsel %vm17346_vm8, %v14184_v18, %v2028_v47 }
  0xc9   : > { %v2044_v59 = vrot.slane %v2042_v25, 4  ;;  %v806_v19 = vrot.slane %v17518_v7, 4 }
  0xca   : > { %v804_v49 = vor.u32 %v802_v22, %v17518_v7  ;;  %v16794_v22 = vld [vmem:[#allocation2 + $0x2c] sm:$0x1]  ;;  %v17638_v7 = vld [vmem:[#allocation2 + $0x34] sm:$0xf] }
  0xcf   : > { %15585 = vmatmul.mubr.msk.bf16.gmra.mrb[20].mxu0 %vm1455_vm11, %v14161_v27  ;;  %v797_v27 = vrot.slane %v793_v28, 4  ;;  %v14185_v28 = vrot.slane %v1964_v15, 9 }
  0xd0   : > { %15588 = vmatprep.mubr.msk.bf16.mxu0 %vm1455_vm11, %v14162_v35  ;;  %v14182_v35 = vrot.slane %v1961_v56, 9  ;;  %v2038_v56 = vrot.slane %v16794_v22, 5 }
  0xd1   : > { %v805_v11 = vsel %vm16969_vm14, %v797_v27, %v804_v49  ;;  %v16795_v49 = vld [vmem:[#allocation2 + $0x38] sm:$0x1]  ;;  %v2036_v10 = vsel %vm17346_vm8, %v14185_v28, %v2035_v50  ;;  %v16800_v28 = vld [vmem:[#allocation2 + $0x5c] sm:$0x1] }
  0xd2   : > { %965 = vst.msk [vmem:[#allocation2 + $0xc4] sm:$0xf] %vm390_vm1, %v805_v11  ;;  %v2015_v60 = vsel %vm17346_vm8, %v14182_v35, %v2014_v36  ;;  %v1965_v36 = vld [vmem:[#allocation2 + $0x30] sm:$0xe]  ;;  %v2045_v58 = vrot.slane %v16795_v49, 5  ;;  %v2039_v9 = vsel %vm17346_vm8, %v2037_v57, %v2038_v56  ;;  %v2066_v57 = vrot.slane %v16800_v28, 5 }
  0xd3   : > { %v14199_v23 = vcombine.low %v2015_v60, %v2018_v37  ;;  %v14186_v27 = vrot.slane %v1965_v36, 9  ;;  %v14202_v11 = vcombine.low %v2036_v10, %v2039_v9  ;;  %v16797_v37 = vld [vmem:[#allocation2 + $0x44] sm:$0x1]  ;;  %v2112_v49 = vrot.slane %v17515_v26, 5  ;;  %v1975_v10 = vld [vmem:[#allocation2 + $0xa8] sm:$0xe] }
  0xd4   : > { %v2046_v35 = vsel %vm17346_vm8, %v2044_v59, %v2045_v58  ;;  %v2052_v1 = vrot.slane %v16797_v37, 5  ;;  %v22392_v59 = vcombine.low %v17418_v46, %v17431_v51  ;;  %v1016_v58 = vld [vmem:[#allocation2 + $0xb0] sm:$0x1]  ;;  %v14196_v9 = vrot.slane %v1975_v10, 9  ;;  %v1976_v46 = vld [vmem:[#allocation2 + $0xb4] sm:$0xe] }
  0xd5   : > { %v2043_v17 = vsel %vm17346_vm8, %v14186_v27, %v2042_v25  ;;  %v22391_v27 = vcombine.low %v17412_v16, %v17423_v40  ;;  %v14197_v51 = vrot.slane %v1976_v46, 9  ;;  %v16701_v37 = vld [vmem:[#allocation2 + $0x3c] sm:$0xff]   ;;  %vm5879_vm1 = vcmask 57344  }
  0xd6   : > { %v14203_v5 = vcombine.low %v2043_v17, %v2046_v35  ;;  %v2115_v17 = vrot.slane %v1016_v58, 5  ;;  %v2113_v20 = vsel %vm17346_vm8, %v14196_v9, %v2112_v49 }
  0xd7   : > { %15589 = vmatmul.mubr.msk.bf16.gmra.mrb[24].mxu0 %vm1455_vm11, %v14163_v0  ;;  %v16793_v0 = vld [vmem:[#allocation2 + $0x20] sm:$0x1] }
  0xd8   : > { %15592 = vmatprep.mubr.msk.bf16.mxu0 %vm1455_vm11, %v14164_v53  ;;  %v2031_v45 = vrot.slane %v16793_v0, 5  ;;  %v2049_v53 = vrot.slane %v17465_v30, 5  ;;  %v14188_v30 = vrot.slane %v1967_v34, 9  ;;  %v16799_v0 = vld [vmem:[#allocation2 + $0x58] sm:$0xf]  ;;  %v3589_v34 = vrot.slane %v17638_v7, 5 }
  0xda   : > { %v2032_v24 = vsel %vm17346_vm8, %v2030_v42, %v2031_v45  ;;  %v2051_v60 = vrot.slane %v2049_v53, 4  ;;  %v2050_v18 = vsel %vm17346_vm8, %v14187_v14, %v2049_v53  ;;  %v2063_v45 = vrot.slane %v16799_v0, 5  ;;  %v16700_v14 = vld [vmem:[#allocation2 + $0x30] sm:$0xff]  }
  0xdb   : > { %v14201_v12 = vcombine.low %v2029_v55, %v2032_v24  ;;  %v1968_v24 = vld [vmem:[#allocation2 + $0x54] sm:$0xe]  ;;  %v2114_v53 = vrot.slane %v2112_v49, 4 }
  0xdc   : > { %v2053_v42 = vsel %vm17346_vm8, %v2051_v60, %v2052_v1  ;;  %v14189_v36 = vrot.slane %v1968_v24, 9 }
  0xdd   : > { %v14204_v15 = vcombine.low %v2050_v18, %v2053_v42  ;;  %v2116_v16 = vsel %vm17346_vm8, %v2114_v53, %v2115_v17  ;;  %v2779_v53 = vld [vmem:[#allocation2 + $0x18] sm:$0xf]  ;;  %v17687_v17 = vld [vmem:[#allocation2 + $0x1c] sm:$0xf] }
  0xde   : > { %v2064_v22 = vsel %vm17346_vm8, %v14189_v36, %v2063_v45  ;;  %v14213_v40 = vcombine.low %v2113_v20, %v2116_v16  ;;  %v16704_v20 = vld [vmem:[#allocation2 + $0x60] sm:$0xff]   ;;  %v17689_v16 = vld [vmem:[#allocation2 + $0x14] sm:$0x1] }
  0xdf   : > { %15593 = vmatmul.mubr.msk.bf16.gmra.mrb[28].mxu0 %vm1455_vm11, %v14165_v13  ;;  %v16798_v13 = vld [vmem:[#allocation2 + $0x50] sm:$0x1] }
  0xe0   : > { %15598 = vmatprep.mubr.msk.bf16.mxu0 %vm1455_vm11, %v14199_v23  ;;  %v2059_v23 = vrot.slane %v16798_v13, 5  ;;  %v17660_v13 = vld [vmem:[#allocation2 + $0x50] sm:$0x1] }
  0xe1   : > { %v3606_v42 = vrot.slane %v17660_v13, 5 }
  0xe7   : > { %15599 = vmatmul.mubr.msk.bf16.vlgmr.msra.gmra.mrb[0].mxu0 %vm1455_vm11, %v14200_v2  ;;  %v2056_v2 = vrot.slane %v16796_v61, 5  ;;  %v17635_v61 = vld [vmem:[%s22218_s1 + $0xa] sm:$0x3] }
  0xe8   : > { %15631 = vmatpush3.bf16.msra.mxu0 %v2581_v63  ;;  %15602 = vmatprep.mubr.msk.bf16.mxu0 %vm1455_vm11, %v14201_v12  ;;  %v2065_v12 = vrot.slane %v2063_v45, 4 }
  0xe9   : > { %16669 = vmatprep.subr.msk.bf16.mxu0 %vm1504_vm0, %v17553_v6  ;;  %v2058_v47 = vrot.slane %v2056_v2, 4  ;;  %v2057_v50 = vsel %vm17346_vm8, %v14188_v30, %v2056_v2  ;;  %v17641_v2 = vld [vmem:[#allocation2 + $0x38] sm:$0x1]  ;;  %v14300_v6 = vrot.slane %v3505_v3, 9  ;;  %v3511_v3 = vld [vmem:[#allocation2 + $0x78] sm:$0xe] }
  0xea   : > { %v2067_v56 = vsel %vm17346_vm8, %v2065_v12, %v2066_v57  ;;  %v16710_v30 = vld [vmem:[#allocation2 + $0xa8] sm:$0xff]  }
  0xeb   : > { %v2060_v55 = vsel %vm17346_vm8, %v2058_v47, %v2059_v23  ;;  %v14206_v63 = vcombine.low %v2064_v22, %v2067_v56  ;;  %v17649_v60 = vsel %vm17346_vm8, %v14300_v6, %v3589_v34  ;;  %v17658_v47 = vld [vmem:[#allocation2 + $0x4c] sm:$0xf]  ;;  %v3507_v23 = vld [vmem:[#allocation2 + $0x48] sm:$0xe] }
  0xec   : > { %v14205_v25 = vcombine.low %v2057_v50, %v2060_v55  ;;  %22393 = vst [vmem:[#allocation7_spill] sm:$0xff] %v17649_v60  ;;  %v3603_v18 = vrot.slane %v17658_v47, 5  ;;  %v14302_v0 = vrot.slane %v3507_v23, 9  ;;  %v16702_v50 = vld [vmem:[#allocation2 + $0x48] sm:$0xff]   ;;  %v14306_v23 = vrot.slane %v3511_v3, 9 }
  0xed   : > { %v2776_v55 = vld [vmem:[#allocation2 + $0xc] sm:$0xf]  ;;  %v2954_v60 = vshll.u32 %v17658_v47, 16 }
  0xee   : > { %v3605_v45 = vrot.slane %v3603_v18, 4  ;;  %v17667_v24 = vsel %vm17346_vm8, %v14302_v0, %v3603_v18  ;;  %v2825_v28 = vshrl.u32 %v2776_v55, 16  ;;  %v2828_v57 = vshll.u32 %v2776_v55, 16  ;;  %v16706_v55 = vld [vmem:[#allocation2 + $0x78] sm:$0xff]  }
  0xef   : > { %15603 = vmatmul.mubr.msk.bf16.gmra.mrb[4].mxu0 %vm1455_vm11, %v14202_v11  ;;  %v3592_v11 = vrot.slane %v17641_v2, 5  ;;  %22395 = vst [vmem:[#allocation9_spill] sm:$0xff] %v17667_v24  ;;  %v17862_v24 = vld [vmem:[#allocation2 + $0x58] sm:$0xf] }
  0xf0   : > { %15606 = vmatprep.mubr.msk.bf16.mxu0 %vm1455_vm11, %v14203_v5  ;;  %v3591_v5 = vrot.slane %v3589_v34, 4  ;;  %v17673_v36 = vsel %vm17346_vm8, %v3605_v45, %v3606_v42  ;;  %v2827_v9 = vrot.slane %v2825_v28, 4  ;;  %v2785_v45 = vld [vmem:[#allocation2 + $0x30] sm:$0xf] }
  0xf1   : > { %22396 = vst [vmem:[#allocation10_spill] sm:$0xff] %v17673_v36 }
  0xf2   : > { %v17653_v1 = vsel %vm17346_vm8, %v3591_v5, %v3592_v11 }
  0xf3   : > { %22394 = vst [vmem:[#allocation8_spill] sm:$0xff] %v17653_v1 }
  0xf7   : > { %15607 = vmatmul.mubr.msk.bf16.gmra.mrb[8].mxu0 %vm1455_vm11, %v14204_v15  ;;  %v16703_v15 = vld [vmem:[#allocation2 + $0x54] sm:$0xff]  }
  0xf8   : > { %15610 = vmatprep.mubr.msk.bf16.mxu0 %vm1455_vm11, %v14205_v25  ;;  %v17669_v25 = vld [vmem:[#allocation2 + $0x10] sm:$0xf] }
  0xf9   : > { %v2834_v22 = vshll.u32 %v17669_v25, 16  ;;  %v2838_v56 = vshrl.u32 %v17669_v25, 16 }
  0xfb   : > { %v17691_v46 = vrot.slane %v2834_v22, 5 }
  0xff   : > { %15611 = vmatmul.mubr.msk.bf16.gmra.mrb[12].mxu0 %vm1455_vm11, %v14206_v63  ;;  %v17680_v63 = vld [vmem:[#allocation2 + $0x64] sm:$0xf] }
 0x100   : > { %15614 = vmatprep.mubr.msk.bf16.mxu0 %vm1455_vm11, %v14207_v38  ;;  %v1017_v38 = vld [vmem:[#allocation2 + $0xbc] sm:$0x1]  ;;  %v3617_v49 = vrot.slane %v17680_v63, 5 }
 0x101   : > { %v2122_v31 = vrot.slane %v1017_v38, 5  ;;  %v2830_v38 = vrot.slane %v2828_v57, 5 }
 0x103   : > { %v2123_v39 = vsel %vm17346_vm8, %v2121_v33, %v2122_v31  ;;  %v16705_v33 = vld [vmem:[#allocation2 + $0x6c] sm:$0xff]  }
 0x107   : > { %15615 = vmatmul.mubr.msk.bf16.gmra.mrb[16].mxu0 %vm1455_vm11, %v22391_v27  ;;  %v17682_v27 = vld [vmem:[#allocation2 + $0x68] sm:$0x1] }
 0x108   : > { %15618 = vmatprep.mubr.msk.bf16.mxu0 %vm1455_vm11, %v22392_v59  ;;  %v3509_v59 = vld [vmem:[#allocation2 + $0x60] sm:$0xe]  ;;  %v3620_v58 = vrot.slane %v17682_v27, 5 }
 0x109   : > { %v14304_v10 = vrot.slane %v3509_v59, 9 }
 0x10f   : > { %15619 = vmatmul.mubr.msk.bf16.gmra.mrb[20].mxu0 %vm1455_vm11, %v14210_v43  ;;  %v2120_v43 = vsel %vm17346_vm8, %v14197_v51, %v2119_v21  ;;  %v3619_v21 = vrot.slane %v3617_v49, 4  ;;  %v17695_v51 = vsel %vm17346_vm8, %v14304_v10, %v3617_v49 }
 0x110   : > { %15622 = vmatprep.mubr.msk.bf16.mxu0 %vm1455_vm11, %v14211_v48  ;;  %v499_v48 = vsel %vm16912_vm7, 0, %v498_v8  ;;  %v14214_v26 = vcombine.low %v2120_v43, %v2123_v39  ;;  %22397 = vst [vmem:[#allocation11_spill] sm:$0xff] %v17695_v51  ;;  %v2849_v8 = vshrl.u32 %v2779_v53, 16  ;;  %v2852_v43 = vshll.u32 %v2779_v53, 16  ;;  %vm18656_vm7 = vmand %vm5879_vm1, %vm451_vm4 }
 0x111   : > { %500 = vst [vmem:[#allocation2 + $0xc8] sm:$0x1] %v499_v48  ;;  %v17699_v31 = vsel %vm17346_vm8, %v3619_v21, %v3620_v58  ;;  %v2844_v48 = vshll.u32 %v17689_v16, 16  ;;  %v2897_v53 = vshrl.u32 %v2785_v45, 16  ;;  %v2900_v21 = vshll.u32 %v2785_v45, 16 }
 0x112   : > { %22398 = vst [vmem:[#allocation12_spill] sm:$0xff] %v17699_v31  ;;  %v2851_v11 = vrot.slane %v2849_v8, 4  ;;  %v2854_v5 = vrot.slane %v2852_v43, 5  ;;  %v17751_v43 = vld [vmem:[#allocation2 + $0x98] sm:$0x1]  ;;  %vm13058_vm4 = vcmask 1042434  }
 0x113   : > { %v17719_v18 = vrot.slane %v2844_v48, 5  ;;  %v3512_v48 = vld [vmem:[#allocation2 + $0x84] sm:$0xe]  ;;  %v2902_v45 = vrot.slane %v2900_v21, 5 }
 0x114   : > { %v2855_v8 = vor.u32 %v2854_v5, %v2851_v11 }
 0x117   : > { %15623 = vmatmul.mubr.msk.bf16.gmra.mrb[24].mxu0 %vm1455_vm11, %v14212_v54  ;;  %v16698_v54 = vld [vmem:[#allocation2 + $0x18] sm:$0xff]  }
 0x118   : > { %15626 = vmatprep.mubr.msk.bf16.mxu0 %vm1455_vm11, %v14213_v40  ;;  %v966_v62 = vld [vmem:[#allocation2 + $0xc8] sm:$0x1]  ;;  %v2840_v40 = vrot.slane %v2838_v56, 4 }
 0x119   : > { %v967_v35 = vsel %vm16904_vm5, %v806_v19, %v966_v62  ;;  %v2782_v19 = vld [vmem:[#allocation2 + $0x24] sm:$0xf]  ;;  %v2831_v62 = vor.u32 %v2830_v38, %v2827_v9  ;;  %v17744_v38 = vld [vmem:[#allocation2 + $0x88] sm:$0xf]  ;;  %vm18645_vm5 = vmand %vm5879_vm1, %vm401_vm3  ;;  %vm5527_vm3 = vcmask 64512  }
 0x11a   : > { %968 = vst [vmem:[#allocation2 + $0xc8] sm:$0x1] %v967_v35  ;;  %v2862_v35 = vshrl.u32 %v17687_v17, 16  ;;  %v16707_v56 = vld [vmem:[#allocation2 + $0x84] sm:$0xff]   ;;  %v2876_v59 = vshll.u32 %v2782_v19, 16 }
 0x11c   : > { %v17728_v57 = vrot.slane %v2862_v35, 4  ;;  %v3513_v35 = vld [vmem:[#allocation2 + $0x90] sm:$0xe] }
 0x11d   : > { %v14308_v5 = vrot.slane %v3513_v35, 9 }
 0x11f   : > { %15627 = vmatmul.mubr.msk.bf16.gmra.mrb[28].mxu0 %vm1455_vm11, %v14214_v26  ;;  %v17704_v26 = vld [vmem:[#allocation2 + $0x20] sm:$0x1] }
 0x120   : > { %15632 = vmatprep.mubr.msk.bf16.mxu0 %vm1455_vm11, %v16697_v29  ;;  %v2858_v29 = vshll.u32 %v17687_v17, 16  ;;  %v2868_v0 = vshll.u32 %v17704_v26, 16 }
 0x122   : > { %v17721_v42 = vrot.slane %v2858_v29, 5  ;;  %v3638_v29 = vrot.slane %v17744_v38, 5  ;;  %v17776_v21 = vrot.slane %v2868_v0, 5  ;;  %v3515_v0 = vld [vmem:[#allocation2 + $0xa8] sm:$0xe] }
 0x124   : > { %v3640_v11 = vrot.slane %v3638_v29, 4  ;;  %v2865_v35 = vor.u32 %v17728_v57, %v17721_v42 }
 0x126   : > { %v17814_v12 = vrot.slane %v2865_v35, 4 }
 0x127   : > { %15633 = vmatmul.mubr.msk.bf16.vlgmr.msra.gmra.mrb[0].mxu0 %vm1455_vm11, %v16698_v54  ;;  %v2841_v54 = vor.u32 %v2840_v40, %v17691_v46  ;;  %v17746_v40 = vld [vmem:[#allocation2 + $0x8c] sm:$0x1] }
 0x128   : > { %15665 = vmatpush3.bf16.msra.mxu0 %v3307_v4  ;;  %15636 = vmatprep.mubr.msk.bf16.mxu0 %vm1455_vm11, %v16699_v41  ;;  %v17710_v41 = vld [vmem:[#allocation2 + $0x7c] sm:$0xf]  ;;  %v17712_v4 = vld [vmem:[#allocation2 + $0x80] sm:$0x1] }
 0x129   : > { %16670 = vmatprep.subr.msk.bf16.mxu0 %vm1504_vm0, %v17635_v61  ;;  %v3631_v34 = vrot.slane %v17710_v41, 5  ;;  %v3634_v6 = vrot.slane %v17712_v4, 5  ;;  %v17726_v28 = vrot.slane %v2841_v54, 4  ;;  %v14307_v54 = vrot.slane %v3512_v48, 9 }
 0x12a   : > { %v2906_v48 = vshll.u32 %v17638_v7, 16 }
 0x12b   : > { %v17732_v22 = vsel %vm17346_vm8, %v14306_v23, %v3631_v34  ;;  %v2899_v23 = vrot.slane %v2897_v53, 4  ;;  %v16709_v53 = vld [vmem:[#allocation2 + $0x9c] sm:$0xff]  }
 0x12c   : > { %22399 = vst [vmem:[#allocation13_spill] sm:$0xff] %v17732_v22  ;;  %v17805_v57 = vrot.slane %v2906_v48, 5  ;;  %v17843_v22 = vld [vmem:[#allocation2 + $0xb8] sm:$0xf] }
 0x12f   : > { %15637 = vmatmul.mubr.msk.bf16.gmra.mrb[4].mxu0 %vm1455_vm11, %v16700_v14  ;;  %v17717_v14 = vld [vmem:[#allocation2 + $0x28] sm:$0xf] }
 0x130   : > { %15640 = vmatprep.mubr.msk.bf16.mxu0 %vm1455_vm11, %v16701_v37  ;;  %v2873_v37 = vshrl.u32 %v2782_v19, 16  ;;  %v2882_v49 = vshll.u32 %v17717_v14, 16  ;;  %v2886_v58 = vshrl.u32 %v17717_v14, 16  ;;  %v3641_v19 = vrot.slane %v17746_v40, 5 }
 0x132   : > { %v17740_v9 = vrot.slane %v2873_v37, 4  ;;  %v2888_v37 = vrot.slane %v2886_v58, 4 }
 0x137   : > { %15641 = vmatmul.mubr.msk.bf16.gmra.mrb[8].mxu0 %vm1455_vm11, %v16702_v50  ;;  %v3633_v50 = vrot.slane %v3631_v34, 4  ;;  %v3648_v34 = vrot.slane %v17751_v43, 5 }
 0x138   : > { %15644 = vmatprep.mubr.msk.bf16.mxu0 %vm1455_vm11, %v16703_v15  ;;  %v17724_v15 = vrot.slane %v2831_v62, 4  ;;  %v2878_v62 = vrot.slane %v2876_v59, 5  ;;  %v17764_v59 = vld [vmem:[#allocation2 + $0x2c] sm:$0x1] }
 0x139   : > { %v17738_v10 = vsel %vm17346_vm8, %v3633_v50, %v3634_v6  ;;  %v17758_v6 = vrot.slane %v2882_v49, 5  ;;  %v17762_v50 = vsel %vm17346_vm8, %v14307_v54, %v3638_v29  ;;  %v17770_v49 = vsel %vm17346_vm8, %v3640_v11, %v3641_v19  ;;  %v17798_v29 = vld [vmem:[#allocation2 + $0x40] sm:$0xf] }
 0x13a   : > { %22400 = vst [vmem:[#allocation14_spill] sm:$0xff] %v17738_v10  ;;  %22401 = vst [vmem:[#allocation15_spill] sm:$0xff] %v17762_v50  ;;  %v17788_v19 = vrot.slane %v2855_v8, 4  ;;  %v2879_v11 = vor.u32 %v2878_v62, %v17740_v9  ;;  %v17807_v9 = vld [vmem:[#allocation2 + $0xac] sm:$0xf] }
 0x13b   : > { %22402 = vst [vmem:[#allocation16_spill] sm:$0xff] %v17770_v49  ;;  %v17809_v62 = vld [vmem:[#allocation2 + $0xb0] sm:$0x1]  ;;  %v16711_v49 = vld [vmem:[#allocation2 + $0xb4] sm:$0xff]  }
 0x13c   : > { %v3662_v39 = vrot.slane %v17809_v62, 5 }
 0x13f   : > { %15645 = vmatmul.mubr.msk.bf16.gmra.mrb[12].mxu0 %vm1455_vm11, %v16704_v20  ;;  %v2910_v20 = vshrl.u32 %v17638_v7, 16  ;;  %v2837_v7 = vsel %vm16963_vm13, %v17724_v15, %v17691_v46  ;;  %v2847_v46 = vsel %vm16963_vm13, %v17726_v28, %v17719_v18  ;;  %v2903_v15 = vor.u32 %v2902_v45, %v2899_v23 }
 0x140   : > { %15648 = vmatprep.mubr.msk.bf16.mxu0 %vm1455_vm11, %v16705_v33  ;;  %v17748_v33 = vld [vmem:[#allocation2 + $0x94] sm:$0xf]  ;;  %v2930_v18 = vshll.u32 %v17798_v29, 16  ;;  %v2934_v28 = vshrl.u32 %v17798_v29, 16  ;;  %v14310_v23 = vrot.slane %v3515_v0, 9  ;;  %v17818_v45 = vrot.slane %v2879_v11, 4 }
 0x141   : > { %v3645_v3 = vrot.slane %v17748_v33, 5  ;;  %v2912_v8 = vrot.slane %v2910_v20, 4  ;;  %v2791_v20 = vld [vmem:[#allocation2 + $0x48] sm:$0xf]  ;;  %v17824_v52 = vrot.slane %v2903_v15, 4 }
 0x142   : > { %v2945_v50 = vshrl.u32 %v2791_v20, 16  ;;  %v17839_v15 = vrot.slane %v2930_v18, 5  ;;  %v2936_v10 = vrot.slane %v2934_v28, 4  ;;  %v17854_v18 = vld [vmem:[#allocation2 + $0xc8] sm:$0x1] }
 0x143   : > { %v17774_v58 = vsel %vm17346_vm8, %v14308_v5, %v3645_v3  ;;  %v2889_v5 = vor.u32 %v2888_v37, %v17758_v6  ;;  %v3516_v28 = vld [vmem:[#allocation2 + $0xb4] sm:$0xe] }
 0x144   : > { %22403 = vst [vmem:[#allocation17_spill] sm:$0xff] %v17774_v58  ;;  %v2947_v51 = vrot.slane %v2945_v50, 4  ;;  %v2937_v1 = vor.u32 %v2936_v10, %v17839_v15 }
 0x145   : > { %v17820_v48 = vrot.slane %v2889_v5, 4 }
 0x147   : > { %15649 = vmatmul.mubr.msk.bf16.gmra.mrb[16].mxu0 %vm1455_vm11, %v16706_v55  ;;  %v3647_v55 = vrot.slane %v3645_v3, 4  ;;  %v2788_v3 = vld [vmem:[#allocation2 + $0x3c] sm:$0xf] }
 0x148   : > { %15652 = vmatprep.mubr.msk.bf16.mxu0 %vm1455_vm11, %v16707_v56  ;;  %v16708_v56 = vld [vmem:[#allocation2 + $0x90] sm:$0xff]   ;;  %v2924_v37 = vshll.u32 %v2788_v3, 16 }
 0x149   : > { %v17782_v54 = vsel %vm17346_vm8, %v3647_v55, %v3648_v34  ;;  %v2892_v34 = vshll.u32 %v17764_v59, 16  ;;  %v2916_v55 = vshll.u32 %v17641_v2, 16  ;;  %v2921_v2 = vshrl.u32 %v2788_v3, 16 }
 0x14a   : > { %22404 = vst [vmem:[#allocation18_spill] sm:$0xff] %v17782_v54  ;;  %v2913_v54 = vor.u32 %v2912_v8, %v17805_v57  ;;  %v2926_v11 = vrot.slane %v2924_v37, 5  ;;  %v2948_v8 = vshll.u32 %v2791_v20, 16  ;;  %v14265_v37 = vcombine.low %v2837_v7, %v2847_v46 }
 0x14b   : > { %v17827_v35 = vrot.slane %v2916_v55, 5  ;;  %v2923_v0 = vrot.slane %v2921_v2, 4  ;;  %v17847_v2 = vld [vmem:[#allocation2 + $0xc4] sm:$0xf]  ;;  %v3666_v20 = vrot.slane %v17843_v22, 5  ;;  %v14311_v55 = vrot.slane %v3516_v28, 9 }
 0x14c   : > { %v3676_v7 = vrot.slane %v17854_v18, 5  ;;  %v2950_v36 = vrot.slane %v2948_v8, 5  ;;  %v16712_v28 = vld [vmem:[#allocation2 + $0xc0] sm:$0xff]  }
 0x14d   : > { %v2927_v46 = vor.u32 %v2926_v11, %v2923_v0  ;;  %v2958_v11 = vshrl.u32 %v17658_v47, 16  ;;  %v2871_v47 = vsel %vm16963_vm13, %v17814_v12, %v17776_v21 }
 0x14f   : > { %15653 = vmatmul.mubr.msk.bf16.gmra.mrb[20].mxu0 %vm1455_vm11, %v16708_v56  ;;  %v3659_v56 = vrot.slane %v17807_v9, 5  ;;  %v2928_v21 = vrot.slane %v2927_v46, 4 }
 0x150   : > { %15656 = vmatprep.mubr.msk.bf16.mxu0 %vm1455_vm11, %v16709_v53  ;;  %v17822_v53 = vrot.slane %v2892_v34, 5  ;;  %v17837_v34 = vld [vmem:[#allocation2 + $0x44] sm:$0x1] }
 0x151   : > { %v3661_v3 = vrot.slane %v3659_v56, 4  ;;  %v17831_v58 = vsel %vm17346_vm8, %v14310_v23, %v3659_v56  ;;  %v17845_v56 = vld [vmem:[#allocation2 + $0xbc] sm:$0x1] }
 0x152   : > { %22405 = vst [vmem:[#allocation19_spill] sm:$0xff] %v17831_v58  ;;  %v3669_v23 = vrot.slane %v17845_v56, 5  ;;  %v2940_v58 = vshll.u32 %v17837_v34, 16 }
 0x153   : > { %v17835_v5 = vsel %vm17346_vm8, %v3661_v3, %v3662_v39  ;;  %v2861_v39 = vsel %vm16963_vm13, %v17788_v19, %v17721_v42  ;;  %v2914_v3 = vrot.slane %v2913_v54, 4  ;;  %v2794_v42 = vld [vmem:[#allocation2 + $0x54] sm:$0xf]  ;;  %v3668_v19 = vrot.slane %v3666_v20, 4 }
 0x154   : > { %22406 = vst [vmem:[#allocation20_spill] sm:$0xff] %v17835_v5  ;;  %v3517_v5 = vld [vmem:[#allocation2 + $0xc0] sm:$0xe]  ;;  %v2972_v10 = vshll.u32 %v2794_v42, 16 }
 0x155   : > { %v14312_v31 = vrot.slane %v3517_v5, 9  ;;  %v17872_v0 = vsel %vm17346_vm8, %v3668_v19, %v3669_v23  ;;  %v2969_v5 = vshrl.u32 %v2794_v42, 16  ;;  %v2982_v23 = vshrl.u32 %v17862_v24, 16 }
 0x156   : > { %v2919_v12 = vsel %vm16963_vm13, %v2914_v3, %v17827_v35  ;;  %v2942_v42 = vrot.slane %v2940_v58, 5  ;;  %v17910_v19 = vrot.slane %v2954_v60, 5  ;;  %v14266_v58 = vcombine.low %v2861_v39, %v2871_v47  ;;  %v2803_v47 = vld [vmem:[#allocation2 + $0x78] sm:$0xf] }
 0x157   : > { %15657 = vmatmul.mubr.msk.bf16.gmra.mrb[24].mxu0 %vm1455_vm11, %v16710_v30  ;;  %v3673_v30 = vrot.slane %v17847_v2, 5  ;;  %v2971_v8 = vrot.slane %v2969_v5, 4  ;;  %v3777_v60 = vsel %vm1504_vm0, %v17635_v61, 0 }
 0x158   : > { %15660 = vmatprep.mubr.msk.bf16.mxu0 %vm1455_vm11, %v16711_v49  ;;  %v17866_v49 = vsel %vm17346_vm8, %v14311_v55, %v3666_v20  ;;  %v2978_v20 = vshll.u32 %v17862_v24, 16 }
 0x159   : > { %v3675_v54 = vrot.slane %v3673_v30, 4  ;;  %v17876_v50 = vsel %vm17346_vm8, %v14312_v31, %v3673_v30  ;;  %v2885_v31 = vsel %vm16963_vm13, %v17818_v45, %v17758_v6  ;;  %v2895_v30 = vsel %vm16963_vm13, %v17820_v48, %v17822_v53  ;;  %v2797_v6 = vld [vmem:[#allocation2 + $0x60] sm:$0xf] }
 0x15a   : > { %v2938_v45 = vrot.slane %v2937_v1, 4  ;;  %v2960_v48 = vrot.slane %v2958_v11, 4  ;;  %v2964_v53 = vshll.u32 %v17660_v13, 16  ;;  %v2993_v35 = vshrl.u32 %v2797_v6, 16 }
 0x15b   : > { %v17883_v55 = vsel %vm17346_vm8, %v3675_v54, %v3676_v7  ;;  %v2909_v7 = vsel %vm16963_vm13, %v17824_v52, %v17805_v57  ;;  %v2951_v54 = vor.u32 %v2950_v36, %v2947_v51  ;;  %v2974_v52 = vrot.slane %v2972_v10, 5  ;;  %v2800_v10 = vld [vmem:[#allocation2 + $0x6c] sm:$0xf] }
 0x15c   : > { %22407 = vst [vmem:[#allocation21_spill] sm:$0xff] %v17883_v55  ;;  %v17913_v57 = vrot.slane %v2978_v20, 5  ;;  %v17915_v55 = vld [vmem:[#allocation2 + $0x5c] sm:$0x1]  ;;  %v2996_v3 = vshll.u32 %v2797_v6, 16  ;;  %v3002_v36 = vshll.u32 %v17680_v63, 16  ;;  %v14267_v1 = vcombine.low %v2885_v31, %v2895_v30 }
 0x15d   : > { %v3006_v51 = vshrl.u32 %v17680_v63, 16  ;;  %v2933_v13 = vsel %vm16963_vm13, %v2928_v21, %v17839_v15  ;;  %v17924_v46 = vrot.slane %v2951_v54, 4  ;;  %v2961_v11 = vor.u32 %v2960_v48, %v17910_v19  ;;  %v17929_v20 = vld [vmem:[#allocation2 + $0x70] sm:$0xf] }
 0x15e   : > { %v17927_v5 = vrot.slane %v2964_v53, 5  ;;  %v2943_v63 = vsel %vm16963_vm13, %v2938_v45, %v2942_v42  ;;  %v2975_v39 = vor.u32 %v2974_v52, %v2971_v8  ;;  %v2995_v31 = vrot.slane %v2993_v35, 4 }
 0x15f   : > { %15661 = vmatmul.mubr.msk.bf16.gmra.mrb[28].mxu0 %vm1455_vm11, %v16712_v28  ;;  %v2984_v28 = vrot.slane %v2982_v23, 4  ;;  %v2988_v23 = vshll.u32 %v17915_v55, 16  ;;  %v2998_v15 = vrot.slane %v2996_v3, 5  ;;  %v17935_v30 = vrot.slane %v3002_v36, 5 }
 0x160   : > { %15666 = vmatprep.mubr.msk.bf16.mxu0 %vm1455_vm11, %v14265_v37  ;;  %v14268_v37 = vcombine.low %v2909_v7, %v2919_v12  ;;  %v3008_v7 = vrot.slane %v3006_v51, 4  ;;  %v17940_v12 = vld [vmem:[%s22218_s1 + $0xc] sm:$0x3]  ;;  %v3017_v21 = vshrl.u32 %v2800_v10, 16  ;;  %v3020_v42 = vshll.u32 %v2800_v10, 16 }
 0x161   : > { %v2985_v61 = vor.u32 %v2984_v28, %v17913_v57  ;;  %v3026_v8 = vshll.u32 %v17929_v20, 16  ;;  %v3030_v54 = vshrl.u32 %v17929_v20, 16  ;;  %v14269_v6 = vcombine.low %v2933_v13, %v2943_v63 }
 0x162   : > { %v2962_v45 = vrot.slane %v2961_v11, 4  ;;  %v3041_v48 = vshrl.u32 %v2803_v47, 16  ;;  %v3044_v53 = vshll.u32 %v2803_v47, 16  ;;  %v2976_v52 = vrot.slane %v2975_v39, 4 }
 0x163   : > { %v2990_v28 = vrot.slane %v2988_v23, 5  ;;  %v3050_v35 = vshll.u32 %v17710_v41, 16  ;;  %v3054_v3 = vshrl.u32 %v17710_v41, 16  ;;  %v2986_v36 = vrot.slane %v2985_v61, 4  ;;  %v17961_v61 = vld [vmem:[#allocation2 + $0x74] sm:$0x1] }
 0x164   : > { %v2999_v51 = vor.u32 %v2998_v15, %v2995_v31  ;;  %v3019_v13 = vrot.slane %v3017_v21, 4  ;;  %v3022_v11 = vrot.slane %v3020_v42, 5  ;;  %v17952_v10 = vrot.slane %v3026_v8, 5 }
 0x165   : > { %v3032_v63 = vrot.slane %v3030_v54, 4  ;;  %v2957_v41 = vsel %vm16963_vm13, %v17924_v46, %v17910_v19  ;;  %v2967_v39 = vsel %vm16963_vm13, %v2962_v45, %v17927_v5  ;;  %v3043_v23 = vrot.slane %v3041_v48, 4 }
 0x166   : > { %v3046_v47 = vrot.slane %v3044_v53, 5  ;;  %v3056_v31 = vrot.slane %v3054_v3, 4  ;;  %v2981_v21 = vsel %vm16963_vm13, %v2976_v52, %v17913_v57  ;;  %v2991_v19 = vsel %vm16963_vm13, %v2986_v36, %v2990_v28 }
 0x167   : > { %15667 = vmatmul.mubr.msk.bf16.vlgmr.msra.gmra.mrb[0].mxu0 %vm1455_vm11, %v14266_v58  ;;  %v3009_v58 = vor.u32 %v3008_v7, %v17935_v30  ;;  %v3000_v46 = vrot.slane %v2999_v51, 4  ;;  %v3023_v8 = vor.u32 %v3022_v11, %v3019_v13  ;;  %v3033_v54 = vor.u32 %v3032_v63, %v17952_v10  ;;  %v2812_v13 = vld [vmem:[#allocation2 + $0x9c] sm:$0xf] }
 0x168   : > { %15699 = vmatpush3.bf16.msra.mxu0 %v3777_v60  ;;  %15670 = vmatprep.mubr.msk.bf16.mxu0 %vm1455_vm11, %v14267_v1  ;;  %v3012_v60 = vshll.u32 %v17682_v27, 16  ;;  %v2806_v1 = vld [vmem:[#allocation2 + $0x84] sm:$0xf]  ;;  %v17963_v27 = vrot.slane %v3050_v35, 5  ;;  %v3036_v45 = vshll.u32 %v17961_v61, 16  ;;  %v3060_v48 = vshll.u32 %v17712_v4, 16 }
 0x169   : > { %16671 = vmatprep.subr.msk.bf16.mxu0 %vm1504_vm0, %v17940_v12  ;;  %v3065_v15 = vshrl.u32 %v2806_v1, 16  ;;  %v3068_v7 = vshll.u32 %v2806_v1, 16  ;;  %v3010_v5 = vrot.slane %v3009_v58, 4  ;;  %v3074_v53 = vshll.u32 %v17744_v38, 16 }
 0x16a   : > { %v3014_v42 = vrot.slane %v3012_v60, 5  ;;  %v3078_v57 = vshrl.u32 %v17744_v38, 16  ;;  %v3047_v52 = vor.u32 %v3046_v47, %v3043_v23  ;;  %v3057_v28 = vor.u32 %v3056_v31, %v17963_v27  ;;  %v17985_v47 = vld [vmem:[#allocation2 + $0xa0] sm:$0xf] }
 0x16b   : > { %v3067_v35 = vrot.slane %v3065_v15, 4  ;;  %v3070_v3 = vrot.slane %v3068_v7, 5  ;;  %v14270_v36 = vcombine.low %v2957_v41, %v2967_v39  ;;  %v14271_v51 = vcombine.low %v2981_v21, %v2991_v19 }
 0x16c   : > { %v3005_v58 = vsel %vm16963_vm13, %v3000_v46, %v17935_v30  ;;  %v3024_v4 = vrot.slane %v3023_v8, 4  ;;  %v3034_v60 = vrot.slane %v3033_v54, 4  ;;  %v3038_v1 = vrot.slane %v3036_v45, 5 }
 0x16d   : > { %v17983_v38 = vrot.slane %v3074_v53, 5  ;;  %v3080_v11 = vrot.slane %v3078_v57, 4  ;;  %v3048_v41 = vrot.slane %v3047_v52, 4  ;;  %v3058_v39 = vrot.slane %v3057_v28, 4 }
 0x16e   : > { %v3062_v31 = vrot.slane %v3060_v48, 5  ;;  %v3071_v15 = vor.u32 %v3070_v3, %v3067_v35  ;;  %v3098_v30 = vshll.u32 %v17748_v33, 16  ;;  %v3102_v7 = vshrl.u32 %v17748_v33, 16 }
 0x16f   : > { %15671 = vmatmul.mubr.msk.bf16.gmra.mrb[4].mxu0 %vm1455_vm11, %v14268_v37  ;;  %v2809_v37 = vld [vmem:[#allocation2 + $0x90] sm:$0xf]  ;;  %v3113_v21 = vshrl.u32 %v2812_v13, 16  ;;  %v3116_v19 = vshll.u32 %v2812_v13, 16  ;;  %v3029_v46 = vsel %vm16963_vm13, %v3024_v4, %v17952_v10  ;;  %v3126_v8 = vshrl.u32 %v17985_v47, 16 }
 0x170   : > { %15674 = vmatprep.mubr.msk.bf16.mxu0 %vm1455_vm11, %v14269_v6  ;;  %v3015_v6 = vsel %vm16963_vm13, %v3010_v5, %v3014_v42  ;;  %v3089_v63 = vshrl.u32 %v2809_v37, 16  ;;  %v3092_v23 = vshll.u32 %v2809_v37, 16  ;;  %v3039_v42 = vsel %vm16963_vm13, %v3034_v60, %v3038_v1  ;;  %v2815_v60 = vld [vmem:[#allocation2 + $0xa8] sm:$0xf] }
 0x171   : > { %v3122_v5 = vshll.u32 %v17985_v47, 16  ;;  %v3081_v54 = vor.u32 %v3080_v11, %v17983_v38  ;;  %v3084_v33 = vshll.u32 %v17746_v40, 16  ;;  %v3053_v53 = vsel %vm16963_vm13, %v3048_v41, %v17963_v27 }
 0x172   : > { %v3091_v45 = vrot.slane %v3089_v63, 4  ;;  %v3094_v48 = vrot.slane %v3092_v23, 5  ;;  %v3063_v10 = vsel %vm16963_vm13, %v3058_v39, %v3062_v31  ;;  %v3072_v57 = vrot.slane %v3071_v15, 4  ;;  %v2818_v15 = vld [vmem:[#allocation2 + $0xb4] sm:$0xf] }
 0x173   : > { %v18005_v52 = vrot.slane %v3098_v30, 5  ;;  %v3104_v28 = vrot.slane %v3102_v7, 4  ;;  %v3115_v35 = vrot.slane %v3113_v21, 4  ;;  %v3118_v3 = vrot.slane %v3116_v19, 5 }
 0x174   : > { %v14272_v37 = vcombine.low %v3005_v58, %v3015_v6  ;;  %v3124_v40 = vrot.slane %v3122_v5, 5  ;;  %v3128_v4 = vrot.slane %v3126_v8, 4  ;;  %v3082_v1 = vrot.slane %v3081_v54, 4 }
 0x175   : > { %v3086_v13 = vrot.slane %v3084_v33, 5  ;;  %v3095_v11 = vor.u32 %v3094_v48, %v3091_v45  ;;  %v3108_v27 = vshll.u32 %v17751_v43, 16  ;;  %v14274_v63 = vcombine.low %v3053_v53, %v3063_v10 }
 0x176   : > { %v3105_v23 = vor.u32 %v3104_v28, %v18005_v52  ;;  %v3119_v41 = vor.u32 %v3118_v3, %v3115_v35  ;;  %v3137_v31 = vshrl.u32 %v2815_v60, 16  ;;  %v3129_v58 = vor.u32 %v3128_v4, %v3124_v40  ;;  %v2821_v4 = vld [vmem:[#allocation2 + $0xc0] sm:$0xf] }
 0x177   : > { %15675 = vmatmul.mubr.msk.bf16.gmra.mrb[8].mxu0 %vm1455_vm11, %v14270_v36  ;;  %v14273_v36 = vcombine.low %v3029_v46, %v3039_v42  ;;  %v3140_v6 = vshll.u32 %v2815_v60, 16  ;;  %v3146_v30 = vshll.u32 %v17807_v9, 16  ;;  %v3150_v7 = vshrl.u32 %v17807_v9, 16 }
 0x178   : > { %15678 = vmatprep.mubr.msk.bf16.mxu0 %vm1455_vm11, %v14271_v51  ;;  %v18007_v51 = vld [vmem:[#allocation2 + $0xa4] sm:$0x1]  ;;  %v3077_v43 = vsel %vm16963_vm13, %v3072_v57, %v17983_v38  ;;  %v3087_v21 = vsel %vm16963_vm13, %v3082_v1, %v3086_v13  ;;  %v3096_v19 = vrot.slane %v3095_v11, 4  ;;  %v3110_v46 = vrot.slane %v3108_v27, 5 }
 0x179   : > { %v3132_v39 = vshll.u32 %v18007_v51, 16  ;;  %v3161_v42 = vshrl.u32 %v2818_v15, 16  ;;  %v3164_v5 = vshll.u32 %v2818_v15, 16  ;;  %v3170_v8 = vshll.u32 %v17843_v22, 16 }
 0x17a   : > { %v3174_v54 = vshrl.u32 %v17843_v22, 16  ;;  %v3106_v33 = vrot.slane %v3105_v23, 4  ;;  %v3120_v45 = vrot.slane %v3119_v41, 4  ;;  %v3139_v48 = vrot.slane %v3137_v31, 4 }
 0x17b   : > { %v3134_v9 = vrot.slane %v3132_v39, 5  ;;  %v3130_v53 = vrot.slane %v3129_v58, 4  ;;  %v3142_v10 = vrot.slane %v3140_v6, 5  ;;  %v3148_v28 = vrot.slane %v3146_v30, 5 }
 0x17c   : > { %v3152_v35 = vrot.slane %v3150_v7, 4  ;;  %v14275_v38 = vcombine.low %v3077_v43, %v3087_v21  ;;  %v3163_v57 = vrot.slane %v3161_v42, 4  ;;  %v3166_v3 = vrot.slane %v3164_v5, 5 }
 0x17d   : > { %v3101_v60 = vsel %vm16963_vm13, %v3096_v19, %v18005_v52  ;;  %v3111_v22 = vsel %vm16963_vm13, %v3106_v33, %v3110_v46  ;;  %v3156_v1 = vshll.u32 %v17809_v62, 16  ;;  %v3125_v13 = vsel %vm16963_vm13, %v3120_v45, %v3124_v40 }
 0x17e   : > { %v3135_v11 = vsel %vm16963_vm13, %v3130_v53, %v3134_v9  ;;  %v3143_v27 = vor.u32 %v3142_v10, %v3139_v48  ;;  %v3153_v23 = vor.u32 %v3152_v35, %v3148_v28  ;;  %v3185_v41 = vshrl.u32 %v2821_v4, 16  ;;  %v3502_v10 = vld [vmem:[#allocation2 + $0xc] sm:$0xe] }
 0x17f   : > { %15679 = vmatmul.mubr.msk.bf16.gmra.mrb[12].mxu0 %vm1455_vm11, %v14272_v37  ;;  %v3172_v37 = vrot.slane %v3170_v8, 5  ;;  %v3188_v39 = vshll.u32 %v2821_v4, 16  ;;  %v3194_v52 = vshll.u32 %v17847_v2, 16  ;;  %v3198_v31 = vshrl.u32 %v17847_v2, 16 }
 0x180   : > { %15682 = vmatprep.mubr.msk.bf16.mxu0 %vm1455_vm11, %v14273_v36  ;;  %v3176_v36 = vrot.slane %v3174_v54, 4  ;;  %v3167_v15 = vor.u32 %v3166_v3, %v3163_v57  ;;  %v14276_v58 = vcombine.low %v3101_v60, %v3111_v22  ;;  %v14277_v6 = vcombine.low %v3125_v13, %v3135_v11  ;;  %v3503_v13 = vld [vmem:[#allocation2 + $0x18] sm:$0xe]  ;;  %v3504_v11 = vld [vmem:[#allocation2 + $0x24] sm:$0xe] }
 0x181   : > { %v3144_v40 = vrot.slane %v3143_v27, 4  ;;  %v3154_v30 = vrot.slane %v3153_v23, 4  ;;  %v3158_v7 = vrot.slane %v3156_v1, 5  ;;  %v3187_v43 = vrot.slane %v3185_v41, 4 }
 0x182   : > { %v3177_v62 = vor.u32 %v3176_v36, %v3172_v37  ;;  %v3190_v21 = vrot.slane %v3188_v39, 5  ;;  %v3196_v19 = vrot.slane %v3194_v52, 5  ;;  %v3200_v46 = vrot.slane %v3198_v31, 4 }
 0x183   : > { %v3168_v42 = vrot.slane %v3167_v15, 4  ;;  %v3149_v2 = vsel %vm16963_vm13, %v3144_v40, %v3148_v28  ;;  %v3204_v45 = vshll.u32 %v17854_v18, 16  ;;  %v3568_v53 = vrot.slane %v17669_v25, 5 }
 0x184   : > { %v3178_v5 = vrot.slane %v3177_v62, 4  ;;  %v3191_v54 = vor.u32 %v3190_v21, %v3187_v43  ;;  %v3201_v33 = vor.u32 %v3200_v46, %v3196_v19  ;;  %v14297_v36 = vrot.slane %v3502_v10, 9 }
 0x185   : > { %v3173_v9 = vsel %vm16963_vm13, %v3168_v42, %v3172_v37  ;;  %v3206_v3 = vrot.slane %v3204_v45, 5  ;;  %v3570_v4 = vrot.slane %v3568_v53, 4  ;;  %v3571_v60 = vrot.slane %v17689_v16, 5 }
 0x186   : > { %v3202_v57 = vrot.slane %v3201_v33, 4  ;;  %v3575_v37 = vrot.slane %v17687_v17, 5  ;;  %v3569_v22 = vsel %vm17346_vm8, %v14297_v36, %v3568_v53  ;;  %v3582_v16 = vrot.slane %v17717_v14, 5 }
 0x187   : > { %15683 = vmatmul.mubr.msk.bf16.gmra.mrb[16].mxu0 %vm1455_vm11, %v14274_v63  ;;  %v3180_v63 = vshll.u32 %v17845_v56, 16  ;;  %v3159_v56 = vsel %vm16963_vm13, %v3154_v30, %v3158_v7  ;;  %v3572_v1 = vsel %vm17346_vm8, %v3570_v4, %v3571_v60  ;;  %v14298_v41 = vrot.slane %v3503_v13, 9  ;;  %v22414_v4 = vld [vmem:[#allocation11_spill] sm:$0xff]  ;;  %v22415_v60 = vld [vmem:[#allocation12_spill] sm:$0xff]  ;;  %v22417_v13 = vld [vmem:[#allocation13_spill] sm:$0xff] }
 0x188   : > { %15686 = vmatprep.mubr.msk.bf16.mxu0 %vm1455_vm11, %v14275_v38  ;;  %v14278_v35 = vcombine.low %v3149_v2, %v3159_v56  ;;  %v3192_v38 = vrot.slane %v3191_v54, 4  ;;  %v3207_v25 = vsel %vm16963_vm13, %v3202_v57, %v3206_v3  ;;  %v14314_v23 = vcombine.low %v3569_v22, %v3572_v1  ;;  %v22408_v56 = vld [vmem:[#allocation7_spill] sm:$0xff]  ;;  %v22409_v54 = vld [vmem:[#allocation8_spill] sm:$0xff] }
 0x189   : > { %v3182_v8 = vrot.slane %v3180_v63, 5  ;;  %v3577_v39 = vrot.slane %v3575_v37, 4  ;;  %v3578_v52 = vrot.slane %v17704_v26, 5  ;;  %v14299_v31 = vrot.slane %v3504_v11, 9 }
 0x18a   : > { %v3197_v18 = vsel %vm16963_vm13, %v3192_v38, %v3196_v19  ;;  %v3584_v15 = vrot.slane %v3582_v16, 4  ;;  %v3585_v17 = vrot.slane %v17764_v59, 5  ;;  %v3576_v62 = vsel %vm17346_vm8, %v14298_v41, %v3575_v37  ;;  %v14379_v19 = vld [vmem:[%s22218_s1 + $0xe] sm:$0x3]  ;;  %v22412_v38 = vld [vmem:[#allocation10_spill] sm:$0xff] }
 0x18b   : > { %v3183_v48 = vsel %vm16963_vm13, %v3178_v5, %v3182_v8  ;;  %v14280_v27 = vcombine.low %v3197_v18, %v3207_v25  ;;  %v3579_v14 = vsel %vm17346_vm8, %v3577_v39, %v3578_v52  ;;  %v3583_v63 = vsel %vm17346_vm8, %v14299_v31, %v3582_v16  ;;  %v3514_v25 = vld [vmem:[#allocation2 + $0x9c] sm:$0xe]  ;;  %v22418_v16 = vld [vmem:[#allocation14_spill] sm:$0xff] }
 0x18c   : > { %v14279_v28 = vcombine.low %v3173_v9, %v3183_v48  ;;  %v3586_v26 = vsel %vm17346_vm8, %v3584_v15, %v3585_v17  ;;  %v14315_v59 = vcombine.low %v3576_v62, %v3579_v14  ;;  %v4136_v30 = vsel %vm1504_vm0, %v17940_v12, 0  ;;  %v3510_v48 = vld [vmem:[#allocation2 + $0x6c] sm:$0xe]  ;;  %v22423_v31 = vld [vmem:[#allocation17_spill] sm:$0xff]  ;;  %v22424_v15 = vld [vmem:[#allocation18_spill] sm:$0xff] }
 0x18d   : > { %v14316_v40 = vcombine.low %v3583_v63, %v3586_v26  ;;  %v3599_v21 = vrot.slane %v17837_v34, 5  ;;  %v3610_v12 = vrot.slane %v17862_v24, 5  ;;  %v3508_v34 = vld [vmem:[#allocation2 + $0x54] sm:$0xe]  ;;  %v3613_v2 = vrot.slane %v17915_v55, 5  ;;  %v22426_v17 = vld [vmem:[#allocation19_spill] sm:$0xff] }
 0x18e   : > { %v14303_v5 = vrot.slane %v3508_v34, 9  ;;  %v22410_v33 = vcombine.low %v22408_v56, %v22409_v54  ;;  %v3624_v9 = vrot.slane %v17929_v20, 5  ;;  %v14305_v10 = vrot.slane %v3510_v48, 9  ;;  %v22427_v62 = vld [vmem:[#allocation20_spill] sm:$0xff]  ;;  %v16713_v26 = vld [vmem:[#allocation2 + $0x18] sm:$0xff]  }
 0x18f   : > { %15687 = vmatmul.mubr.msk.bf16.gmra.mrb[20].mxu0 %vm1455_vm11, %v14276_v58  ;;  %v3596_v58 = vrot.slane %v17798_v29, 5  ;;  %v3612_v8 = vrot.slane %v3610_v12, 4  ;;  %v3627_v55 = vrot.slane %v17961_v61, 5  ;;  %v22416_v18 = vcombine.low %v22414_v4, %v22415_v60  ;;  %v16718_v34 = vld [vmem:[#allocation2 + $0x54] sm:$0xff]   ;;  %v4334_v54 = vld [vmem:[#allocation2 + $0x24] sm:$0xf] }
 0x190   : > { %15690 = vmatprep.mubr.msk.bf16.mxu0 %vm1455_vm11, %v14277_v6  ;;  %v3506_v6 = vld [vmem:[#allocation2 + $0x3c] sm:$0xe]  ;;  %v3611_v45 = vsel %vm17346_vm8, %v14303_v5, %v3610_v12  ;;  %v3625_v3 = vsel %vm17346_vm8, %v14305_v10, %v3624_v9  ;;  %v3652_v61 = vrot.slane %v17985_v47, 5  ;;  %v14309_v37 = vrot.slane %v3514_v25, 9  ;;  %v18183_v10 = vld [vmem:[#allocation2 + $0x70] sm:$0xf] }
 0x191   : > { %v14301_v7 = vrot.slane %v3506_v6, 9  ;;  %v3598_v43 = vrot.slane %v3596_v58, 4  ;;  %v3614_v24 = vsel %vm17346_vm8, %v3612_v8, %v3613_v2  ;;  %v3655_v1 = vrot.slane %v18007_v51, 5  ;;  %v16719_v8 = vld [vmem:[#allocation2 + $0x60] sm:$0xff]   ;;  %v18170_v2 = vld [vmem:[#allocation2 + $0x1c] sm:$0xf] }
 0x192   : > { %v14320_v53 = vcombine.low %v3611_v45, %v3614_v24  ;;  %v3654_v22 = vrot.slane %v3652_v61, 4  ;;  %v22419_v11 = vcombine.low %v22417_v13, %v22418_v16  ;;  %v3653_v39 = vsel %vm17346_vm8, %v14309_v37, %v3652_v61  ;;  %v16720_v25 = vld [vmem:[#allocation2 + $0x6c] sm:$0xff]   ;;  %v16721_v16 = vld [vmem:[#allocation2 + $0x78] sm:$0xff]  }
 0x193   : > { %v3597_v29 = vsel %vm17346_vm8, %v14301_v7, %v3596_v58  ;;  %v3600_v46 = vsel %vm17346_vm8, %v3598_v43, %v3599_v21  ;;  %v22425_v51 = vcombine.low %v22423_v31, %v22424_v15  ;;  %v22428_v14 = vcombine.low %v22426_v17, %v22427_v62  ;;  %v22430_v58 = vld [vmem:[#allocation21_spill] sm:$0xff]  ;;  %v18152_v7 = vld [vmem:[%s22218_s1 + $0x10] sm:$0x3]  ;;  %v5062_v21 = vld [vmem:[#allocation2 + $0x54] sm:$0xe] }
 0x194   : > { %v14318_v42 = vcombine.low %v3597_v29, %v3600_v46  ;;  %v3656_v47 = vsel %vm17346_vm8, %v3654_v22, %v3655_v1  ;;  %v22429_v63 = vcombine.low %v17866_v49, %v17872_v0  ;;  %v22431_v6 = vcombine.low %v17876_v50, %v22430_v58  ;;  %v16716_v49 = vld [vmem:[#allocation2 + $0x3c] sm:$0xff]   ;;  %v16717_v0 = vld [vmem:[#allocation2 + $0x48] sm:$0xff]   ;;  %v18159_v50 = vld [vmem:[#allocation2 + $0x58] sm:$0xf] }
 0x195   : > { %v14326_v52 = vcombine.low %v3653_v39, %v3656_v47  ;;  %v18161_v43 = vld [vmem:[#allocation2 + $0x5c] sm:$0x1]  ;;  %v14417_v46 = vrot.slane %v5062_v21, 9  ;;  %v4389_v48 = vshll.u32 %v18170_v2, 16  ;;  %v18204_v39 = vld [vmem:[#allocation2 + $0x20] sm:$0x1] }
 0x196   : > { %v5161_v29 = vrot.slane %v18161_v43, 5  ;;  %v18213_v62 = vld [vmem:[#allocation2 + $0x2c] sm:$0x1]  ;;  %v5066_v21 = vld [vmem:[#allocation2 + $0x84] sm:$0xe] }
 0x197   : > { %15691 = vmatmul.mubr.msk.bf16.gmra.mrb[24].mxu0 %vm1455_vm11, %v14278_v35  ;;  %v3626_v35 = vrot.slane %v3624_v9, 4  ;;  %v18178_v9 = vld [vmem:[#allocation2 + $0x28] sm:$0xf]  ;;  %v18192_v22 = vrot.slane %v4389_v48, 5 }
 0x198   : > { %15694 = vmatprep.mubr.msk.bf16.mxu0 %vm1455_vm11, %v14279_v28  ;;  %v22411_v28 = vld [vmem:[#allocation9_spill] sm:$0xff] }
 0x199   : > { %v22413_v57 = vcombine.low %v22411_v28, %v22412_v38  ;;  %v3628_v36 = vsel %vm17346_vm8, %v3626_v35, %v3627_v55  ;;  %v18185_v35 = vld [vmem:[#allocation2 + $0x74] sm:$0x1]  ;;  %v4404_v55 = vshrl.u32 %v4334_v54, 16  ;;  %v4407_v28 = vshll.u32 %v4334_v54, 16  ;;  %v5064_v38 = vld [vmem:[#allocation2 + $0x6c] sm:$0xe] }
 0x19a   : > { %v14322_v20 = vcombine.low %v3625_v3, %v3628_v36  ;;  %v5175_v3 = vrot.slane %v18185_v35, 5  ;;  %v4413_v36 = vshll.u32 %v18178_v9, 16  ;;  %v14419_v4 = vrot.slane %v5064_v38, 9  ;;  %v18229_v54 = vld [vmem:[#allocation2 + $0x40] sm:$0xf] }
 0x19c   : > { %v18206_v47 = vrot.slane %v4413_v36, 5 }
 0x19f   : > { %15695 = vmatmul.mubr.msk.bf16.gmra.mrb[28].mxu0 %vm1455_vm11, %v14280_v27  ;;  %v22420_v27 = vld [vmem:[#allocation15_spill] sm:$0xff] }
 0x1a0   : > { %15700 = vmatprep.mubr.msk.bf16.mxu0 %vm1455_vm11, %v14314_v23  ;;  %v22421_v23 = vld [vmem:[#allocation16_spill] sm:$0xff] }
 0x1a1   : > { %v22422_v41 = vcombine.low %v22420_v27, %v22421_v23  ;;  %v4409_v27 = vrot.slane %v4407_v28, 5  ;;  %v18198_v23 = vld [vmem:[#allocation2 + $0x34] sm:$0xf] }
 0x1a7   : > { %15701 = vmatmul.mubr.msk.bf16.vlgmr.msra.gmra.mrb[0].mxu0 %vm1455_vm11, %v14315_v59  ;;  %v16714_v59 = vld [vmem:[#allocation2 + $0x24] sm:$0xff]  }
 0x1a8   : > { %15733 = vmatpush3.bf16.msra.mxu0 %v4136_v30  ;;  %15704 = vmatprep.mubr.msk.bf16.mxu0 %vm1455_vm11, %v14316_v40  ;;  %v16715_v40 = vld [vmem:[#allocation2 + $0x30] sm:$0xff]   ;;  %v4862_v30 = vsel %vm1504_vm0, %v14379_v19, 0 }
 0x1a9   : > { %16672 = vmatprep.subr.msk.bf16.mxu0 %vm1504_vm0, %v14379_v19  ;;  %v5158_v19 = vrot.slane %v18159_v50, 5 }
 0x1ab   : > { %v5160_v12 = vrot.slane %v5158_v19, 4  ;;  %v18168_v5 = vsel %vm17346_vm8, %v14417_v46, %v5158_v19 }
 0x1ac   : > { %22432 = vst [vmem:[#allocation7_spill] sm:$0xff] %v18168_v5 }
 0x1ad   : > { %v18174_v56 = vsel %vm17346_vm8, %v5160_v12, %v5161_v29  ;;  %v4423_v12 = vshll.u32 %v18213_v62, 16 }
 0x1ae   : > { %22433 = vst [vmem:[#allocation8_spill] sm:$0xff] %v18174_v56  ;;  %v16806_v56 = vld [vmem:[#allocation2 + $0xbc] sm:$0x1] }
 0x1af   : > { %15705 = vmatmul.mubr.msk.bf16.gmra.mrb[4].mxu0 %vm1455_vm11, %v22410_v33  ;;  %v1401_v5 = vshll.u32 %v16806_v56, 16 }
 0x1b0   : > { %15708 = vmatprep.mubr.msk.bf16.mxu0 %vm1455_vm11, %v14318_v42  ;;  %v4331_v42 = vld [vmem:[#allocation2 + $0x18] sm:$0xf] }
 0x1b1   : > { %v4380_v45 = vshrl.u32 %v4331_v42, 16  ;;  %v4383_v24 = vshll.u32 %v4331_v42, 16  ;;  %v14421_v42 = vrot.slane %v5066_v21, 9 }
 0x1b3   : > { %v4382_v60 = vrot.slane %v4380_v45, 4  ;;  %v4385_v37 = vrot.slane %v4383_v24, 5 }
 0x1b7   : > { %15709 = vmatmul.mubr.msk.bf16.gmra.mrb[8].mxu0 %vm1455_vm11, %v22413_v57  ;;  %v5172_v57 = vrot.slane %v18183_v10, 5 }
 0x1b8   : > { %15712 = vmatprep.mubr.msk.bf16.mxu0 %vm1455_vm11, %v14320_v53  ;;  %v4393_v53 = vshrl.u32 %v18170_v2, 16 }
 0x1b9   : > { %v5174_v61 = vrot.slane %v5172_v57, 4  ;;  %v18196_v13 = vsel %vm17346_vm8, %v14419_v4, %v5172_v57 }
 0x1ba   : > { %v4395_v1 = vrot.slane %v4393_v53, 4  ;;  %22434 = vst [vmem:[#allocation9_spill] sm:$0xff] %v18196_v13  ;;  %v16722_v53 = vld [vmem:[#allocation2 + $0x84] sm:$0xff]  }
 0x1bc   : > { %v4396_v58 = vor.u32 %v4395_v1, %v18192_v22  ;;  %v16804_v1 = vld [vmem:[#allocation2 + $0xac] sm:$0xf] }
 0x1bd   : > { %v1367_v15 = vshll.u32 %v16804_v1, 16 }
 0x1be   : > { %v4397_v36 = vrot.slane %v4396_v58, 4  ;;  %v18253_v58 = vld [vmem:[#allocation2 + $0xa0] sm:$0xf] }
 0x1bf   : > { %15713 = vmatmul.mubr.msk.bf16.gmra.mrb[12].mxu0 %vm1455_vm11, %v22416_v18  ;;  %v4337_v18 = vld [vmem:[#allocation2 + $0x30] sm:$0xf]  ;;  %v5200_v21 = vrot.slane %v18253_v58, 5 }
 0x1c0   : > { %15716 = vmatprep.mubr.msk.bf16.mxu0 %vm1455_vm11, %v14322_v20  ;;  %v4417_v20 = vshrl.u32 %v18178_v9, 16  ;;  %v4428_v31 = vshrl.u32 %v4337_v18, 16 }
 0x1c7   : > { %15717 = vmatmul.mubr.msk.bf16.gmra.mrb[16].mxu0 %vm1455_vm11, %v22419_v11  ;;  %v4406_v11 = vrot.slane %v4404_v55, 4 }
 0x1c8   : > { %15720 = vmatprep.mubr.msk.bf16.mxu0 %vm1455_vm11, %v22422_v41  ;;  %v18202_v41 = vsel %vm17346_vm8, %v5174_v61, %v5175_v3  ;;  %v16723_v3 = vld [vmem:[#allocation2 + $0x90] sm:$0xff]  }
 0x1c9   : > { %22435 = vst [vmem:[#allocation10_spill] sm:$0xff] %v18202_v41 }
 0x1cf   : > { %15721 = vmatmul.mubr.msk.bf16.gmra.mrb[20].mxu0 %vm1455_vm11, %v22425_v51  ;;  %v18210_v51 = vld [vmem:[#allocation2 + $0xb4] sm:$0xf] }
 0x1d0   : > { %15724 = vmatprep.mubr.msk.bf16.mxu0 %vm1455_vm11, %v14326_v52  ;;  %v4419_v52 = vrot.slane %v4417_v20, 4  ;;  %v1382_v17 = vshrl.u32 %v18210_v51, 16 }
 0x1d2   : > { %v4420_v46 = vor.u32 %v4419_v52, %v18206_v47 }
 0x1d4   : > { %v4421_v61 = vrot.slane %v4420_v46, 4 }
 0x1d7   : > { %15725 = vmatmul.mubr.msk.bf16.gmra.mrb[24].mxu0 %vm1455_vm11, %v22428_v14  ;;  %v4431_v14 = vshll.u32 %v4337_v18, 16 }
 0x1d8   : > { %15728 = vmatprep.mubr.msk.bf16.mxu0 %vm1455_vm11, %v22429_v63  ;;  %v4340_v63 = vld [vmem:[#allocation2 + $0x3c] sm:$0xf] }
 0x1d9   : > { %v4452_v45 = vshrl.u32 %v4340_v63, 16  ;;  %v4455_v24 = vshll.u32 %v4340_v63, 16 }
 0x1db   : > { %v4454_v52 = vrot.slane %v4452_v45, 4  ;;  %v4343_v45 = vld [vmem:[#allocation2 + $0x48] sm:$0xf] }
 0x1df   : > { %15729 = vmatmul.mubr.msk.bf16.gmra.mrb[28].mxu0 %vm1455_vm11, %v22431_v6  ;;  %v4437_v6 = vshll.u32 %v18198_v23, 16 }
 0x1e0   : > { %15734 = vmatprep.mubr.msk.bf16.mxu0 %vm1455_vm11, %v16713_v26  ;;  %v4386_v26 = vor.u32 %v4385_v37, %v4382_v60  ;;  %v18237_v60 = vld [vmem:[#allocation2 + $0x38] sm:$0x1]  ;;  %v4461_v37 = vshll.u32 %v18229_v54, 16 }
 0x1e1   : > { %v18231_v28 = vrot.slane %v4437_v6, 5  ;;  %v4447_v63 = vshll.u32 %v18237_v60, 16  ;;  %v18255_v6 = vld [vmem:[#allocation2 + $0xa4] sm:$0x1] }
 0x1e2   : > { %v4387_v55 = vrot.slane %v4386_v26, 4  ;;  %v4465_v26 = vshrl.u32 %v18229_v54, 16 }
 0x1e7   : > { %15735 = vmatmul.mubr.msk.bf16.vlgmr.msra.gmra.mrb[0].mxu0 %vm1455_vm11, %v16714_v59  ;;  %v4441_v59 = vshrl.u32 %v18198_v23, 16 }
 0x1e8   : > { %15767 = vmatpush3.bf16.msra.mxu0 %v4862_v30  ;;  %15738 = vmatprep.mubr.msk.bf16.mxu0 %vm1455_vm11, %v16715_v40  ;;  %v18219_v40 = vld [vmem:[#allocation2 + $0x88] sm:$0xf]  ;;  %v18221_v30 = vld [vmem:[#allocation2 + $0x8c] sm:$0x1] }
 0x1e9   : > { %16673 = vmatprep.subr.msk.bf16.mxu0 %vm1504_vm0, %v18152_v7  ;;  %v5186_v19 = vrot.slane %v18219_v40, 5  ;;  %v5189_v29 = vrot.slane %v18221_v30, 5  ;;  %v4443_v38 = vrot.slane %v4441_v59, 4  ;;  %v4392_v59 = vsel %vm16963_vm13, %v4387_v55, %v18192_v22 }
 0x1ea   : > { %v18277_v55 = vrot.slane %v4447_v63, 5 }
 0x1eb   : > { %v5188_v48 = vrot.slane %v5186_v19, 4  ;;  %v18235_v57 = vsel %vm17346_vm8, %v14421_v42, %v5186_v19  ;;  %v5203_v19 = vrot.slane %v18255_v6, 5 }
 0x1ec   : > { %22436 = vst [vmem:[#allocation11_spill] sm:$0xff] %v18235_v57  ;;  %v1369_v57 = vrot.slane %v1367_v15, 5 }
 0x1ed   : > { %v18241_v18 = vsel %vm17346_vm8, %v5188_v48, %v5189_v29  ;;  %v16724_v48 = vld [vmem:[#allocation2 + $0x9c] sm:$0xff]  }
 0x1ee   : > { %22437 = vst [vmem:[#allocation12_spill] sm:$0xff] %v18241_v18 }
 0x1ef   : > { %15739 = vmatmul.mubr.msk.bf16.gmra.mrb[4].mxu0 %vm1455_vm11, %v16716_v49  ;;  %v4399_v49 = vshll.u32 %v18204_v39, 16 }
 0x1f0   : > { %15742 = vmatprep.mubr.msk.bf16.mxu0 %vm1455_vm11, %v16717_v0  ;;  %v4410_v0 = vor.u32 %v4409_v27, %v4406_v11  ;;  %v18247_v27 = vld [vmem:[#allocation2 + $0x44] sm:$0x1] }
 0x1f1   : > { %v4401_v20 = vrot.slane %v4399_v49, 5  ;;  %22438 = vst [vmem:[#allocation13_spill] sm:$0xff] %v18247_v27 }
 0x1f2   : > { %v4411_v4 = vrot.slane %v4410_v0, 4  ;;  %v5068_v0 = vld [vmem:[#allocation2 + $0x9c] sm:$0xe] }
 0x1f3   : > { %v4402_v49 = vsel %vm16963_vm13, %v4397_v36, %v4401_v20  ;;  %v16802_v20 = vld [vmem:[#allocation2 + $0xb8] sm:$0xf] }
 0x1f4   : > { %v4416_v29 = vsel %vm16963_vm13, %v4411_v4, %v18206_v47  ;;  %v1395_v4 = vshrl.u32 %v16802_v20, 16 }
 0x1f7   : > { %15743 = vmatmul.mubr.msk.bf16.gmra.mrb[8].mxu0 %vm1455_vm11, %v16718_v34  ;;  %v4430_v34 = vrot.slane %v4428_v31, 4  ;;  %v4457_v31 = vrot.slane %v4455_v24, 5  ;;  %v5202_v24 = vrot.slane %v5200_v21, 4 }
 0x1f8   : > { %15746 = vmatprep.mubr.msk.bf16.mxu0 %vm1455_vm11, %v16719_v8  ;;  %v4433_v8 = vrot.slane %v4431_v14, 5  ;;  %v4444_v14 = vor.u32 %v4443_v38, %v18231_v28  ;;  %v4467_v38 = vrot.slane %v4465_v26, 4  ;;  %v4479_v26 = vshll.u32 %v4343_v45, 16 }
 0x1f9   : > { %v4458_v22 = vor.u32 %v4457_v31, %v4454_v52  ;;  %v4476_v31 = vshrl.u32 %v4343_v45, 16  ;;  %v16803_v45 = vld [vmem:[#allocation2 + $0xa8] sm:$0xf] }
 0x1fa   : > { %v4434_v11 = vor.u32 %v4433_v8, %v4430_v34  ;;  %v14423_v34 = vrot.slane %v5068_v0, 9  ;;  %v4471_v8 = vshll.u32 %v18247_v27, 16  ;;  %v18327_v33 = vrot.slane %v4479_v26, 5 }
 0x1fc   : > { %v18272_v42 = vrot.slane %v4434_v11, 4  ;;  %v18281_v47 = vsel %vm17346_vm8, %v14423_v34, %v5200_v21  ;;  %v18293_v11 = vcombine.low %v4392_v59, %v4402_v49  ;;  %v18307_v63 = vrot.slane %v4471_v8, 5  ;;  %v5070_v34 = vld [vmem:[#allocation2 + $0xb4] sm:$0xe] }
 0x1fd   : > { %22439 = vst [vmem:[#allocation14_spill] sm:$0xff] %v18281_v47 }
 0x1ff   : > { %15747 = vmatmul.mubr.msk.bf16.gmra.mrb[12].mxu0 %vm1455_vm11, %v16720_v25  ;;  %v4425_v25 = vrot.slane %v4423_v12, 5  ;;  %v18270_v12 = vrot.slane %v4461_v37, 5  ;;  %v18291_v37 = vsel %vm17346_vm8, %v5202_v24, %v5203_v19  ;;  %v18317_v19 = vld [vmem:[#allocation2 + $0xb8] sm:$0xf]  ;;  %v1358_v24 = vshrl.u32 %v16803_v45, 16 }
 0x200   : > { %15750 = vmatprep.mubr.msk.bf16.mxu0 %vm1455_vm11, %v16721_v16  ;;  %v1385_v16 = vshll.u32 %v18210_v51, 16  ;;  %22440 = vst [vmem:[#allocation15_spill] sm:$0xff] %v18291_v37  ;;  %v1361_v51 = vshll.u32 %v16803_v45, 16  ;;  %v16726_v37 = vld [vmem:[#allocation2 + $0xb4] sm:$0xff]   ;;  %v16805_v45 = vld [vmem:[#allocation2 + $0xb0] sm:$0x1] }
 0x201   : > { %v4426_v46 = vsel %vm16963_vm13, %v4421_v61, %v4425_v25  ;;  %v16725_v61 = vld [vmem:[#allocation2 + $0xa8] sm:$0xff]   ;;  %v4468_v49 = vor.u32 %v4467_v38, %v18270_v12  ;;  %v14425_v38 = vrot.slane %v5070_v34, 9  ;;  %v1360_v59 = vrot.slane %v1358_v24, 4 }
 0x202   : > { %v1387_v36 = vrot.slane %v1385_v16, 5  ;;  %v18287_v25 = vld [vmem:[#allocation2 + $0x4c] sm:$0xf]  ;;  %v18295_v52 = vcombine.low %v4416_v29, %v4426_v46  ;;  %v18305_v16 = vrot.slane %v4458_v22, 4  ;;  %v18319_v29 = vld [vmem:[#allocation2 + $0xbc] sm:$0x1] }
 0x203   : > { %v4485_v0 = vshll.u32 %v18287_v25, 16  ;;  %v4489_v21 = vshrl.u32 %v18287_v25, 16  ;;  %v5214_v22 = vrot.slane %v18317_v19, 5  ;;  %v5217_v8 = vrot.slane %v18319_v29, 5 }
 0x204   : > { %v18329_v46 = vrot.slane %v4468_v49, 4  ;;  %v1363_v18 = vrot.slane %v1361_v51, 5  ;;  %v1377_v24 = vshll.u32 %v16805_v45, 16  ;;  %v1391_v51 = vshll.u32 %v16802_v20, 16  ;;  %v5072_v20 = vld [vmem:[#allocation2 + $0xcc] sm:$0xe] }
 0x205   : > { %v18333_v47 = vsel %vm17346_vm8, %v14425_v38, %v5214_v22  ;;  %v18335_v41 = vrot.slane %v4485_v0, 5  ;;  %v1397_v0 = vrot.slane %v1395_v4, 4  ;;  %v4513_v4 = vshrl.u32 %v18159_v50, 16 }
 0x206   : > { %22441 = vst [vmem:[#allocation16_spill] sm:$0xff] %v18333_v47  ;;  %v1364_v13 = vor.u32 %v1363_v18, %v1360_v59  ;;  %v1379_v38 = vrot.slane %v1377_v24, 5  ;;  %v1393_v45 = vrot.slane %v1391_v51, 5  ;;  %v18352_v59 = vld [vmem:[#allocation2 + $0xd0] sm:$0xf] }
 0x207   : > { %15751 = vmatmul.mubr.msk.bf16.gmra.mrb[16].mxu0 %vm1455_vm11, %v16722_v53  ;;  %v18275_v53 = vrot.slane %v4444_v14, 4  ;;  %v18297_v14 = vld [vmem:[#allocation2 + $0x54] sm:$0xf]  ;;  %v5228_v51 = vrot.slane %v18352_v59, 5 }
 0x208   : > { %15754 = vmatprep.mubr.msk.bf16.mxu0 %vm1455_vm11, %v16723_v3  ;;  %v18285_v3 = vrot.slane %v1382_v17, 4  ;;  %v5216_v17 = vrot.slane %v5214_v22, 4  ;;  %v4503_v18 = vshll.u32 %v18297_v14, 16 }
 0x20a   : > { %v18339_v34 = vsel %vm17346_vm8, %v5216_v17, %v5217_v8  ;;  %v1388_v22 = vor.u32 %v1387_v36, %v18285_v3  ;;  %v4491_v17 = vrot.slane %v4489_v21, 4  ;;  %v1365_v8 = vrot.slane %v1364_v13, 4 }
 0x20b   : > { %22442 = vst [vmem:[#allocation17_spill] sm:$0xff] %v18339_v34  ;;  %v4509_v3 = vshll.u32 %v18159_v50, 16  ;;  %v1398_v13 = vor.u32 %v1397_v0, %v1393_v45  ;;  %v16728_v50 = vld [vmem:[#allocation2 + $0xcc] sm:$0xff]  }
 0x20c   : > { %v1370_v56 = vsel %vm16963_vm13, %v1365_v8, %v1369_v57 }
 0x20f   : > { %15755 = vmatmul.mubr.msk.bf16.gmra.mrb[20].mxu0 %vm1455_vm11, %v16724_v48  ;;  %v18325_v48 = vrot.slane %v4476_v31, 4  ;;  %v16727_v31 = vld [vmem:[#allocation2 + $0xc0] sm:$0xff]  }
 0x210   : > { %15758 = vmatprep.mubr.msk.bf16.mxu0 %vm1455_vm11, %v16725_v61  ;;  %v1371_v61 = vshrl.u32 %v16804_v1, 16  ;;  %v18341_v1 = vld [vmem:[#allocation2 + $0x50] sm:$0x1] }
 0x211   : > { %v4495_v27 = vshll.u32 %v18341_v1, 16  ;;  %v4482_v21 = vor.u32 %v18327_v33, %v18325_v48  ;;  %v4492_v33 = vor.u32 %v4491_v17, %v18335_v41  ;;  %v22443_v48 = vshrl.u32 %v18297_v14, 16 }
 0x212   : > { %v1373_v26 = vrot.slane %v1371_v61, 4  ;;  %v1389_v61 = vrot.slane %v1388_v22, 4  ;;  %v14427_v22 = vrot.slane %v5072_v20, 9  ;;  %v4505_v20 = vrot.slane %v4503_v18, 5 }
 0x213   : > { %v4502_v8 = vrot.slane %v22443_v48, 4  ;;  %v5332_v18 = vsel %vm1504_vm0, %v18152_v7, 0 }
 0x214   : > { %v1374_v15 = vor.u32 %v1373_v26, %v1369_v57  ;;  %v18358_v26 = vld [vmem:[#allocation2 + $0xd4] sm:$0x1]  ;;  %v1394_v57 = vsel %vm16963_vm13, %v1389_v61, %v1393_v45 }
 0x215   : > { %v5231_v0 = vrot.slane %v18358_v26, 5 }
 0x216   : > { %v1375_v36 = vrot.slane %v1374_v15, 4  ;;  %v18363_v15 = vld [vmem:[#allocation2 + $0x64] sm:$0xf] }
 0x217   : > { %15759 = vmatmul.mubr.msk.bf16.gmra.mrb[24].mxu0 %vm1455_vm11, %v16726_v37  ;;  %v1403_v37 = vrot.slane %v1401_v5, 5  ;;  %v1399_v5 = vrot.slane %v1398_v13, 4  ;;  %v4533_v45 = vshll.u32 %v18363_v15, 16  ;;  %v4537_v17 = vshrl.u32 %v18363_v15, 16 }
 0x218   : > { %15762 = vmatprep.mubr.msk.bf16.mxu0 %vm1455_vm11, %v16727_v31  ;;  %v4349_v31 = vld [vmem:[#allocation2 + $0x60] sm:$0xf]  ;;  %v1380_v24 = vsel %vm16963_vm13, %v1375_v36, %v1379_v38  ;;  %v18373_v38 = vsel %vm17346_vm8, %v14427_v22, %v5228_v51  ;;  %v5230_v36 = vrot.slane %v5228_v51, 4  ;;  %v18387_v13 = vrot.slane %v4509_v3, 5  ;;  %v18411_v22 = vld [vmem:[#allocation2 + $0x68] sm:$0x1] }
 0x219   : > { %v14132_v49 = vcombine.low %v1370_v56, %v1380_v24  ;;  %v4524_v34 = vshrl.u32 %v4349_v31, 16  ;;  %v4527_v47 = vshll.u32 %v4349_v31, 16  ;;  %v1404_v61 = vsel %vm16963_vm13, %v1399_v5, %v1403_v37 }
 0x21a   : > { %v14133_v56 = vcombine.low %v1394_v57, %v1404_v61  ;;  %v18382_v14 = vsel %vm17346_vm8, %v5230_v36, %v5231_v0  ;;  %v22444_v31 = vsel %vm16963_vm13, %v18275_v53, %v18277_v55  ;;  %v22445_v24 = vsel %vm16963_vm13, %v18272_v42, %v18231_v28  ;;  %v4352_v53 = vld [vmem:[#allocation2 + $0x6c] sm:$0xf]  ;;  %v18417_v0 = vld [vmem:[#allocation2 + $0x7c] sm:$0xf] }
 0x21b   : > { %15558 = vmatprep.mubr.msk.bf16.mxu1 %vm1455_vm11, %v14132_v49  ;;  %v4515_v49 = vrot.slane %v4513_v4, 4  ;;  %v14444_v37 = vcombine.low %v18373_v38, %v18382_v14  ;;  %v14382_v7 = vcombine.low %v22445_v24, %v22444_v31  ;;  %v4464_v3 = vsel %vm16963_vm13, %v18305_v16, %v18270_v12 }
 0x21c   : > { %v4497_v4 = vrot.slane %v4495_v27, 5  ;;  %15559 = vmatmul.mubr.msk.bf16.vlgmr.msra.gmra.mrb[0].mxu1 %vm1455_vm11, %v14133_v56  ;;  %v4483_v55 = vrot.slane %v4482_v21, 4  ;;  %v4493_v51 = vrot.slane %v4492_v33, 4  ;;  %v4506_v28 = vor.u32 %v4505_v20, %v4502_v8 }
 0x21d   : > { %v4519_v42 = vshll.u32 %v18161_v43, 16  ;;  %v4526_v57 = vrot.slane %v4524_v34, 4  ;;  %v4529_v5 = vrot.slane %v4527_v47, 5  ;;  %v18415_v12 = vrot.slane %v4533_v45, 5 }
 0x21e   : > { %v4539_v16 = vrot.slane %v4537_v17, 4  ;;  %v4516_v27 = vor.u32 %v4515_v49, %v18387_v13  ;;  %v4551_v48 = vshll.u32 %v4352_v53, 16  ;;  %v4557_v21 = vshll.u32 %v18183_v10, 16  ;;  %v4358_v49 = vld [vmem:[#allocation2 + $0x84] sm:$0xf] }
 0x21f   : > { %15763 = vmatmul.mubr.msk.bf16.gmra.mrb[28].mxu0 %vm1455_vm11, %v16728_v50  ;;  %v4355_v50 = vld [vmem:[#allocation2 + $0x78] sm:$0xf]  ;;  %v4561_v33 = vshrl.u32 %v18183_v10, 16  ;;  %v4488_v47 = vsel %vm16963_vm13, %v4483_v55, %v18335_v41  ;;  %v4498_v34 = vsel %vm16963_vm13, %v4493_v51, %v4497_v4  ;;  %v4581_v36 = vshll.u32 %v18417_v0, 16 }
 0x220   : > { %15768 = vmatprep.mubr.msk.bf16.mxu0 %vm1455_vm11, %v18293_v11  ;;  %v4474_v11 = vsel %vm16963_vm13, %v18329_v46, %v18307_v63  ;;  %v4543_v63 = vshll.u32 %v18411_v22, 16  ;;  %v4548_v46 = vshrl.u32 %v4352_v53, 16  ;;  %v4572_v8 = vshrl.u32 %v4355_v50, 16 }
 0x221   : > { %v4575_v43 = vshll.u32 %v4355_v50, 16  ;;  %v4585_v20 = vshrl.u32 %v18417_v0, 16  ;;  %v4507_v61 = vrot.slane %v4506_v28, 4  ;;  %v4521_v45 = vrot.slane %v4519_v42, 5  ;;  %v18436_v28 = vld [vmem:[#allocation2 + $0x80] sm:$0x1] }
 0x222   : > { %v4530_v17 = vor.u32 %v4529_v5, %v4526_v57  ;;  %v4540_v56 = vor.u32 %v4539_v16, %v18415_v12  ;;  %v4517_v10 = vrot.slane %v4516_v27, 4  ;;  %v4545_v31 = vrot.slane %v4543_v63, 5 }
 0x223   : > { %v4550_v24 = vrot.slane %v4548_v46, 4  ;;  %v4553_v41 = vrot.slane %v4551_v48, 5  ;;  %v18434_v4 = vrot.slane %v4557_v21, 5  ;;  %v4563_v53 = vrot.slane %v4561_v33, 4 }
 0x224   : > { %v4574_v55 = vrot.slane %v4572_v8, 4  ;;  %v4577_v51 = vrot.slane %v4575_v43, 5  ;;  %v18438_v42 = vrot.slane %v4581_v36, 5  ;;  %v4587_v50 = vrot.slane %v4585_v20, 4  ;;  %v4361_v36 = vld [vmem:[#allocation2 + $0x90] sm:$0xf] }
 0x225   : > { %v4596_v57 = vshrl.u32 %v4358_v49, 16  ;;  %v4599_v5 = vshll.u32 %v4358_v49, 16  ;;  %v4541_v16 = vrot.slane %v4540_v56, 4  ;;  %v4605_v27 = vshll.u32 %v18219_v40, 16  ;;  %v18450_v20 = vld [vmem:[#allocation2 + $0x94] sm:$0xf] }
 0x226   : > { %v14383_v63 = vcombine.low %v4464_v3, %v4474_v11  ;;  %v4512_v46 = vsel %vm16963_vm13, %v4507_v61, %v18387_v13  ;;  %v4522_v48 = vsel %vm16963_vm13, %v4517_v10, %v4521_v45  ;;  %v4554_v21 = vor.u32 %v4553_v41, %v4550_v24 }
 0x227   : > { %15769 = vmatmul.mubr.msk.bf16.vlgmr.msra.gmra.mrb[0].mxu0 %vm1455_vm11, %v18295_v52  ;;  %v4531_v52 = vrot.slane %v4530_v17, 4  ;;  %v4564_v33 = vor.u32 %v4563_v53, %v18434_v4  ;;  %v4567_v8 = vshll.u32 %v18185_v35, 16  ;;  %v4591_v43 = vshll.u32 %v18436_v28, 16 }
 0x228   : > { %15801 = vmatpush3.bf16.msra.mxu0 %v5332_v18  ;;  %15772 = vmatprep.mubr.msk.bf16.mxu0 %vm1455_vm11, %v14382_v7  ;;  %v4609_v18 = vshrl.u32 %v18219_v40, 16  ;;  %v14384_v7 = vcombine.low %v4488_v47, %v4498_v34  ;;  %v4578_v40 = vor.u32 %v4577_v51, %v4574_v55  ;;  %v4588_v3 = vor.u32 %v4587_v50, %v18438_v42  ;;  %v4364_v50 = vld [vmem:[#allocation2 + $0x9c] sm:$0xf] }
 0x229   : > { %v4598_v11 = vrot.slane %v4596_v57, 4  ;;  %v4601_v47 = vrot.slane %v4599_v5, 5  ;;  %v4536_v13 = vsel %vm16963_vm13, %v4531_v52, %v18415_v12  ;;  %v4546_v34 = vsel %vm16963_vm13, %v4541_v16, %v4545_v31  ;;  %v18466_v16 = vld [vmem:[#allocation2 + $0x98] sm:$0x1] }
 0x22a   : > { %v18458_v61 = vrot.slane %v4605_v27, 5  ;;  %v4611_v35 = vrot.slane %v4609_v18, 4  ;;  %v4620_v45 = vshrl.u32 %v4361_v36, 16  ;;  %v4623_v17 = vshll.u32 %v4361_v36, 16 }
 0x22b   : > { %v4629_v56 = vshll.u32 %v18450_v20, 16  ;;  %v4633_v49 = vshrl.u32 %v18450_v20, 16  ;;  %v4555_v10 = vrot.slane %v4554_v21, 4  ;;  %v4565_v24 = vrot.slane %v4564_v33, 4 }
 0x22c   : > { %v4569_v41 = vrot.slane %v4567_v8, 5  ;;  %v4593_v12 = vrot.slane %v4591_v43, 5  ;;  %v4579_v53 = vrot.slane %v4578_v40, 4  ;;  %v4589_v55 = vrot.slane %v4588_v3, 4 }
 0x22d   : > { %v4602_v31 = vor.u32 %v4601_v47, %v4598_v11  ;;  %v4615_v51 = vshll.u32 %v18221_v30, 16  ;;  %v14385_v57 = vcombine.low %v4512_v46, %v4522_v48  ;;  %v14386_v5 = vcombine.low %v4536_v13, %v4546_v34  ;;  %v4367_v46 = vld [vmem:[#allocation2 + $0xa8] sm:$0xf]  ;;  %v18475_v48 = vld [vmem:[#allocation2 + $0xac] sm:$0xf] }
 0x22e   : > { %v4612_v52 = vor.u32 %v4611_v35, %v18458_v61  ;;  %v4622_v27 = vrot.slane %v4620_v45, 4  ;;  %v4625_v18 = vrot.slane %v4623_v17, 5  ;;  %v4560_v21 = vsel %vm16963_vm13, %v4555_v10, %v18434_v4 }
 0x22f   : > { %15773 = vmatmul.mubr.msk.bf16.gmra.mrb[4].mxu0 %vm1455_vm11, %v14383_v63  ;;  %v18468_v63 = vrot.slane %v4629_v56, 5  ;;  %v4570_v33 = vsel %vm16963_vm13, %v4565_v24, %v4569_v41  ;;  %v4644_v30 = vshrl.u32 %v4364_v50, 16  ;;  %v4647_v8 = vshll.u32 %v4364_v50, 16 }
 0x230   : > { %15776 = vmatprep.mubr.msk.bf16.mxu0 %vm1455_vm11, %v14384_v7  ;;  %v4635_v7 = vrot.slane %v4633_v49, 4  ;;  %v4584_v43 = vsel %vm16963_vm13, %v4579_v53, %v18438_v42  ;;  %v4594_v36 = vsel %vm16963_vm13, %v4589_v55, %v4593_v12  ;;  %v4603_v40 = vrot.slane %v4602_v31, 4 }
 0x231   : > { %v4617_v3 = vrot.slane %v4615_v51, 5  ;;  %v4613_v11 = vrot.slane %v4612_v52, 4  ;;  %v4639_v4 = vshll.u32 %v18466_v16, 16  ;;  %v4653_v47 = vshll.u32 %v18253_v58, 16  ;;  %v18497_v51 = vld [vmem:[#allocation2 + $0xb0] sm:$0x1] }
 0x232   : > { %v4657_v13 = vshrl.u32 %v18253_v58, 16  ;;  %v4668_v34 = vshrl.u32 %v4367_v46, 16  ;;  %v4671_v35 = vshll.u32 %v4367_v46, 16  ;;  %v4677_v45 = vshll.u32 %v18475_v48, 16 }
 0x233   : > { %v4681_v42 = vshrl.u32 %v18475_v48, 16  ;;  %v4626_v17 = vor.u32 %v4625_v18, %v4622_v27  ;;  %v4636_v56 = vor.u32 %v4635_v7, %v18468_v63  ;;  %v4646_v49 = vrot.slane %v4644_v30, 4  ;;  %v4370_v27 = vld [vmem:[#allocation2 + $0xb4] sm:$0xf] }
 0x234   : > { %v4649_v10 = vrot.slane %v4647_v8, 5  ;;  %v14387_v24 = vcombine.low %v4560_v21, %v4570_v33  ;;  %v14388_v41 = vcombine.low %v4584_v43, %v4594_v36  ;;  %v4608_v58 = vsel %vm16963_vm13, %v4603_v40, %v18458_v61  ;;  %v4373_v36 = vld [vmem:[#allocation2 + $0xc0] sm:$0xf]  ;;  %v18502_v40 = vld [vmem:[#allocation2 + $0xc4] sm:$0xf] }
 0x235   : > { %v4618_v12 = vsel %vm16963_vm13, %v4613_v11, %v4617_v3  ;;  %v4641_v53 = vrot.slane %v4639_v4, 5  ;;  %v18495_v55 = vrot.slane %v4653_v47, 5  ;;  %v4659_v31 = vrot.slane %v4657_v13, 4 }
 0x236   : > { %v4670_v50 = vrot.slane %v4668_v34, 4  ;;  %v4683_v52 = vrot.slane %v4681_v42, 4  ;;  %v4627_v18 = vrot.slane %v4626_v17, 4  ;;  %v4637_v7 = vrot.slane %v4636_v56, 4 }
 0x237   : > { %15777 = vmatmul.mubr.msk.bf16.gmra.mrb[8].mxu0 %vm1455_vm11, %v14385_v57  ;;  %v4673_v57 = vrot.slane %v4671_v35, 5  ;;  %v4650_v21 = vor.u32 %v4649_v10, %v4646_v49  ;;  %v4663_v33 = vshll.u32 %v18255_v6, 16  ;;  %v4687_v61 = vshll.u32 %v18497_v51, 16 }
 0x238   : > { %15780 = vmatprep.mubr.msk.bf16.mxu0 %vm1455_vm11, %v14386_v5  ;;  %v4679_v5 = vrot.slane %v4677_v45, 5  ;;  %v14389_v30 = vcombine.low %v4608_v58, %v4618_v12  ;;  %v4660_v8 = vor.u32 %v4659_v31, %v18495_v55  ;;  %v4692_v46 = vshrl.u32 %v4370_v27, 16 }
 0x239   : > { %v4695_v43 = vshll.u32 %v4370_v27, 16  ;;  %v4674_v3 = vor.u32 %v4673_v57, %v4670_v50  ;;  %v4701_v4 = vshll.u32 %v18317_v19, 16  ;;  %v4705_v47 = vshrl.u32 %v18317_v19, 16  ;;  %v4376_v27 = vld [vmem:[#allocation2 + $0xcc] sm:$0xf] }
 0x23a   : > { %v4684_v11 = vor.u32 %v4683_v52, %v4679_v5  ;;  %v4632_v6 = vsel %vm16963_vm13, %v4627_v18, %v18468_v63  ;;  %v4642_v13 = vsel %vm16963_vm13, %v4637_v7, %v4641_v53  ;;  %v4651_v34 = vrot.slane %v4650_v21, 4 }
 0x23b   : > { %v4665_v35 = vrot.slane %v4663_v33, 5  ;;  %v4716_v45 = vshrl.u32 %v4373_v36, 16  ;;  %v4719_v42 = vshll.u32 %v4373_v36, 16  ;;  %v4725_v17 = vshll.u32 %v18502_v40, 16  ;;  %v18520_v33 = vld [vmem:[#allocation2 + $0xc8] sm:$0x1] }
 0x23c   : > { %v4729_v56 = vshrl.u32 %v18502_v40, 16  ;;  %v4661_v49 = vrot.slane %v4660_v8, 4  ;;  %v4689_v10 = vrot.slane %v4687_v61, 5  ;;  %v4694_v19 = vrot.slane %v4692_v46, 4 }
 0x23d   : > { %v4685_v58 = vrot.slane %v4684_v11, 4  ;;  %v4703_v12 = vrot.slane %v4701_v4, 5  ;;  %v4707_v31 = vrot.slane %v4705_v47, 4  ;;  %v14390_v63 = vcombine.low %v4632_v6, %v4642_v13 }
 0x23e   : > { %v4718_v50 = vrot.slane %v4716_v45, 4  ;;  %v4721_v57 = vrot.slane %v4719_v42, 5  ;;  %v4727_v53 = vrot.slane %v4725_v17, 5  ;;  %v4731_v52 = vrot.slane %v4729_v56, 4 }
 0x23f   : > { %15781 = vmatmul.mubr.msk.bf16.gmra.mrb[12].mxu0 %vm1455_vm11, %v14387_v24  ;;  %v4697_v24 = vrot.slane %v4695_v43, 5  ;;  %v4656_v18 = vsel %vm16963_vm13, %v4651_v34, %v18495_v55  ;;  %v4666_v7 = vsel %vm16963_vm13, %v4661_v49, %v4665_v35  ;;  %v4690_v8 = vsel %vm16963_vm13, %v4685_v58, %v4689_v10 }
 0x240   : > { %15784 = vmatprep.mubr.msk.bf16.mxu0 %vm1455_vm11, %v14388_v41  ;;  %v4675_v41 = vrot.slane %v4674_v3, 4  ;;  %v4708_v46 = vor.u32 %v4707_v31, %v4703_v12  ;;  %v4711_v43 = vshll.u32 %v18319_v29, 16  ;;  %v4740_v55 = vshrl.u32 %v4376_v27, 16 }
 0x241   : > { %v4698_v21 = vor.u32 %v4697_v24, %v4694_v19  ;;  %v4743_v36 = vshll.u32 %v4376_v27, 16  ;;  %v4749_v3 = vshll.u32 %v18352_v59, 16  ;;  %v4753_v11 = vshrl.u32 %v18352_v59, 16 }
 0x242   : > { %v4680_v61 = vsel %vm16963_vm13, %v4675_v41, %v4679_v5  ;;  %v4722_v4 = vor.u32 %v4721_v57, %v4718_v50  ;;  %v4732_v47 = vor.u32 %v4731_v52, %v4727_v53  ;;  %v14391_v6 = vcombine.low %v4656_v18, %v4666_v7  ;;  %v5057_v57 = vld [vmem:[#allocation2 + $0x18] sm:$0xe] }
 0x243   : > { %v14392_v5 = vcombine.low %v4680_v61, %v4690_v8  ;;  %v4699_v13 = vrot.slane %v4698_v21, 4  ;;  %v4709_v34 = vrot.slane %v4708_v46, 4  ;;  %v4713_v35 = vrot.slane %v4711_v43, 5 }
 0x244   : > { %v4742_v45 = vrot.slane %v4740_v55, 4  ;;  %v4745_v42 = vrot.slane %v4743_v36, 5  ;;  %v4751_v29 = vrot.slane %v4749_v3, 5  ;;  %v4755_v17 = vrot.slane %v4753_v11, 4  ;;  %v5058_v55 = vld [vmem:[#allocation2 + $0x24] sm:$0xe] }
 0x245   : > { %v4723_v56 = vrot.slane %v4722_v4, 4  ;;  %v4733_v49 = vrot.slane %v4732_v47, 4  ;;  %v4704_v59 = vsel %vm16963_vm13, %v4699_v13, %v4703_v12  ;;  %v4714_v19 = vsel %vm16963_vm13, %v4709_v34, %v4713_v35  ;;  %v5059_v36 = vld [vmem:[#allocation2 + $0x30] sm:$0xe] }
 0x246   : > { %v4746_v24 = vor.u32 %v4745_v42, %v4742_v45  ;;  %v4756_v41 = vor.u32 %v4755_v17, %v4751_v29  ;;  %v4759_v58 = vshll.u32 %v18358_v26, 16  ;;  %v5123_v50 = vrot.slane %v18170_v2, 5  ;;  %v5060_v45 = vld [vmem:[#allocation2 + $0x3c] sm:$0xe]  ;;  %v5061_v42 = vld [vmem:[#allocation2 + $0x48] sm:$0xe] }
 0x247   : > { %15785 = vmatmul.mubr.msk.bf16.gmra.mrb[16].mxu0 %vm1455_vm11, %v14389_v30  ;;  %v4735_v30 = vshll.u32 %v18520_v33, 16  ;;  %v4728_v31 = vsel %vm16963_vm13, %v4723_v56, %v4727_v53  ;;  %v14393_v52 = vcombine.low %v4704_v59, %v4714_v19  ;;  %v14412_v21 = vrot.slane %v5057_v57, 9 }
 0x248   : > { %15788 = vmatprep.mubr.msk.bf16.mxu0 %vm1455_vm11, %v14390_v63  ;;  %v4747_v27 = vrot.slane %v4746_v24, 4  ;;  %v4757_v18 = vrot.slane %v4756_v41, 4  ;;  %v4761_v7 = vrot.slane %v4759_v58, 5  ;;  %v5125_v61 = vrot.slane %v5123_v50, 4 }
 0x249   : > { %v4737_v10 = vrot.slane %v4735_v30, 5  ;;  %v5126_v8 = vrot.slane %v18204_v39, 5  ;;  %v5130_v53 = vrot.slane %v18178_v9, 5  ;;  %v5124_v46 = vsel %vm17346_vm8, %v14412_v21, %v5123_v50  ;;  %v5063_v50 = vld [vmem:[#allocation2 + $0x60] sm:$0xe] }
 0x24a   : > { %v4752_v26 = vsel %vm16963_vm13, %v4747_v27, %v4751_v29  ;;  %v4762_v2 = vsel %vm16963_vm13, %v4757_v18, %v4761_v7  ;;  %v5137_v39 = vrot.slane %v18198_v23, 5  ;;  %v14413_v4 = vrot.slane %v5058_v55, 9 }
 0x24b   : > { %v4738_v63 = vsel %vm16963_vm13, %v4733_v49, %v4737_v10  ;;  %v5127_v43 = vsel %vm17346_vm8, %v5125_v61, %v5126_v8  ;;  %v14395_v3 = vcombine.low %v4752_v26, %v4762_v2  ;;  %v5132_v47 = vrot.slane %v5130_v53, 4  ;;  %v22446_v10 = vld [vmem:[#allocation13_spill] sm:$0xff] }
 0x24c   : > { %v14394_v12 = vcombine.low %v4728_v31, %v4738_v63  ;;  %v14429_v11 = vcombine.low %v5124_v46, %v5127_v43  ;;  %v5133_v30 = vrot.slane %v18213_v62, 5  ;;  %v5140_v9 = vrot.slane %v18237_v60, 5 }
 0x24d   : > { %v5131_v13 = vsel %vm17346_vm8, %v14413_v4, %v5130_v53  ;;  %v5144_v34 = vrot.slane %v18229_v54, 5  ;;  %v5151_v60 = vrot.slane %v18287_v25, 5  ;;  %v14415_v56 = vrot.slane %v5060_v45, 9  ;;  %v22447_v53 = vld [vmem:[#allocation7_spill] sm:$0xff]  ;;  %v22450_v4 = vld [vmem:[#allocation9_spill] sm:$0xff] }
 0x24e   : > { %v5134_v23 = vsel %vm17346_vm8, %v5132_v47, %v5133_v30  ;;  %v5147_v59 = vrot.slane %v22446_v10, 5  ;;  %v14416_v19 = vrot.slane %v5061_v42, 9  ;;  %v5154_v54 = vrot.slane %v18341_v1, 5  ;;  %v22451_v47 = vld [vmem:[#allocation10_spill] sm:$0xff] }
 0x24f   : > { %15789 = vmatmul.mubr.msk.bf16.gmra.mrb[20].mxu0 %vm1455_vm11, %v14391_v6  ;;  %v14414_v6 = vrot.slane %v5059_v36, 9  ;;  %v14430_v29 = vcombine.low %v5131_v13, %v5134_v23  ;;  %v5146_v49 = vrot.slane %v5144_v34, 4  ;;  %v5153_v24 = vrot.slane %v5151_v60, 4  ;;  %v22456_v10 = vld [vmem:[#allocation14_spill] sm:$0xff] }
 0x250   : > { %15792 = vmatprep.mubr.msk.bf16.mxu0 %vm1455_vm11, %v14392_v5  ;;  %v5139_v5 = vrot.slane %v5137_v39, 4  ;;  %v5145_v41 = vsel %vm17346_vm8, %v14415_v56, %v5144_v34  ;;  %v5152_v58 = vsel %vm17346_vm8, %v14416_v19, %v5151_v60  ;;  %v5165_v63 = vrot.slane %v18363_v15, 5  ;;  %v5065_v15 = vld [vmem:[#allocation2 + $0x78] sm:$0xe] }
 0x251   : > { %v5138_v35 = vsel %vm17346_vm8, %v14414_v6, %v5137_v39  ;;  %v5148_v25 = vsel %vm17346_vm8, %v5146_v49, %v5147_v59  ;;  %v5155_v31 = vsel %vm17346_vm8, %v5153_v24, %v5154_v54  ;;  %v5168_v27 = vrot.slane %v18411_v22, 5  ;;  %v22448_v22 = vld [vmem:[#allocation8_spill] sm:$0xff]  ;;  %v22457_v59 = vld [vmem:[#allocation15_spill] sm:$0xff] }
 0x252   : > { %v5141_v62 = vsel %vm17346_vm8, %v5139_v5, %v5140_v9  ;;  %v14432_v1 = vcombine.low %v5145_v41, %v5148_v25  ;;  %v14433_v57 = vcombine.low %v5152_v58, %v5155_v31  ;;  %v5179_v21 = vrot.slane %v18417_v0, 5  ;;  %v5067_v39 = vld [vmem:[#allocation2 + $0x90] sm:$0xe]  ;;  %v5069_v9 = vld [vmem:[#allocation2 + $0xa8] sm:$0xe]  ;;  %v22460_v25 = vld [vmem:[#allocation17_spill] sm:$0xff] }
 0x253   : > { %v14431_v17 = vcombine.low %v5138_v35, %v5141_v62  ;;  %v14420_v8 = vrot.slane %v5065_v15, 9  ;;  %v5182_v2 = vrot.slane %v18436_v28, 5  ;;  %v22449_v46 = vcombine.low %v22447_v53, %v22448_v22  ;;  %v22453_v35 = vld [vmem:[#allocation11_spill] sm:$0xff]  ;;  %v22454_v62 = vld [vmem:[#allocation12_spill] sm:$0xff] }
 0x254   : > { %v5181_v26 = vrot.slane %v5179_v21, 4  ;;  %v5193_v0 = vrot.slane %v18450_v20, 5  ;;  %v5196_v28 = vrot.slane %v18466_v16, 5  ;;  %v22452_v30 = vcombine.low %v22450_v4, %v22451_v47  ;;  %v22459_v41 = vld [vmem:[#allocation16_spill] sm:$0xff] }
 0x255   : > { %v5180_v43 = vsel %vm17346_vm8, %v14420_v8, %v5179_v21  ;;  %v5207_v20 = vrot.slane %v18475_v48, 5  ;;  %v14424_v23 = vrot.slane %v5069_v9, 9  ;;  %v5210_v16 = vrot.slane %v18497_v51, 5  ;;  %v5891_v31 = vld [vmem:[#allocation3 + $0x18] sm:$0x1] }
 0x256   : > { %v5183_v55 = vsel %vm17346_vm8, %v5181_v26, %v5182_v2  ;;  %v22455_v45 = vcombine.low %v22453_v35, %v22454_v62  ;;  %v5221_v48 = vrot.slane %v18502_v40, 5  ;;  %v5224_v51 = vrot.slane %v18520_v33, 5  ;;  %v5946_v15 = vld [vmem:[#allocation3 + $0x38] sm:$0x1]  ;;  %v5943_v8 = vld [vmem:[#allocation3 + $0x2c] sm:$0x1] }
 0x257   : > { %15793 = vmatmul.mubr.msk.bf16.gmra.mrb[24].mxu0 %vm1455_vm11, %v14393_v52  ;;  %v14418_v52 = vrot.slane %v5063_v50, 9  ;;  %v14437_v36 = vcombine.low %v5180_v43, %v5183_v55  ;;  %v5209_v34 = vrot.slane %v5207_v20, 4  ;;  %v5208_v60 = vsel %vm17346_vm8, %v14424_v23, %v5207_v20  ;;  %v5888_v50 = vld [vmem:[#allocation3 + $0xc] sm:$0x1]  ;;  %v5903_v2 = vld [vmem:[#allocation3 + $0x48] sm:$0x1] }
 0x258   : > { %15796 = vmatprep.mubr.msk.bf16.mxu0 %vm1455_vm11, %v14394_v12  ;;  %v5167_v12 = vrot.slane %v5165_v63, 4  ;;  %v5223_v49 = vrot.slane %v5221_v48, 4  ;;  %v22458_v19 = vcombine.low %v22456_v10, %v22457_v59  ;;  %v22461_v58 = vcombine.low %v22459_v41, %v22460_v25  ;;  %v5900_v22 = vld [vmem:[#allocation3 + $0x3c] sm:$0x1]  ;;  %v5912_v9 = vld [vmem:[#allocation3 + $0x6c] sm:$0x1] }
 0x259   : > { %v5166_v18 = vsel %vm17346_vm8, %v14418_v52, %v5165_v63  ;;  %v5211_v42 = vsel %vm17346_vm8, %v5209_v34, %v5210_v16  ;;  %v22464_v63 = vmov 0   ;;  %v5889_v38 = vsel %vm18645_vm5, 0, %v5888_v50  ;;  %v5937_v52 = vld [vmem:[#allocation3 + $0x14] sm:$0x1]  ;;  %v5921_v62 = vld [vmem:[#allocation3 + $0x90] sm:$0x1] }
 0x25a   : > { %v5169_v7 = vsel %vm17346_vm8, %v5167_v12, %v5168_v27  ;;  %v5225_v54 = vsel %vm17346_vm8, %v5223_v49, %v5224_v51  ;;  %5880 = vst.msk [vmem:[#allocation3 + $0x8] sm:$0x1] %vm5879_vm1, %v22464_v63  ;;  %5884 = vst.msk [vmem:[#allocation3 + $0xd4] sm:$0x1] %vm5879_vm1, %v22464_v63  ;;  %v5938_v12 = vsel %vm18656_vm7, 0, %v5937_v52  ;;  %v5944_v26 = vsel %vm18656_vm7, 0, %v5943_v8 }
 0x25b   : > { %v14435_v61 = vcombine.low %v5166_v18, %v5169_v7  ;;  %5890 = vst [vmem:[#allocation3 + $0xc] sm:$0x1] %v5889_v38  ;;  %5939 = vst [vmem:[#allocation3 + $0x14] sm:$0x1] %v5938_v12  ;;  %v5897_v27 = vld [vmem:[#allocation3 + $0x30] sm:$0x1] }
 0x25c   : > { %v5898_v18 = vsel %vm18645_vm5, 0, %v5897_v27  ;;  %v5894_v7 = vld [vmem:[#allocation3 + $0x24] sm:$0x1]  ;;  %5945 = vst [vmem:[#allocation3 + $0x2c] sm:$0x1] %v5944_v26  ;;  %v5904_v53 = vsel %vm18645_vm5, 0, %v5903_v2 }
 0x25d   : > { %5899 = vst [vmem:[#allocation3 + $0x30] sm:$0x1] %v5898_v18  ;;  %v5895_v21 = vsel %vm18645_vm5, 0, %v5894_v7  ;;  %5905 = vst [vmem:[#allocation3 + $0x48] sm:$0x1] %v5904_v53  ;;  %v5901_v43 = vsel %vm18645_vm5, 0, %v5900_v22 }
 0x25e   : > { %5896 = vst [vmem:[#allocation3 + $0x24] sm:$0x1] %v5895_v21  ;;  %5902 = vst [vmem:[#allocation3 + $0x3c] sm:$0x1] %v5901_v43  ;;  %v5913_v23 = vsel %vm18645_vm5, 0, %v5912_v9 }
 0x25f   : > { %15797 = vmatmul.mubr.msk.bf16.gmra.mrb[28].mxu0 %vm1455_vm11, %v14395_v3  ;;  %v14422_v3 = vrot.slane %v5067_v39, 9  ;;  %5914 = vst [vmem:[#allocation3 + $0x6c] sm:$0x1] %v5913_v23  ;;  %v5961_v16 = vld [vmem:[#allocation3 + $0x74] sm:$0x1] }
 0x260   : > { %15802 = vmatprep.mubr.msk.bf16.mxu0 %vm1455_vm11, %v14429_v11  ;;  %v5195_v11 = vrot.slane %v5193_v0, 4  ;;  %v5962_v35 = vsel %vm18656_vm7, 0, %v5961_v16  ;;  %v5927_v49 = vld [vmem:[#allocation3 + $0xa8] sm:$0x1]  ;;  %v5924_v10 = vld [vmem:[#allocation3 + $0x9c] sm:$0x1] }
 0x261   : > { %v5194_v6 = vsel %vm17346_vm8, %v14422_v3, %v5193_v0  ;;  %v5949_v0 = vld [vmem:[#allocation3 + $0x44] sm:$0x1]  ;;  %5963 = vst [vmem:[#allocation3 + $0x74] sm:$0x1] %v5962_v35  ;;  %v5928_v51 = vsel %vm18645_vm5, 0, %v5927_v49 }
 0x262   : > { %v5197_v5 = vsel %vm17346_vm8, %v5195_v11, %v5196_v28  ;;  %v5950_v39 = vsel %vm18656_vm7, 0, %v5949_v0  ;;  %v5906_v11 = vld [vmem:[#allocation3 + $0x54] sm:$0x1]  ;;  %v5958_v28 = vld [vmem:[#allocation3 + $0x68] sm:$0x1] }
 0x263   : > { %v14439_v13 = vcombine.low %v5194_v6, %v5197_v5  ;;  %5951 = vst [vmem:[#allocation3 + $0x44] sm:$0x1] %v5950_v39  ;;  %v5907_v4 = vsel %vm18645_vm5, 0, %v5906_v11  ;;  %v5959_v47 = vsel %vm18656_vm7, 0, %v5958_v28  ;;  %v5915_v5 = vld [vmem:[#allocation3 + $0x78] sm:$0x1] }
 0x264   : > { %5908 = vst [vmem:[#allocation3 + $0x54] sm:$0x1] %v5907_v4  ;;  %5960 = vst [vmem:[#allocation3 + $0x68] sm:$0x1] %v5959_v47  ;;  %v5916_v20 = vsel %vm18645_vm5, 0, %v5915_v5 }
 0x265   : > { %5917 = vst [vmem:[#allocation3 + $0x78] sm:$0x1] %v5916_v20  ;;  %5929 = vst [vmem:[#allocation3 + $0xa8] sm:$0x1] %v5928_v51  ;;  %v5976_v59 = vld [vmem:[#allocation3 + $0xb0] sm:$0x1] }
 0x266   : > { %v5982_v38 = vld [vmem:[#allocation3 + $0xc8] sm:$0x1] }
 0x267   : > { %15803 = vmatmul.mubr.msk.bf16.vlgmr.msra.gmra.mrb[0].mxu0 %vm1455_vm11, %v14430_v29  ;;  %v5071_v29 = vld [vmem:[#allocation2 + $0xc0] sm:$0xe] }
 0x268   : > { %15806 = vmatprep.mubr.msk.bf16.mxu0 %vm1455_vm11, %v14431_v17  ;;  %v14441_v17 = vcombine.low %v5208_v60, %v5211_v42  ;;  %v14426_v56 = vrot.slane %v5071_v29, 9  ;;  %v5918_v60 = vld [vmem:[#allocation3 + $0x84] sm:$0x1]  ;;  %v5970_v42 = vld [vmem:[#allocation3 + $0x98] sm:$0x1] }
 0x269   : > { %v5971_v29 = vsel %vm18656_vm7, 0, %v5970_v42  ;;  %v6463_v32 = vld [vmem:[#allocation3 + $0x74] sm:$0x1]  ;;  %v16807_v33 = vld [vmem:[%s22221_s4] sm:$0xf] }
 0x26a   : > { %v5222_v24 = vsel %vm17346_vm8, %v14426_v56, %v5221_v48  ;;  %v5919_v48 = vsel %vm18645_vm5, 0, %v5918_v60  ;;  %5972 = vst [vmem:[#allocation3 + $0x98] sm:$0x1] %v5971_v29 }
 0x26b   : > { %v14443_v40 = vcombine.low %v5222_v24, %v5225_v54  ;;  %5920 = vst [vmem:[#allocation3 + $0x84] sm:$0x1] %v5919_v48  ;;  %v5977_v24 = vsel %vm18656_vm7, 0, %v5976_v59  ;;  %v5973_v54 = vld [vmem:[#allocation3 + $0xa4] sm:$0x1] }
 0x26c   : > { %5978 = vst [vmem:[#allocation3 + $0xb0] sm:$0x1] %v5977_v24 }
 0x26f   : > { %15807 = vmatmul.mubr.msk.bf16.gmra.mrb[4].mxu0 %vm1455_vm11, %v14432_v1  ;;  %v5892_v1 = vsel %vm18645_vm5, 0, %v5891_v31  ;;  %v5933_v31 = vld [vmem:[#allocation3 + $0xc0] sm:$0x1] }
 0x270   : > { %15810 = vmatprep.mubr.msk.bf16.mxu0 %vm1455_vm11, %v14433_v57  ;;  %5893 = vst [vmem:[#allocation3 + $0x18] sm:$0x1] %v5892_v1  ;;  %v5934_v50 = vsel %vm18645_vm5, 0, %v5933_v31  ;;  %v5930_v1 = vld [vmem:[#allocation3 + $0xb4] sm:$0x1] }
 0x271   : > { %5935 = vst [vmem:[#allocation3 + $0xc0] sm:$0x1] %v5934_v50 }
 0x277   : > { %15811 = vmatmul.mubr.msk.bf16.gmra.mrb[8].mxu0 %vm1455_vm11, %v22449_v46  ;;  %v5952_v46 = vld [vmem:[#allocation3 + $0x50] sm:$0x1] }
 0x278   : > { %15814 = vmatprep.mubr.msk.bf16.mxu0 %vm1455_vm11, %v14435_v61  ;;  %v5947_v61 = vsel %vm18656_vm7, 0, %v5946_v15  ;;  %v5953_v55 = vsel %vm18656_vm7, 0, %v5952_v46 }
 0x279   : > { %5948 = vst [vmem:[#allocation3 + $0x38] sm:$0x1] %v5947_v61  ;;  %5954 = vst [vmem:[#allocation3 + $0x50] sm:$0x1] %v5953_v55 }
 0x27f   : > { %15815 = vmatmul.mubr.msk.bf16.gmra.mrb[12].mxu0 %vm1455_vm11, %v22452_v30  ;;  %v5955_v30 = vld [vmem:[#allocation3 + $0x5c] sm:$0x1] }
 0x280   : > { %15818 = vmatprep.mubr.msk.bf16.mxu0 %vm1455_vm11, %v14437_v36  ;;  %v5909_v36 = vld [vmem:[#allocation3 + $0x60] sm:$0x1]  ;;  %v5956_v6 = vsel %vm18656_vm7, 0, %v5955_v30 }
 0x281   : > { %v5910_v3 = vsel %vm18645_vm5, 0, %v5909_v36  ;;  %5957 = vst [vmem:[#allocation3 + $0x5c] sm:$0x1] %v5956_v6 }
 0x282   : > { %5911 = vst [vmem:[#allocation3 + $0x60] sm:$0x1] %v5910_v3 }
 0x287   : > { %15819 = vmatmul.mubr.msk.bf16.gmra.mrb[16].mxu0 %vm1455_vm11, %v22455_v45  ;;  %v5922_v45 = vsel %vm18645_vm5, 0, %v5921_v62 }
 0x288   : > { %15822 = vmatprep.mubr.msk.bf16.mxu0 %vm1455_vm11, %v14439_v13  ;;  %v5964_v13 = vld [vmem:[#allocation3 + $0x80] sm:$0x1]  ;;  %5923 = vst [vmem:[#allocation3 + $0x90] sm:$0x1] %v5922_v45 }
 0x289   : > { %v5965_v34 = vsel %vm18656_vm7, 0, %v5964_v13 }
 0x28a   : > { %5966 = vst [vmem:[#allocation3 + $0x80] sm:$0x1] %v5965_v34 }
 0x28f   : > { %15823 = vmatmul.mubr.msk.bf16.gmra.mrb[20].mxu0 %vm1455_vm11, %v22458_v19  ;;  %v5925_v19 = vsel %vm18645_vm5, 0, %v5924_v10 }
 0x290   : > { %15826 = vmatprep.mubr.msk.bf16.mxu0 %vm1455_vm11, %v14441_v17  ;;  %v5967_v17 = vld [vmem:[#allocation3 + $0x8c] sm:$0x1]  ;;  %5926 = vst [vmem:[#allocation3 + $0x9c] sm:$0x1] %v5925_v19 }
 0x291   : > { %v5968_v56 = vsel %vm18656_vm7, 0, %v5967_v17 }
 0x292   : > { %5969 = vst [vmem:[#allocation3 + $0x8c] sm:$0x1] %v5968_v56 }
 0x297   : > { %15827 = vmatmul.mubr.msk.bf16.gmra.mrb[24].mxu0 %vm1455_vm11, %v22461_v58 }
 0x298   : > { %15830 = vmatprep.mubr.msk.bf16.mxu0 %vm1455_vm11, %v14443_v40  ;;  %v5974_v40 = vsel %vm18656_vm7, 0, %v5973_v54 }
 0x299   : > { %5975 = vst [vmem:[#allocation3 + $0xa4] sm:$0x1] %v5974_v40 }
 0x29f   : > { %15831 = vmatmul.mubr.msk.bf16.gmra.mrb[28].mxu0 %vm1455_vm11, %v14444_v37  ;;  %v5940_v37 = vld [vmem:[#allocation3 + $0x20] sm:$0x1] }
 0x2a0   : > { %v5941_v57 = vsel %vm18656_vm7, 0, %v5940_v37  ;;  %v5931_v37 = vsel %vm18645_vm5, 0, %v5930_v1 }
 0x2a1   : > { %5942 = vst [vmem:[#allocation3 + $0x20] sm:$0x1] %v5941_v57  ;;  %v5983_v57 = vsel %vm18656_vm7, 0, %v5982_v38  ;;  %5932 = vst [vmem:[#allocation3 + $0xb4] sm:$0x1] %v5931_v37 }
 0x2a2   : > { %5984 = vst [vmem:[#allocation3 + $0xc8] sm:$0x1] %v5983_v57 }
 0x2ef   : > { %v18712_v41 = vpop.f32.mrb[0].mxu1 }
 0x2f0   : > { %v18714_v25 = vpop.f32.mrb[1].mxu1 }
 0x2f1   : > { %v18716_v58 = vpop.f32.mrb[2].mxu1 }
 0x2f2   : > { %v18718_v63 = vpop.f32.mrb[3].mxu1 }
 0x33a   : > { %v18726_v52 = vpop.f32.mrb[0].mxu0 }
 0x33b   : > { %v18728_v12 = vpop.f32.mrb[1].mxu0  ;;  %v5531_v61 = vsel %vm5527_vm3, %v18726_v52, 0.0 }
 0x33c   : > { %v18730_v27 = vpop.f32.mrb[2].mxu0  ;;  %v5528_v7 = vsel %vm5527_vm3, %v18728_v12, 0.0 }
 0x33d   : > { %v18732_v18 = vpop.f32.mrb[3].mxu0  ;;  %v5533_v26 = vsel %vm5527_vm3, %v18730_v27, 0.0 }
 0x33e   : > { %v5529_v21 = vsel %vm5527_vm3, %v18732_v18, 0.0 }
 0x33f   : > { %v5530_v15 = vadd.f32 %v5529_v21, %v5528_v7 }
 0x341   : > { %v5532_v8 = vadd.f32 %v5531_v61, %v5530_v15 }
 0x342   : > { %v18742_v2 = vpop.f32.mrb[4].mxu0 }
 0x343   : > { %v18744_v53 = vpop.f32.mrb[5].mxu0  ;;  %v5534_v22 = vadd.f32 %v5533_v26, %v5532_v8  ;;  %v5539_v3 = vsel %vm5527_vm3, %v18742_v2, 0.0 }
 0x344   : > { %v5535_v46 = vsel %vm5527_vm3, %v18744_v53, 0.0  ;;  %v18748_v43 = vpop.f32.mrb[6].mxu0 }
 0x345   : > { %v5536_v55 = vadd.f32 %v5535_v46, %v5534_v22  ;;  %v18750_v0 = vpop.f32.mrb[7].mxu0  ;;  %v5541_v28 = vsel %vm5527_vm3, %v18748_v43, 0.0 }
 0x346   : > { %v5537_v39 = vsel %vm5527_vm3, %v18750_v0, 0.0 }
 0x347   : > { %v5538_v36 = vadd.f32 %v5537_v39, %v5536_v55 }
 0x349   : > { %v5540_v11 = vadd.f32 %v5539_v3, %v5538_v36 }
 0x34a   : > { %v18758_v4 = vpop.f32.mrb[8].mxu0 }
 0x34b   : > { %v18760_v47 = vpop.f32.mrb[9].mxu0  ;;  %v5542_v30 = vadd.f32 %v5541_v28, %v5540_v11  ;;  %v5547_v34 = vsel %vm5527_vm3, %v18758_v4, 0.0 }
 0x34c   : > { %v5543_v6 = vsel %vm5527_vm3, %v18760_v47, 0.0  ;;  %v18764_v5 = vpop.f32.mrb[10].mxu0 }
 0x34d   : > { %v5544_v20 = vadd.f32 %v5543_v6, %v5542_v30  ;;  %v18766_v9 = vpop.f32.mrb[11].mxu0  ;;  %v5549_v35 = vsel %vm5527_vm3, %v18764_v5, 0.0 }
 0x34e   : > { %v5545_v13 = vsel %vm5527_vm3, %v18766_v9, 0.0 }
 0x34f   : > { %v5546_v23 = vadd.f32 %v5545_v13, %v5544_v20 }
 0x351   : > { %v5548_v16 = vadd.f32 %v5547_v34, %v5546_v23 }
 0x352   : > { %v18774_v62 = vpop.f32.mrb[12].mxu0 }
 0x353   : > { %v18776_v45 = vpop.f32.mrb[13].mxu0  ;;  %v5550_v60 = vadd.f32 %v5549_v35, %v5548_v16  ;;  %v5555_v51 = vsel %vm5527_vm3, %v18774_v62, 0.0 }
 0x354   : > { %v5551_v42 = vsel %vm5527_vm3, %v18776_v45, 0.0  ;;  %v18780_v48 = vpop.f32.mrb[14].mxu0 }
 0x355   : > { %v5552_v29 = vadd.f32 %v5551_v42, %v5550_v60  ;;  %v18782_v17 = vpop.f32.mrb[15].mxu0  ;;  %v5557_v59 = vsel %vm5527_vm3, %v18780_v48, 0.0 }
 0x356   : > { %v5553_v56 = vsel %vm5527_vm3, %v18782_v17, 0.0 }
 0x357   : > { %v5554_v49 = vadd.f32 %v5553_v56, %v5552_v29 }
 0x359   : > { %v5556_v10 = vadd.f32 %v5555_v51, %v5554_v49 }
 0x35a   : > { %v18790_v19 = vpop.f32.mrb[16].mxu0 }
 0x35b   : > { %v18792_v24 = vpop.f32.mrb[17].mxu0  ;;  %v5558_v54 = vadd.f32 %v5557_v59, %v5556_v10  ;;  %v5563_v57 = vsel %vm5527_vm3, %v18790_v19, 0.0 }
 0x35c   : > { %v5559_v40 = vsel %vm5527_vm3, %v18792_v24, 0.0  ;;  %v18796_v31 = vpop.f32.mrb[18].mxu0 }
 0x35d   : > { %v5560_v50 = vadd.f32 %v5559_v40, %v5558_v54  ;;  %v18798_v1 = vpop.f32.mrb[19].mxu0  ;;  %v5565_v21 = vsel %vm5527_vm3, %v18796_v31, 0.0 }
 0x35e   : > { %v5561_v38 = vsel %vm5527_vm3, %v18798_v1, 0.0 }
 0x35f   : > { %v5562_v37 = vadd.f32 %v5561_v38, %v5560_v50 }
 0x361   : > { %v5564_v7 = vadd.f32 %v5563_v57, %v5562_v37 }
 0x362   : > { %v18806_v15 = vpop.f32.mrb[20].mxu0 }
 0x363   : > { %v18808_v61 = vpop.f32.mrb[21].mxu0  ;;  %v5566_v8 = vadd.f32 %v5565_v21, %v5564_v7  ;;  %v5571_v3 = vsel %vm5527_vm3, %v18806_v15, 0.0 }
 0x364   : > { %v5567_v26 = vsel %vm5527_vm3, %v18808_v61, 0.0  ;;  %v18812_v22 = vpop.f32.mrb[22].mxu0 }
 0x365   : > { %v5568_v46 = vadd.f32 %v5567_v26, %v5566_v8  ;;  %v18814_v55 = vpop.f32.mrb[23].mxu0  ;;  %v5573_v28 = vsel %vm5527_vm3, %v18812_v22, 0.0 }
 0x366   : > { %v5569_v39 = vsel %vm5527_vm3, %v18814_v55, 0.0 }
 0x367   : > { %v5570_v36 = vadd.f32 %v5569_v39, %v5568_v46 }
 0x369   : > { %v5572_v11 = vadd.f32 %v5571_v3, %v5570_v36  ;;  %v5979_v36 = vld [vmem:[#allocation3 + $0xbc] sm:$0x1] }
 0x36a   : > { %v18822_v30 = vpop.f32.mrb[24].mxu0 }
 0x36b   : > { %v5464_v6 = vpop.f32.mrb[25].mxu0  ;;  %v5574_v20 = vadd.f32 %v5573_v28, %v5572_v11  ;;  %v5579_v42 = vsel %vm5527_vm3, %v18822_v30, 0.0 }
 0x36c   : > { %v5575_v13 = vsel %vm5527_vm3, %v5464_v6, 0.0  ;;  %v15829_v23 = vpop.f32.mrb[26].mxu0 }
 0x36d   : > { %v5576_v34 = vadd.f32 %v5575_v13, %v5574_v20  ;;  %v5467_v16 = vpop.f32.mrb[27].mxu0  ;;  %v5581_v56 = vsel %vm5527_vm3, %v15829_v23, 0.0 }
 0x36e   : > { %v5577_v35 = vsel %vm5527_vm3, %v5467_v16, 0.0 }
 0x36f   : > { %v5578_v60 = vadd.f32 %v5577_v35, %v5576_v34 }
 0x371   : > { %v5580_v29 = vadd.f32 %v5579_v42, %v5578_v60 }
 0x372   : > { %v15832_v49 = vpop.f32.mrb[28].mxu0 }
 0x373   : > { %v16152_v51 = vadd.f32 %v15832_v49, %v18712_v41  ;;  %v5480_v10 = vpop.f32.mrb[29].mxu0  ;;  %v5582_v59 = vadd.f32 %v5581_v56, %v5580_v29 }
 0x374   : > { %v16153_v54 = vadd.f32 %v5480_v10, %v18714_v25  ;;  %v15833_v40 = vpop.f32.mrb[30].mxu0  ;;  %v5980_v25 = vsel %vm18656_vm7, 0, %v5979_v36 }
 0x375   : > { %v16154_v50 = vadd.f32 %v15833_v40, %v18716_v58  ;;  %v5483_v38 = vpop.f32.mrb[31].mxu0  ;;  %v5587_v26 = vsel %vm5527_vm3, %v16152_v51, 0.0  ;;  %5981 = vst [vmem:[#allocation3 + $0xbc] sm:$0x1] %v5980_v25 }
 0x376   : > { %v5583_v37 = vsel %vm5527_vm3, %v16153_v54, 0.0  ;;  %v16155_v57 = vadd.f32 %v5483_v38, %v18718_v63 }
 0x377   : > { %v5584_v7 = vadd.f32 %v5583_v37, %v5582_v59  ;;  %v5589_v41 = vsel %vm5527_vm3, %v16154_v50, 0.0 }
 0x378   : > { %v5585_v21 = vsel %vm5527_vm3, %v16155_v57, 0.0 }
 0x379   : > { %v5586_v8 = vadd.f32 %v5585_v21, %v5584_v7 }
 0x37b   : > { %v5588_v46 = vadd.f32 %v5587_v26, %v5586_v8 }
 0x37d   : > { %v5590_v39 = vadd.f32 %v5589_v41, %v5588_v46 }
 0x37f   : > { %v5591_v58 = vrot.slane %v5590_v39, 4 }
 0x381   : > { %v5592_v3 = vadd.f32 %v5591_v58, %v5590_v39 }
 0x383   : > { %v5593_v11 = vrot.slane %v5592_v3, 2 }
 0x385   : > { %v5594_v28 = vadd.f32 %v5593_v11, %v5592_v3 }
 0x387   : > { %v5595_v63 = vrot.slane %v5594_v28, 1 }
 0x389   : > { %v5596_v20 = vadd.f32 %v5595_v63, %v5594_v28 }
 0x38b   : > { %v5597_v13 = vmul.f32 0.00390625, %v5596_v20 }
 0x38d   : > { %v18840_v34 = vsub.f32 %v18728_v12, %v5597_v13  ;;  %v18843_v35 = vsub.f32 %v18732_v18, %v5597_v13  ;;  %v18846_v60 = vsub.f32 %v18726_v52, %v5597_v13  ;;  %v18849_v14 = vsub.f32 %v18730_v27, %v5597_v13 }
 0x38e   : > { %v18852_v42 = vsub.f32 %v18744_v53, %v5597_v13  ;;  %v18855_v29 = vsub.f32 %v18750_v0, %v5597_v13  ;;  %v18858_v56 = vsub.f32 %v18742_v2, %v5597_v13  ;;  %v18861_v12 = vsub.f32 %v18748_v43, %v5597_v13 }
 0x38f   : > { %v18864_v18 = vsub.f32 %v18760_v47, %v5597_v13  ;;  %v18867_v52 = vsub.f32 %v18766_v9, %v5597_v13  ;;  %v18870_v27 = vsub.f32 %v18758_v4, %v5597_v13  ;;  %v18873_v53 = vsub.f32 %v18764_v5, %v5597_v13 }
 0x390   : > { %v18876_v0 = vsub.f32 %v18776_v45, %v5597_v13  ;;  %v18879_v2 = vsub.f32 %v18782_v17, %v5597_v13  ;;  %v18882_v43 = vsub.f32 %v18774_v62, %v5597_v13  ;;  %v18885_v47 = vsub.f32 %v18780_v48, %v5597_v13 }
 0x391   : > { %v18888_v9 = vsub.f32 %v18792_v24, %v5597_v13  ;;  %v18891_v4 = vsub.f32 %v18798_v1, %v5597_v13  ;;  %v18894_v5 = vsub.f32 %v18790_v19, %v5597_v13  ;;  %v18897_v45 = vsub.f32 %v18796_v31, %v5597_v13 }
 0x392   : > { %v18900_v17 = vsub.f32 %v18808_v61, %v5597_v13  ;;  %v18903_v62 = vsub.f32 %v18814_v55, %v5597_v13  ;;  %v18906_v48 = vsub.f32 %v18806_v15, %v5597_v13  ;;  %v18909_v24 = vsub.f32 %v18812_v22, %v5597_v13 }
 0x393   : > { %v18911_v1 = vsub.f32 %v5464_v6, %v5597_v13  ;;  %v18913_v49 = vsub.f32 %v5467_v16, %v5597_v13  ;;  %v18916_v19 = vsub.f32 %v18822_v30, %v5597_v13  ;;  %v18918_v31 = vsub.f32 %v15829_v23, %v5597_v13 }
 0x394   : > { %v18920_v61 = vsub.f32 %v16153_v54, %v5597_v13  ;;  %v18922_v10 = vsub.f32 %v16155_v57, %v5597_v13  ;;  %v18924_v55 = vsub.f32 %v16152_v51, %v5597_v13  ;;  %v18926_v15 = vsub.f32 %v16154_v50, %v5597_v13 }
 0x395   : > { %v5630_v22 = vmul.f32 %v18840_v34, %v18840_v34  ;;  %v5631_v6 = vmul.f32 %v18843_v35, %v18843_v35  ;;  %v5632_v30 = vmul.f32 %v18846_v60, %v18846_v60  ;;  %v5633_v23 = vmul.f32 %v18849_v14, %v18849_v14 }
 0x396   : > { %v5634_v54 = vmul.f32 %v18852_v42, %v18852_v42  ;;  %v5635_v38 = vmul.f32 %v18855_v29, %v18855_v29  ;;  %v5636_v7 = vmul.f32 %v18858_v56, %v18858_v56  ;;  %v5637_v26 = vmul.f32 %v18861_v12, %v18861_v12 }
 0x397   : > { %v5662_v16 = vsel %vm5527_vm3, %v5630_v22, 0.0  ;;  %v5663_v59 = vsel %vm5527_vm3, %v5631_v6, 0.0  ;;  %v5665_v40 = vsel %vm5527_vm3, %v5632_v30, 0.0  ;;  %v5667_v37 = vsel %vm5527_vm3, %v5633_v23, 0.0 }
 0x398   : > { %v5664_v51 = vadd.f32 %v5663_v59, %v5662_v16  ;;  %v5669_v21 = vsel %vm5527_vm3, %v5634_v54, 0.0  ;;  %v5671_v46 = vsel %vm5527_vm3, %v5635_v38, 0.0  ;;  %v5638_v39 = vmul.f32 %v18864_v18, %v18864_v18 }
 0x399   : > { %v5673_v36 = vsel %vm5527_vm3, %v5636_v7, 0.0  ;;  %v5639_v58 = vmul.f32 %v18867_v52, %v18867_v52  ;;  %v5675_v3 = vsel %vm5527_vm3, %v5637_v26, 0.0  ;;  %v5640_v28 = vmul.f32 %v18870_v27, %v18870_v27 }
 0x39a   : > { %v5666_v50 = vadd.f32 %v5665_v40, %v5664_v51  ;;  %v5677_v63 = vsel %vm5527_vm3, %v5638_v39, 0.0  ;;  %v5641_v13 = vmul.f32 %v18873_v53, %v18873_v53  ;;  %v5642_v30 = vmul.f32 %v18876_v0, %v18876_v0 }
 0x39b   : > { %v5679_v22 = vsel %vm5527_vm3, %v5639_v58, 0.0  ;;  %v5681_v23 = vsel %vm5527_vm3, %v5640_v28, 0.0  ;;  %v5643_v59 = vmul.f32 %v18879_v2, %v18879_v2  ;;  %v5644_v40 = vmul.f32 %v18882_v43, %v18882_v43 }
 0x39c   : > { %v5668_v57 = vadd.f32 %v5667_v37, %v5666_v50  ;;  %v5683_v51 = vsel %vm5527_vm3, %v5641_v13, 0.0  ;;  %v5685_v50 = vsel %vm5527_vm3, %v5642_v30, 0.0  ;;  %v5645_v37 = vmul.f32 %v18885_v47, %v18885_v47 }
 0x39e   : > { %v5670_v8 = vadd.f32 %v5669_v21, %v5668_v57  ;;  %v5687_v57 = vsel %vm5527_vm3, %v5643_v59, 0.0  ;;  %v5646_v21 = vmul.f32 %v18888_v9, %v18888_v9 }
 0x3a0   : > { %v5672_v41 = vadd.f32 %v5671_v46, %v5670_v8  ;;  %v5689_v8 = vsel %vm5527_vm3, %v5644_v40, 0.0  ;;  %v5647_v46 = vmul.f32 %v18891_v4, %v18891_v4 }
 0x3a2   : > { %v5674_v25 = vadd.f32 %v5673_v36, %v5672_v41  ;;  %v5691_v41 = vsel %vm5527_vm3, %v5645_v37, 0.0  ;;  %v5648_v36 = vmul.f32 %v18894_v5, %v18894_v5 }
 0x3a4   : > { %v5676_v11 = vadd.f32 %v5675_v3, %v5674_v25  ;;  %v5693_v25 = vsel %vm5527_vm3, %v5646_v21, 0.0  ;;  %v5649_v3 = vmul.f32 %v18897_v45, %v18897_v45 }
 0x3a6   : > { %v5678_v20 = vadd.f32 %v5677_v63, %v5676_v11  ;;  %v5695_v11 = vsel %vm5527_vm3, %v5647_v46, 0.0  ;;  %v5650_v63 = vmul.f32 %v18900_v17, %v18900_v17 }
 0x3a8   : > { %v5680_v6 = vadd.f32 %v5679_v22, %v5678_v20  ;;  %v5697_v20 = vsel %vm5527_vm3, %v5648_v36, 0.0  ;;  %v5651_v22 = vmul.f32 %v18903_v62, %v18903_v62  ;;  %v5658_v36 = vmul.f32 %v18920_v61, %v18920_v61 }
 0x3aa   : > { %v5682_v16 = vadd.f32 %v5681_v23, %v5680_v6  ;;  %v5699_v6 = vsel %vm5527_vm3, %v5649_v3, 0.0  ;;  %v5652_v23 = vmul.f32 %v18906_v48, %v18906_v48 }
 0x3ac   : > { %v5684_v54 = vadd.f32 %v5683_v51, %v5682_v16  ;;  %v5701_v16 = vsel %vm5527_vm3, %v5650_v63, 0.0  ;;  %v5653_v51 = vmul.f32 %v18909_v24, %v18909_v24 }
 0x3ae   : > { %v5686_v38 = vadd.f32 %v5685_v50, %v5684_v54  ;;  %v5703_v54 = vsel %vm5527_vm3, %v5651_v22, 0.0  ;;  %v5654_v50 = vmul.f32 %v18911_v1, %v18911_v1 }
 0x3b0   : > { %v5688_v7 = vadd.f32 %v5687_v57, %v5686_v38  ;;  %v5705_v38 = vsel %vm5527_vm3, %v5652_v23, 0.0  ;;  %v5655_v57 = vmul.f32 %v18913_v49, %v18913_v49  ;;  %v5661_v23 = vmul.f32 %v18926_v15, %v18926_v15 }
 0x3b2   : > { %v5690_v26 = vadd.f32 %v5689_v8, %v5688_v7  ;;  %v5707_v7 = vsel %vm5527_vm3, %v5653_v51, 0.0  ;;  %v5656_v8 = vmul.f32 %v18916_v19, %v18916_v19  ;;  %v6516_v51 = vld [vmem:[#allocation3 + $0x4] sm:$0xf] }
 0x3b4   : > { %v5692_v39 = vadd.f32 %v5691_v41, %v5690_v26  ;;  %v5709_v26 = vsel %vm5527_vm3, %v5654_v50, 0.0  ;;  %v5657_v41 = vmul.f32 %v18918_v31, %v18918_v31  ;;  %v5713_v3 = vsel %vm5527_vm3, %v5656_v8, 0.0 }
 0x3b6   : > { %v5694_v58 = vadd.f32 %v5693_v25, %v5692_v39  ;;  %v5711_v39 = vsel %vm5527_vm3, %v5655_v57, 0.0 }
 0x3b8   : > { %v5696_v28 = vadd.f32 %v5695_v11, %v5694_v58  ;;  %v5659_v58 = vmul.f32 %v18922_v10, %v18922_v10 }
 0x3ba   : > { %v5698_v13 = vadd.f32 %v5697_v20, %v5696_v28  ;;  %v5715_v28 = vsel %vm5527_vm3, %v5657_v41, 0.0  ;;  %v5717_v20 = vsel %vm5527_vm3, %v5658_v36, 0.0  ;;  %v5719_v22 = vsel %vm5527_vm3, %v5659_v58, 0.0 }
 0x3bc   : > { %v5700_v30 = vadd.f32 %v5699_v6, %v5698_v13  ;;  %v5660_v13 = vmul.f32 %v18924_v55, %v18924_v55  ;;  %v14495_v6 = vld [vmem:[%s22221_s4 + $0x4] sm:$0xf] }
 0x3bd   : > { %16674 = vmatprep.subr.msk.bf16.mxu1 %vm7046_vm9, %v14495_v6 }
 0x3be   : > { %v5702_v59 = vadd.f32 %v5701_v16, %v5700_v30  ;;  %v6515_v30 = vld [vmem:[#allocation3] sm:$0xf] }
 0x3bf   : > { %v6568_v50 = vshll.u32 %v6515_v30, 16 }
 0x3c0   : > { %v5704_v40 = vadd.f32 %v5703_v54, %v5702_v59  ;;  %v7048_v59 = vsel %vm7046_vm9, %v14495_v6, 0  ;;  %v6548_v54 = vld [vmem:[#allocation3 + $0x8] sm:$0x1] }
 0x3c1   : > { %15835 = vmatpush3.bf16.msra.mxu1 %v7048_v59  ;;  %v6584_v57 = vshll.u32 %v6548_v54, 16 }
 0x3c2   : > { %v5706_v37 = vadd.f32 %v5705_v38, %v5704_v40  ;;  %v6565_v40 = vshrl.u32 %v6515_v30, 16  ;;  %v6574_v38 = vshll.u32 %v6516_v51, 16 }
 0x3c4   : > { %v5708_v21 = vadd.f32 %v5707_v7, %v5706_v37  ;;  %v6578_v37 = vshrl.u32 %v6516_v51, 16  ;;  %v6547_v7 = vld [vmem:[%s22221_s4] sm:$0xf]  ;;  %v6567_v8 = vrot.slane %v6565_v40, 4  ;;  %v6576_v41 = vrot.slane %v6574_v38, 5 }
 0x3c5   : > { %16675 = vmatprep.subr.msk.bf16.mxu1 %vm7046_vm9, %v6547_v7 }
 0x3c6   : > { %v5710_v46 = vadd.f32 %v5709_v26, %v5708_v21  ;;  %v5721_v26 = vsel %vm5527_vm3, %v5660_v13, 0.0 }
 0x3c8   : > { %v5712_v25 = vadd.f32 %v5711_v39, %v5710_v46  ;;  %v6570_v46 = vrot.slane %v6568_v50, 5  ;;  %v6580_v39 = vrot.slane %v6578_v37, 4  ;;  %v19046_v37 = vld [vmem:[%s374_s21] ss:$0 sm:$0xff] }
 0x3ca   : > { %v5714_v11 = vadd.f32 %v5713_v3, %v5712_v25  ;;  %v5723_v25 = vsel %vm5527_vm3, %v5661_v23, 0.0  ;;  %v6571_v58 = vor.u32 %v6570_v46, %v6567_v8  ;;  %v6581_v3 = vor.u32 %v6580_v39, %v6576_v41 }
 0x3cc   : > { %v5716_v63 = vadd.f32 %v5715_v28, %v5714_v11  ;;  %v6586_v11 = vrot.slane %v6584_v57, 5 }
 0x3ce   : > { %v5718_v16 = vadd.f32 %v5717_v20, %v5716_v63  ;;  %v6572_v63 = vrot.slane %v6571_v58, 4  ;;  %v6582_v20 = vrot.slane %v6581_v3, 4 }
 0x3d0   : > { %v5720_v21 = vadd.f32 %v5719_v22, %v5718_v16  ;;  %v6577_v6 = vsel %vm16963_vm13, %v6572_v63, %v6576_v41  ;;  %v6587_v13 = vsel %vm16963_vm13, %v6582_v20, %v6586_v11 }
 0x3d1   : > { %v14496_v16 = vcombine.low %v6577_v6, %v6587_v13 }
 0x3d2   : > { %v5722_v36 = vadd.f32 %v5721_v26, %v5720_v21  ;;  %v19052_v26 = vld [vmem:[%s377_s24] ss:$0 sm:$0xff] }
 0x3d3   : > { %15836 = vmatprep.mubr.msk.bf16.mxu1 %vm5527_vm3, %v14496_v16 }
 0x3d4   : > { %v5724_v28 = vadd.f32 %v5723_v25, %v5722_v36 }
 0x3d6   : > { %v5725_v22 = vrot.slane %v5724_v28, 4 }
 0x3d8   : > { %v5726_v30 = vadd.f32 %v5725_v22, %v5724_v28 }
 0x3da   : > { %v5727_v59 = vrot.slane %v5726_v30, 2 }
 0x3dc   : > { %v5728_v23 = vadd.f32 %v5727_v59, %v5726_v30  ;;  %v6505_v59 = vld [vmem:[#allocation3 + $0xbc] sm:$0x1] }
 0x3de   : > { %v5729_v51 = vrot.slane %v5728_v23, 1 }
 0x3e0   : > { %v5730_v54 = vadd.f32 %v5729_v51, %v5728_v23 }
 0x3e2   : > { %v5731_v40 = vmul.f32 0.00390625, %v5730_v54 }
 0x3e4   : > { %v5732_v50 = vadd.f32 1e-05, %v5731_v40 }
 0x3e6   : > { %16777 = vrsqrt.f32 %v5732_v50 }
 0x3f0   : > { %v16778_v38 = vpop.eup %16777 }
 0x3f1   : > { %v5762_v57 = vmul.f32 %v16778_v38, %v18920_v61  ;;  %v5763_v7 = vmul.f32 %v16778_v38, %v18922_v10  ;;  %v5734_v21 = vmul.f32 %v16778_v38, %v18840_v34  ;;  %v5735_v8 = vmul.f32 %v16778_v38, %v18843_v35 }
 0x3f2   : > { %v5736_v46 = vmul.f32 %v16778_v38, %v18846_v60  ;;  %v5737_v41 = vmul.f32 %v16778_v38, %v18849_v14  ;;  %v5738_v39 = vmul.f32 %v16778_v38, %v18852_v42  ;;  %v5739_v36 = vmul.f32 %v16778_v38, %v18855_v29 }
 0x3f3   : > { %v5801_v25 = vmul.f32 %v19046_v37, %v5762_v57  ;;  %v5802_v61 = vmul.f32 %v19046_v37, %v5763_v7  ;;  %v5740_v10 = vmul.f32 %v16778_v38, %v18858_v56  ;;  %v5741_v34 = vmul.f32 %v16778_v38, %v18861_v12 }
 0x3f4   : > { %v5742_v35 = vmul.f32 %v16778_v38, %v18864_v18  ;;  %v5743_v58 = vmul.f32 %v16778_v38, %v18867_v52  ;;  %v5744_v60 = vmul.f32 %v16778_v38, %v18870_v27  ;;  %v5745_v14 = vmul.f32 %v16778_v38, %v18873_v53 }
 0x3f5   : > { %v5840_v42 = vadd.f32 %v19052_v26, %v5801_v25  ;;  %v5841_v29 = vadd.f32 %v19052_v26, %v5802_v61  ;;  %v5746_v3 = vmul.f32 %v16778_v38, %v18876_v0  ;;  %v5747_v11 = vmul.f32 %v16778_v38, %v18879_v2 }
 0x3f6   : > { %v5748_v56 = vmul.f32 %v16778_v38, %v18882_v43  ;;  %v5749_v12 = vmul.f32 %v16778_v38, %v18885_v47  ;;  %v5750_v18 = vmul.f32 %v16778_v38, %v18888_v9  ;;  %v5751_v52 = vmul.f32 %v16778_v38, %v18891_v4 }
 0x3f7   : > { %v5872_v28 = vmax.f32 %v5840_v42, 0.0  ;;  %v5873_v27 = vmax.f32 %v5841_v29, 0.0  ;;  %v5752_v53 = vmul.f32 %v16778_v38, %v18894_v5  ;;  %v5753_v63 = vmul.f32 %v16778_v38, %v18897_v45 }
 0x3f8   : > { %v5754_v20 = vmul.f32 %v16778_v38, %v18900_v17  ;;  %v5755_v0 = vmul.f32 %v16778_v38, %v18903_v62  ;;  %v5756_v2 = vmul.f32 %v16778_v38, %v18906_v48  ;;  %v5757_v43 = vmul.f32 %v16778_v38, %v18909_v24 }
 0x3f9   : > { %v19080_v22 = vpack.c.bf16 %v5872_v28, %v5872_v28  ;;  %v15071_v47 = vpack.c.bf16 %v5873_v27, %v5873_v27  ;;  %v5758_v9 = vmul.f32 %v16778_v38, %v18911_v1  ;;  %v5759_v4 = vmul.f32 %v16778_v38, %v18913_v49 }
 0x3fa   : > { %v5760_v6 = vmul.f32 %v16778_v38, %v18916_v19  ;;  %v5761_v5 = vmul.f32 %v16778_v38, %v18918_v31  ;;  %v5764_v45 = vmul.f32 %v16778_v38, %v18924_v55  ;;  %v5765_v17 = vmul.f32 %v16778_v38, %v18926_v15 }
 0x3fb   : > { %v6320_v62 = vshrl.u32 %v19080_v22, 16  ;;  %v6328_v48 = vshrl.u32 %v15071_v47, 16  ;;  %v6331_v13 = vshll.u32 %v15071_v47, 16  ;;  %v6323_v24 = vshll.u32 %v19080_v22, 16 }
 0x3fc   : > { %v5773_v30 = vmul.f32 %v19046_v37, %v5734_v21  ;;  %v5774_v1 = vmul.f32 %v19046_v37, %v5735_v8  ;;  %v5775_v49 = vmul.f32 %v19046_v37, %v5736_v46  ;;  %v5776_v19 = vmul.f32 %v19046_v37, %v5737_v41 }
 0x3fd   : > { %v19094_v16 = vrot.slane %v6320_v62, 7  ;;  %v6330_v31 = vrot.slane %v6328_v48, 7  ;;  %v5777_v55 = vmul.f32 %v19046_v37, %v5738_v39  ;;  %v5778_v15 = vmul.f32 %v19046_v37, %v5739_v36  ;;  %v6501_v39 = vld [vmem:[#allocation3 + $0xb4] sm:$0xf] }
 0x3fe   : > { %v5779_v23 = vmul.f32 %v19046_v37, %v5740_v10  ;;  %v5780_v51 = vmul.f32 %v19046_v37, %v5741_v34  ;;  %v5781_v54 = vmul.f32 %v19046_v37, %v5742_v35  ;;  %v5782_v40 = vmul.f32 %v19046_v37, %v5743_v58 }
 0x3ff   : > { %v6326_v50 = vrot.slane %v19094_v16, 4  ;;  %v6333_v38 = vor.u32 %v6331_v13, %v6330_v31  ;;  %v6335_v57 = vrot.slane %v6330_v31, 4  ;;  %v5783_v7 = vmul.f32 %v19046_v37, %v5744_v60 }
 0x400   : > { %v5784_v21 = vmul.f32 %v19046_v37, %v5745_v14  ;;  %v5785_v8 = vmul.f32 %v19046_v37, %v5746_v3  ;;  %v5786_v46 = vmul.f32 %v19046_v37, %v5747_v11  ;;  %v5787_v41 = vmul.f32 %v19046_v37, %v5748_v56 }
 0x401   : > { %v6334_v36 = vsel %vm16969_vm14, %v6326_v50, %v6333_v38  ;;  %v6506_v25 = vsel %vm18645_vm5, %v6335_v57, %v6505_v59  ;;  %v5788_v61 = vmul.f32 %v19046_v37, %v5749_v12  ;;  %v5789_v10 = vmul.f32 %v19046_v37, %v5750_v18 }
 0x402   : > { %6504 = vst.msk [vmem:[#allocation3 + $0xb8] sm:$0xf] %vm5876_vm6, %v6334_v36  ;;  %6507 = vst [vmem:[#allocation3 + $0xbc] sm:$0x1] %v6506_v25  ;;  %v5790_v34 = vmul.f32 %v19046_v37, %v5751_v52  ;;  %v5791_v35 = vmul.f32 %v19046_v37, %v5752_v53  ;;  %v5792_v58 = vmul.f32 %v19046_v37, %v5753_v63 }
 0x403   : > { %v5793_v60 = vmul.f32 %v19046_v37, %v5754_v20  ;;  %v5794_v14 = vmul.f32 %v19046_v37, %v5755_v0  ;;  %v5795_v42 = vmul.f32 %v19046_v37, %v5756_v2  ;;  %v5796_v29 = vmul.f32 %v19046_v37, %v5757_v43 }
 0x404   : > { %v5797_v3 = vmul.f32 %v19046_v37, %v5758_v9  ;;  %v5798_v11 = vmul.f32 %v19046_v37, %v5759_v4  ;;  %v5799_v56 = vmul.f32 %v19046_v37, %v5760_v6  ;;  %v5800_v12 = vmul.f32 %v19046_v37, %v5761_v5 }
 0x405   : > { %v5803_v18 = vmul.f32 %v19046_v37, %v5764_v45  ;;  %v5804_v52 = vmul.f32 %v19046_v37, %v5765_v17  ;;  %v5812_v28 = vadd.f32 %v19052_v26, %v5773_v30  ;;  %v5813_v27 = vadd.f32 %v19052_v26, %v5774_v1 }
 0x406   : > { %v5814_v53 = vadd.f32 %v19052_v26, %v5775_v49  ;;  %v5815_v63 = vadd.f32 %v19052_v26, %v5776_v19  ;;  %v5816_v20 = vadd.f32 %v19052_v26, %v5777_v55  ;;  %v5817_v0 = vadd.f32 %v19052_v26, %v5778_v15 }
 0x407   : > { %v5818_v2 = vadd.f32 %v19052_v26, %v5779_v23  ;;  %v5819_v43 = vadd.f32 %v19052_v26, %v5780_v51  ;;  %v5820_v47 = vadd.f32 %v19052_v26, %v5781_v54  ;;  %v5821_v37 = vadd.f32 %v19052_v26, %v5782_v40 }
 0x408   : > { %v5822_v9 = vadd.f32 %v19052_v26, %v5783_v7  ;;  %v5823_v4 = vadd.f32 %v19052_v26, %v5784_v21  ;;  %v5824_v6 = vadd.f32 %v19052_v26, %v5785_v8  ;;  %v5825_v5 = vadd.f32 %v19052_v26, %v5786_v46 }
 0x409   : > { %v5826_v45 = vadd.f32 %v19052_v26, %v5787_v41  ;;  %v5827_v17 = vadd.f32 %v19052_v26, %v5788_v61  ;;  %v5828_v62 = vadd.f32 %v19052_v26, %v5789_v10  ;;  %v5829_v48 = vadd.f32 %v19052_v26, %v5790_v34 }
 0x40a   : > { %v5830_v13 = vadd.f32 %v19052_v26, %v5791_v35  ;;  %v5831_v30 = vadd.f32 %v19052_v26, %v5792_v58  ;;  %v5832_v1 = vadd.f32 %v19052_v26, %v5793_v60  ;;  %v5833_v49 = vadd.f32 %v19052_v26, %v5794_v14 }
 0x40b   : > { %v5834_v19 = vadd.f32 %v19052_v26, %v5795_v42  ;;  %v5835_v31 = vadd.f32 %v19052_v26, %v5796_v29  ;;  %v5836_v55 = vadd.f32 %v19052_v26, %v5797_v3  ;;  %v5837_v15 = vadd.f32 %v19052_v26, %v5798_v11 }
 0x40c   : > { %v5838_v59 = vadd.f32 %v19052_v26, %v5799_v56  ;;  %v5839_v23 = vadd.f32 %v19052_v26, %v5800_v12  ;;  %v5842_v51 = vadd.f32 %v19052_v26, %v5803_v18  ;;  %v5843_v54 = vadd.f32 %v19052_v26, %v5804_v52 }
 0x40d   : > { %v5844_v40 = vmax.f32 %v5812_v28, 0.0  ;;  %v5845_v50 = vmax.f32 %v5813_v27, 0.0  ;;  %v5846_v38 = vmax.f32 %v5814_v53, 0.0  ;;  %v5847_v57 = vmax.f32 %v5815_v63, 0.0 }
 0x40e   : > { %v5848_v7 = vmax.f32 %v5816_v20, 0.0  ;;  %v5849_v21 = vmax.f32 %v5817_v0, 0.0  ;;  %v5850_v8 = vmax.f32 %v5818_v2, 0.0  ;;  %v5851_v46 = vmax.f32 %v5819_v43, 0.0 }
 0x40f   : > { %v5852_v41 = vmax.f32 %v5820_v47, 0.0  ;;  %v5853_v36 = vmax.f32 %v5821_v37, 0.0  ;;  %v5854_v25 = vmax.f32 %v5822_v9, 0.0  ;;  %v5855_v61 = vmax.f32 %v5823_v4, 0.0 }
 0x410   : > { %v5856_v10 = vmax.f32 %v5824_v6, 0.0  ;;  %v5857_v34 = vmax.f32 %v5825_v5, 0.0  ;;  %v5858_v35 = vmax.f32 %v5826_v45, 0.0  ;;  %v5859_v58 = vmax.f32 %v5827_v17, 0.0 }
 0x411   : > { %v5860_v60 = vmax.f32 %v5828_v62, 0.0  ;;  %v5861_v14 = vmax.f32 %v5829_v48, 0.0  ;;  %v5862_v42 = vmax.f32 %v5830_v13, 0.0  ;;  %v5863_v26 = vmax.f32 %v5831_v30, 0.0 }
 0x412   : > { %v5864_v29 = vmax.f32 %v5832_v1, 0.0  ;;  %v5865_v3 = vmax.f32 %v5833_v49, 0.0  ;;  %v5866_v11 = vmax.f32 %v5834_v19, 0.0  ;;  %v5867_v56 = vmax.f32 %v5835_v31, 0.0 }
 0x413   : > { %v5868_v12 = vmax.f32 %v5836_v55, 0.0  ;;  %v5869_v18 = vmax.f32 %v5837_v15, 0.0  ;;  %v5870_v52 = vmax.f32 %v5838_v59, 0.0  ;;  %v5871_v28 = vmax.f32 %v5839_v23, 0.0 }
 0x414   : > { %v5874_v27 = vmax.f32 %v5842_v51, 0.0  ;;  %v5875_v53 = vmax.f32 %v5843_v54, 0.0  ;;  %v15042_v63 = vpack.c.bf16 %v5844_v40, %v5844_v40  ;;  %v15043_v20 = vpack.c.bf16 %v5845_v50, %v5845_v50 }
 0x415   : > { %v15044_v0 = vpack.c.bf16 %v5846_v38, %v5846_v38  ;;  %v15045_v2 = vpack.c.bf16 %v5847_v57, %v5847_v57  ;;  %v15046_v43 = vpack.c.bf16 %v5848_v7, %v5848_v7  ;;  %v15047_v47 = vpack.c.bf16 %v5849_v21, %v5849_v21 }
 0x416   : > { %v19158_v37 = vpack.c.bf16 %v5850_v8, %v5850_v8  ;;  %v19160_v9 = vpack.c.bf16 %v5851_v46, %v5851_v46  ;;  %v19162_v4 = vpack.c.bf16 %v5852_v41, %v5852_v41  ;;  %v19164_v6 = vpack.c.bf16 %v5853_v36, %v5853_v36 }
 0x417   : > { %v19166_v5 = vpack.c.bf16 %v5854_v25, %v5854_v25  ;;  %v19168_v45 = vpack.c.bf16 %v5855_v61, %v5855_v61  ;;  %v19170_v17 = vpack.c.bf16 %v5856_v10, %v5856_v10  ;;  %v19172_v62 = vpack.c.bf16 %v5857_v34, %v5857_v34 }
 0x418   : > { %v19174_v48 = vpack.c.bf16 %v5858_v35, %v5858_v35  ;;  %v19176_v13 = vpack.c.bf16 %v5859_v58, %v5859_v58  ;;  %v19178_v30 = vpack.c.bf16 %v5860_v60, %v5860_v60  ;;  %v19180_v1 = vpack.c.bf16 %v5861_v14, %v5861_v14 }
 0x419   : > { %v19182_v49 = vpack.c.bf16 %v5862_v42, %v5862_v42  ;;  %v19184_v19 = vpack.c.bf16 %v5863_v26, %v5863_v26  ;;  %v19186_v31 = vpack.c.bf16 %v5864_v29, %v5864_v29  ;;  %v19188_v55 = vpack.c.bf16 %v5865_v3, %v5865_v3 }
 0x41a   : > { %v19190_v15 = vpack.c.bf16 %v5866_v11, %v5866_v11  ;;  %v19192_v59 = vpack.c.bf16 %v5867_v56, %v5867_v56  ;;  %v19194_v23 = vpack.c.bf16 %v5868_v12, %v5868_v12  ;;  %v19196_v51 = vpack.c.bf16 %v5869_v18, %v5869_v18 }
 0x41b   : > { %v19198_v54 = vpack.c.bf16 %v5870_v52, %v5870_v52  ;;  %v19200_v40 = vpack.c.bf16 %v5871_v28, %v5871_v28  ;;  %v19202_v50 = vpack.c.bf16 %v5874_v27, %v5874_v27  ;;  %v19204_v38 = vpack.c.bf16 %v5875_v53, %v5875_v53 }
 0x41c   : > { %v6082_v57 = vshrl.u32 %v15042_v63, 16  ;;  %v6085_v7 = vshll.u32 %v15042_v63, 16  ;;  %v6090_v21 = vshrl.u32 %v15043_v20, 16  ;;  %v6093_v8 = vshll.u32 %v15043_v20, 16 }
 0x41d   : > { %v6099_v46 = vshrl.u32 %v15044_v0, 16  ;;  %v6102_v36 = vshll.u32 %v15044_v0, 16  ;;  %v6107_v25 = vshrl.u32 %v15045_v2, 16  ;;  %v6110_v61 = vshll.u32 %v15045_v2, 16 }
 0x41e   : > { %v6084_v41 = vrot.slane %v6082_v57, 7  ;;  %v19206_v10 = vrot.slane %v6090_v21, 7  ;;  %v6116_v35 = vshrl.u32 %v15046_v43, 16  ;;  %v6119_v58 = vshll.u32 %v15046_v43, 16 }
 0x41f   : > { %v6101_v34 = vrot.slane %v6099_v46, 7  ;;  %v19210_v42 = vrot.slane %v6107_v25, 7  ;;  %v6124_v26 = vshrl.u32 %v15047_v47, 16  ;;  %v6127_v53 = vshll.u32 %v15047_v47, 16 }
 0x420   : > { %v19208_v60 = vor.u32 %v6085_v7, %v6084_v41  ;;  %v6088_v14 = vrot.slane %v6084_v41, 4  ;;  %v6095_v29 = vor.u32 %v6093_v8, %v19206_v10  ;;  %v6097_v3 = vrot.slane %v19206_v10, 4 }
 0x421   : > { %v19214_v11 = vor.u32 %v6102_v36, %v6101_v34  ;;  %v6105_v56 = vrot.slane %v6101_v34, 4  ;;  %v6112_v12 = vor.u32 %v6110_v61, %v19210_v42  ;;  %v6118_v52 = vrot.slane %v6116_v35, 7 }
 0x422   : > { %v19218_v28 = vrot.slane %v6124_v26, 7  ;;  %v6096_v27 = vsel %vm16969_vm14, %v6088_v14, %v6095_v29  ;;  %v6133_v63 = vshrl.u32 %v19158_v37, 16  ;;  %v6136_v20 = vshll.u32 %v19158_v37, 16 }
 0x423   : > { %v6113_v0 = vsel %vm16969_vm14, %v6105_v56, %v6112_v12  ;;  %v19226_v2 = vor.u32 %v6119_v58, %v6118_v52  ;;  %v6122_v43 = vrot.slane %v6118_v52, 4  ;;  %6406 = vst.msk [vmem:[#allocation3 + $0x10] sm:$0xf] %vm5876_vm6, %v6096_v27  ;;  %v6141_v8 = vshrl.u32 %v19160_v9, 16 }
 0x424   : > { %v6129_v7 = vor.u32 %v6127_v53, %v19218_v28  ;;  %v6135_v21 = vrot.slane %v6133_v63, 7  ;;  %v6144_v47 = vshll.u32 %v19160_v9, 16  ;;  %6413 = vst.msk [vmem:[#allocation3 + $0x1c] sm:$0xf] %vm5876_vm6, %v6113_v0  ;;  %v6150_v37 = vshrl.u32 %v19162_v4, 16 }
 0x425   : > { %v6153_v46 = vshll.u32 %v19162_v4, 16  ;;  %v6158_v41 = vshrl.u32 %v19164_v6, 16  ;;  %v6161_v36 = vshll.u32 %v19164_v6, 16  ;;  %v19242_v35 = vrot.slane %v6141_v8, 7  ;;  %v6435_v53 = vld [vmem:[#allocation3 + $0x44] sm:$0x1] }
 0x426   : > { %v6130_v25 = vsel %vm16969_vm14, %v6122_v43, %v6129_v7  ;;  %v19240_v61 = vor.u32 %v6136_v20, %v6135_v21  ;;  %v6139_v34 = vrot.slane %v6135_v21, 4  ;;  %v6152_v58 = vrot.slane %v6150_v37, 7  ;;  %v6445_v6 = vld [vmem:[#allocation3 + $0x54] sm:$0xf] }
 0x427   : > { %v19244_v9 = vrot.slane %v6158_v41, 7  ;;  %v6167_v14 = vshrl.u32 %v19166_v5, 16  ;;  %v6170_v26 = vshll.u32 %v19166_v5, 16  ;;  %6420 = vst.msk [vmem:[#allocation3 + $0x28] sm:$0xf] %vm5876_vm6, %v6130_v25  ;;  %v6146_v4 = vor.u32 %v6144_v47, %v19242_v35 }
 0x428   : > { %v6175_v29 = vshrl.u32 %v19168_v45, 16  ;;  %v6178_v56 = vshll.u32 %v19168_v45, 16  ;;  %v19253_v12 = vor.u32 %v6153_v46, %v6152_v58  ;;  %v6156_v52 = vrot.slane %v6152_v58, 4  ;;  %v6438_v46 = vld [vmem:[#allocation3 + $0x48] sm:$0xf] }
 0x429   : > { %v6163_v27 = vor.u32 %v6161_v36, %v19244_v9  ;;  %v6147_v5 = vsel %vm16969_vm14, %v6139_v34, %v6146_v4  ;;  %v6169_v63 = vrot.slane %v6167_v14, 7  ;;  %v6184_v0 = vshrl.u32 %v19170_v17, 16 }
 0x42a   : > { %v19259_v20 = vrot.slane %v6175_v29, 7  ;;  %v6187_v45 = vshll.u32 %v19170_v17, 16  ;;  %v6192_v7 = vshrl.u32 %v19172_v62, 16  ;;  %v6195_v21 = vshll.u32 %v19172_v62, 16  ;;  %6427 = vst.msk [vmem:[#allocation3 + $0x34] sm:$0xf] %vm5876_vm6, %v6147_v5 }
 0x42b   : > { %v6164_v43 = vsel %vm16969_vm14, %v6156_v52, %v6163_v27  ;;  %v19268_v8 = vor.u32 %v6170_v26, %v6169_v63  ;;  %v6173_v47 = vrot.slane %v6169_v63, 4  ;;  %v6186_v41 = vrot.slane %v6184_v0, 7 }
 0x42c   : > { %v6180_v37 = vor.u32 %v6178_v56, %v19259_v20  ;;  %6434 = vst.msk [vmem:[#allocation3 + $0x40] sm:$0xf] %vm5876_vm6, %v6164_v43  ;;  %v19273_v36 = vrot.slane %v6192_v7, 7  ;;  %v6201_v17 = vshrl.u32 %v19174_v48, 16  ;;  %v6204_v25 = vshll.u32 %v19174_v48, 16 }
 0x42d   : > { %v6209_v34 = vshrl.u32 %v19176_v13, 16  ;;  %v6212_v58 = vshll.u32 %v19176_v13, 16  ;;  %v6218_v14 = vshrl.u32 %v19178_v30, 16  ;;  %v19282_v26 = vor.u32 %v6187_v45, %v6186_v41 }
 0x42e   : > { %v6181_v62 = vsel %vm16969_vm14, %v6173_v47, %v6180_v37  ;;  %v6190_v4 = vrot.slane %v6186_v41, 4  ;;  %v6197_v29 = vor.u32 %v6195_v21, %v19273_v36  ;;  %v6203_v52 = vrot.slane %v6201_v17, 7 }
 0x42f   : > { %6441 = vst.msk [vmem:[#allocation3 + $0x4c] sm:$0xf] %vm5876_vm6, %v6181_v62  ;;  %v19287_v48 = vrot.slane %v6209_v34, 7  ;;  %v6220_v27 = vrot.slane %v6218_v14, 7  ;;  %v6221_v5 = vshll.u32 %v19178_v30, 16  ;;  %v6226_v63 = vshrl.u32 %v19180_v1, 16 }
 0x430   : > { %v6198_v13 = vsel %vm16969_vm14, %v6190_v4, %v6197_v29  ;;  %v6229_v0 = vshll.u32 %v19180_v1, 16  ;;  %v6235_v43 = vshrl.u32 %v19182_v49, 16  ;;  %v19295_v45 = vor.u32 %v6204_v25, %v6203_v52  ;;  %v6431_v14 = vld [vmem:[#allocation3 + $0x3c] sm:$0xf] }
 0x431   : > { %v6207_v7 = vrot.slane %v6203_v52, 4  ;;  %v6214_v21 = vor.u32 %v6212_v58, %v19287_v48  ;;  %6448 = vst.msk [vmem:[#allocation3 + $0x58] sm:$0xf] %vm5876_vm6, %v6198_v13  ;;  %v19300_v37 = vor.u32 %v6221_v5, %v6220_v27  ;;  %v6224_v30 = vrot.slane %v6220_v27, 4 }
 0x432   : > { %v19302_v41 = vrot.slane %v6226_v63, 7  ;;  %v6237_v17 = vrot.slane %v6235_v43, 7  ;;  %v6238_v62 = vshll.u32 %v19182_v49, 16  ;;  %v6243_v25 = vshrl.u32 %v19184_v19, 16 }
 0x433   : > { %v6215_v1 = vsel %vm16969_vm14, %v6207_v7, %v6214_v21  ;;  %v6246_v34 = vshll.u32 %v19184_v19, 16  ;;  %v6252_v29 = vshrl.u32 %v19186_v31, 16  ;;  %v6255_v5 = vshll.u32 %v19186_v31, 16 }
 0x434   : > { %v6231_v58 = vor.u32 %v6229_v0, %v19302_v41  ;;  %v6241_v4 = vrot.slane %v6237_v17, 4  ;;  %6455 = vst.msk [vmem:[#allocation3 + $0x64] sm:$0xf] %vm5876_vm6, %v6215_v1  ;;  %v19313_v52 = vor.u32 %v6238_v62, %v6237_v17  ;;  %v19315_v27 = vrot.slane %v6243_v25, 7 }
 0x435   : > { %v6260_v49 = vshrl.u32 %v19188_v55, 16  ;;  %v6254_v13 = vrot.slane %v6252_v29, 7  ;;  %v6263_v63 = vshll.u32 %v19188_v55, 16  ;;  %v6269_v0 = vshrl.u32 %v19190_v15, 16 }
 0x436   : > { %v6232_v19 = vsel %vm16969_vm14, %v6224_v30, %v6231_v58  ;;  %v6248_v43 = vor.u32 %v6246_v34, %v19315_v27  ;;  %v6272_v17 = vshll.u32 %v19190_v15, 16  ;;  %v6277_v30 = vshrl.u32 %v19192_v59, 16  ;;  %v6407_v34 = vld [vmem:[#allocation3 + $0x14] sm:$0x1] }
 0x437   : > { %v19325_v21 = vrot.slane %v6260_v49, 7  ;;  %6462 = vst.msk [vmem:[#allocation3 + $0x70] sm:$0xf] %vm5876_vm6, %v6232_v19  ;;  %v19329_v31 = vor.u32 %v6255_v5, %v6254_v13  ;;  %v6258_v1 = vrot.slane %v6254_v13, 4  ;;  %v6271_v62 = vrot.slane %v6269_v0, 7 }
 0x438   : > { %v6249_v55 = vsel %vm16969_vm14, %v6241_v4, %v6248_v43  ;;  %v6280_v58 = vshll.u32 %v19192_v59, 16  ;;  %v19339_v49 = vrot.slane %v6277_v30, 7  ;;  %v6286_v5 = vshrl.u32 %v19194_v23, 16 }
 0x439   : > { %v6265_v25 = vor.u32 %v6263_v63, %v19325_v21  ;;  %v19337_v29 = vor.u32 %v6272_v17, %v6271_v62  ;;  %v6275_v15 = vrot.slane %v6271_v62, 4  ;;  %6469 = vst.msk [vmem:[#allocation3 + $0x7c] sm:$0xf] %vm5876_vm6, %v6249_v55  ;;  %v6289_v4 = vshll.u32 %v19194_v23, 16  ;;  %v6403_v62 = vld [vmem:[#allocation3 + $0xc] sm:$0xf] }
 0x43a   : > { %v6294_v13 = vshrl.u32 %v19196_v51, 16  ;;  %v6297_v63 = vshll.u32 %v19196_v51, 16  ;;  %v6282_v59 = vor.u32 %v6280_v58, %v19339_v49  ;;  %v6288_v43 = vrot.slane %v6286_v5, 7  ;;  %v6414_v51 = vld [vmem:[#allocation3 + $0x20] sm:$0x1] }
 0x43b   : > { %v6266_v19 = vsel %vm16969_vm14, %v6258_v1, %v6265_v25  ;;  %v6303_v17 = vshrl.u32 %v19198_v54, 16  ;;  %v6306_v1 = vshll.u32 %v19198_v54, 16  ;;  %v6311_v23 = vshrl.u32 %v19200_v40, 16  ;;  %v6410_v25 = vld [vmem:[#allocation3 + $0x18] sm:$0xf] }
 0x43c   : > { %6476 = vst.msk [vmem:[#allocation3 + $0x88] sm:$0xf] %vm5876_vm6, %v6266_v19  ;;  %v19352_v30 = vrot.slane %v6294_v13, 7  ;;  %v6314_v55 = vshll.u32 %v19200_v40, 16  ;;  %v6283_v58 = vsel %vm16969_vm14, %v6275_v15, %v6282_v59  ;;  %v19359_v5 = vor.u32 %v6289_v4, %v6288_v43  ;;  %v6417_v54 = vld [vmem:[#allocation3 + $0x24] sm:$0xf] }
 0x43d   : > { %v6292_v0 = vrot.slane %v6288_v43, 4  ;;  %v6305_v7 = vrot.slane %v6303_v17, 7  ;;  %v6421_v13 = vld [vmem:[#allocation3 + $0x2c] sm:$0x1]  ;;  %v19369_v47 = vrot.slane %v6311_v23, 7  ;;  %v19374_v15 = vor.u32 %v6323_v24, %v19094_v16 }
 0x43e   : > { %v6299_v40 = vor.u32 %v6297_v63, %v19352_v30  ;;  %6483 = vst.msk [vmem:[#allocation3 + $0x94] sm:$0xf] %vm5876_vm6, %v6283_v58  ;;  %v6424_v4 = vld [vmem:[#allocation3 + $0x30] sm:$0xf]  ;;  %v6428_v59 = vld [vmem:[#allocation3 + $0x38] sm:$0x1] }
 0x43f   : > { %22470 = vst [vmem:[#allocation18_spill] sm:$0xff] %v19374_v15  ;;  %v19377_v43 = vor.u32 %v6306_v1, %v6305_v7  ;;  %v6309_v17 = vrot.slane %v6305_v7, 4  ;;  %v6337_v56 = vshrl.u32 %v19202_v50, 16  ;;  %v6340_v63 = vshll.u32 %v19202_v50, 16  ;;  %v6442_v23 = vld [vmem:[#allocation3 + $0x50] sm:$0x1] }
 0x440   : > { %v6300_v22 = vsel %vm16969_vm14, %v6292_v0, %v6299_v40  ;;  %v6316_v24 = vor.u32 %v6314_v55, %v19369_v47  ;;  %v6345_v58 = vshrl.u32 %v19204_v38, 16  ;;  %v6452_v1 = vld [vmem:[#allocation3 + $0x60] sm:$0xf]  ;;  %v6449_v7 = vld [vmem:[#allocation3 + $0x5c] sm:$0x1]  ;;  %v6348_v18 = vshll.u32 %v19204_v38, 16 }
 0x441   : > { %v6339_v57 = vrot.slane %v6337_v56, 7  ;;  %v6404_v50 = vsel %vm19363_vm10, %v19208_v60, %v6403_v62  ;;  %v6408_v0 = vsel %vm18645_vm5, %v6097_v3, %v6407_v34  ;;  %6490 = vst.msk [vmem:[#allocation3 + $0xa0] sm:$0xf] %vm5876_vm6, %v6300_v22  ;;  %v6456_v55 = vld [vmem:[#allocation3 + $0x68] sm:$0x1]  ;;  %v6411_v38 = vsel %vm19363_vm10, %v19214_v11, %v6410_v25 }
 0x442   : > { %v6466_v40 = vld [vmem:[#allocation3 + $0x78] sm:$0xf]  ;;  %v6459_v16 = vld [vmem:[#allocation3 + $0x6c] sm:$0xf]  ;;  %v6317_v56 = vsel %vm16969_vm14, %v6309_v17, %v6316_v24  ;;  %v19397_v44 = vrot.slane %v6345_v58, 7  ;;  %v22471_v10 = vrot.slane %v19210_v42, 4  ;;  %v6418_v17 = vsel %vm19363_vm10, %v19226_v2, %v6417_v54 }
 0x443   : > { %6405 = vst [vmem:[#allocation3 + $0xc] sm:$0xf] %v6404_v50  ;;  %6409 = vst [vmem:[#allocation3 + $0x14] sm:$0x1] %v6408_v0  ;;  %v6470_v3 = vld [vmem:[#allocation3 + $0x80] sm:$0x1]  ;;  %v19406_v22 = vor.u32 %v6340_v63, %v6339_v57 }
 0x444   : > { %v6415_v60 = vsel %vm18645_vm5, %v22471_v10, %v6414_v51  ;;  %v6480_v34 = vld [vmem:[#allocation3 + $0x90] sm:$0xf]  ;;  %v6473_v62 = vld [vmem:[#allocation3 + $0x84] sm:$0xf]  ;;  %v6343_v15 = vrot.slane %v6339_v57, 4  ;;  %v22472_v24 = vrot.slane %v19218_v28, 4  ;;  %v6350_v51 = vor.u32 %v6348_v18, %v19397_v44 }
 0x445   : > { %6412 = vst [vmem:[#allocation3 + $0x18] sm:$0xf] %v6411_v38  ;;  %6416 = vst [vmem:[#allocation3 + $0x20] sm:$0x1] %v6415_v60  ;;  %v6484_v11 = vld [vmem:[#allocation3 + $0x98] sm:$0x1]  ;;  %v6425_v57 = vsel %vm19363_vm10, %v19240_v61, %v6424_v4  ;;  %v6432_v18 = vsel %vm19363_vm10, %v19253_v12, %v6431_v14  ;;  %v6439_v61 = vsel %vm19363_vm10, %v19268_v8, %v6438_v46 }
 0x446   : > { %v6422_v42 = vsel %vm18645_vm5, %v22472_v24, %v6421_v13  ;;  %6497 = vst.msk [vmem:[#allocation3 + $0xac] sm:$0xf] %vm5876_vm6, %v6317_v56  ;;  %v6477_v25 = vld [vmem:[#allocation3 + $0x8c] sm:$0x1]  ;;  %v6352_v63 = vrot.slane %v19397_v44, 4  ;;  %v22473_v2 = vrot.slane %v19242_v35, 4  ;;  %v6351_v12 = vsel %vm16969_vm14, %v6343_v15, %v6350_v51 }
 0x447   : > { %6419 = vst [vmem:[#allocation3 + $0x24] sm:$0xf] %v6418_v17  ;;  %6423 = vst [vmem:[#allocation3 + $0x2c] sm:$0x1] %v6422_v42  ;;  %v6494_v54 = vld [vmem:[#allocation3 + $0xa8] sm:$0xf]  ;;  %v6453_v8 = vsel %vm19363_vm10, %v19295_v45, %v6452_v1 }
 0x448   : > { %v6429_v28 = vsel %vm18645_vm5, %v22473_v2, %v6428_v59  ;;  %6426 = vst [vmem:[#allocation3 + $0x30] sm:$0xf] %v6425_v57  ;;  %v22474_v44 = vrot.slane %v19244_v9, 4  ;;  %v22475_v35 = vrot.slane %v19259_v20, 4  ;;  %v6487_v59 = vld [vmem:[#allocation3 + $0x9c] sm:$0xf]  ;;  %v6446_v9 = vsel %vm19363_vm10, %v19282_v26, %v6445_v6 }
 0x449   : > { %6430 = vst [vmem:[#allocation3 + $0x38] sm:$0x1] %v6429_v28  ;;  %v6498_v58 = vld [vmem:[#allocation3 + $0xb0] sm:$0x1]  ;;  %v6491_v50 = vld [vmem:[#allocation3 + $0xa4] sm:$0x1]  ;;  %v6495_v0 = vsel %vm19363_vm10, %v19377_v43, %v6494_v54 }
 0x44a   : > { %v6436_v13 = vsel %vm18645_vm5, %v22474_v44, %v6435_v53  ;;  %v6443_v4 = vsel %vm18645_vm5, %v22475_v35, %v6442_v23  ;;  %6433 = vst [vmem:[#allocation3 + $0x3c] sm:$0xf] %v6432_v18  ;;  %6440 = vst [vmem:[#allocation3 + $0x48] sm:$0xf] %v6439_v61  ;;  %v22476_v53 = vrot.slane %v19273_v36, 4  ;;  %v22477_v15 = vrot.slane %v19287_v48, 4 }
 0x44b   : > { %6437 = vst [vmem:[#allocation3 + $0x44] sm:$0x1] %v6436_v13  ;;  %6444 = vst [vmem:[#allocation3 + $0x50] sm:$0x1] %v6443_v4  ;;  %v6508_v46 = vld [vmem:[#allocation3 + $0xc0] sm:$0xf]  ;;  %v6460_v36 = vsel %vm19363_vm10, %v19300_v37, %v6459_v16  ;;  %v6467_v23 = vsel %vm19363_vm10, %v19313_v52, %v6466_v40  ;;  %v6481_v16 = vsel %vm19363_vm10, %v19337_v29, %v6480_v34 }
 0x44c   : > { %v6450_v20 = vsel %vm18645_vm5, %v22476_v53, %v6449_v7  ;;  %v6512_v14 = vld [vmem:[#allocation3 + $0xc8] sm:$0x1]  ;;  %6447 = vst [vmem:[#allocation3 + $0x54] sm:$0xf] %v6446_v9  ;;  %6454 = vst [vmem:[#allocation3 + $0x60] sm:$0xf] %v6453_v8  ;;  %v6457_v6 = vsel %vm18645_vm5, %v22477_v15, %v6456_v55  ;;  %v6509_v43 = vsel %vm19363_vm10, %v19406_v22, %v6508_v46 }
 0x44d   : > { %6451 = vst [vmem:[#allocation3 + $0x5c] sm:$0x1] %v6450_v20  ;;  %v22478_v26 = vrot.slane %v19302_v41, 4  ;;  %6511 = vst.msk [vmem:[#allocation3 + $0xc4] sm:$0xf] %vm5876_vm6, %v6351_v12  ;;  %v22479_v48 = vrot.slane %v19315_v27, 4  ;;  %v6474_v41 = vsel %vm19363_vm10, %v19329_v31, %v6473_v62  ;;  %v6513_v38 = vsel %vm18645_vm5, %v6352_v63, %v6512_v14 }
 0x44e   : > { %6458 = vst [vmem:[#allocation3 + $0x68] sm:$0x1] %v6457_v6  ;;  %6461 = vst [vmem:[#allocation3 + $0x6c] sm:$0xf] %v6460_v36  ;;  %v19480_v1 = vld [vmem:[#allocation3 + $0x10] sm:$0xf] }
 0x44f   : > { %v6464_v45 = vsel %vm18645_vm5, %v22478_v26, %v6463_v32  ;;  %6468 = vst [vmem:[#allocation3 + $0x78] sm:$0xf] %v6467_v23  ;;  %v6471_v37 = vsel %vm18645_vm5, %v22479_v48, %v6470_v3  ;;  %v22480_v32 = vrot.slane %v19325_v21, 4  ;;  %6475 = vst [vmem:[#allocation3 + $0x84] sm:$0xf] %v6474_v41  ;;  %v22481_v27 = vrot.slane %v19339_v49, 4 }
 0x450   : > { %6465 = vst [vmem:[#allocation3 + $0x74] sm:$0x1] %v6464_v45  ;;  %6472 = vst [vmem:[#allocation3 + $0x80] sm:$0x1] %v6471_v37  ;;  %v6488_v21 = vsel %vm19363_vm10, %v19359_v5, %v6487_v59  ;;  %v22482_v7 = vrot.slane %v19352_v30, 4  ;;  %v22483_v49 = vrot.slane %v19369_v47, 4 }
 0x451   : > { %v6478_v52 = vsel %vm18645_vm5, %v22480_v32, %v6477_v25  ;;  %6482 = vst [vmem:[#allocation3 + $0x90] sm:$0xf] %v6481_v16  ;;  %v6485_v31 = vsel %vm18645_vm5, %v22481_v27, %v6484_v11  ;;  %v19496_v55 = vld [vmem:[#allocation3 + $0xc] sm:$0xf]  ;;  %v6549_v40 = vld [vmem:[#allocation3 + $0x14] sm:$0x1] }
 0x452   : > { %6479 = vst [vmem:[#allocation3 + $0x8c] sm:$0x1] %v6478_v52  ;;  %v6492_v29 = vsel %vm18645_vm5, %v22482_v7, %v6491_v50  ;;  %6486 = vst [vmem:[#allocation3 + $0x98] sm:$0x1] %v6485_v31  ;;  %v6499_v5 = vsel %vm18645_vm5, %v22483_v49, %v6498_v58  ;;  %v22484_v30 = vld [vmem:[#allocation18_spill] sm:$0xff]  ;;  %v6589_v47 = vshrl.u32 %v19496_v55, 16 }
 0x453   : > { %6489 = vst [vmem:[#allocation3 + $0x9c] sm:$0xf] %v6488_v21  ;;  %6493 = vst [vmem:[#allocation3 + $0xa4] sm:$0x1] %v6492_v29  ;;  %v6502_v56 = vsel %vm19363_vm10, %v22484_v30, %v6501_v39  ;;  %v19510_v10 = vld [vmem:[#allocation3 + $0x18] sm:$0xf] }
 0x454   : > { %6496 = vst [vmem:[#allocation3 + $0xa8] sm:$0xf] %v6495_v0  ;;  %6500 = vst [vmem:[#allocation3 + $0xb0] sm:$0x1] %v6499_v5  ;;  %v6592_v60 = vshll.u32 %v19496_v55, 16  ;;  %v6598_v3 = vshll.u32 %v19480_v1, 16 }
 0x455   : > { %6503 = vst [vmem:[#allocation3 + $0xb4] sm:$0xf] %v6502_v56  ;;  %6510 = vst [vmem:[#allocation3 + $0xc0] sm:$0xf] %v6509_v43  ;;  %v6602_v34 = vshrl.u32 %v19480_v1, 16  ;;  %v6608_v19 = vshll.u32 %v6549_v40, 16 }
 0x456   : > { %6514 = vst [vmem:[#allocation3 + $0xc8] sm:$0x1] %v6513_v38  ;;  %v19516_v62 = vld [vmem:[#allocation3 + $0x1c] sm:$0xf]  ;;  %v7340_v22 = vsel %vm7046_vm9, %v16807_v33, 0  ;;  %v6613_v24 = vshrl.u32 %v19510_v10, 16 }
 0x457   : > { %v19522_v17 = vld [vmem:[#allocation3 + $0x20] sm:$0x1]  ;;  %v6616_v42 = vshll.u32 %v19510_v10, 16  ;;  %v6591_v11 = vrot.slane %v6589_v47, 4  ;;  %v6594_v25 = vrot.slane %v6592_v60, 5  ;;  %v6600_v51 = vrot.slane %v6598_v3, 5 }
 0x458   : > { %22485 = vst [vmem:[#allocation19_spill] sm:$0xff] %v19522_v17  ;;  %v6604_v63 = vrot.slane %v6602_v34, 4  ;;  %v19526_v57 = vld [vmem:[#allocation3 + $0x24] sm:$0xf]  ;;  %v6610_v2 = vrot.slane %v6608_v19, 5  ;;  %v6615_v28 = vrot.slane %v6613_v24, 4 }
 0x459   : > { %v6618_v54 = vrot.slane %v6616_v42, 5  ;;  %v6622_v18 = vshll.u32 %v19516_v62, 16  ;;  %v6595_v44 = vor.u32 %v6594_v25, %v6591_v11  ;;  %v6626_v61 = vshrl.u32 %v19516_v62, 16  ;;  %v19531_v4 = vld [vmem:[#allocation3 + $0x28] sm:$0xf] }
 0x45a   : > { %v6605_v13 = vor.u32 %v6604_v63, %v6600_v51  ;;  %v6632_v35 = vshll.u32 %v19522_v17, 16  ;;  %v6637_v50 = vshrl.u32 %v19526_v57, 16  ;;  %v6640_v12 = vshll.u32 %v19526_v57, 16  ;;  %v19535_v46 = vld [vmem:[#allocation3 + $0x2c] sm:$0x1] }
 0x45b   : > { %v6619_v59 = vor.u32 %v6618_v54, %v6615_v28  ;;  %v6624_v58 = vrot.slane %v6622_v18, 5  ;;  %v6596_v9 = vrot.slane %v6595_v44, 4  ;;  %v6628_v20 = vrot.slane %v6626_v61, 4  ;;  %v19538_v36 = vld [vmem:[#allocation3 + $0x30] sm:$0xf] }
 0x45c   : > { %v6606_v53 = vrot.slane %v6605_v13, 4  ;;  %v6634_v8 = vrot.slane %v6632_v35, 5  ;;  %v6639_v14 = vrot.slane %v6637_v50, 4  ;;  %v6642_v15 = vrot.slane %v6640_v12, 5  ;;  %v19545_v41 = vld [vmem:[#allocation3 + $0x34] sm:$0xf] }
 0x45d   : > { %v6620_v39 = vrot.slane %v6619_v59, 4  ;;  %v6646_v6 = vshll.u32 %v19531_v4, 16  ;;  %v6601_v45 = vsel %vm16963_vm13, %v6596_v9, %v6600_v51  ;;  %v6629_v48 = vor.u32 %v6628_v20, %v6624_v58  ;;  %v19552_v31 = vld [vmem:[%s22221_s4 + $0x8] sm:$0xf]  ;;  %v19555_v0 = vld [vmem:[#allocation3 + $0x38] sm:$0x1] }
 0x45e   : > { %v6611_v23 = vsel %vm16963_vm13, %v6606_v53, %v6610_v2  ;;  %v6650_v37 = vshrl.u32 %v19531_v4, 16  ;;  %v6643_v16 = vor.u32 %v6642_v15, %v6639_v14  ;;  %v6656_v29 = vshll.u32 %v19535_v46, 16  ;;  %v19562_v43 = vld [vmem:[#allocation3 + $0x3c] sm:$0xf]  ;;  %v19566_v34 = vld [vmem:[#allocation3 + $0x40] sm:$0xf] }
 0x45f   : > { %v14497_v32 = vcombine.low %v6601_v45, %v6611_v23  ;;  %v6625_v52 = vsel %vm16963_vm13, %v6620_v39, %v6624_v58  ;;  %v6648_v27 = vrot.slane %v6646_v6, 5  ;;  %v6630_v21 = vrot.slane %v6629_v48, 4  ;;  %v19573_v51 = vld [vmem:[#allocation3 + $0x44] sm:$0x1]  ;;  %v19580_v44 = vld [vmem:[#allocation3 + $0x48] sm:$0xf] }
 0x460   : > { %v6652_v7 = vrot.slane %v6650_v37, 4  ;;  %v6661_v40 = vshrl.u32 %v19538_v36, 16  ;;  %v6644_v49 = vrot.slane %v6643_v16, 4  ;;  %v6664_v5 = vshll.u32 %v19538_v36, 16  ;;  %v19584_v58 = vld [vmem:[#allocation3 + $0x4c] sm:$0xf] }
 0x461   : > { %15837 = vmatmul.mubr.msk.bf16.vlgmr.msra.gmra.mrb[4].mxu1 %vm5527_vm3, %v14497_v32  ;;  %v6670_v30 = vshll.u32 %v19545_v41, 16  ;;  %v6674_v56 = vshrl.u32 %v19545_v41, 16  ;;  %v6635_v38 = vsel %vm16963_vm13, %v6630_v21, %v6634_v8  ;;  %v6658_v60 = vrot.slane %v6656_v29, 5  ;;  %v19591_v45 = vld [vmem:[#allocation3 + $0x50] sm:$0x1] }
 0x462   : > { %15869 = vmatpush3.bf16.msra.mxu1 %v7340_v22  ;;  %v6653_v47 = vor.u32 %v6652_v7, %v6648_v27  ;;  %v6663_v3 = vrot.slane %v6661_v40, 4  ;;  %v14498_v19 = vcombine.low %v6625_v52, %v6635_v38  ;;  %v6649_v33 = vsel %vm16963_vm13, %v6644_v49, %v6648_v27  ;;  %v19595_v37 = vld [vmem:[#allocation3 + $0x54] sm:$0xf]  ;;  %v19599_v21 = vld [vmem:[#allocation3 + $0x58] sm:$0xf] }
 0x463   : > { %v6666_v24 = vrot.slane %v6664_v5, 5  ;;  %v6672_v42 = vrot.slane %v6670_v30, 5  ;;  %16676 = vmatprep.subr.msk.bf16.mxu1 %vm7046_vm9, %v19552_v31  ;;  %v6676_v25 = vrot.slane %v6674_v56, 4  ;;  %v6680_v22 = vshll.u32 %v19555_v0, 16 }
 0x464   : > { %v6654_v11 = vrot.slane %v6653_v47, 4  ;;  %v6685_v63 = vshrl.u32 %v19562_v43, 16  ;;  %15840 = vmatprep.mubr.msk.bf16.mxu1 %vm5527_vm3, %v14498_v19  ;;  %v6688_v28 = vshll.u32 %v19562_v43, 16  ;;  %v6694_v54 = vshll.u32 %v19566_v34, 16 }
 0x465   : > { %v6667_v2 = vor.u32 %v6666_v24, %v6663_v3  ;;  %v6698_v18 = vshrl.u32 %v19566_v34, 16  ;;  %v6677_v61 = vor.u32 %v6676_v25, %v6672_v42  ;;  %v6682_v35 = vrot.slane %v6680_v22, 5  ;;  %v19607_v3 = vld [vmem:[#allocation3 + $0x5c] sm:$0x1]  ;;  %v19611_v24 = vld [vmem:[#allocation3 + $0x60] sm:$0xf] }
 0x466   : > { %v6659_v13 = vsel %vm16963_vm13, %v6654_v11, %v6658_v60  ;;  %v6687_v59 = vrot.slane %v6685_v63, 4  ;;  %v6690_v9 = vrot.slane %v6688_v28, 5  ;;  %v6696_v53 = vrot.slane %v6694_v54, 5  ;;  %v19615_v63 = vld [vmem:[#allocation3 + $0x64] sm:$0xf] }
 0x467   : > { %v14499_v50 = vcombine.low %v6649_v33, %v6659_v13  ;;  %v6668_v12 = vrot.slane %v6667_v2, 4  ;;  %v6678_v20 = vrot.slane %v6677_v61, 4  ;;  %v6700_v8 = vrot.slane %v6698_v18, 4 }
 0x468   : > { %v6704_v39 = vshll.u32 %v19573_v51, 16  ;;  %v6709_v14 = vshrl.u32 %v19580_v44, 16  ;;  %v6691_v6 = vor.u32 %v6690_v9, %v6687_v59  ;;  %v6712_v23 = vshll.u32 %v19580_v44, 16  ;;  %v19623_v9 = vld [vmem:[#allocation3 + $0x68] sm:$0x1] }
 0x469   : > { %15841 = vmatmul.mubr.msk.bf16.gmra.mrb[8].mxu1 %vm5527_vm3, %v14499_v50  ;;  %v6673_v15 = vsel %vm16963_vm13, %v6668_v12, %v6672_v42  ;;  %v6718_v48 = vshll.u32 %v19584_v58, 16  ;;  %v6683_v32 = vsel %vm16963_vm13, %v6678_v20, %v6682_v35  ;;  %v6701_v52 = vor.u32 %v6700_v8, %v6696_v53  ;;  %v19627_v8 = vld [vmem:[#allocation3 + $0x6c] sm:$0xf] }
 0x46a   : > { %v6706_v16 = vrot.slane %v6704_v39, 5  ;;  %v6711_v27 = vrot.slane %v6709_v14, 4  ;;  %v14500_v7 = vcombine.low %v6673_v15, %v6683_v32  ;;  %v6692_v29 = vrot.slane %v6691_v6, 4 }
 0x46b   : > { %v6714_v40 = vrot.slane %v6712_v23, 5  ;;  %v6720_v49 = vrot.slane %v6718_v48, 5  ;;  %v6702_v5 = vrot.slane %v6701_v52, 4  ;;  %v6722_v30 = vshrl.u32 %v19584_v58, 16  ;;  %v19629_v23 = vld [vmem:[#allocation3 + $0x70] sm:$0xf] }
 0x46c   : > { %v6728_v56 = vshll.u32 %v19591_v45, 16  ;;  %v6733_v38 = vshrl.u32 %v19595_v37, 16  ;;  %15844 = vmatprep.mubr.msk.bf16.mxu1 %vm5527_vm3, %v14500_v7  ;;  %v6697_v47 = vsel %vm16963_vm13, %v6692_v29, %v6696_v53  ;;  %v6736_v19 = vshll.u32 %v19595_v37, 16 }
 0x46d   : > { %v6715_v60 = vor.u32 %v6714_v40, %v6711_v27  ;;  %v6742_v33 = vshll.u32 %v19599_v21, 16  ;;  %v6707_v42 = vsel %vm16963_vm13, %v6702_v5, %v6706_v16  ;;  %v6724_v11 = vrot.slane %v6722_v30, 4  ;;  %v19632_v27 = vld [vmem:[#allocation3 + $0x74] sm:$0x1]  ;;  %v19638_v5 = vld [vmem:[#allocation3 + $0x78] sm:$0xf] }
 0x46e   : > { %v6730_v25 = vrot.slane %v6728_v56, 5  ;;  %v6735_v22 = vrot.slane %v6733_v38, 4  ;;  %v14501_v2 = vcombine.low %v6697_v47, %v6707_v42  ;;  %v6738_v54 = vrot.slane %v6736_v19, 5  ;;  %22487 = vst [vmem:[#allocation20_spill] sm:$0xff] %v19632_v27 }
 0x46f   : > { %v6716_v28 = vrot.slane %v6715_v60, 4  ;;  %v6744_v18 = vrot.slane %v6742_v33, 5  ;;  %v6725_v13 = vor.u32 %v6724_v11, %v6720_v49  ;;  %v6746_v61 = vshrl.u32 %v19599_v21, 16  ;;  %v19643_v11 = vld [vmem:[#allocation3 + $0x7c] sm:$0xf] }
 0x470   : > { %v6752_v35 = vshll.u32 %v19607_v3, 16  ;;  %v6757_v59 = vshrl.u32 %v19611_v24, 16  ;;  %v6739_v12 = vor.u32 %v6738_v54, %v6735_v22  ;;  %v6760_v53 = vshll.u32 %v19611_v24, 16  ;;  %v19648_v54 = vld [vmem:[#allocation3 + $0x80] sm:$0x1] }
 0x471   : > { %15845 = vmatmul.mubr.msk.bf16.gmra.mrb[12].mxu1 %vm5527_vm3, %v14501_v2  ;;  %v6721_v50 = vsel %vm16963_vm13, %v6716_v28, %v6720_v49  ;;  %v6766_v20 = vshll.u32 %v19615_v63, 16  ;;  %v6726_v39 = vrot.slane %v6725_v13, 4  ;;  %v6748_v14 = vrot.slane %v6746_v61, 4  ;;  %22488 = vst [vmem:[#allocation21_spill] sm:$0xff] %v19648_v54 }
 0x472   : > { %v6754_v15 = vrot.slane %v6752_v35, 5  ;;  %v6759_v6 = vrot.slane %v6757_v59, 4  ;;  %v6740_v48 = vrot.slane %v6739_v12, 4  ;;  %v6762_v32 = vrot.slane %v6760_v53, 5  ;;  %v19654_v59 = vld [vmem:[#allocation3 + $0x84] sm:$0xf] }
 0x473   : > { %v6768_v52 = vrot.slane %v6766_v20, 5  ;;  %v6770_v16 = vshrl.u32 %v19615_v63, 16  ;;  %v6731_v7 = vsel %vm16963_vm13, %v6726_v39, %v6730_v25  ;;  %v6749_v29 = vor.u32 %v6748_v14, %v6744_v18 }
 0x474   : > { %v6776_v40 = vshll.u32 %v19623_v9, 16  ;;  %v6781_v49 = vshrl.u32 %v19627_v8, 16  ;;  %v14502_v30 = vcombine.low %v6721_v50, %v6731_v7  ;;  %v6745_v56 = vsel %vm16963_vm13, %v6740_v48, %v6744_v18 }
 0x475   : > { %v6763_v38 = vor.u32 %v6762_v32, %v6759_v6  ;;  %v6772_v47 = vrot.slane %v6770_v16, 4  ;;  %v6750_v60 = vrot.slane %v6749_v29, 4  ;;  %v6784_v42 = vshll.u32 %v19627_v8, 16  ;;  %v19658_v32 = vld [vmem:[#allocation3 + $0x88] sm:$0xf] }
 0x476   : > { %v6778_v19 = vrot.slane %v6776_v40, 5  ;;  %v6783_v33 = vrot.slane %v6781_v49, 4  ;;  %15848 = vmatprep.mubr.msk.bf16.mxu1 %vm5527_vm3, %v14502_v30  ;;  %v6790_v2 = vshll.u32 %v19629_v23, 16  ;;  %v6794_v28 = vshrl.u32 %v19629_v23, 16 }
 0x477   : > { %v6764_v25 = vrot.slane %v6763_v38, 4  ;;  %v6773_v22 = vor.u32 %v6772_v47, %v6768_v52  ;;  %v6755_v18 = vsel %vm16963_vm13, %v6750_v60, %v6754_v15  ;;  %v6786_v13 = vrot.slane %v6784_v42, 5  ;;  %v19670_v42 = vld [vmem:[#allocation3 + $0x90] sm:$0xf] }
 0x478   : > { %v6800_v61 = vshll.u32 %v19632_v27, 16  ;;  %v6805_v35 = vshrl.u32 %v19638_v5, 16  ;;  %v14503_v50 = vcombine.low %v6745_v56, %v6755_v18  ;;  %v6792_v20 = vrot.slane %v6790_v2, 5  ;;  %v19746_v27 = vld [vmem:[#allocation3 + $0x4] sm:$0xf] }
 0x479   : > { %v6769_v12 = vsel %vm16963_vm13, %v6764_v25, %v6768_v52  ;;  %v6774_v53 = vrot.slane %v6773_v22, 4  ;;  %v6787_v39 = vor.u32 %v6786_v13, %v6783_v33  ;;  %v6796_v14 = vrot.slane %v6794_v28, 4  ;;  %v19666_v52 = vld [vmem:[#allocation3 + $0x8c] sm:$0x1]  ;;  %v19676_v28 = vld [vmem:[#allocation3 + $0x94] sm:$0xf] }
 0x47a   : > { %v6802_v6 = vrot.slane %v6800_v61, 5  ;;  %v6807_v48 = vrot.slane %v6805_v35, 4  ;;  %15849 = vmatmul.mubr.msk.bf16.gmra.mrb[16].mxu1 %vm5527_vm3, %v14503_v50  ;;  %v6808_v16 = vshll.u32 %v19638_v5, 16  ;;  %v6814_v7 = vshll.u32 %v19643_v11, 16  ;;  %22489 = vst [vmem:[#allocation13_spill] sm:$0xff] %v19666_v52 }
 0x47b   : > { %v6779_v15 = vsel %vm16963_vm13, %v6774_v53, %v6778_v19  ;;  %v6818_v29 = vshrl.u32 %v19643_v11, 16  ;;  %v6788_v49 = vrot.slane %v6787_v39, 4  ;;  %v6797_v30 = vor.u32 %v6796_v14, %v6792_v20 }
 0x47c   : > { %v14504_v40 = vcombine.low %v6769_v12, %v6779_v15  ;;  %v6824_v56 = vshll.u32 %v19648_v54, 16  ;;  %v6810_v38 = vrot.slane %v6808_v16, 5  ;;  %v6816_v47 = vrot.slane %v6814_v7, 5  ;;  %v16808_v54 = vld [vmem:[#allocation3] sm:$0xf] }
 0x47d   : > { %v6820_v60 = vrot.slane %v6818_v29, 4  ;;  %v6829_v33 = vshrl.u32 %v19654_v59, 16  ;;  %v6793_v19 = vsel %vm16963_vm13, %v6788_v49, %v6792_v20  ;;  %v6798_v25 = vrot.slane %v6797_v30, 4 }
 0x47e   : > { %15852 = vmatprep.mubr.msk.bf16.mxu1 %vm5527_vm3, %v14504_v40  ;;  %v6826_v22 = vrot.slane %v6824_v56, 5  ;;  %v6832_v2 = vshll.u32 %v19654_v59, 16  ;;  %v6811_v18 = vor.u32 %v6810_v38, %v6807_v48  ;;  %v6838_v35 = vshll.u32 %v19658_v32, 16  ;;  %v19683_v48 = vld [vmem:[#allocation3 + $0x98] sm:$0x1] }
 0x47f   : > { %v6821_v13 = vor.u32 %v6820_v60, %v6816_v47  ;;  %v6831_v61 = vrot.slane %v6829_v33, 4  ;;  %v6803_v50 = vsel %vm16963_vm13, %v6798_v25, %v6802_v6  ;;  %v6842_v53 = vshrl.u32 %v19658_v32, 16  ;;  %22490 = vst [vmem:[#allocation7_spill] sm:$0xff] %v19683_v48  ;;  %v19693_v60 = vld [vmem:[#allocation3 + $0x9c] sm:$0xf] }
 0x480   : > { %v6834_v12 = vrot.slane %v6832_v2, 5  ;;  %v6848_v39 = vshll.u32 %v19666_v52, 16  ;;  %v14505_v20 = vcombine.low %v6793_v19, %v6803_v50  ;;  %v6812_v14 = vrot.slane %v6811_v18, 4  ;;  %v19695_v18 = vld [vmem:[#allocation3 + $0xa0] sm:$0xf] }
 0x481   : > { %v6822_v15 = vrot.slane %v6821_v13, 4  ;;  %v6840_v16 = vrot.slane %v6838_v35, 5  ;;  %v6844_v29 = vrot.slane %v6842_v53, 4  ;;  %v6853_v49 = vshrl.u32 %v19670_v42, 16 }
 0x482   : > { %v6835_v7 = vor.u32 %v6834_v12, %v6831_v61  ;;  %v6850_v40 = vrot.slane %v6848_v39, 5  ;;  %15853 = vmatmul.mubr.msk.bf16.gmra.mrb[20].mxu1 %vm5527_vm3, %v14505_v20  ;;  %v6817_v6 = vsel %vm16963_vm13, %v6812_v14, %v6816_v47  ;;  %v6856_v56 = vshll.u32 %v19670_v42, 16  ;;  %v19702_v12 = vld [vmem:[#allocation3 + $0xa4] sm:$0x1] }
 0x483   : > { %v6827_v30 = vsel %vm16963_vm13, %v6822_v15, %v6826_v22  ;;  %v6862_v38 = vshll.u32 %v19676_v28, 16  ;;  %v6845_v25 = vor.u32 %v6844_v29, %v6840_v16  ;;  %v6855_v2 = vrot.slane %v6853_v49, 4  ;;  %22491 = vst [vmem:[#allocation8_spill] sm:$0xff] %v19702_v12  ;;  %v19707_v29 = vld [vmem:[#allocation3 + $0xa8] sm:$0xf] }
 0x484   : > { %v14506_v33 = vcombine.low %v6817_v6, %v6827_v30  ;;  %v6836_v19 = vrot.slane %v6835_v7, 4  ;;  %v6858_v13 = vrot.slane %v6856_v56, 5  ;;  %v6866_v35 = vshrl.u32 %v19676_v28, 16  ;;  %v19712_v56 = vld [vmem:[#allocation3 + $0xac] sm:$0xf] }
 0x485   : > { %v6864_v61 = vrot.slane %v6862_v38, 5  ;;  %v6872_v47 = vshll.u32 %v19683_v48, 16  ;;  %v6846_v50 = vrot.slane %v6845_v25, 4  ;;  %v6877_v53 = vshrl.u32 %v19693_v60, 16 }
 0x486   : > { %15856 = vmatprep.mubr.msk.bf16.mxu1 %vm5527_vm3, %v14506_v33  ;;  %v6841_v22 = vsel %vm16963_vm13, %v6836_v19, %v6840_v16  ;;  %v6880_v39 = vshll.u32 %v19693_v60, 16  ;;  %v6859_v20 = vor.u32 %v6858_v13, %v6855_v2  ;;  %v6868_v14 = vrot.slane %v6866_v35, 4 }
 0x487   : > { %v6874_v15 = vrot.slane %v6872_v47, 5  ;;  %v6886_v7 = vshll.u32 %v19695_v18, 16  ;;  %v6851_v49 = vsel %vm16963_vm13, %v6846_v50, %v6850_v40  ;;  %v6879_v6 = vrot.slane %v6877_v53, 4  ;;  %v19719_v53 = vld [vmem:[#allocation3 + $0xb0] sm:$0x1] }
 0x488   : > { %v6882_v30 = vrot.slane %v6880_v39, 5  ;;  %v6890_v16 = vshrl.u32 %v19695_v18, 16  ;;  %v14507_v38 = vcombine.low %v6841_v22, %v6851_v49  ;;  %v6860_v33 = vrot.slane %v6859_v20, 4  ;;  %22492 = vst [vmem:[#allocation9_spill] sm:$0xff] %v19719_v53 }
 0x489   : > { %v6869_v19 = vor.u32 %v6868_v14, %v6864_v61  ;;  %v6888_v25 = vrot.slane %v6886_v7, 5  ;;  %v6896_v35 = vshll.u32 %v19702_v12, 16  ;;  %v6901_v47 = vshrl.u32 %v19707_v29, 16 }
 0x48a   : > { %v6883_v2 = vor.u32 %v6882_v30, %v6879_v6  ;;  %v6892_v13 = vrot.slane %v6890_v16, 4  ;;  %15857 = vmatmul.mubr.msk.bf16.gmra.mrb[24].mxu1 %vm5527_vm3, %v14507_v38  ;;  %v6865_v40 = vsel %vm16963_vm13, %v6860_v33, %v6864_v61  ;;  %v6904_v39 = vshll.u32 %v19707_v29, 16  ;;  %v19723_v6 = vld [vmem:[#allocation3 + $0xb4] sm:$0xf]  ;;  %v19728_v33 = vld [vmem:[#allocation3 + $0xb8] sm:$0xf] }
 0x48b   : > { %v6870_v50 = vrot.slane %v6869_v19, 4  ;;  %v6910_v22 = vshll.u32 %v19712_v56, 16  ;;  %v6898_v7 = vrot.slane %v6896_v35, 5  ;;  %v6903_v49 = vrot.slane %v6901_v47, 4  ;;  %v19733_v47 = vld [vmem:[#allocation3 + $0xbc] sm:$0x1] }
 0x48c   : > { %v6884_v20 = vrot.slane %v6883_v2, 4  ;;  %v6893_v14 = vor.u32 %v6892_v13, %v6888_v25  ;;  %v6906_v16 = vrot.slane %v6904_v39, 5  ;;  %v6914_v61 = vshrl.u32 %v19712_v56, 16 }
 0x48d   : > { %v6875_v30 = vsel %vm16963_vm13, %v6870_v50, %v6874_v15  ;;  %v6912_v38 = vrot.slane %v6910_v22, 5  ;;  %v6920_v2 = vshll.u32 %v19719_v53, 16  ;;  %v6925_v48 = vshrl.u32 %v19723_v6, 16 }
 0x48e   : > { %v14508_v19 = vcombine.low %v6865_v40, %v6875_v30  ;;  %v6889_v17 = vsel %vm16963_vm13, %v6884_v20, %v6888_v25  ;;  %v6894_v12 = vrot.slane %v6893_v14, 4  ;;  %v6907_v13 = vor.u32 %v6906_v16, %v6903_v49 }
 0x48f   : > { %v6916_v35 = vrot.slane %v6914_v61, 4  ;;  %v6928_v15 = vshll.u32 %v19723_v6, 16  ;;  %v6934_v40 = vshll.u32 %v19728_v33, 16  ;;  %v6938_v25 = vshrl.u32 %v19728_v33, 16 }
 0x490   : > { %15860 = vmatprep.mubr.msk.bf16.mxu1 %vm5527_vm3, %v14508_v19  ;;  %v6899_v50 = vsel %vm16963_vm13, %v6894_v12, %v6898_v7  ;;  %v6908_v22 = vrot.slane %v6907_v13, 4  ;;  %v6927_v14 = vrot.slane %v6925_v48, 4  ;;  %v6944_v61 = vshll.u32 %v19733_v47, 16 }
 0x491   : > { %v14509_v39 = vcombine.low %v6889_v17, %v6899_v50  ;;  %v6917_v20 = vor.u32 %v6916_v35, %v6912_v38  ;;  %v6930_v49 = vrot.slane %v6928_v15, 5  ;;  %v6936_v30 = vrot.slane %v6934_v40, 5 }
 0x492   : > { %v6940_v16 = vrot.slane %v6938_v25, 4  ;;  %v6913_v19 = vsel %vm16963_vm13, %v6908_v22, %v6912_v38  ;;  %v6922_v12 = vrot.slane %v6920_v2, 5  ;;  %v14528_v17 = vcombine.low %v16808_v54, %v19746_v27  ;;  %v7518_v54 = vld [vmem:[#allocation3 + $0xb4] sm:$0xe] }
 0x493   : > { %15861 = vmatmul.mubr.msk.bf16.gmra.mrb[28].mxu1 %vm5527_vm3, %v14509_v39  ;;  %v6918_v53 = vrot.slane %v6917_v20, 4  ;;  %v6931_v7 = vor.u32 %v6930_v49, %v6927_v14  ;;  %v6946_v13 = vrot.slane %v6944_v61, 5  ;;  %v14531_v35 = vcombine.low %v19526_v57, %v19531_v4  ;;  %v7511_v14 = vld [vmem:[#allocation3 + $0x60] sm:$0xe]  ;;  %v7512_v39 = vld [vmem:[#allocation3 + $0x6c] sm:$0xe] }
 0x494   : > { %v6941_v52 = vor.u32 %v6940_v16, %v6936_v30  ;;  %v14532_v15 = vcombine.low %v19538_v36, %v19545_v41  ;;  %v14533_v40 = vcombine.low %v19562_v43, %v19566_v34  ;;  %v22495_v57 = vld [vmem:[#allocation21_spill] sm:$0xff]  ;;  %v7517_v36 = vld [vmem:[#allocation3 + $0xa8] sm:$0xe]  ;;  %v14575_v26 = vrot.slane %v7518_v54, 9 }
 0x495   : > { %v6923_v48 = vsel %vm16963_vm13, %v6918_v53, %v6922_v12  ;;  %v6932_v50 = vrot.slane %v6931_v7, 4  ;;  %v7506_v12 = vld [vmem:[#allocation3 + $0x24] sm:$0xe]  ;;  %v7661_v54 = vrot.slane %v19733_v47, 5  ;;  %v22502_v47 = vcombine.low %v19611_v24, %v19615_v63 }
 0x496   : > { %v14510_v38 = vcombine.low %v6913_v19, %v6923_v48  ;;  %v6942_v2 = vrot.slane %v6941_v52, 4  ;;  %v14563_v7 = vrot.slane %v7506_v12, 9  ;;  %v7574_v48 = vrot.slane %v19531_v4, 5 }
 0x497   : > { %v6937_v52 = vsel %vm16963_vm13, %v6932_v50, %v6936_v30  ;;  %v7581_v19 = vrot.slane %v19545_v41, 5  ;;  %v7626_v4 = vrot.slane %v22495_v57, 5  ;;  %v22496_v57 = vld [vmem:[#allocation13_spill] sm:$0xff]  ;;  %v7553_v24 = vrot.slane %v19746_v27, 5 }
 0x498   : > { %15864 = vmatprep.mubr.msk.bf16.mxu1 %vm5527_vm3, %v14510_v38  ;;  %v6947_v22 = vsel %vm16963_vm13, %v6942_v2, %v6946_v13  ;;  %v7507_v13 = vld [vmem:[#allocation3 + $0x30] sm:$0xe]  ;;  %v7508_v38 = vld [vmem:[#allocation3 + $0x3c] sm:$0xe]  ;;  %v7576_v50 = vrot.slane %v7574_v48, 4  ;;  %v7577_v2 = vrot.slane %v19535_v46, 5  ;;  %v19795_v61 = vsel %vm17346_vm8, %v14563_v7, %v7574_v48 }
 0x499   : > { %v14511_v49 = vcombine.low %v6937_v52, %v6947_v22  ;;  %v14529_v52 = vcombine.low %v19496_v55, %v19480_v1  ;;  %v7762_v22 = vsel %vm7046_vm9, %v19552_v31, 0  ;;  %v14564_v30 = vrot.slane %v7507_v13, 9  ;;  %v7510_v1 = vld [vmem:[#allocation3 + $0x54] sm:$0xe] }
 0x49a   : > { %v19799_v46 = vsel %vm17346_vm8, %v7576_v50, %v7577_v2  ;;  %v14565_v16 = vrot.slane %v7508_v38, 9  ;;  %v19804_v55 = vld [vmem:[%s22221_s4 + $0xc] sm:$0xf]  ;;  %v7583_v13 = vrot.slane %v7581_v19, 4  ;;  %v7588_v7 = vrot.slane %v19566_v34, 5 }
 0x49b   : > { %15865 = vmatmul.mubr.msk.bf16.gmra.mrb[32].mxu1 %vm5527_vm3, %v14511_v49  ;;  %v7509_v49 = vld [vmem:[#allocation3 + $0x48] sm:$0xe]  ;;  %v19813_v48 = vsel %vm17346_vm8, %v14564_v30, %v7581_v19  ;;  %v7591_v38 = vrot.slane %v19573_v51, 5  ;;  %v7595_v2 = vrot.slane %v19584_v58, 5  ;;  %v14567_v20 = vrot.slane %v7510_v1, 9 }
 0x49c   : > { %15870 = vmatprep.mubr.msk.bf16.mxu1 %vm5527_vm3, %v14528_v17  ;;  %v14530_v17 = vcombine.low %v19510_v10, %v19516_v62  ;;  %v7584_v10 = vrot.slane %v19555_v0, 5  ;;  %v14566_v50 = vrot.slane %v7509_v49, 9  ;;  %v7590_v31 = vrot.slane %v7588_v7, 4 }
 0x49d   : > { %v19829_v19 = vsel %vm17346_vm8, %v14565_v16, %v7588_v7  ;;  %v7597_v30 = vrot.slane %v7595_v2, 4  ;;  %v7609_v1 = vrot.slane %v19615_v63, 5  ;;  %v7605_v51 = vrot.slane %v19607_v3, 5  ;;  %v7503_v63 = vld [vmem:[#allocation3] sm:$0xe] }
 0x49e   : > { %v19820_v0 = vsel %vm17346_vm8, %v7583_v13, %v7584_v10  ;;  %v19834_v49 = vsel %vm17346_vm8, %v7590_v31, %v7591_v38  ;;  %v7513_v13 = vld [vmem:[#allocation3 + $0x78] sm:$0xe]  ;;  %v7616_v3 = vrot.slane %v19629_v23, 5  ;;  %v7514_v10 = vld [vmem:[#allocation3 + $0x84] sm:$0xe]  ;;  %v7630_v31 = vrot.slane %v19658_v32, 5 }
 0x49f   : > { %v7633_v53 = vrot.slane %v22496_v57, 5  ;;  %v7644_v57 = vrot.slane %v19695_v18, 5  ;;  %vm13067_vm14 = vcmask 1045509  }
 0x4a3   : > { %15871 = vmatmul.mubr.msk.bf16.vlgmr.msra.gmra.mrb[4].mxu1 %vm5527_vm3, %v14529_v52  ;;  %v7598_v52 = vrot.slane %v19591_v45, 5  ;;  %v19838_v45 = vsel %vm17346_vm8, %v14566_v50, %v7595_v2  ;;  %v7612_v50 = vrot.slane %v19623_v9, 5  ;;  %v14570_v9 = vrot.slane %v7513_v13, 9 }
 0x4a4   : > { %15903 = vmatpush3.bf16.msra.mxu1 %v7762_v22  ;;  %15874 = vmatprep.mubr.msk.bf16.mxu1 %vm5527_vm3, %v14530_v17  ;;  %v7602_v22 = vrot.slane %v19599_v21, 5  ;;  %v14568_v17 = vrot.slane %v7511_v14, 9  ;;  %v7611_v14 = vrot.slane %v7609_v1, 4 }
 0x4a5   : > { %16677 = vmatprep.subr.msk.bf16.mxu1 %vm7046_vm9, %v19804_v55  ;;  %v19845_v16 = vsel %vm17346_vm8, %v7597_v30, %v7598_v52  ;;  %v14569_v30 = vrot.slane %v7512_v39, 9 }
 0x4a6   : > { %v7604_v7 = vrot.slane %v7602_v22, 4  ;;  %v19852_v38 = vsel %vm17346_vm8, %v14567_v20, %v7602_v22  ;;  %v19861_v52 = vsel %vm17346_vm8, %v14568_v17, %v7609_v1  ;;  %v19868_v20 = vsel %vm17346_vm8, %v7611_v14, %v7612_v50  ;;  %v7516_v50 = vld [vmem:[#allocation3 + $0x9c] sm:$0xe] }
 0x4a7   : > { %v7623_v22 = vrot.slane %v19643_v11, 5  ;;  %v19879_v17 = vsel %vm17346_vm8, %v14569_v30, %v7616_v3  ;;  %v7618_v1 = vrot.slane %v7616_v3, 4 }
 0x4a8   : > { %v19857_v2 = vsel %vm17346_vm8, %v7604_v7, %v7605_v51  ;;  %v7515_v51 = vld [vmem:[#allocation3 + $0x90] sm:$0xe]  ;;  %v22494_v7 = vld [vmem:[#allocation20_spill] sm:$0xff] }
 0x4a9   : > { %v7619_v14 = vrot.slane %v22494_v7, 5  ;;  %v7625_v13 = vrot.slane %v7623_v22, 4  ;;  %v19894_v30 = vsel %vm17346_vm8, %v14570_v9, %v7623_v22  ;;  %v14572_v3 = vrot.slane %v7515_v51, 9  ;;  %v22497_v51 = vld [vmem:[#allocation7_spill] sm:$0xff] }
 0x4aa   : > { %v7637_v7 = vrot.slane %v19676_v28, 5 }
 0x4ab   : > { %15875 = vmatmul.mubr.msk.bf16.gmra.mrb[8].mxu1 %vm5527_vm3, %v14531_v35  ;;  %v14571_v35 = vrot.slane %v7514_v10, 9  ;;  %v19890_v39 = vsel %vm17346_vm8, %v7618_v1, %v7619_v14  ;;  %v7632_v10 = vrot.slane %v7630_v31, 4  ;;  %v7640_v14 = vrot.slane %v22497_v51, 5  ;;  %v22499_v1 = vld [vmem:[#allocation9_spill] sm:$0xff] }
 0x4ac   : > { %15878 = vmatprep.mubr.msk.bf16.mxu1 %vm5527_vm3, %v14532_v15  ;;  %v19901_v15 = vsel %vm17346_vm8, %v7625_v13, %v7626_v4  ;;  %v7639_v22 = vrot.slane %v7637_v7, 4  ;;  %v19917_v13 = vsel %vm17346_vm8, %v14572_v3, %v7637_v7  ;;  %v14573_v4 = vrot.slane %v7516_v50, 9  ;;  %v22498_v3 = vld [vmem:[#allocation8_spill] sm:$0xff] }
 0x4ad   : > { %v19908_v9 = vsel %vm17346_vm8, %v14571_v35, %v7630_v31  ;;  %v19913_v41 = vsel %vm17346_vm8, %v7632_v10, %v7633_v53  ;;  %v14574_v35 = vrot.slane %v7517_v36, 9  ;;  %v7651_v51 = vrot.slane %v19712_v56, 5 }
 0x4ae   : > { %v19924_v31 = vsel %vm17346_vm8, %v7639_v22, %v7640_v14  ;;  %v7646_v10 = vrot.slane %v7644_v57, 4  ;;  %v7647_v7 = vrot.slane %v22498_v3, 5  ;;  %v7654_v25 = vrot.slane %v22499_v1, 5 }
 0x4af   : > { %v14589_v53 = vcombine.low %v19917_v13, %v19924_v31  ;;  %v7653_v50 = vrot.slane %v7651_v51, 4  ;;  %v7658_v22 = vrot.slane %v19728_v33, 5  ;;  %v22500_v36 = vcombine.low %v19580_v44, %v19584_v58 }
 0x4b0   : > { %v19942_v14 = vsel %vm17346_vm8, %v14573_v4, %v7644_v57  ;;  %v19946_v43 = vsel %vm17346_vm8, %v7646_v10, %v7647_v7  ;;  %v19950_v34 = vsel %vm17346_vm8, %v14574_v35, %v7651_v51  ;;  %v22504_v51 = vcombine.low %v19638_v5, %v19643_v11  ;;  %v16810_v10 = vld [vmem:[#allocation3 + $0x8] sm:$0x1]  ;;  %v20221_v35 = vld [vmem:[#allocation3 + $0xb8] sm:$0xf] }
 0x4b1   : > { %v19956_v44 = vsel %vm17346_vm8, %v7653_v50, %v7654_v25  ;;  %v7660_v58 = vrot.slane %v7658_v22, 4  ;;  %v19963_v4 = vsel %vm17346_vm8, %v14575_v26, %v7658_v22  ;;  %v22501_v25 = vcombine.low %v19595_v37, %v19599_v21  ;;  %v7504_v50 = vld [vmem:[#allocation3 + $0xc] sm:$0xe] }
 0x4b2   : > { %v22503_v26 = vcombine.low %v19627_v8, %v19629_v23  ;;  %v22505_v37 = vcombine.low %v19654_v59, %v19658_v32  ;;  %v22506_v21 = vcombine.low %v19670_v42, %v19676_v28  ;;  %v14560_v8 = vrot.slane %v7503_v63, 9  ;;  %v16811_v32 = vld [vmem:[#allocation3 + $0x10] sm:$0xf] }
 0x4b3   : > { %15879 = vmatmul.mubr.msk.bf16.gmra.mrb[12].mxu1 %vm5527_vm3, %v14533_v40  ;;  %v19967_v57 = vsel %vm17346_vm8, %v7660_v58, %v7661_v54  ;;  %v7555_v23 = vrot.slane %v7553_v24, 4  ;;  %v7556_v3 = vrot.slane %v16810_v10, 5  ;;  %v22507_v5 = vcombine.low %v19693_v60, %v19695_v18  ;;  %v7505_v18 = vld [vmem:[#allocation3 + $0x18] sm:$0xe]  ;;  %v20050_v10 = vld [vmem:[#allocation3 + $0x28] sm:$0xf] }
 0x4b4   : > { %15882 = vmatprep.mubr.msk.bf16.mxu1 %vm5527_vm3, %v22500_v36  ;;  %v22508_v11 = vcombine.low %v19707_v29, %v19712_v56  ;;  %v7554_v59 = vsel %vm17346_vm8, %v14560_v8, %v7553_v24  ;;  %v7560_v42 = vrot.slane %v16811_v32, 5  ;;  %v7567_v28 = vrot.slane %v19516_v62, 5  ;;  %v16812_v56 = vld [vmem:[#allocation3 + $0x14] sm:$0x1]  ;;  %v20028_v24 = vld [vmem:[%s22221_s4 + $0x10] sm:$0xf] }
 0x4b5   : > { %v7557_v27 = vsel %vm17346_vm8, %v7555_v23, %v7556_v3  ;;  %v22509_v22 = vcombine.low %v19723_v6, %v19728_v33  ;;  %v7563_v36 = vrot.slane %v16812_v56, 5  ;;  %v14561_v58 = vrot.slane %v7504_v50, 9  ;;  %v20065_v3 = vld [vmem:[#allocation3 + $0x40] sm:$0xf]  ;;  %v9046_v32 = vld [vmem:[#allocation3 + $0x48] sm:$0xe] }
 0x4b6   : > { %v14577_v7 = vcombine.low %v7554_v59, %v7557_v27  ;;  %v7562_v60 = vrot.slane %v7560_v42, 4  ;;  %v7569_v29 = vrot.slane %v7567_v28, 4  ;;  %v14562_v54 = vrot.slane %v7505_v18, 9  ;;  %v20072_v27 = vld [vmem:[#allocation3 + $0x44] sm:$0x1] }
 0x4b7   : > { %v7561_v6 = vsel %vm17346_vm8, %v14561_v58, %v7560_v42  ;;  %v22512_v63 = vcombine.low %v19813_v48, %v19820_v0  ;;  %v22513_v8 = vcombine.low %v19829_v19, %v19834_v49  ;;  %v22514_v23 = vcombine.low %v19838_v45, %v19845_v16  ;;  %v20056_v48 = vld [vmem:[#allocation3 + $0x2c] sm:$0x1]  ;;  %v20062_v19 = vld [vmem:[#allocation3 + $0x34] sm:$0xf]  ;;  %v9044_v16 = vld [vmem:[#allocation3 + $0x30] sm:$0xe] }
 0x4b8   : > { %v7564_v62 = vsel %vm17346_vm8, %v7562_v60, %v7563_v36  ;;  %v22516_v0 = vcombine.low %v19861_v52, %v19868_v20  ;;  %v9121_v45 = vrot.slane %v20050_v10, 5  ;;  %v9124_v59 = vrot.slane %v20056_v48, 5  ;;  %v20075_v42 = vld [vmem:[#allocation3 + $0x58] sm:$0xf]  ;;  %v9047_v18 = vld [vmem:[#allocation3 + $0x54] sm:$0xe] }
 0x4b9   : > { %v14578_v33 = vcombine.low %v7561_v6, %v7564_v62  ;;  %v14678_v52 = vrot.slane %v9044_v16, 9  ;;  %v9128_v20 = vrot.slane %v20062_v19, 5  ;;  %v9135_v60 = vrot.slane %v20065_v3, 5  ;;  %v20230_v40 = vld [vmem:[#allocation3 + $0xb0] sm:$0x1] }
 0x4ba   : > { %v14680_v62 = vrot.slane %v9046_v32, 9  ;;  %v22520_v6 = vcombine.low %v19879_v17, %v19890_v39  ;;  %v20118_v39 = vld [vmem:[#allocation3 + $0x70] sm:$0xf]  ;;  %v20210_v17 = vld [vmem:[#allocation3 + $0xac] sm:$0xf] }
 0x4bb   : > { %15883 = vmatmul.mubr.msk.bf16.gmra.mrb[16].mxu1 %vm5527_vm3, %v22501_v25  ;;  %v22510_v25 = vld [vmem:[#allocation19_spill] sm:$0xff]  ;;  %v20092_v56 = vsel %vm17346_vm8, %v14678_v52, %v9128_v20  ;;  %v9130_v36 = vrot.slane %v9128_v20, 4 }
 0x4bc   : > { %15886 = vmatprep.mubr.msk.bf16.mxu1 %vm5527_vm3, %v22502_v47  ;;  %v7570_v47 = vrot.slane %v22510_v25, 5  ;;  %22519 = vst [vmem:[#allocation12_spill] sm:$0xff] %v20092_v56  ;;  %v9137_v25 = vrot.slane %v9135_v60, 4 }
 0x4c3   : > { %15887 = vmatmul.mubr.msk.bf16.gmra.mrb[20].mxu1 %vm5527_vm3, %v22503_v26  ;;  %v7571_v26 = vsel %vm17346_vm8, %v7569_v29, %v7570_v47  ;;  %v9138_v47 = vrot.slane %v20072_v27, 5  ;;  %v9054_v29 = vld [vmem:[#allocation3 + $0xa8] sm:$0xe] }
 0x4c4   : > { %15890 = vmatprep.mubr.msk.bf16.mxu1 %vm5527_vm3, %v22504_v51  ;;  %v8120_v51 = vsel %vm7046_vm9, %v19804_v55, 0  ;;  %v22511_v55 = vcombine.low %v19795_v61, %v19799_v46  ;;  %v9043_v61 = vld [vmem:[#allocation3 + $0x24] sm:$0xe]  ;;  %v22515_v46 = vcombine.low %v19852_v38, %v19857_v2  ;;  %v20069_v38 = vld [vmem:[#allocation3 + $0x4c] sm:$0xf]  ;;  %v9123_v2 = vrot.slane %v9121_v45, 4 }
 0x4c5   : > { %v14677_v49 = vrot.slane %v9043_v61, 9 }
 0x4cb   : > { %15891 = vmatmul.mubr.msk.bf16.gmra.mrb[24].mxu1 %vm5527_vm3, %v22505_v37  ;;  %v7568_v37 = vsel %vm17346_vm8, %v14562_v54, %v7567_v28  ;;  %v20079_v28 = vsel %vm17346_vm8, %v14677_v49, %v9121_v45  ;;  %v20095_v54 = vld [vmem:[#allocation3 + $0x5c] sm:$0x1]  ;;  %v20127_v49 = vld [vmem:[#allocation3 + $0x68] sm:$0x1]  ;;  %v20129_v45 = vld [vmem:[#allocation3 + $0x74] sm:$0x1] }
 0x4cc   : > { %15894 = vmatprep.mubr.msk.bf16.mxu1 %vm5527_vm3, %v22506_v21  ;;  %v14579_v21 = vcombine.low %v7568_v37, %v7571_v26  ;;  %22517 = vst [vmem:[#allocation10_spill] sm:$0xff] %v20079_v28  ;;  %v9142_v26 = vrot.slane %v20069_v38, 5 }
 0x4ce   : > { %v9144_v61 = vrot.slane %v9142_v26, 4 }
 0x4d3   : > { %15895 = vmatmul.mubr.msk.bf16.gmra.mrb[28].mxu1 %vm5527_vm3, %v22507_v5  ;;  %v9045_v5 = vld [vmem:[#allocation3 + $0x3c] sm:$0xe] }
 0x4d4   : > { %15898 = vmatprep.mubr.msk.bf16.mxu1 %vm5527_vm3, %v22508_v11  ;;  %v20067_v11 = vld [vmem:[#allocation3 + $0x38] sm:$0x1]  ;;  %v14679_v50 = vrot.slane %v9045_v5, 9  ;;  %v9152_v5 = vrot.slane %v20095_v54, 5 }
 0x4d5   : > { %v9131_v58 = vrot.slane %v20067_v11, 5 }
 0x4d6   : > { %v20111_v37 = vsel %vm17346_vm8, %v14679_v50, %v9135_v60  ;;  %v9050_v50 = vld [vmem:[#allocation3 + $0x78] sm:$0xe]  ;;  %v20149_v60 = vld [vmem:[#allocation3 + $0x88] sm:$0xf] }
 0x4d7   : > { %22522 = vst [vmem:[#allocation15_spill] sm:$0xff] %v20111_v37 }
 0x4db   : > { %15899 = vmatmul.mubr.msk.bf16.gmra.mrb[32].mxu1 %vm5527_vm3, %v22509_v22  ;;  %v20086_v22 = vld [vmem:[#allocation3 + $0x50] sm:$0x1] }
 0x4dc   : > { %15904 = vmatprep.mubr.msk.bf16.mxu1 %vm5527_vm3, %v14577_v7  ;;  %v20083_v7 = vsel %vm17346_vm8, %v9123_v2, %v9124_v59  ;;  %v20138_v2 = vld [vmem:[#allocation3 + $0x7c] sm:$0xf] }
 0x4dd   : > { %22518 = vst [vmem:[#allocation11_spill] sm:$0xff] %v20083_v7 }
 0x4e3   : > { %15905 = vmatmul.mubr.msk.bf16.vlgmr.msra.gmra.mrb[4].mxu1 %vm5527_vm3, %v14578_v33  ;;  %v20103_v33 = vld [vmem:[#allocation3 + $0x64] sm:$0xf] }
 0x4e4   : > { %15937 = vmatpush3.bf16.msra.mxu1 %v8120_v51  ;;  %15908 = vmatprep.mubr.msk.bf16.mxu1 %vm5527_vm3, %v14579_v21  ;;  %v20107_v51 = vsel %vm17346_vm8, %v9130_v36, %v9131_v58  ;;  %v14681_v21 = vrot.slane %v9047_v18, 9  ;;  %v9156_v32 = vrot.slane %v20103_v33, 5  ;;  %v9052_v18 = vld [vmem:[#allocation3 + $0x90] sm:$0xe] }
 0x4e5   : > { %16678 = vmatprep.subr.msk.bf16.mxu1 %vm7046_vm9, %v20028_v24  ;;  %22521 = vst [vmem:[#allocation14_spill] sm:$0xff] %v20107_v51  ;;  %v16754_v51 = vld [vmem:[#allocation3 + $0x78] sm:$0xff]  }
 0x4eb   : > { %15909 = vmatmul.mubr.msk.bf16.gmra.mrb[8].mxu1 %vm5527_vm3, %v22511_v55  ;;  %v9149_v55 = vrot.slane %v20075_v42, 5 }
 0x4ec   : > { %15912 = vmatprep.mubr.msk.bf16.mxu1 %vm5527_vm3, %v22512_v63  ;;  %v9048_v63 = vld [vmem:[#allocation3 + $0x60] sm:$0xe] }
 0x4ed   : > { %v9151_v16 = vrot.slane %v9149_v55, 4  ;;  %v20146_v52 = vsel %vm17346_vm8, %v14681_v21, %v9149_v55  ;;  %v14682_v20 = vrot.slane %v9048_v63, 9  ;;  %v9158_v21 = vrot.slane %v9156_v32, 4  ;;  %v20167_v63 = vld [vmem:[#allocation3 + $0x8c] sm:$0x1] }
 0x4ee   : > { %22527 = vst [vmem:[#allocation18_spill] sm:$0xff] %v20146_v52  ;;  %v9159_v55 = vrot.slane %v20127_v49, 5 }
 0x4ef   : > { %v20155_v36 = vsel %vm17346_vm8, %v9151_v16, %v9152_v5  ;;  %v20171_v16 = vld [vmem:[#allocation3 + $0x94] sm:$0xf] }
 0x4f0   : > { %22528 = vst [vmem:[#allocation6_spill] sm:$0xff] %v20155_v36  ;;  %v20175_v5 = vsel %vm17346_vm8, %v9158_v21, %v9159_v55 }
 0x4f1   : > { %22530 = vst [vmem:[#allocation21_spill] sm:$0xff] %v20175_v5 }
 0x4f3   : > { %15913 = vmatmul.mubr.msk.bf16.gmra.mrb[12].mxu1 %vm5527_vm3, %v22513_v8  ;;  %v22523_v8 = vcombine.low %v19894_v30, %v19901_v15  ;;  %v20135_v15 = vsel %vm17346_vm8, %v14680_v62, %v9142_v26  ;;  %v20158_v62 = vld [vmem:[#allocation3 + $0x80] sm:$0x1]  ;;  %v9177_v26 = vrot.slane %v20149_v60, 5  ;;  %v22532_v30 = vcombine.low %v19908_v9, %v19913_v41  ;;  %v20199_v41 = vld [vmem:[#allocation3 + $0x98] sm:$0x1] }
 0x4f4   : > { %15916 = vmatprep.mubr.msk.bf16.mxu1 %vm5527_vm3, %v22514_v23  ;;  %v20124_v23 = vsel %vm17346_vm8, %v9137_v25, %v9138_v47  ;;  %22525 = vst [vmem:[#allocation17_spill] sm:$0xff] %v20135_v15  ;;  %v9163_v25 = vrot.slane %v20118_v39, 5  ;;  %v9051_v47 = vld [vmem:[#allocation3 + $0x84] sm:$0xe]  ;;  %v20201_v9 = vld [vmem:[#allocation3 + $0xa4] sm:$0x1] }
 0x4f5   : > { %22524 = vst [vmem:[#allocation16_spill] sm:$0xff] %v20124_v23 }
 0x4fb   : > { %15917 = vmatmul.mubr.msk.bf16.gmra.mrb[16].mxu1 %vm5527_vm3, %v22515_v46  ;;  %v9145_v46 = vrot.slane %v20086_v22, 5 }
 0x4fc   : > { %15920 = vmatprep.mubr.msk.bf16.mxu1 %vm5527_vm3, %v22516_v0  ;;  %v9049_v0 = vld [vmem:[#allocation3 + $0x6c] sm:$0xe] }
 0x4fd   : > { %v20142_v59 = vsel %vm17346_vm8, %v9144_v61, %v9145_v46  ;;  %v14683_v58 = vrot.slane %v9049_v0, 9  ;;  %v9166_v61 = vrot.slane %v20129_v45, 5  ;;  %v14684_v46 = vrot.slane %v9050_v50, 9  ;;  %v20186_v50 = vld [vmem:[#allocation3 + $0xa0] sm:$0xf] }
 0x4fe   : > { %22526 = vst [vmem:[#allocation5_spill] sm:$0xff] %v20142_v59  ;;  %v9170_v0 = vrot.slane %v20138_v2, 5  ;;  %v20334_v59 = vld [vmem:[#allocation3 + $0x20] sm:$0x1] }
 0x4ff   : > { %22553 = vst [vmem:[#allocation35_spill] sm:$0xff] %v20334_v59 }
 0x500   : > { %v20207_v55 = vsel %vm17346_vm8, %v14684_v46, %v9170_v0  ;;  %v9187_v46 = vrot.slane %v20199_v41, 5 }
 0x501   : > { %22534 = vst [vmem:[#allocation8_spill] sm:$0xff] %v20207_v55  ;;  %v9198_v55 = vrot.slane %v20210_v17, 5 }
 0x503   : > { %15921 = vmatmul.mubr.msk.bf16.gmra.mrb[20].mxu1 %vm5527_vm3, %v22520_v6  ;;  %v20164_v6 = vsel %vm17346_vm8, %v14682_v20, %v9156_v32  ;;  %v20179_v20 = vsel %vm17346_vm8, %v14683_v58, %v9163_v25  ;;  %v14685_v32 = vrot.slane %v9051_v47, 9  ;;  %v9172_v58 = vrot.slane %v9170_v0, 4  ;;  %v9053_v47 = vld [vmem:[#allocation3 + $0x9c] sm:$0xe] }
 0x504   : > { %15924 = vmatprep.mubr.msk.bf16.mxu1 %vm5527_vm3, %v22523_v8  ;;  %22529 = vst [vmem:[#allocation20_spill] sm:$0xff] %v20164_v6  ;;  %v9165_v8 = vrot.slane %v9163_v25, 4  ;;  %22531 = vst [vmem:[#allocation13_spill] sm:$0xff] %v20179_v20  ;;  %v9173_v25 = vrot.slane %v20158_v62, 5  ;;  %v14687_v1 = vrot.slane %v9053_v47, 9  ;;  %v9194_v47 = vrot.slane %v20201_v9, 5 }
 0x505   : > { %v20218_v31 = vsel %vm17346_vm8, %v14685_v32, %v9177_v26  ;;  %v9200_v5 = vrot.slane %v9198_v55, 4  ;;  %v9201_v6 = vrot.slane %v20230_v40, 5 }
 0x506   : > { %v20192_v21 = vsel %vm17346_vm8, %v9165_v8, %v9166_v61  ;;  %v9179_v8 = vrot.slane %v9177_v26, 4  ;;  %v9180_v61 = vrot.slane %v20167_v63, 5  ;;  %v20214_v13 = vsel %vm17346_vm8, %v9172_v58, %v9173_v25  ;;  %22536 = vst [vmem:[#allocation19_spill] sm:$0xff] %v20218_v31  ;;  %v9055_v25 = vld [vmem:[#allocation3 + $0xb4] sm:$0xe] }
 0x507   : > { %22533 = vst [vmem:[#allocation7_spill] sm:$0xff] %v20192_v21  ;;  %22535 = vst [vmem:[#allocation9_spill] sm:$0xff] %v20214_v13  ;;  %v9191_v58 = vrot.slane %v20186_v50, 5  ;;  %v20239_v13 = vld [vmem:[#allocation3 + $0xbc] sm:$0x1] }
 0x508   : > { %v20227_v0 = vsel %vm17346_vm8, %v9179_v8, %v9180_v61  ;;  %v14688_v61 = vrot.slane %v9054_v29, 9  ;;  %v20243_v21 = vld [vmem:[#allocation3 + $0xc4] sm:$0xf]  ;;  %v9056_v31 = vld [vmem:[#allocation3 + $0xc0] sm:$0xe] }
 0x509   : > { %22537 = vst [vmem:[#allocation22_spill] sm:$0xff] %v20227_v0  ;;  %v9193_v8 = vrot.slane %v9191_v58, 4  ;;  %v9205_v0 = vrot.slane %v20221_v35, 5 }
 0x50b   : > { %15925 = vmatmul.mubr.msk.bf16.gmra.mrb[24].mxu1 %vm5527_vm3, %v22532_v30  ;;  %v9184_v30 = vrot.slane %v20171_v16, 5  ;;  %v20258_v29 = vsel %vm17346_vm8, %v9193_v8, %v9194_v47  ;;  %v22543_v8 = vcombine.low %v19950_v34, %v19956_v44  ;;  %v20276_v47 = vsel %vm17346_vm8, %v14688_v61, %v9198_v55  ;;  %v16745_v61 = vld [vmem:[#allocation3 + $0xc] sm:$0xff]   ;;  %v8321_v44 = vld [vmem:[#allocation3 + $0x24] sm:$0xf] }
 0x50c   : > { %15928 = vmatprep.mubr.msk.bf16.mxu1 %vm5527_vm3, %v14589_v53  ;;  %v14686_v53 = vrot.slane %v9052_v18, 9  ;;  %22541 = vst [vmem:[#allocation26_spill] sm:$0xff] %v20258_v29  ;;  %22544 = vst [vmem:[#allocation27_spill] sm:$0xff] %v20276_v47  ;;  %v8415_v47 = vshll.u32 %v8321_v44, 16 }
 0x50d   : > { %v9186_v32 = vrot.slane %v9184_v30, 4 }
 0x50e   : > { %v20236_v26 = vsel %vm17346_vm8, %v14686_v53, %v9184_v30  ;;  %v20251_v53 = vsel %vm17346_vm8, %v14687_v1, %v9191_v58  ;;  %v14689_v30 = vrot.slane %v9055_v25, 9  ;;  %v20265_v1 = vld [vmem:[#allocation3 + $0xc8] sm:$0x1]  ;;  %v9207_v25 = vrot.slane %v9205_v0, 4  ;;  %v16748_v58 = vld [vmem:[#allocation3 + $0x30] sm:$0xff]  }
 0x50f   : > { %22538 = vst [vmem:[#allocation23_spill] sm:$0xff] %v20236_v26  ;;  %v20247_v18 = vsel %vm17346_vm8, %v9186_v32, %v9187_v46  ;;  %22540 = vst [vmem:[#allocation25_spill] sm:$0xff] %v20251_v53  ;;  %v22542_v46 = vcombine.low %v19942_v14, %v19946_v43  ;;  %v9208_v32 = vrot.slane %v20239_v13, 5  ;;  %v20280_v14 = vsel %vm17346_vm8, %v9200_v5, %v9201_v6  ;;  %v20332_v26 = vld [vmem:[#allocation3 + $0x14] sm:$0x1] }
 0x510   : > { %22539 = vst [vmem:[#allocation24_spill] sm:$0xff] %v20247_v18  ;;  %22545 = vst [vmem:[#allocation28_spill] sm:$0xff] %v20280_v14  ;;  %v14690_v43 = vrot.slane %v9056_v31, 9  ;;  %v20287_v20 = vsel %vm17346_vm8, %v14689_v30, %v9205_v0  ;;  %v9215_v6 = vrot.slane %v20265_v1, 5  ;;  %v22550_v30 = vcombine.low %v19963_v4, %v19967_v57  ;;  %v20320_v4 = vld [vmem:[#allocation3 + $0x10] sm:$0xf] }
 0x511   : > { %22546 = vst [vmem:[#allocation29_spill] sm:$0xff] %v20287_v20  ;;  %v20291_v34 = vsel %vm17346_vm8, %v9207_v25, %v9208_v32  ;;  %v16746_v25 = vld [vmem:[#allocation3 + $0x18] sm:$0xff]   ;;  %v8846_v32 = vsel %vm7046_vm9, %v20028_v24, 0  ;;  %22552 = vst [vmem:[#allocation34_spill] sm:$0xff] %v20332_v26 }
 0x512   : > { %22547 = vst [vmem:[#allocation30_spill] sm:$0xff] %v20291_v34  ;;  %v8318_v57 = vld [vmem:[#allocation3 + $0x18] sm:$0xf] }
 0x513   : > { %15929 = vmatmul.mubr.msk.bf16.gmra.mrb[28].mxu1 %vm5527_vm3, %v22542_v46  ;;  %v9212_v46 = vrot.slane %v20243_v21, 5  ;;  %v8388_v0 = vshrl.u32 %v8318_v57, 16 }
 0x514   : > { %15932 = vmatprep.mubr.msk.bf16.mxu1 %vm5527_vm3, %v22543_v8  ;;  %v16747_v8 = vld [vmem:[#allocation3 + $0x24] sm:$0xff]  }
 0x515   : > { %v9214_v55 = vrot.slane %v9212_v46, 4  ;;  %v20298_v5 = vsel %vm17346_vm8, %v14690_v43, %v9212_v46  ;;  %v20316_v43 = vld [vmem:[%s22221_s4 + $0x14] sm:$0xf]  ;;  %v8315_v46 = vld [vmem:[#allocation3 + $0xc] sm:$0xf]  ;;  %v8390_v29 = vrot.slane %v8388_v0, 4 }
 0x516   : > { %22548 = vst [vmem:[#allocation31_spill] sm:$0xff] %v20298_v5  ;;  %v8364_v24 = vshrl.u32 %v8315_v46, 16  ;;  %v16751_v0 = vld [vmem:[#allocation3 + $0x54] sm:$0xff]  }
 0x517   : > { %v20302_v31 = vsel %vm17346_vm8, %v9214_v55, %v9215_v6  ;;  %v20324_v55 = vld [vmem:[#allocation3 + $0x1c] sm:$0xf]  ;;  %v8367_v6 = vshll.u32 %v8315_v46, 16  ;;  %v8412_v46 = vshrl.u32 %v8321_v44, 16  ;;  %v8425_v44 = vshrl.u32 %v20050_v10, 16 }
 0x518   : > { %22549 = vst [vmem:[#allocation32_spill] sm:$0xff] %v20302_v31  ;;  %22551 = vst [vmem:[#allocation33_spill] sm:$0xff] %v20324_v55  ;;  %v16749_v31 = vld [vmem:[#allocation3 + $0x3c] sm:$0xff]   ;;  %v8366_v5 = vrot.slane %v8364_v24, 4 }
 0x519   : > { %v8369_v34 = vrot.slane %v8367_v6, 5  ;;  %v8414_v24 = vrot.slane %v8412_v46, 4  ;;  %v8417_v6 = vrot.slane %v8415_v47, 5 }
 0x51b   : > { %15933 = vmatmul.mubr.msk.bf16.gmra.mrb[32].mxu1 %vm5527_vm3, %v22550_v30  ;;  %v8377_v30 = vshrl.u32 %v20320_v4, 16  ;;  %v8370_v36 = vor.u32 %v8369_v34, %v8366_v5  ;;  %v8418_v34 = vor.u32 %v8417_v6, %v8414_v24  ;;  %v8324_v5 = vld [vmem:[#allocation3 + $0x30] sm:$0xf] }
 0x51c   : > { %15938 = vmatprep.mubr.msk.bf16.mxu1 %vm5527_vm3, %v16745_v61  ;;  %v8373_v61 = vshll.u32 %v20320_v4, 16  ;;  %v8436_v24 = vshrl.u32 %v8324_v5, 16  ;;  %v8439_v6 = vshll.u32 %v8324_v5, 16 }
 0x51d   : > { %v8379_v14 = vrot.slane %v8377_v30, 4  ;;  %v16750_v30 = vld [vmem:[#allocation3 + $0x48] sm:$0xff]  }
 0x51e   : > { %v8375_v20 = vrot.slane %v8373_v61, 5  ;;  %v8421_v61 = vshll.u32 %v20050_v10, 16 }
 0x520   : > { %v8380_v52 = vor.u32 %v8379_v14, %v8375_v20 }
 0x522   : > { %v8381_v14 = vrot.slane %v8380_v52, 4  ;;  %v20349_v52 = vrot.slane %v8418_v34, 4 }
 0x523   : > { %15939 = vmatmul.mubr.msk.bf16.vlgmr.msra.gmra.mrb[4].mxu1 %vm5527_vm3, %v16746_v25  ;;  %v8391_v25 = vshll.u32 %v8318_v57, 16 }
 0x524   : > { %15971 = vmatpush3.bf16.msra.mxu1 %v8846_v32  ;;  %15942 = vmatprep.mubr.msk.bf16.mxu1 %vm5527_vm3, %v16747_v8  ;;  %v8397_v32 = vshll.u32 %v20324_v55, 16  ;;  %v8401_v8 = vshrl.u32 %v20324_v55, 16 }
 0x525   : > { %16679 = vmatprep.subr.msk.bf16.mxu1 %vm7046_vm9, %v20316_v43  ;;  %v8393_v53 = vrot.slane %v8391_v25, 5  ;;  %v8371_v25 = vrot.slane %v8370_v36, 4  ;;  %v8431_v36 = vshll.u32 %v20056_v48, 16  ;;  %v16753_v48 = vld [vmem:[#allocation3 + $0x6c] sm:$0xff]  }
 0x526   : > { %v8399_v57 = vrot.slane %v8397_v32, 5  ;;  %v8403_v18 = vrot.slane %v8401_v8, 4  ;;  %v8407_v32 = vshll.u32 %v20334_v59, 16  ;;  %v21201_v8 = vld [vmem:[%s16947_s18 + $0x30] sm:$0xff]  }
 0x527   : > { %v8394_v15 = vor.u32 %v8393_v53, %v8390_v29  ;;  %v8427_v29 = vrot.slane %v8425_v44, 4  ;;  %v8376_v46 = vsel %vm16963_vm13, %v8371_v25, %v8375_v20  ;;  %v8445_v20 = vshll.u32 %v20062_v19, 16  ;;  %v16752_v44 = vld [vmem:[#allocation3 + $0x60] sm:$0xff]  }
 0x528   : > { %v8409_v23 = vrot.slane %v8407_v32, 5  ;;  %v8433_v25 = vrot.slane %v8431_v36, 5  ;;  %v8449_v32 = vshrl.u32 %v20062_v19, 16  ;;  %v8473_v36 = vshrl.u32 %v20065_v3, 16 }
 0x529   : > { %v8395_v47 = vrot.slane %v8394_v15, 4  ;;  %v20368_v5 = vrot.slane %v8445_v20, 5  ;;  %v8521_v20 = vshrl.u32 %v20075_v42, 16 }
 0x52b   : > { %15943 = vmatmul.mubr.msk.bf16.gmra.mrb[8].mxu1 %vm5527_vm3, %v16748_v58  ;;  %v8404_v58 = vor.u32 %v8403_v18, %v8399_v57  ;;  %v20342_v18 = vrot.slane %v8421_v61, 5  ;;  %v8400_v15 = vsel %vm16963_vm13, %v8395_v47, %v8399_v57  ;;  %v8438_v57 = vrot.slane %v8436_v24, 4 }
 0x52c   : > { %15946 = vmatprep.mubr.msk.bf16.mxu1 %vm5527_vm3, %v16749_v31  ;;  %v8383_v31 = vshll.u32 %v20332_v26, 16  ;;  %v8441_v47 = vrot.slane %v8439_v6, 5  ;;  %v8451_v6 = vrot.slane %v8449_v32, 4  ;;  %v16755_v32 = vld [vmem:[#allocation3 + $0x84] sm:$0xff]  }
 0x52d   : > { %v8405_v53 = vrot.slane %v8404_v58, 4  ;;  %v8428_v61 = vor.u32 %v8427_v29, %v20342_v18 }
 0x52e   : > { %v8385_v10 = vrot.slane %v8383_v31, 5  ;;  %v8327_v31 = vld [vmem:[#allocation3 + $0x3c] sm:$0xf] }
 0x52f   : > { %v8410_v58 = vsel %vm16963_vm13, %v8405_v53, %v8409_v23  ;;  %v8424_v23 = vsel %vm16963_vm13, %v20349_v52, %v20342_v18  ;;  %v8333_v53 = vld [vmem:[#allocation3 + $0x54] sm:$0xf]  ;;  %v8429_v29 = vrot.slane %v8428_v61, 4  ;;  %v8463_v19 = vshll.u32 %v8327_v31, 16 }
 0x530   : > { %v20361_v34 = vcombine.low %v8400_v15, %v8410_v58  ;;  %v8493_v58 = vshll.u32 %v20069_v38, 16  ;;  %v8497_v18 = vshrl.u32 %v20069_v38, 16  ;;  %v8508_v52 = vshrl.u32 %v8333_v53, 16 }
 0x531   : > { %v8511_v24 = vshll.u32 %v8333_v53, 16  ;;  %v8517_v61 = vshll.u32 %v20075_v42, 16  ;;  %v8465_v37 = vrot.slane %v8463_v19, 5  ;;  %v8475_v38 = vrot.slane %v8473_v36, 4 }
 0x532   : > { %v20381_v28 = vrot.slane %v8493_v58, 5  ;;  %v8510_v59 = vrot.slane %v8508_v52, 4  ;;  %v8541_v19 = vshll.u32 %v20103_v33, 16  ;;  %v8339_v58 = vld [vmem:[#allocation3 + $0x6c] sm:$0xf] }
 0x533   : > { %15947 = vmatmul.mubr.msk.bf16.gmra.mrb[12].mxu1 %vm5527_vm3, %v16750_v30  ;;  %v8386_v30 = vsel %vm16963_vm13, %v8381_v14, %v8385_v10  ;;  %v8330_v14 = vld [vmem:[#allocation3 + $0x48] sm:$0xf]  ;;  %v8460_v10 = vshrl.u32 %v8327_v31, 16  ;;  %v8434_v31 = vsel %vm16963_vm13, %v8429_v29, %v8433_v25  ;;  %v8513_v55 = vrot.slane %v8511_v24, 5 }
 0x534   : > { %15950 = vmatprep.mubr.msk.bf16.mxu1 %vm5527_vm3, %v16751_v0  ;;  %v20357_v0 = vcombine.low %v8376_v46, %v8386_v30  ;;  %v8469_v46 = vshll.u32 %v20065_v3, 16  ;;  %v8484_v30 = vshrl.u32 %v8330_v14, 16  ;;  %v8487_v15 = vshll.u32 %v8330_v14, 16  ;;  %v8336_v14 = vld [vmem:[#allocation3 + $0x60] sm:$0xf] }
 0x535   : > { %v8462_v3 = vrot.slane %v8460_v10, 4  ;;  %v20384_v42 = vrot.slane %v8517_v61, 5  ;;  %v8523_v25 = vrot.slane %v8521_v20, 4  ;;  %v8452_v29 = vor.u32 %v8451_v6, %v20368_v5 }
 0x536   : > { %v20379_v56 = vrot.slane %v8469_v46, 5  ;;  %v8486_v7 = vrot.slane %v8484_v30, 4  ;;  %v8489_v53 = vrot.slane %v8487_v15, 5  ;;  %v8545_v46 = vshrl.u32 %v20103_v33, 16 }
 0x537   : > { %v20392_v36 = vcombine.low %v8424_v23, %v8434_v31  ;;  %v8466_v30 = vor.u32 %v8465_v37, %v8462_v3  ;;  %v8479_v15 = vshll.u32 %v20072_v27, 16  ;;  %v8503_v6 = vshll.u32 %v20086_v22, 16  ;;  %v16756_v3 = vld [vmem:[#allocation3 + $0x90] sm:$0xff]  }
 0x538   : > { %v8490_v52 = vor.u32 %v8489_v53, %v8486_v7  ;;  %v8524_v61 = vor.u32 %v8523_v25, %v20384_v42  ;;  %v20399_v33 = vrot.slane %v8541_v19, 5  ;;  %v8547_v23 = vrot.slane %v8545_v46, 4  ;;  %v16757_v7 = vld [vmem:[#allocation3 + $0x9c] sm:$0xff]  }
 0x539   : > { %v8556_v37 = vshrl.u32 %v8339_v58, 16  ;;  %v8559_v31 = vshll.u32 %v8339_v58, 16  ;;  %v8467_v27 = vrot.slane %v8466_v30, 4  ;;  %v8505_v26 = vrot.slane %v8503_v6, 5 }
 0x53a   : > { %v8491_v53 = vrot.slane %v8490_v52, 4  ;;  %v8527_v22 = vshll.u32 %v20095_v54, 16  ;;  %v8565_v25 = vshll.u32 %v20118_v39, 16 }
 0x53b   : > { %15951 = vmatmul.mubr.msk.bf16.gmra.mrb[16].mxu1 %vm5527_vm3, %v16752_v44  ;;  %v8455_v44 = vshll.u32 %v20067_v11, 16  ;;  %v8499_v11 = vrot.slane %v8497_v18, 4  ;;  %v8558_v19 = vrot.slane %v8556_v37, 4  ;;  %v8561_v46 = vrot.slane %v8559_v31, 5  ;;  %v20438_v31 = vld [vmem:[#allocation3 + $0x1c] sm:$0xf] }
 0x53c   : > { %15954 = vmatprep.mubr.msk.bf16.mxu1 %vm5527_vm3, %v16753_v48  ;;  %v8442_v48 = vor.u32 %v8441_v47, %v8438_v57  ;;  %v8532_v57 = vshrl.u32 %v8336_v14, 16  ;;  %v8535_v47 = vshll.u32 %v8336_v14, 16  ;;  %v8529_v52 = vrot.slane %v8527_v22, 5 }
 0x53d   : > { %v20388_v10 = vrot.slane %v8455_v44, 5  ;;  %v8500_v24 = vor.u32 %v8499_v11, %v20381_v28  ;;  %v8514_v44 = vor.u32 %v8513_v55, %v8510_v59  ;;  %v8589_v37 = vshll.u32 %v20138_v2, 16 }
 0x53e   : > { %v8443_v18 = vrot.slane %v8442_v48, 4  ;;  %v8534_v20 = vrot.slane %v8532_v57, 4  ;;  %v8537_v14 = vrot.slane %v8535_v47, 5  ;;  %v8481_v48 = vrot.slane %v8479_v15, 5 }
 0x53f   : > { %v8501_v11 = vrot.slane %v8500_v24, 4  ;;  %v8515_v59 = vrot.slane %v8514_v44, 4  ;;  %v8569_v57 = vshrl.u32 %v20118_v39, 16  ;;  %v8525_v47 = vrot.slane %v8524_v61, 4  ;;  %v16758_v44 = vld [vmem:[#allocation3 + $0xa8] sm:$0xff]  }
 0x540   : > { %v8538_v55 = vor.u32 %v8537_v14, %v8534_v20  ;;  %v8448_v30 = vsel %vm16963_vm13, %v8443_v18, %v20368_v5  ;;  %v8496_v15 = vsel %vm16963_vm13, %v8491_v53, %v20381_v28  ;;  %v8551_v5 = vshll.u32 %v20127_v49, 16  ;;  %v8342_v18 = vld [vmem:[#allocation3 + $0x78] sm:$0xf]  ;;  %v20452_v53 = vld [vmem:[#allocation3 + $0x28] sm:$0xf] }
 0x541   : > { %v8506_v58 = vsel %vm16963_vm13, %v8501_v11, %v8505_v26  ;;  %v8571_v6 = vrot.slane %v8569_v57, 4  ;;  %v8530_v28 = vsel %vm16963_vm13, %v8525_v47, %v8529_v52  ;;  %v8562_v26 = vor.u32 %v8561_v46, %v8558_v19  ;;  %v10596_v49 = vld [vmem:[#allocation3 + $0x18] sm:$0xe]  ;;  %22556 = vst [vmem:[#allocation36_spill] sm:$0xff] %v20452_v53  ;;  %v20473_v19 = vld [vmem:[#allocation3 + $0x34] sm:$0xf] }
 0x542   : > { %v20427_v24 = vrot.slane %v8538_v55, 4  ;;  %v8575_v20 = vshll.u32 %v20129_v45, 16  ;;  %v8580_v14 = vshrl.u32 %v8342_v18, 16  ;;  %v20450_v45 = vld [vmem:[#allocation3 + $0x20] sm:$0x1]  ;;  %v14790_v55 = vrot.slane %v10596_v49, 9 }
 0x543   : > { %15955 = vmatmul.mubr.msk.bf16.gmra.mrb[20].mxu1 %vm5527_vm3, %v16754_v51  ;;  %v8476_v51 = vor.u32 %v8475_v38, %v20379_v56  ;;  %v8453_v38 = vrot.slane %v8452_v29, 4  ;;  %v8548_v29 = vor.u32 %v8547_v23, %v20399_v33  ;;  %v8583_v23 = vshll.u32 %v8342_v18, 16  ;;  %22555 = vst [vmem:[#allocation4_spill] sm:$0xff] %v20450_v45  ;;  %22558 = vst [vmem:[#allocation38_spill] sm:$0xff] %v20473_v19  ;;  %v20486_v52 = vld [vmem:[#allocation3 + $0x40] sm:$0xf] }
 0x544   : > { %15958 = vmatprep.mubr.msk.bf16.mxu1 %vm5527_vm3, %v16755_v32  ;;  %v20469_v47 = vrot.slane %v8562_v26, 4  ;;  %v10662_v46 = vrot.slane %v20438_v31, 5  ;;  %22560 = vst [vmem:[#allocation40_spill] sm:$0xff] %v20486_v52  ;;  %v10665_v18 = vrot.slane %v20450_v45, 5  ;;  %v10600_v26 = vld [vmem:[#allocation3 + $0x48] sm:$0xe] }
 0x545   : > { %v8477_v32 = vrot.slane %v8476_v51, 4  ;;  %v8458_v54 = vsel %vm16963_vm13, %v8453_v38, %v20388_v10  ;;  %v8472_v51 = vsel %vm16963_vm13, %v8467_v27, %v20379_v56  ;;  %v8520_v10 = vsel %vm16963_vm13, %v8515_v59, %v20384_v42  ;;  %v20462_v59 = vld [vmem:[#allocation3 + $0x2c] sm:$0x1]  ;;  %v20518_v45 = vld [vmem:[#allocation3 + $0x64] sm:$0xf] }
 0x546   : > { %v20429_v56 = vrot.slane %v8565_v25, 5  ;;  %v20433_v61 = vrot.slane %v8548_v29, 4  ;;  %v8593_v42 = vshrl.u32 %v20138_v2, 16  ;;  %v20440_v38 = vcombine.low %v8448_v30, %v8458_v54  ;;  %22557 = vst [vmem:[#allocation37_spill] sm:$0xff] %v20462_v59  ;;  %v10597_v25 = vld [vmem:[#allocation3 + $0x24] sm:$0xe] }
 0x547   : > { %v8482_v39 = vsel %vm16963_vm13, %v8477_v32, %v8481_v48  ;;  %v20444_v32 = vcombine.low %v8496_v15, %v8506_v58  ;;  %v20446_v48 = vrot.slane %v8551_v5, 5  ;;  %v20455_v2 = vcombine.low %v8520_v10, %v8530_v28  ;;  %v10598_v15 = vld [vmem:[#allocation3 + $0x30] sm:$0xe]  ;;  %v20484_v58 = vld [vmem:[#allocation3 + $0x38] sm:$0x1]  ;;  %22567 = vst [vmem:[#allocation47_spill] sm:$0xff] %v20518_v45 }
 0x548   : > { %v20442_v27 = vcombine.low %v8472_v51, %v8482_v39  ;;  %v8572_v22 = vor.u32 %v8571_v6, %v20429_v56  ;;  %v20471_v29 = vrot.slane %v8575_v20, 5  ;;  %v20476_v30 = vrot.slane %v8580_v14, 4  ;;  %22559 = vst [vmem:[#allocation39_spill] sm:$0xff] %v20484_v58  ;;  %v20494_v20 = vld [vmem:[#allocation3 + $0x44] sm:$0x1] }
 0x549   : > { %v20478_v54 = vrot.slane %v8583_v23, 5  ;;  %v20480_v51 = vrot.slane %v8589_v37, 5  ;;  %v20482_v39 = vrot.slane %v8593_v42, 4  ;;  %v10664_v5 = vrot.slane %v10662_v46, 4  ;;  %22561 = vst [vmem:[#allocation41_spill] sm:$0xff] %v20494_v20  ;;  %v16760_v23 = vld [vmem:[#allocation3 + $0xc0] sm:$0xff]  }
 0x54a   : > { %v14791_v10 = vrot.slane %v10597_v25, 9  ;;  %v10669_v6 = vrot.slane %v20452_v53, 5  ;;  %v20498_v49 = vsel %vm17346_vm8, %v14790_v55, %v10662_v46  ;;  %v10599_v14 = vld [vmem:[#allocation3 + $0x3c] sm:$0xe]  ;;  %v20500_v37 = vld [vmem:[#allocation3 + $0x4c] sm:$0xf] }
 0x54b   : > { %15959 = vmatmul.mubr.msk.bf16.gmra.mrb[24].mxu1 %vm5527_vm3, %v16756_v3  ;;  %v16759_v3 = vld [vmem:[#allocation3 + $0xb4] sm:$0xff]   ;;  %22562 = vst [vmem:[#allocation42_spill] sm:$0xff] %v20498_v49  ;;  %22563 = vst [vmem:[#allocation43_spill] sm:$0xff] %v20500_v37  ;;  %v20504_v42 = vsel %vm17346_vm8, %v10664_v5, %v10665_v18  ;;  %v14792_v25 = vrot.slane %v10598_v15, 9  ;;  %v20510_v28 = vld [vmem:[#allocation3 + $0x50] sm:$0x1] }
 0x54c   : > { %15962 = vmatprep.mubr.msk.bf16.mxu1 %vm5527_vm3, %v16757_v7  ;;  %v20448_v7 = vld [vmem:[#allocation3 + $0x84] sm:$0xf]  ;;  %22564 = vst [vmem:[#allocation44_spill] sm:$0xff] %v20504_v42  ;;  %22565 = vst [vmem:[#allocation45_spill] sm:$0xff] %v20510_v28  ;;  %v10676_v46 = vrot.slane %v20473_v19, 5  ;;  %v20522_v15 = vsel %vm17346_vm8, %v14791_v10, %v10669_v6  ;;  %v14793_v11 = vrot.slane %v10599_v14, 9 }
 0x54d   : > { %v20516_v18 = vld [vmem:[#allocation3 + $0x58] sm:$0xf]  ;;  %22568 = vst [vmem:[#allocation48_spill] sm:$0xff] %v20522_v15  ;;  %v10679_v5 = vrot.slane %v20484_v58, 5  ;;  %v10683_v49 = vrot.slane %v20486_v52, 5  ;;  %v14794_v14 = vrot.slane %v10600_v26, 9 }
 0x54e   : > { %22566 = vst [vmem:[#allocation46_spill] sm:$0xff] %v20516_v18  ;;  %v10678_v42 = vrot.slane %v10676_v46, 4  ;;  %v20537_v10 = vsel %vm17346_vm8, %v14792_v25, %v10676_v46  ;;  %v20543_v55 = vld [vmem:[#allocation3 + $0x68] sm:$0x1]  ;;  %v10693_v46 = vrot.slane %v20510_v28, 5  ;;  %v10704_v28 = vrot.slane %v20518_v45, 5 }
 0x54f   : > { %22570 = vst [vmem:[#allocation50_spill] sm:$0xff] %v20537_v10  ;;  %v10685_v25 = vrot.slane %v10683_v49, 4  ;;  %v20554_v15 = vld [vmem:[#allocation3 + $0x70] sm:$0xf]  ;;  %v20559_v52 = vld [vmem:[#allocation3 + $0x74] sm:$0x1] }
 0x550   : > { %v10603_v26 = vld [vmem:[#allocation3 + $0x6c] sm:$0xe]  ;;  %v10706_v19 = vrot.slane %v10704_v28, 4  ;;  %v10707_v53 = vrot.slane %v20543_v55, 5  ;;  %v10605_v45 = vld [vmem:[#allocation3 + $0x84] sm:$0xe] }
 0x551   : > { %v14797_v10 = vrot.slane %v10603_v26, 9 }
 0x553   : > { %15963 = vmatmul.mubr.msk.bf16.gmra.mrb[28].mxu1 %vm5527_vm3, %v16758_v44  ;;  %v20490_v44 = vrot.slane %v8572_v22, 4  ;;  %v10672_v22 = vrot.slane %v20462_v59, 5  ;;  %v10601_v59 = vld [vmem:[#allocation3 + $0x54] sm:$0xe] }
 0x554   : > { %15966 = vmatprep.mubr.msk.bf16.mxu1 %vm5527_vm3, %v16759_v3  ;;  %v10671_v3 = vrot.slane %v10669_v6, 4  ;;  %v10686_v6 = vrot.slane %v20494_v20, 5  ;;  %v14795_v58 = vrot.slane %v10601_v59, 9  ;;  %v20574_v59 = vld [vmem:[#allocation3 + $0x88] sm:$0xf] }
 0x555   : > { %22576 = vst [vmem:[#allocation56_spill] sm:$0xff] %v20574_v59 }
 0x556   : > { %v20526_v57 = vsel %vm17346_vm8, %v10671_v3, %v10672_v22  ;;  %v10602_v3 = vld [vmem:[#allocation3 + $0x60] sm:$0xe]  ;;  %v20541_v22 = vld [vmem:[#allocation3 + $0x5c] sm:$0x1] }
 0x557   : > { %22569 = vst [vmem:[#allocation49_spill] sm:$0xff] %v20526_v57  ;;  %v20547_v57 = vsel %vm17346_vm8, %v10678_v42, %v10679_v5  ;;  %v20561_v42 = vld [vmem:[#allocation3 + $0x7c] sm:$0xf]  ;;  %v14796_v5 = vrot.slane %v10602_v3, 9  ;;  %v20585_v3 = vld [vmem:[#allocation3 + $0x8c] sm:$0x1] }
 0x558   : > { %22571 = vst [vmem:[#allocation51_spill] sm:$0xff] %v20547_v57  ;;  %v20572_v57 = vld [vmem:[#allocation3 + $0x80] sm:$0x1]  ;;  %22578 = vst [vmem:[#allocation58_spill] sm:$0xff] %v20585_v3 }
 0x559   : > { %22575 = vst [vmem:[#allocation55_spill] sm:$0xff] %v20572_v57 }
 0x55b   : > { %15967 = vmatmul.mubr.msk.bf16.gmra.mrb[32].mxu1 %vm5527_vm3, %v16760_v23  ;;  %v10690_v23 = vrot.slane %v20500_v37, 5  ;;  %v10697_v37 = vrot.slane %v20516_v18, 5 }
 0x55c   : > { %15972 = vmatprep.mubr.msk.bf16.mxu1 %vm5527_vm3, %v20357_v0  ;;  %v20551_v0 = vsel %vm17346_vm8, %v14793_v11, %v10683_v49  ;;  %v20565_v11 = vsel %vm17346_vm8, %v10685_v25, %v10686_v6  ;;  %v10700_v25 = vrot.slane %v20541_v22, 5 }
 0x55d   : > { %22572 = vst [vmem:[#allocation52_spill] sm:$0xff] %v20551_v0  ;;  %v10692_v20 = vrot.slane %v10690_v23, 4  ;;  %22573 = vst [vmem:[#allocation53_spill] sm:$0xff] %v20565_v11  ;;  %v20569_v49 = vsel %vm17346_vm8, %v14794_v14, %v10690_v23  ;;  %v10699_v6 = vrot.slane %v10697_v37, 4  ;;  %v10604_v14 = vld [vmem:[#allocation3 + $0x78] sm:$0xe] }
 0x55e   : > { %22574 = vst [vmem:[#allocation54_spill] sm:$0xff] %v20569_v49  ;;  %v9316_v23 = vsel %vm7046_vm9, %v20316_v43, 0  ;;  %v10711_v11 = vrot.slane %v20554_v15, 5  ;;  %v14798_v26 = vrot.slane %v10604_v14, 9  ;;  %v10607_v14 = vld [vmem:[#allocation3 + $0x9c] sm:$0xe] }
 0x55f   : > { %v20580_v18 = vsel %vm17346_vm8, %v10692_v20, %v10693_v46  ;;  %v20593_v20 = vld [vmem:[%s22221_s4 + $0x18] sm:$0xf]  ;;  %v20597_v46 = vsel %vm17346_vm8, %v14795_v58, %v10697_v37  ;;  %v20601_v43 = vsel %vm17346_vm8, %v10699_v6, %v10700_v25  ;;  %v20612_v58 = vsel %vm17346_vm8, %v14796_v5, %v10704_v28  ;;  %v10606_v6 = vld [vmem:[#allocation3 + $0x90] sm:$0xe]  ;;  %v20641_v0 = vld [vmem:[#allocation3 + $0xa4] sm:$0x1] }
 0x560   : > { %22577 = vst [vmem:[#allocation57_spill] sm:$0xff] %v20580_v18  ;;  %22579 = vst [vmem:[#allocation59_spill] sm:$0xff] %v20597_v46  ;;  %v20606_v18 = vld [vmem:[#allocation3 + $0x94] sm:$0xf]  ;;  %v20616_v37 = vsel %vm17346_vm8, %v10706_v19, %v10707_v53  ;;  %v10713_v49 = vrot.slane %v10711_v11, 4  ;;  %v10718_v28 = vrot.slane %v20561_v42, 5  ;;  %v20630_v53 = vsel %vm17346_vm8, %v14797_v10, %v10711_v11 }
 0x561   : > { %22580 = vst [vmem:[#allocation60_spill] sm:$0xff] %v20601_v43  ;;  %22581 = vst [vmem:[#allocation61_spill] sm:$0xff] %v20606_v18  ;;  %v10714_v43 = vrot.slane %v20559_v52, 5  ;;  %v10721_v19 = vrot.slane %v20572_v57, 5  ;;  %v10725_v5 = vrot.slane %v20574_v59, 5  ;;  %v14800_v46 = vrot.slane %v10606_v6, 9 }
 0x562   : > { %22582 = vst [vmem:[#allocation62_spill] sm:$0xff] %v20612_v58  ;;  %22583 = vst [vmem:[#allocation63_spill] sm:$0xff] %v20616_v37  ;;  %v10720_v37 = vrot.slane %v10718_v28, 4  ;;  %v10728_v58 = vrot.slane %v20585_v3, 5  ;;  %v10732_v59 = vrot.slane %v20606_v18, 5  ;;  %v14801_v6 = vrot.slane %v10607_v14, 9 }
 0x563   : > { %15973 = vmatmul.mubr.msk.bf16.vlgmr.msra.gmra.mrb[4].mxu1 %vm5527_vm3, %v20361_v34  ;;  %v20620_v34 = vld [vmem:[#allocation3 + $0xa0] sm:$0xf]  ;;  %22584 = vst [vmem:[#allocation64_spill] sm:$0xff] %v20630_v53  ;;  %v20638_v25 = vsel %vm17346_vm8, %v10713_v49, %v10714_v43  ;;  %22586 = vst [vmem:[#allocation66_spill] sm:$0xff] %v20641_v0  ;;  %v10727_v11 = vrot.slane %v10725_v5, 4 }
 0x564   : > { %16005 = vmatpush3.bf16.msra.mxu1 %v9316_v23  ;;  %15976 = vmatprep.mubr.msk.bf16.mxu1 %vm5527_vm3, %v20392_v36  ;;  %v14799_v36 = vrot.slane %v10605_v45, 9  ;;  %v20634_v23 = vld [vmem:[#allocation3 + $0x98] sm:$0x1]  ;;  %22585 = vst [vmem:[#allocation65_spill] sm:$0xff] %v20638_v25  ;;  %v20647_v45 = vsel %vm17346_vm8, %v14798_v26, %v10718_v28  ;;  %v20650_v57 = vld [vmem:[#allocation3 + $0xac] sm:$0xf]  ;;  %v20654_v49 = vsel %vm17346_vm8, %v10720_v37, %v10721_v19 }
 0x565   : > { %16680 = vmatprep.subr.msk.bf16.mxu1 %vm7046_vm9, %v20593_v20  ;;  %22587 = vst [vmem:[#allocation67_spill] sm:$0xff] %v20647_v45  ;;  %22588 = vst [vmem:[#allocation68_spill] sm:$0xff] %v20654_v49  ;;  %v10739_v10 = vrot.slane %v20620_v34, 5  ;;  %v10608_v25 = vld [vmem:[#allocation3 + $0xa8] sm:$0xe]  ;;  %v20667_v28 = vsel %vm17346_vm8, %v10727_v11, %v10728_v58  ;;  %v10734_v3 = vrot.slane %v10732_v59, 4  ;;  %v20678_v14 = vsel %vm17346_vm8, %v14800_v46, %v10732_v59 }
 0x566   : > { %v20658_v43 = vsel %vm17346_vm8, %v14799_v36, %v10725_v5  ;;  %v20661_v53 = vld [vmem:[#allocation3 + $0xb8] sm:$0xf]  ;;  %22590 = vst [vmem:[#allocation70_spill] sm:$0xff] %v20667_v28  ;;  %v10735_v37 = vrot.slane %v20634_v23, 5  ;;  %v10609_v19 = vld [vmem:[#allocation3 + $0xb4] sm:$0xe] }
 0x567   : > { %22589 = vst [vmem:[#allocation69_spill] sm:$0xff] %v20658_v43  ;;  %v20670_v18 = vld [vmem:[#allocation3 + $0xb0] sm:$0x1]  ;;  %v20672_v36 = vld [vmem:[#allocation3 + $0xbc] sm:$0x1]  ;;  %22593 = vst [vmem:[#allocation73_spill] sm:$0xff] %v20678_v14  ;;  %v20691_v45 = vsel %vm17346_vm8, %v14801_v6, %v10739_v10 }
 0x568   : > { %22591 = vst [vmem:[#allocation71_spill] sm:$0xff] %v20670_v18  ;;  %22592 = vst [vmem:[#allocation72_spill] sm:$0xff] %v20672_v36  ;;  %v10741_v26 = vrot.slane %v10739_v10, 4  ;;  %v10742_v49 = vrot.slane %v20641_v0, 5  ;;  %v20683_v58 = vld [vmem:[#allocation3 + $0xc4] sm:$0xf]  ;;  %v20687_v11 = vsel %vm17346_vm8, %v10734_v3, %v10735_v37 }
 0x569   : > { %22594 = vst [vmem:[#allocation74_spill] sm:$0xff] %v20687_v11  ;;  %22595 = vst [vmem:[#allocation75_spill] sm:$0xff] %v20691_v45  ;;  %v14802_v5 = vrot.slane %v10608_v25, 9  ;;  %v10746_v59 = vrot.slane %v20650_v57, 5  ;;  %v10610_v46 = vld [vmem:[#allocation3 + $0xc0] sm:$0xe] }
 0x56a   : > { %v20700_v28 = vsel %vm17346_vm8, %v10741_v26, %v10742_v49  ;;  %v14803_v3 = vrot.slane %v10609_v19, 9  ;;  %v10753_v37 = vrot.slane %v20661_v53, 5  ;;  %v8617_v10 = vshrl.u32 %v20149_v60, 16  ;;  %v20704_v6 = vld [vmem:[#allocation3 + $0xc8] sm:$0x1] }
 0x56b   : > { %15977 = vmatmul.mubr.msk.bf16.gmra.mrb[8].mxu1 %vm5527_vm3, %v20440_v38  ;;  %22596 = vst [vmem:[#allocation76_spill] sm:$0xff] %v20700_v28  ;;  %v10748_v43 = vrot.slane %v10746_v59, 4  ;;  %v10756_v38 = vrot.slane %v20672_v36, 5  ;;  %v14804_v11 = vrot.slane %v10610_v46, 9  ;;  %v10760_v49 = vrot.slane %v20683_v58, 5 }
 0x56c   : > { %15980 = vmatprep.mubr.msk.bf16.mxu1 %vm5527_vm3, %v20442_v27  ;;  %v10749_v27 = vrot.slane %v20670_v18, 5  ;;  %v10755_v0 = vrot.slane %v10753_v37, 4  ;;  %v8596_v26 = vor.u32 %v20482_v39, %v20480_v51  ;;  %v20715_v19 = vsel %vm17346_vm8, %v14802_v5, %v10746_v59  ;;  %v8348_v28 = vld [vmem:[#allocation3 + $0x90] sm:$0xf]  ;;  %v8351_v18 = vld [vmem:[#allocation3 + $0x9c] sm:$0xf] }
 0x56d   : > { %22597 = vst [vmem:[#allocation77_spill] sm:$0xff] %v20715_v19  ;;  %v20723_v25 = vsel %vm17346_vm8, %v14803_v3, %v10753_v37  ;;  %v10762_v39 = vrot.slane %v10760_v49, 4  ;;  %v10763_v5 = vrot.slane %v20704_v6, 5  ;;  %v22601_v59 = vor.u32 %v20478_v54, %v20476_v30 }
 0x56e   : > { %v20719_v14 = vsel %vm17346_vm8, %v10748_v43, %v10749_v27  ;;  %22599 = vst [vmem:[#allocation79_spill] sm:$0xff] %v20723_v25  ;;  %v20729_v45 = vsel %vm17346_vm8, %v10755_v0, %v10756_v38  ;;  %v22602_v27 = vshrl.u32 %v20448_v7, 16  ;;  %v22603_v3 = vshll.u32 %v20448_v7, 16 }
 0x56f   : > { %22598 = vst [vmem:[#allocation78_spill] sm:$0xff] %v20719_v14  ;;  %22600 = vst [vmem:[#allocation80_spill] sm:$0xff] %v20729_v45  ;;  %v8587_v43 = vrot.slane %v22601_v59, 4  ;;  %v22604_v0 = vshll.u32 %v20149_v60, 16  ;;  %v8619_v14 = vrot.slane %v8617_v10, 4  ;;  %v20747_v19 = vsel %vm17346_vm8, %v14804_v11, %v10760_v49 }
 0x570   : > { %v8606_v36 = vrot.slane %v22602_v27, 4  ;;  %v8609_v37 = vrot.slane %v22603_v3, 5  ;;  %22605 = vst [vmem:[#allocation81_spill] sm:$0xff] %v20747_v19  ;;  %v20751_v30 = vsel %vm17346_vm8, %v10762_v39, %v10763_v5  ;;  %v8597_v7 = vrot.slane %v8596_v26, 4 }
 0x571   : > { %v20743_v38 = vrot.slane %v22604_v0, 5  ;;  %22606 = vst [vmem:[#allocation82_spill] sm:$0xff] %v20751_v30  ;;  %v8628_v54 = vshrl.u32 %v8348_v28, 16  ;;  %v8631_v59 = vshll.u32 %v8348_v28, 16  ;;  %v8637_v10 = vshll.u32 %v20171_v16, 16 }
 0x572   : > { %v8641_v11 = vshrl.u32 %v20171_v16, 16  ;;  %v8652_v49 = vshrl.u32 %v8351_v18, 16  ;;  %v8655_v27 = vshll.u32 %v8351_v18, 16  ;;  %v22607_v26 = vshll.u32 %v20158_v62, 16 }
 0x573   : > { %15981 = vmatmul.mubr.msk.bf16.gmra.mrb[12].mxu1 %vm5527_vm3, %v20444_v32  ;;  %v8568_v32 = vsel %vm16963_vm13, %v20469_v47, %v20429_v56  ;;  %v8661_v39 = vshll.u32 %v20186_v50, 16  ;;  %v8665_v5 = vshrl.u32 %v20186_v50, 16  ;;  %v8610_v16 = vor.u32 %v8609_v37, %v8606_v36 }
 0x574   : > { %15984 = vmatprep.mubr.msk.bf16.mxu1 %vm5527_vm3, %v20455_v2  ;;  %v8601_v28 = vrot.slane %v22607_v26, 5  ;;  %v8578_v2 = vsel %vm16963_vm13, %v20490_v44, %v20471_v29  ;;  %v8620_v18 = vor.u32 %v8619_v14, %v20743_v38  ;;  %v8623_v3 = vshll.u32 %v20167_v63, 16  ;;  %v8354_v14 = vld [vmem:[#allocation3 + $0xa8] sm:$0xf] }
 0x575   : > { %v8592_v56 = vsel %vm16963_vm13, %v8587_v43, %v20480_v51  ;;  %v8630_v47 = vrot.slane %v8628_v54, 4  ;;  %v8633_v0 = vrot.slane %v8631_v59, 5  ;;  %v20780_v50 = vrot.slane %v8637_v10, 5 }
 0x576   : > { %v8602_v62 = vsel %vm16963_vm13, %v8597_v7, %v8601_v28  ;;  %v8643_v26 = vrot.slane %v8641_v11, 4  ;;  %v8654_v60 = vrot.slane %v8652_v49, 4  ;;  %v8657_v46 = vrot.slane %v8655_v27, 5  ;;  %v8357_v49 = vld [vmem:[#allocation3 + $0xb4] sm:$0xf] }
 0x577   : > { %v22608_v29 = vsel %vm16963_vm13, %v20433_v61, %v20446_v48  ;;  %v22609_v63 = vsel %vm16963_vm13, %v20427_v24, %v20399_v33  ;;  %v8663_v44 = vrot.slane %v8661_v39, 5  ;;  %v8667_v36 = vrot.slane %v8665_v5, 4 }
 0x578   : > { %v14650_v51 = vcombine.low %v22609_v63, %v22608_v29  ;;  %v14651_v43 = vcombine.low %v8568_v32, %v8578_v2  ;;  %v8611_v37 = vrot.slane %v8610_v16, 4  ;;  %v8621_v7 = vrot.slane %v8620_v18, 4 }
 0x579   : > { %v14652_v54 = vcombine.low %v8592_v56, %v8602_v62  ;;  %v8625_v59 = vrot.slane %v8623_v3, 5  ;;  %v8634_v10 = vor.u32 %v8633_v0, %v8630_v47  ;;  %v8644_v61 = vor.u32 %v8643_v26, %v20780_v50 }
 0x57a   : > { %v8658_v48 = vor.u32 %v8657_v46, %v8654_v60  ;;  %v8676_v11 = vshrl.u32 %v8354_v14, 16  ;;  %v8668_v33 = vor.u32 %v8667_v36, %v8663_v44  ;;  %v8679_v24 = vshll.u32 %v8354_v14, 16 }
 0x57b   : > { %15985 = vmatmul.mubr.msk.bf16.gmra.mrb[16].mxu1 %vm5527_vm3, %v14650_v51  ;;  %v8685_v27 = vshll.u32 %v20210_v17, 16  ;;  %v8689_v32 = vshrl.u32 %v20210_v17, 16  ;;  %v8616_v28 = vsel %vm16963_vm13, %v8611_v37, %v20743_v38  ;;  %v8626_v39 = vsel %vm16963_vm13, %v8621_v7, %v8625_v59 }
 0x57c   : > { %15988 = vmatprep.mubr.msk.bf16.mxu1 %vm5527_vm3, %v14651_v43  ;;  %v8647_v5 = vshll.u32 %v20199_v41, 16  ;;  %v8671_v2 = vshll.u32 %v20201_v9, 16  ;;  %v8700_v46 = vshrl.u32 %v8357_v49, 16  ;;  %v8703_v60 = vshll.u32 %v8357_v49, 16  ;;  %v8360_v43 = vld [vmem:[#allocation3 + $0xc0] sm:$0xf] }
 0x57d   : > { %v8709_v16 = vshll.u32 %v20221_v35, 16  ;;  %v8713_v18 = vshrl.u32 %v20221_v35, 16  ;;  %v8635_v3 = vrot.slane %v8634_v10, 4  ;;  %v8645_v56 = vrot.slane %v8644_v61, 4 }
 0x57e   : > { %v8659_v17 = vrot.slane %v8658_v48, 4  ;;  %v8678_v62 = vrot.slane %v8676_v11, 4  ;;  %v8669_v47 = vrot.slane %v8668_v33, 4  ;;  %v8681_v0 = vrot.slane %v8679_v24, 5 }
 0x57f   : > { %v8687_v38 = vrot.slane %v8685_v27, 5  ;;  %v8691_v26 = vrot.slane %v8689_v32, 4  ;;  %v14653_v29 = vcombine.low %v8616_v28, %v8626_v39  ;;  %v8649_v63 = vrot.slane %v8647_v5, 5 }
 0x580   : > { %v8673_v51 = vrot.slane %v8671_v2, 5  ;;  %v8702_v41 = vrot.slane %v8700_v46, 4  ;;  %v8705_v9 = vrot.slane %v8703_v60, 5  ;;  %v8711_v36 = vrot.slane %v8709_v16, 5 }
 0x581   : > { %v8715_v14 = vrot.slane %v8713_v18, 4  ;;  %v8640_v35 = vsel %vm16963_vm13, %v8635_v3, %v20780_v50  ;;  %v8650_v37 = vsel %vm16963_vm13, %v8645_v56, %v8649_v63  ;;  %v8664_v7 = vsel %vm16963_vm13, %v8659_v17, %v8663_v44 }
 0x582   : > { %v8682_v59 = vor.u32 %v8681_v0, %v8678_v62  ;;  %v8692_v10 = vor.u32 %v8691_v26, %v8687_v38  ;;  %v8724_v61 = vshrl.u32 %v8360_v43, 16  ;;  %v8727_v48 = vshll.u32 %v8360_v43, 16 }
 0x583   : > { %15989 = vmatmul.mubr.msk.bf16.gmra.mrb[20].mxu1 %vm5527_vm3, %v14652_v54  ;;  %v8674_v54 = vsel %vm16963_vm13, %v8669_v47, %v8673_v51  ;;  %v8733_v11 = vshll.u32 %v20243_v21, 16  ;;  %v8737_v49 = vshrl.u32 %v20243_v21, 16  ;;  %v8706_v33 = vor.u32 %v8705_v9, %v8702_v41 }
 0x584   : > { %15992 = vmatprep.mubr.msk.bf16.mxu1 %vm5527_vm3, %v14653_v29  ;;  %v8716_v24 = vor.u32 %v8715_v14, %v8711_v36  ;;  %v14654_v50 = vcombine.low %v8640_v35, %v8650_v37  ;;  %v8695_v27 = vshll.u32 %v20230_v40, 16  ;;  %v14655_v32 = vcombine.low %v8664_v7, %v8674_v54 }
 0x585   : > { %v8683_v28 = vrot.slane %v8682_v59, 4  ;;  %v8693_v39 = vrot.slane %v8692_v10, 4  ;;  %v8719_v44 = vshll.u32 %v20239_v13, 16  ;;  %v8726_v5 = vrot.slane %v8724_v61, 4  ;;  %v9042_v61 = vld [vmem:[#allocation3 + $0x18] sm:$0xe] }
 0x586   : > { %v8729_v2 = vrot.slane %v8727_v48, 5  ;;  %v8735_v46 = vrot.slane %v8733_v11, 5  ;;  %v8739_v60 = vrot.slane %v8737_v49, 4  ;;  %v8707_v16 = vrot.slane %v8706_v33, 4  ;;  %v22612_v33 = vld [vmem:[#allocation35_spill] sm:$0xff] }
 0x587   : > { %v8717_v18 = vrot.slane %v8716_v24, 4  ;;  %v8697_v21 = vrot.slane %v8695_v27, 5  ;;  %v8721_v3 = vrot.slane %v8719_v44, 5  ;;  %v8688_v40 = vsel %vm16963_vm13, %v8683_v28, %v8687_v38  ;;  %v9041_v38 = vld [vmem:[#allocation3 + $0xc] sm:$0xe] }
 0x588   : > { %v8730_v17 = vor.u32 %v8729_v2, %v8726_v5  ;;  %v8740_v13 = vor.u32 %v8739_v60, %v8735_v46  ;;  %v8712_v62 = vsel %vm16963_vm13, %v8707_v16, %v8711_v36  ;;  %v9107_v0 = vrot.slane %v20320_v4, 5  ;;  %v22610_v36 = vld [vmem:[#allocation34_spill] sm:$0xff]  ;;  %v22611_v4 = vld [vmem:[#allocation33_spill] sm:$0xff]  ;;  %v22614_v5 = vld [vmem:[#allocation11_spill] sm:$0xff] }
 0x589   : > { %v8698_v56 = vsel %vm16963_vm13, %v8693_v39, %v8697_v21  ;;  %v8722_v47 = vsel %vm16963_vm13, %v8717_v18, %v8721_v3  ;;  %v8743_v26 = vshll.u32 %v20265_v1, 16  ;;  %v14675_v43 = vrot.slane %v9041_v38, 9  ;;  %v20857_v39 = vld [vmem:[%s22221_s4 + $0x1c] sm:$0xf]  ;;  %v22613_v44 = vld [vmem:[#allocation10_spill] sm:$0xff]  ;;  %v22620_v18 = vld [vmem:[#allocation16_spill] sm:$0xff] }
 0x58a   : > { %v14656_v29 = vcombine.low %v8688_v40, %v8698_v56  ;;  %v14657_v63 = vcombine.low %v8712_v62, %v8722_v47  ;;  %v8731_v51 = vrot.slane %v8730_v17, 4  ;;  %v8741_v41 = vrot.slane %v8740_v13, 4  ;;  %v22617_v60 = vld [vmem:[#allocation14_spill] sm:$0xff]  ;;  %v22622_v3 = vld [vmem:[#allocation17_spill] sm:$0xff]  ;;  %v22628_v47 = vld [vmem:[#allocation20_spill] sm:$0xff] }
 0x58b   : > { %15993 = vmatmul.mubr.msk.bf16.gmra.mrb[24].mxu1 %vm5527_vm3, %v14654_v50  ;;  %v9109_v9 = vrot.slane %v9107_v0, 4  ;;  %v8745_v14 = vrot.slane %v8743_v26, 5  ;;  %v9110_v35 = vrot.slane %v22610_v36, 5  ;;  %v9114_v7 = vrot.slane %v22611_v4, 5  ;;  %v22623_v40 = vld [vmem:[#allocation5_spill] sm:$0xff]  ;;  %v22625_v17 = vld [vmem:[#allocation18_spill] sm:$0xff] }
 0x58c   : > { %15996 = vmatprep.mubr.msk.bf16.mxu1 %vm5527_vm3, %v14655_v32  ;;  %v8736_v37 = vsel %vm16963_vm13, %v8731_v51, %v8735_v46  ;;  %v9108_v10 = vsel %vm17346_vm8, %v14675_v43, %v9107_v0  ;;  %v14676_v49 = vrot.slane %v9042_v61, 9  ;;  %v9117_v24 = vrot.slane %v22612_v33, 5  ;;  %v22616_v46 = vld [vmem:[#allocation12_spill] sm:$0xff]  ;;  %v22626_v13 = vld [vmem:[#allocation6_spill] sm:$0xff]  ;;  %v22629_v0 = vld [vmem:[#allocation21_spill] sm:$0xff] }
 0x58d   : > { %v8746_v1 = vsel %vm16963_vm13, %v8741_v41, %v8745_v14  ;;  %v9111_v54 = vsel %vm17346_vm8, %v9109_v9, %v9110_v35  ;;  %v9116_v11 = vrot.slane %v9114_v7, 4  ;;  %v9675_v28 = vsel %vm7046_vm9, %v20593_v20, 0  ;;  %v22619_v20 = vld [vmem:[#allocation15_spill] sm:$0xff]  ;;  %v22634_v41 = vld [vmem:[#allocation8_spill] sm:$0xff]  ;;  %v22635_v38 = vld [vmem:[#allocation9_spill] sm:$0xff] }
 0x58e   : > { %v14658_v59 = vcombine.low %v8736_v37, %v8746_v1  ;;  %v14692_v48 = vcombine.low %v9108_v10, %v9111_v54  ;;  %v9115_v27 = vsel %vm17346_vm8, %v14676_v49, %v9114_v7  ;;  %v22615_v2 = vcombine.low %v22613_v44, %v22614_v5  ;;  %v22637_v14 = vld [vmem:[#allocation19_spill] sm:$0xff]  ;;  %v22638_v43 = vld [vmem:[#allocation22_spill] sm:$0xff]  ;;  %v22641_v37 = vld [vmem:[#allocation24_spill] sm:$0xff] }
 0x58f   : > { %v9118_v50 = vsel %vm17346_vm8, %v9116_v11, %v9117_v24  ;;  %v22618_v16 = vcombine.low %v22616_v46, %v22617_v60  ;;  %v22621_v21 = vcombine.low %v22619_v20, %v22620_v18  ;;  %v22624_v56 = vcombine.low %v22622_v3, %v22623_v40  ;;  %v22640_v35 = vld [vmem:[#allocation23_spill] sm:$0xff]  ;;  %v22643_v4 = vld [vmem:[#allocation25_spill] sm:$0xff]  ;;  %v22644_v7 = vld [vmem:[#allocation26_spill] sm:$0xff] }
 0x590   : > { %v14693_v32 = vcombine.low %v9115_v27, %v9118_v50  ;;  %v22627_v62 = vcombine.low %v22625_v17, %v22626_v13  ;;  %v22630_v26 = vcombine.low %v22628_v47, %v22629_v0  ;;  %v22636_v9 = vcombine.low %v22634_v41, %v22635_v38  ;;  %v22647_v11 = vld [vmem:[#allocation28_spill] sm:$0xff]  ;;  %v9873_v33 = vld [vmem:[#allocation3 + $0x24] sm:$0xf]  ;;  %v22650_v50 = vld [vmem:[#allocation30_spill] sm:$0xff] }
 0x591   : > { %v22639_v36 = vcombine.low %v22637_v14, %v22638_v43  ;;  %v22642_v1 = vcombine.low %v22640_v35, %v22641_v37  ;;  %v22645_v54 = vcombine.low %v22643_v4, %v22644_v7  ;;  %v22649_v24 = vld [vmem:[#allocation29_spill] sm:$0xff]  ;;  %v9928_v44 = vshll.u32 %v20438_v31, 16  ;;  %v9879_v5 = vld [vmem:[#allocation3 + $0x3c] sm:$0xf]  ;;  %v22655_v14 = vld [vmem:[#allocation31_spill] sm:$0xff] }
 0x592   : > { %v22651_v27 = vcombine.low %v22649_v24, %v22650_v50  ;;  %v9932_v46 = vshrl.u32 %v20438_v31, 16  ;;  %v9943_v60 = vshrl.u32 %v9873_v33, 16  ;;  %v22652_v20 = vld [vmem:[#allocation36_spill] sm:$0xff]  ;;  %v9994_v47 = vshll.u32 %v9879_v5, 16 }
 0x593   : > { %15997 = vmatmul.mubr.msk.bf16.gmra.mrb[28].mxu1 %vm5527_vm3, %v14656_v29  ;;  %v22631_v29 = vld [vmem:[#allocation13_spill] sm:$0xff]  ;;  %v9952_v18 = vshll.u32 %v22652_v20, 16  ;;  %v20920_v0 = vrot.slane %v9928_v44, 5  ;;  %v22656_v43 = vld [vmem:[#allocation32_spill] sm:$0xff] }
 0x594   : > { %16000 = vmatprep.mubr.msk.bf16.mxu1 %vm5527_vm3, %v14657_v63  ;;  %v22632_v63 = vld [vmem:[#allocation7_spill] sm:$0xff]  ;;  %v9934_v41 = vrot.slane %v9932_v46, 4  ;;  %v9945_v38 = vrot.slane %v9943_v60, 4  ;;  %v22658_v24 = vld [vmem:[#allocation4_spill] sm:$0xff] }
 0x595   : > { %v22633_v51 = vcombine.low %v22631_v29, %v22632_v63  ;;  %v16761_v63 = vld [vmem:[#allocation3 + $0x18] sm:$0xff]   ;;  %v20928_v35 = vrot.slane %v9952_v18, 5  ;;  %v9938_v50 = vshll.u32 %v22658_v24, 16  ;;  %v10401_v18 = vsel %vm7046_vm9, %v20857_v39, 0  ;;  %v22663_v24 = vld [vmem:[#allocation46_spill] sm:$0xff] }
 0x59b   : > { %16001 = vmatmul.mubr.msk.bf16.gmra.mrb[32].mxu1 %vm5527_vm3, %v14658_v59  ;;  %v9870_v59 = vld [vmem:[#allocation3 + $0x18] sm:$0xf] }
 0x59c   : > { %16006 = vmatprep.mubr.msk.bf16.mxu1 %vm5527_vm3, %v14692_v48  ;;  %v9919_v10 = vshrl.u32 %v9870_v59, 16  ;;  %v9922_v61 = vshll.u32 %v9870_v59, 16  ;;  %v22646_v48 = vld [vmem:[#allocation27_spill] sm:$0xff] }
 0x59d   : > { %v22648_v49 = vcombine.low %v22646_v48, %v22647_v11 }
 0x5a3   : > { %16007 = vmatmul.mubr.msk.bf16.vlgmr.msra.gmra.mrb[4].mxu1 %vm5527_vm3, %v14693_v32  ;;  %v9876_v32 = vld [vmem:[#allocation3 + $0x30] sm:$0xf] }
 0x5a4   : > { %16039 = vmatpush3.bf16.msra.mxu1 %v9675_v28  ;;  %16010 = vmatprep.mubr.msk.bf16.mxu1 %vm5527_vm3, %v22615_v2  ;;  %v9921_v28 = vrot.slane %v9919_v10, 4  ;;  %v9924_v2 = vrot.slane %v9922_v61, 5  ;;  %v9967_v3 = vshrl.u32 %v9876_v32, 16  ;;  %v9970_v40 = vshll.u32 %v9876_v32, 16  ;;  %v9882_v61 = vld [vmem:[#allocation3 + $0x48] sm:$0xf] }
 0x5a5   : > { %16681 = vmatprep.subr.msk.bf16.mxu1 %vm7046_vm9, %v20857_v39  ;;  %v9996_v10 = vrot.slane %v9994_v47, 5  ;;  %v22659_v32 = vld [vmem:[#allocation37_spill] sm:$0xff]  ;;  %v10015_v44 = vshrl.u32 %v9882_v61, 16  ;;  %v9940_v47 = vrot.slane %v9938_v50, 5  ;;  %v22661_v39 = vld [vmem:[#allocation39_spill] sm:$0xff]  ;;  %v10048_v50 = vshll.u32 %v22663_v24, 16 }
 0x5a6   : > { %v9972_v4 = vrot.slane %v9970_v40, 5 }
 0x5ab   : > { %16011 = vmatmul.mubr.msk.bf16.gmra.mrb[8].mxu1 %vm5527_vm3, %v22618_v16  ;;  %v9946_v16 = vshll.u32 %v9873_v33, 16  ;;  %v9935_v33 = vor.u32 %v9934_v41, %v20920_v0  ;;  %v10017_v41 = vrot.slane %v10015_v44, 4 }
 0x5ac   : > { %16014 = vmatprep.mubr.msk.bf16.mxu1 %vm5527_vm3, %v22621_v21  ;;  %v9956_v21 = vshrl.u32 %v22652_v20, 16  ;;  %v16762_v20 = vld [vmem:[#allocation3 + $0x24] sm:$0xff]  }
 0x5ae   : > { %v9958_v37 = vrot.slane %v9956_v21, 4 }
 0x5b3   : > { %16015 = vmatmul.mubr.msk.bf16.gmra.mrb[12].mxu1 %vm5527_vm3, %v22624_v56  ;;  %v22653_v56 = vld [vmem:[#allocation38_spill] sm:$0xff] }
 0x5b4   : > { %16018 = vmatprep.mubr.msk.bf16.mxu1 %vm5527_vm3, %v22627_v62  ;;  %v9976_v17 = vshll.u32 %v22653_v56, 16  ;;  %v9980_v13 = vshrl.u32 %v22653_v56, 16  ;;  %v9991_v62 = vshrl.u32 %v9879_v5, 16  ;;  %v10018_v5 = vshll.u32 %v9882_v61, 16 }
 0x5b6   : > { %v20931_v7 = vrot.slane %v9976_v17, 5  ;;  %v9993_v59 = vrot.slane %v9991_v62, 4  ;;  %v16763_v17 = vld [vmem:[#allocation3 + $0x30] sm:$0xff]   ;;  %v9936_v62 = vrot.slane %v9935_v33, 4 }
 0x5bb   : > { %16019 = vmatmul.mubr.msk.bf16.gmra.mrb[16].mxu1 %vm5527_vm3, %v22630_v26  ;;  %v22654_v26 = vld [vmem:[#allocation40_spill] sm:$0xff] }
 0x5bc   : > { %16022 = vmatprep.mubr.msk.bf16.mxu1 %vm5527_vm3, %v22633_v51  ;;  %v10000_v29 = vshll.u32 %v22654_v26, 16  ;;  %v10004_v31 = vshrl.u32 %v22654_v26, 16  ;;  %v9925_v51 = vor.u32 %v9924_v2, %v9921_v28  ;;  %v9962_v28 = vshll.u32 %v22659_v32, 16  ;;  %v20954_v26 = vld [vmem:[%s22221_s4 + $0x20] sm:$0xf] }
 0x5bd   : > { %v9959_v2 = vor.u32 %v9958_v37, %v20928_v35  ;;  %v9888_v32 = vld [vmem:[#allocation3 + $0x60] sm:$0xf] }
 0x5be   : > { %v20933_v48 = vrot.slane %v10000_v29, 5  ;;  %v10006_v11 = vrot.slane %v10004_v31, 4  ;;  %v9986_v29 = vshll.u32 %v22661_v39, 16  ;;  %v9964_v31 = vrot.slane %v9962_v28, 5 }
 0x5c0   : > { %v10007_v21 = vor.u32 %v10006_v11, %v20933_v48 }
 0x5c3   : > { %16023 = vmatmul.mubr.msk.bf16.gmra.mrb[20].mxu1 %vm5527_vm3, %v22636_v9  ;;  %v9948_v9 = vrot.slane %v9946_v16, 5  ;;  %v9997_v16 = vor.u32 %v9996_v10, %v9993_v59  ;;  %v9941_v59 = vsel %vm16963_vm13, %v9936_v62, %v9940_v47  ;;  %v9988_v10 = vrot.slane %v9986_v29, 5 }
 0x5c4   : > { %16026 = vmatprep.mubr.msk.bf16.mxu1 %vm5527_vm3, %v22639_v36  ;;  %v22657_v36 = vcombine.low %v22655_v14, %v22656_v43  ;;  %v9960_v14 = vrot.slane %v9959_v2, 4  ;;  %v20986_v62 = vrot.slane %v10048_v50, 5  ;;  %v10124_v50 = vshrl.u32 %v20561_v42, 16 }
 0x5c5   : > { %v9998_v37 = vrot.slane %v9997_v16, 4 }
 0x5c6   : > { %v9965_v44 = vsel %vm16963_vm13, %v9960_v14, %v9964_v31  ;;  %v9894_v14 = vld [vmem:[#allocation3 + $0x78] sm:$0xf] }
 0x5cb   : > { %16027 = vmatmul.mubr.msk.bf16.gmra.mrb[24].mxu1 %vm5527_vm3, %v22642_v1  ;;  %v9969_v1 = vrot.slane %v9967_v3, 4  ;;  %v22660_v3 = vld [vmem:[#allocation43_spill] sm:$0xff] }
 0x5cc   : > { %16030 = vmatprep.mubr.msk.bf16.mxu1 %vm5527_vm3, %v22645_v54  ;;  %v9982_v54 = vrot.slane %v9980_v13, 4  ;;  %v10024_v40 = vshll.u32 %v22660_v3, 16  ;;  %v10028_v56 = vshrl.u32 %v22660_v3, 16 }
 0x5cd   : > { %v9973_v46 = vor.u32 %v9972_v4, %v9969_v1  ;;  %v10008_v1 = vrot.slane %v10007_v21, 4  ;;  %v16765_v21 = vld [vmem:[#allocation3 + $0x48] sm:$0xff]  }
 0x5ce   : > { %v9983_v60 = vor.u32 %v9982_v54, %v20931_v7  ;;  %v20962_v4 = vrot.slane %v10024_v40, 5  ;;  %v10030_v54 = vrot.slane %v10028_v56, 4  ;;  %v10063_v56 = vshrl.u32 %v9888_v32, 16 }
 0x5cf   : > { %v9974_v43 = vrot.slane %v9973_v46, 4  ;;  %v16764_v46 = vld [vmem:[#allocation3 + $0x3c] sm:$0xff]  }
 0x5d3   : > { %16031 = vmatmul.mubr.msk.bf16.gmra.mrb[28].mxu1 %vm5527_vm3, %v22648_v49  ;;  %v20935_v49 = vrot.slane %v9925_v51, 4 }
 0x5d4   : > { %16034 = vmatprep.mubr.msk.bf16.mxu1 %vm5527_vm3, %v22651_v27  ;;  %v9949_v27 = vor.u32 %v9948_v9, %v9945_v38  ;;  %v10020_v38 = vrot.slane %v10018_v5, 5  ;;  %v9885_v9 = vld [vmem:[#allocation3 + $0x54] sm:$0xf]  ;;  %v9979_v5 = vsel %vm16963_vm13, %v9974_v43, %v20931_v7  ;;  %v10066_v7 = vshll.u32 %v9888_v32, 16 }
 0x5d5   : > { %v9931_v13 = vsel %vm16963_vm13, %v20935_v49, %v20920_v0  ;;  %v10039_v61 = vshrl.u32 %v9885_v9, 16  ;;  %v10042_v11 = vshll.u32 %v9885_v9, 16  ;;  %v10065_v9 = vrot.slane %v10063_v56, 4 }
 0x5d6   : > { %v9950_v0 = vrot.slane %v9949_v27, 4  ;;  %v10021_v33 = vor.u32 %v10020_v38, %v10017_v41  ;;  %v10052_v27 = vshrl.u32 %v22663_v24, 16  ;;  %v10120_v24 = vshll.u32 %v20561_v42, 16 }
 0x5d7   : > { %v10041_v3 = vrot.slane %v10039_v61, 4  ;;  %v10044_v40 = vrot.slane %v10042_v11, 5  ;;  %v10100_v61 = vshrl.u32 %v20554_v15, 16  ;;  %v16766_v11 = vld [vmem:[#allocation3 + $0x54] sm:$0xff]  }
 0x5d8   : > { %v9955_v28 = vsel %vm16963_vm13, %v9950_v0, %v20928_v35  ;;  %v10031_v35 = vor.u32 %v10030_v54, %v20962_v4  ;;  %v10054_v47 = vrot.slane %v10052_v27, 4  ;;  %v10068_v0 = vrot.slane %v10066_v7, 5 }
 0x5d9   : > { %v20991_v39 = vcombine.low %v9955_v28, %v9965_v44  ;;  %v10045_v38 = vor.u32 %v10044_v40, %v10041_v3  ;;  %v10058_v28 = vshll.u32 %v20541_v22, 16  ;;  %v10126_v3 = vrot.slane %v10124_v50, 4 }
 0x5da   : > { %v10032_v41 = vrot.slane %v10031_v35, 4  ;;  %v10069_v44 = vor.u32 %v10068_v0, %v10065_v9  ;;  %v10106_v0 = vshll.u32 %v20559_v52, 16 }
 0x5db   : > { %16035 = vmatmul.mubr.msk.bf16.gmra.mrb[32].mxu1 %vm5527_vm3, %v22657_v36  ;;  %v9984_v36 = vrot.slane %v9983_v60, 4  ;;  %v10003_v60 = vsel %vm16963_vm13, %v9998_v37, %v20933_v48  ;;  %v20989_v48 = vcombine.low %v9931_v13, %v9941_v59  ;;  %v10055_v13 = vor.u32 %v10054_v47, %v20986_v62 }
 0x5dc   : > { %16040 = vmatprep.mubr.msk.bf16.mxu1 %vm5527_vm3, %v16761_v63  ;;  %v22662_v63 = vld [vmem:[#allocation41_spill] sm:$0xff]  ;;  %v21009_v32 = vrot.slane %v10045_v38, 4  ;;  %v21023_v40 = vrot.slane %v10058_v28, 5  ;;  %v21025_v56 = vrot.slane %v10069_v44, 4 }
 0x5dd   : > { %v10010_v51 = vshll.u32 %v22662_v63, 16  ;;  %v9989_v2 = vsel %vm16963_vm13, %v9984_v36, %v9988_v10  ;;  %v22665_v36 = vld [vmem:[#allocation47_spill] sm:$0xff]  ;;  %v10096_v10 = vshll.u32 %v20554_v15, 16 }
 0x5de   : > { %v20993_v29 = vcombine.low %v9979_v5, %v9989_v2  ;;  %v10072_v37 = vshll.u32 %v22665_v36, 16  ;;  %v21013_v5 = vrot.slane %v10055_v13, 4  ;;  %v10051_v47 = vsel %vm16963_vm13, %v21009_v32, %v20986_v62  ;;  %v22666_v62 = vld [vmem:[#allocation55_spill] sm:$0xff] }
 0x5df   : > { %v10012_v49 = vrot.slane %v10010_v51, 5  ;;  %v9891_v51 = vld [vmem:[#allocation3 + $0x6c] sm:$0xf]  ;;  %v21019_v35 = vrot.slane %v10096_v10, 5 }
 0x5e0   : > { %v10087_v54 = vshrl.u32 %v9891_v51, 16  ;;  %v10090_v59 = vshll.u32 %v9891_v51, 16  ;;  %v21015_v15 = vrot.slane %v10072_v37, 5  ;;  %v10130_v37 = vshll.u32 %v22666_v62, 16  ;;  %v16771_v62 = vld [vmem:[#allocation3 + $0x90] sm:$0xff]  }
 0x5e1   : > { %v10013_v16 = vsel %vm16963_vm13, %v10008_v1, %v10012_v49  ;;  %v10076_v1 = vshrl.u32 %v22665_v36, 16  ;;  %v10111_v49 = vshrl.u32 %v9894_v14, 16 }
 0x5e2   : > { %v20995_v31 = vcombine.low %v10003_v60, %v10013_v16  ;;  %v9897_v60 = vld [vmem:[#allocation3 + $0x84] sm:$0xf]  ;;  %v10089_v42 = vrot.slane %v10087_v54, 4  ;;  %v10092_v16 = vrot.slane %v10090_v59, 5  ;;  %v16769_v59 = vld [vmem:[#allocation3 + $0x78] sm:$0xff]   ;;  %v10075_v10 = vsel %vm16963_vm13, %v21025_v56, %v21015_v15 }
 0x5e3   : > { %16041 = vmatmul.mubr.msk.bf16.vlgmr.msra.gmra.mrb[4].mxu1 %vm5527_vm3, %v16762_v20  ;;  %v22664_v20 = vld [vmem:[#allocation45_spill] sm:$0xff]  ;;  %v10078_v2 = vrot.slane %v10076_v1, 4  ;;  %v10135_v7 = vshrl.u32 %v9897_v60, 16  ;;  %v22667_v1 = vld [vmem:[#allocation56_spill] sm:$0xff] }
 0x5e4   : > { %16073 = vmatpush3.bf16.msra.mxu1 %v10401_v18  ;;  %16044 = vmatprep.mubr.msk.bf16.mxu1 %vm5527_vm3, %v16763_v17  ;;  %v10034_v18 = vshll.u32 %v22664_v20, 16  ;;  %v10022_v17 = vrot.slane %v10021_v33, 4  ;;  %v10114_v33 = vshll.u32 %v9894_v14, 16  ;;  %v10102_v20 = vrot.slane %v10100_v61, 4  ;;  %v9900_v14 = vld [vmem:[#allocation3 + $0x90] sm:$0xf] }
 0x5e5   : > { %16682 = vmatprep.subr.msk.bf16.mxu1 %vm7046_vm9, %v20954_v26  ;;  %v10093_v38 = vor.u32 %v10092_v16, %v10089_v42  ;;  %v10144_v54 = vshll.u32 %v22667_v1, 16  ;;  %v10137_v61 = vrot.slane %v10135_v7, 4  ;;  %v10159_v52 = vshrl.u32 %v9900_v14, 16 }
 0x5e6   : > { %v10036_v63 = vrot.slane %v10034_v18, 5  ;;  %v10027_v43 = vsel %vm16963_vm13, %v10022_v17, %v20962_v4  ;;  %v16767_v4 = vld [vmem:[#allocation3 + $0x60] sm:$0xff]   ;;  %v10113_v18 = vrot.slane %v10111_v49, 4  ;;  %v10116_v22 = vrot.slane %v10114_v33, 5 }
 0x5e7   : > { %v10138_v17 = vshll.u32 %v9897_v60, 16  ;;  %v10103_v9 = vor.u32 %v10102_v20, %v21019_v35  ;;  %v10148_v49 = vshrl.u32 %v22667_v1, 16  ;;  %v10162_v33 = vshll.u32 %v9900_v14, 16 }
 0x5e8   : > { %v10037_v27 = vsel %vm16963_vm13, %v10032_v41, %v10036_v63  ;;  %v10079_v63 = vor.u32 %v10078_v2, %v21015_v15  ;;  %v10061_v41 = vsel %vm16963_vm13, %v21013_v5, %v21023_v40  ;;  %v10117_v13 = vor.u32 %v10116_v22, %v10113_v18 }
 0x5e9   : > { %v10094_v28 = vrot.slane %v10093_v38, 4  ;;  %v10104_v44 = vrot.slane %v10103_v9, 4  ;;  %v10108_v5 = vrot.slane %v10106_v0, 5  ;;  %v21054_v60 = vrot.slane %v10144_v54, 5  ;;  %v16770_v9 = vld [vmem:[#allocation3 + $0x84] sm:$0xff]  }
 0x5ea   : > { %v10080_v32 = vrot.slane %v10079_v63, 4  ;;  %v10118_v15 = vrot.slane %v10117_v13, 4  ;;  %v10150_v16 = vrot.slane %v10148_v49, 4  ;;  %v10161_v22 = vrot.slane %v10159_v52, 4 }
 0x5eb   : > { %16045 = vmatmul.mubr.msk.bf16.gmra.mrb[8].mxu1 %vm5527_vm3, %v16764_v46  ;;  %v10082_v46 = vshll.u32 %v20543_v55, 16  ;;  %v21027_v55 = vcombine.low %v10027_v43, %v10037_v27  ;;  %v16768_v43 = vld [vmem:[#allocation3 + $0x6c] sm:$0xff]   ;;  %v9903_v27 = vld [vmem:[#allocation3 + $0x9c] sm:$0xf]  ;;  %v10192_v63 = vshll.u32 %v20620_v34, 16  ;;  %v10196_v38 = vshrl.u32 %v20620_v34, 16 }
 0x5ec   : > { %16048 = vmatprep.mubr.msk.bf16.mxu1 %vm5527_vm3, %v16765_v21  ;;  %v21021_v21 = vrot.slane %v10120_v24, 5  ;;  %v22668_v24 = vld [vmem:[#allocation61_spill] sm:$0xff]  ;;  %v10183_v20 = vshrl.u32 %v9903_v27, 16  ;;  %v10186_v18 = vshll.u32 %v9903_v27, 16  ;;  %v10109_v0 = vsel %vm16963_vm13, %v10104_v44, %v10108_v5 }
 0x5ed   : > { %v21034_v51 = vrot.slane %v10082_v46, 5  ;;  %v10168_v50 = vshll.u32 %v22668_v24, 16  ;;  %v10132_v46 = vrot.slane %v10130_v37, 5  ;;  %v10151_v37 = vor.u32 %v10150_v16, %v21054_v60 }
 0x5ee   : > { %v10127_v36 = vor.u32 %v10126_v3, %v21021_v21  ;;  %v10164_v3 = vrot.slane %v10162_v33, 5  ;;  %v10123_v14 = vsel %vm16963_vm13, %v10118_v15, %v21021_v21  ;;  %v10185_v34 = vrot.slane %v10183_v20, 4 }
 0x5ef   : > { %v21056_v40 = vrot.slane %v10168_v50, 5  ;;  %v10085_v7 = vsel %vm16963_vm13, %v10080_v32, %v21034_v51  ;;  %v22669_v51 = vld [vmem:[#allocation58_spill] sm:$0xff]  ;;  %v10188_v1 = vrot.slane %v10186_v18, 5  ;;  %v21078_v54 = vcombine.low %v10051_v47, %v10061_v41 }
 0x5f0   : > { %v10128_v2 = vrot.slane %v10127_v36, 4  ;;  %v10154_v13 = vshll.u32 %v22669_v51, 16  ;;  %v9906_v36 = vld [vmem:[#allocation3 + $0xa8] sm:$0xf]  ;;  %v10198_v49 = vrot.slane %v10196_v38, 4  ;;  %v10216_v32 = vshll.u32 %v20650_v57, 16 }
 0x5f1   : > { %v10207_v52 = vshrl.u32 %v9906_v36, 16  ;;  %v10210_v33 = vshll.u32 %v9906_v36, 16  ;;  %v10189_v27 = vor.u32 %v10188_v1, %v10185_v34  ;;  %v10220_v18 = vshrl.u32 %v20650_v57, 16  ;;  %v9915_v51 = vld [vmem:[#allocation3 + $0xcc] sm:$0xf] }
 0x5f2   : > { %v10156_v47 = vrot.slane %v10154_v13, 5  ;;  %v21103_v38 = vrot.slane %v10216_v32, 5  ;;  %v9916_v13 = vld [vmem:[#allocation3 + $0xd0] sm:$0xf] }
 0x5f3   : > { %16049 = vmatmul.mubr.msk.bf16.gmra.mrb[12].mxu1 %vm5527_vm3, %v16766_v11  ;;  %v10140_v11 = vrot.slane %v10138_v17, 5  ;;  %v10099_v17 = vsel %vm16963_vm13, %v10094_v28, %v21019_v35  ;;  %v9909_v28 = vld [vmem:[#allocation3 + $0xb4] sm:$0xf]  ;;  %v10209_v16 = vrot.slane %v10207_v52, 4  ;;  %v10212_v20 = vrot.slane %v10210_v33, 5 }
 0x5f4   : > { %16052 = vmatprep.mubr.msk.bf16.mxu1 %vm5527_vm3, %v16767_v4  ;;  %v10172_v4 = vshrl.u32 %v22668_v24, 16  ;;  %v21085_v24 = vcombine.low %v10075_v10, %v10085_v7  ;;  %v21087_v50 = vcombine.low %v10099_v17, %v10109_v0  ;;  %v22670_v10 = vld [vmem:[#allocation66_spill] sm:$0xff]  ;;  %v10244_v7 = vshrl.u32 %v20661_v53, 16 }
 0x5f5   : > { %v10141_v42 = vor.u32 %v10140_v11, %v10137_v61  ;;  %v10178_v61 = vshll.u32 %v20634_v23, 16  ;;  %v21083_v11 = vrot.slane %v10192_v63, 5  ;;  %v10152_v23 = vrot.slane %v10151_v37, 4  ;;  %v16773_v17 = vld [vmem:[#allocation3 + $0xa8] sm:$0xff]  }
 0x5f6   : > { %v10174_v56 = vrot.slane %v10172_v4, 4  ;;  %v21101_v63 = vrot.slane %v10189_v27, 4  ;;  %v10222_v37 = vrot.slane %v10220_v18, 4  ;;  %v10292_v52 = vshrl.u32 %v9916_v13, 16 }
 0x5f7   : > { %v21074_v35 = vrot.slane %v10141_v42, 4  ;;  %v10180_v15 = vrot.slane %v10178_v61, 5  ;;  %v10199_v42 = vor.u32 %v10198_v49, %v21083_v11  ;;  %v10282_v61 = vshll.u32 %v9915_v51, 16 }
 0x5f8   : > { %v10175_v21 = vor.u32 %v10174_v56, %v21056_v40  ;;  %v10240_v56 = vshll.u32 %v20661_v53, 16  ;;  %v10268_v53 = vshrl.u32 %v20683_v58, 16  ;;  %v10288_v49 = vshll.u32 %v9916_v13, 16 }
 0x5f9   : > { %v10147_v41 = vsel %vm16963_vm13, %v21074_v35, %v21054_v60  ;;  %v10234_v60 = vshll.u32 %v9909_v28, 16  ;;  %v10213_v35 = vor.u32 %v10212_v20, %v10209_v16  ;;  %v16775_v20 = vld [vmem:[#allocation3 + $0xc0] sm:$0xff]  }
 0x5fa   : > { %v10176_v5 = vrot.slane %v10175_v21, 4  ;;  %v10246_v21 = vrot.slane %v10244_v7, 4 }
 0x5fb   : > { %16053 = vmatmul.mubr.msk.bf16.gmra.mrb[16].mxu1 %vm5527_vm3, %v16768_v43  ;;  %v10133_v43 = vsel %vm16963_vm13, %v10128_v2, %v10132_v46  ;;  %v10202_v2 = vshll.u32 %v22670_v10, 16  ;;  %v9912_v46 = vld [vmem:[#allocation3 + $0xc0] sm:$0xf]  ;;  %v10236_v1 = vrot.slane %v10234_v60, 5  ;;  %v21136_v60 = vrot.slane %v10213_v35, 4 }
 0x5fc   : > { %16056 = vmatprep.mubr.msk.bf16.mxu1 %vm5527_vm3, %v16769_v59  ;;  %v10165_v59 = vor.u32 %v10164_v3, %v10161_v22  ;;  %v21089_v4 = vcombine.low %v10123_v14, %v10133_v43  ;;  %v16772_v22 = vld [vmem:[#allocation3 + $0x9c] sm:$0xff]   ;;  %v10231_v3 = vshrl.u32 %v9909_v28, 16  ;;  %v10258_v0 = vshll.u32 %v9912_v46, 16 }
 0x5fd   : > { %v10157_v14 = vsel %vm16963_vm13, %v10152_v23, %v10156_v47  ;;  %v10264_v43 = vshll.u32 %v20683_v58, 16  ;;  %v10181_v36 = vsel %vm16963_vm13, %v10176_v5, %v10180_v15  ;;  %v10270_v23 = vrot.slane %v10268_v53, 4  ;;  %v16774_v15 = vld [vmem:[#allocation3 + $0xb4] sm:$0xff]  }
 0x5fe   : > { %v10166_v44 = vrot.slane %v10165_v59, 4  ;;  %v10233_v34 = vrot.slane %v10231_v3, 4  ;;  %v21116_v59 = vrot.slane %v10240_v56, 5  ;;  %v10260_v33 = vrot.slane %v10258_v0, 5  ;;  %v10611_v0 = vld [vmem:[#allocation3 + $0xcc] sm:$0xe] }
 0x5ff   : > { %v21118_v47 = vrot.slane %v10264_v43, 5  ;;  %v21120_v27 = vcombine.low %v10147_v41, %v10157_v14  ;;  %v10204_v32 = vrot.slane %v10202_v2, 5  ;;  %v10223_v28 = vor.u32 %v10222_v37, %v21103_v38 }
 0x600   : > { %v10171_v57 = vsel %vm16963_vm13, %v10166_v44, %v21056_v40  ;;  %v10279_v40 = vshrl.u32 %v9915_v51, 16  ;;  %v22671_v44 = vld [vmem:[#allocation71_spill] sm:$0xff]  ;;  %v10247_v16 = vor.u32 %v10246_v21, %v21116_v59  ;;  %v10284_v41 = vrot.slane %v10282_v61, 5 }
 0x601   : > { %v10226_v5 = vshll.u32 %v22671_v44, 16  ;;  %v21124_v10 = vcombine.low %v10171_v57, %v10181_v36  ;;  %v10294_v2 = vrot.slane %v10292_v52, 4  ;;  %v10271_v7 = vor.u32 %v10270_v23, %v21118_v47 }
 0x602   : > { %v10281_v18 = vrot.slane %v10279_v40, 4  ;;  %v10767_v14 = vrot.slane %v9916_v13, 5  ;;  %v10248_v53 = vrot.slane %v10247_v16, 4  ;;  %v10274_v51 = vshll.u32 %v20704_v6, 16  ;;  %v15202_v16 = vld [vmem:[%s16947_s18 + $0x8] sm:$0xff]  }
 0x603   : > { %16057 = vmatmul.mubr.msk.bf16.gmra.mrb[20].mxu1 %vm5527_vm3, %v16770_v9  ;;  %v10255_v9 = vshrl.u32 %v9912_v46, 16  ;;  %v10195_v46 = vsel %vm16963_vm13, %v21101_v63, %v21083_v11  ;;  %v9917_v11 = vld [vmem:[#allocation3 + $0xd4] sm:$0x1]  ;;  %v22672_v63 = vld [vmem:[#allocation72_spill] sm:$0xff]  ;;  %v14805_v36 = vrot.slane %v10611_v0, 9  ;;  %v10228_v21 = vrot.slane %v10226_v5, 5 }
 0x604   : > { %16060 = vmatprep.mubr.msk.bf16.mxu1 %vm5527_vm3, %v16771_v62  ;;  %v10200_v62 = vrot.slane %v10199_v42, 4  ;;  %v10237_v42 = vor.u32 %v10236_v1, %v10233_v34  ;;  %v10770_v57 = vrot.slane %v9917_v11, 5  ;;  %v10298_v37 = vshll.u32 %v9917_v11, 16  ;;  %v16776_v1 = vld [vmem:[#allocation3 + $0xcc] sm:$0xff]  }
 0x605   : > { %v10257_v58 = vrot.slane %v10255_v9, 4  ;;  %v10250_v9 = vshll.u32 %v22672_v63, 16  ;;  %v10769_v34 = vrot.slane %v10767_v14, 4  ;;  %v10272_v61 = vrot.slane %v10271_v7, 4 }
 0x606   : > { %v10205_v3 = vsel %vm16963_vm13, %v10200_v62, %v10204_v32  ;;  %v10238_v43 = vrot.slane %v10237_v42, 4  ;;  %v10285_v62 = vor.u32 %v10284_v41, %v10281_v18  ;;  %v10219_v6 = vsel %vm16963_vm13, %v21136_v60, %v21103_v38  ;;  %v15139_v42 = vld [vmem:[%s16947_s18] sm:$0xff]   ;;  %v15204_v60 = vld [vmem:[%s16947_s18 + $0x18] sm:$0xff]  }
 0x607   : > { %v10261_v56 = vor.u32 %v10260_v33, %v10257_v58  ;;  %v21147_v13 = vcombine.low %v10195_v46, %v10205_v3  ;;  %v10252_v52 = vrot.slane %v10250_v9, 5  ;;  %v21155_v58 = vsel %vm17346_vm8, %v10769_v34, %v10770_v57  ;;  %v12918_v46 = vld [vmem:[%s22224_s7] sm:$0x3]  ;;  %v15203_v3 = vld [vmem:[%s16947_s18 + $0x10] sm:$0xff]  }
 0x608   : > { %22674 = vst [vmem:[#allocation33_spill] sm:$0xff] %v21155_v58  ;;  %v10243_v23 = vsel %vm16963_vm13, %v10238_v43, %v21116_v59  ;;  %v10276_v32 = vrot.slane %v10274_v51, 5  ;;  %v10286_v44 = vrot.slane %v10285_v62, 4  ;;  %v10300_v12 = vrot.slane %v10298_v37, 5  ;;  %16683 = vmatprep.subr.msk.bf16.mxu0 %vm1504_vm0, %v12918_v46  ;;  %v21191_v34 = vld [vmem:[%s16947_s18 + $0x20] sm:$0xff]  }
 0x609   : > { %v10262_v40 = vrot.slane %v10261_v56, 4  ;;  %v10253_v38 = vsel %vm16963_vm13, %v10248_v53, %v10252_v52  ;;  %v13190_v18 = vsel %vm1504_vm0, %v12918_v46, 0  ;;  %v15140_v41 = vunpack.c.l.bf16 %v15139_v42 }
 0x60a   : > { %v10277_v59 = vsel %vm16963_vm13, %v10272_v61, %v10276_v32  ;;  %16141 = vmatpush3.bf16.msra.mxu0 %v13190_v18  ;;  %v15145_v56 = vunpack.c.h.bf16 %v15202_v16  ;;  %v15148_v7 = vunpack.c.l.bf16 %v15203_v3  ;;  %v15149_v11 = vunpack.c.h.bf16 %v15203_v3 }
 0x60b   : > { %16061 = vmatmul.mubr.msk.bf16.gmra.mrb[24].mxu1 %vm5527_vm3, %v16772_v22  ;;  %v21131_v22 = vrot.slane %v10288_v49, 5  ;;  %v21145_v49 = vsel %vm17346_vm8, %v14805_v36, %v10767_v14  ;;  %v15153_v63 = vunpack.c.h.bf16 %v15204_v60  ;;  %v16825_v9 = vmov 1983009808  }
 0x60c   : > { %16064 = vmatprep.mubr.msk.bf16.mxu1 %vm5527_vm3, %v16773_v17  ;;  %v10224_v17 = vrot.slane %v10223_v28, 4  ;;  %22673 = vst [vmem:[#allocation34_spill] sm:$0xff] %v21145_v49  ;;  %v11512_v0 = vunpack.c.l.s4 %v16825_v9  ;;  %vm13055_vm0 = vcmask 1041409  }
 0x60d   : > { %v10295_v35 = vor.u32 %v10294_v2, %v21131_v22  ;;  %v15141_v2 = vunpack.c.h.bf16 %v15139_v42  ;;  %v10291_v57 = vsel %vm16963_vm13, %v10286_v44, %v21131_v22 }
 0x60e   : > { %v10229_v33 = vsel %vm16963_vm13, %v10224_v17, %v10228_v21  ;;  %v15152_v17 = vunpack.c.l.bf16 %v15204_v60  ;;  %v11513_v62 = vunpack.c.0.s8 %v11512_v0  ;;  %v10871_v21 = vsel %vm7046_vm9, %v20954_v26, 0 }
 0x60f   : > { %v10296_v5 = vrot.slane %v10295_v35, 4  ;;  %v12167_v53 = vadd.f32 %v15145_v56, %v15141_v2  ;;  %v21188_v36 = vcombine.low %v10219_v6, %v10229_v33  ;;  %v12169_v35 = vadd.f32 %v15153_v63, %v15149_v11 }
 0x610   : > { %v12168_v51 = vadd.f32 %v15152_v17, %v15148_v7 }
 0x611   : > { %v10301_v43 = vsel %vm16963_vm13, %v10296_v5, %v10300_v12  ;;  %v12215_v22 = vcombine.high %v12167_v53, %v12167_v53  ;;  %v12249_v32 = vcombine.high %v12169_v35, %v12169_v35 }
 0x612   : > { %v12232_v61 = vcombine.high %v12168_v51, %v12168_v51  ;;  %v21205_v6 = vcombine.low %v10291_v57, %v10301_v43 }
 0x613   : > { %16065 = vmatmul.mubr.msk.bf16.gmra.mrb[28].mxu1 %vm5527_vm3, %v16774_v15  ;;  %v10267_v15 = vsel %vm16963_vm13, %v10262_v40, %v21118_v47  ;;  %v15144_v47 = vunpack.c.l.bf16 %v15202_v16  ;;  %v21198_v40 = vcombine.low %v10243_v23, %v10253_v38  ;;  %vm13064_vm13 = vcmask 1044484  }
 0x614   : > { %16068 = vmatprep.mubr.msk.bf16.mxu1 %vm5527_vm3, %v16775_v20  ;;  %v11514_v20 = vlaneseq  ;;  %v21203_v52 = vcombine.low %v10267_v15, %v10277_v59  ;;  %22677 = vst [vmem:[#allocation11_spill] sm:$0xff] %v21205_v6 }
 0x615   : > { %v12166_v14 = vadd.f32 %v15144_v47, %v15140_v41  ;;  %22675 = vst [vmem:[#allocation35_spill] sm:$0xff] %v21198_v40 }
 0x616   : > { %22676 = vst [vmem:[#allocation10_spill] sm:$0xff] %v21203_v52 }
 0x617   : > { %v12198_v37 = vcombine.high %v12166_v14, %v12166_v14 }
 0x61b   : > { %16069 = vmatmul.mubr.msk.bf16.gmra.mrb[32].mxu1 %vm5527_vm3, %v16776_v1  ;;  %v21194_v1 = vld [vmem:[%s16947_s18 + $0x28] sm:$0xff]  }
 0x61c   : > { %16074 = vmatprep.mubr.msk.bf16.mxu1 %vm5527_vm3, %v20989_v48  ;;  %v11515_v48 = vshrl.u32 %v11514_v20, 7 }
 0x61e   : > { %v21207_v33 = vsub.s32 %v11513_v62, %v11515_v48 }
 0x620   : > { %v12205_v5 = vrot.slane %v12166_v14, %v21207_v33  ;;  %v12212_v12 = vrot.slane %v12198_v37, %v21207_v33  ;;  %v12222_v15 = vrot.slane %v12167_v53, %v21207_v33  ;;  %v12229_v59 = vrot.slane %v12215_v22, %v21207_v33 }
 0x621   : > { %v12239_v46 = vrot.slane %v12168_v51, %v21207_v33  ;;  %v12246_v42 = vrot.slane %v12232_v61, %v21207_v33  ;;  %v12256_v16 = vrot.slane %v12169_v35, %v21207_v33 }
 0x622   : > { %v12213_v20 = vcombine.high %v12205_v5, %v12205_v5  ;;  %v12214_v18 = vcombine.high %v12212_v12, %v12212_v12  ;;  %v12230_v41 = vcombine.high %v12222_v15, %v12222_v15  ;;  %v12231_v2 = vcombine.high %v12229_v59, %v12229_v59 }
 0x623   : > { %16075 = vmatmul.mubr.msk.bf16.vlgmr.msra.gmra.mrb[4].mxu1 %vm5527_vm3, %v20991_v39  ;;  %v12247_v47 = vcombine.high %v12239_v46, %v12239_v46  ;;  %v12248_v3 = vcombine.high %v12246_v42, %v12246_v42  ;;  %v12264_v60 = vcombine.high %v12256_v16, %v12256_v16  ;;  %v14905_v7 = vrot.slane %v12205_v5, 9 }
 0x624   : > { %16107 = vmatpush3.bf16.msra.mxu1 %v10871_v21  ;;  %16078 = vmatprep.mubr.msk.bf16.mxu1 %vm5527_vm3, %v20993_v29  ;;  %v12263_v29 = vrot.slane %v12249_v32, %v21207_v33  ;;  %v14906_v11 = vrot.slane %v12213_v20, 9  ;;  %v14907_v17 = vrot.slane %v12212_v12, 9  ;;  %v14908_v63 = vrot.slane %v12214_v18, 9 }
 0x625   : > { %v14909_v9 = vrot.slane %v12222_v15, 9  ;;  %v14910_v0 = vrot.slane %v12230_v41, 9  ;;  %v14911_v48 = vrot.slane %v12229_v59, 9  ;;  %v14912_v14 = vrot.slane %v12231_v2, 9 }
 0x626   : > { %v12265_v56 = vcombine.high %v12263_v29, %v12263_v29  ;;  %v14913_v57 = vrot.slane %v12239_v46, 9  ;;  %v14914_v43 = vrot.slane %v12247_v47, 9  ;;  %v14915_v53 = vrot.slane %v12246_v42, 9 }
 0x627   : > { %v14916_v51 = vrot.slane %v12248_v3, 9  ;;  %v14917_v62 = vrot.slane %v12256_v16, 9  ;;  %v14918_v35 = vrot.slane %v12264_v60, 9  ;;  %v14919_v37 = vrot.slane %v12263_v29, 9 }
 0x628   : > { %v14920_v21 = vrot.slane %v12265_v56, 9  ;;  %v12726_v22 = vadd.f32 %v14905_v7, %v12205_v5  ;;  %v12727_v61 = vadd.f32 %v14906_v11, %v12213_v20  ;;  %v12728_v32 = vadd.f32 %v14907_v17, %v12212_v12 }
 0x629   : > { %v12729_v28 = vadd.f32 %v14908_v63, %v12214_v18  ;;  %v12730_v39 = vadd.f32 %v14909_v9, %v12222_v15  ;;  %v12731_v38 = vadd.f32 %v14910_v0, %v12230_v41  ;;  %v12732_v26 = vadd.f32 %v14911_v48, %v12229_v59 }
 0x62a   : > { %v12733_v23 = vadd.f32 %v14912_v14, %v12231_v2  ;;  %v12734_v44 = vadd.f32 %v14913_v57, %v12239_v46  ;;  %v12735_v58 = vadd.f32 %v14914_v43, %v12247_v47  ;;  %v12736_v49 = vadd.f32 %v14915_v53, %v12246_v42 }
 0x62b   : > { %16079 = vmatmul.mubr.msk.bf16.gmra.mrb[8].mxu1 %vm5527_vm3, %v20995_v31  ;;  %v12737_v31 = vadd.f32 %v14916_v51, %v12248_v3  ;;  %v12738_v30 = vadd.f32 %v14917_v62, %v12256_v16  ;;  %v12739_v19 = vadd.f32 %v14918_v35, %v12264_v60  ;;  %v12740_v45 = vadd.f32 %v14919_v37, %v12263_v29 }
 0x62c   : > { %16082 = vmatprep.mubr.msk.bf16.mxu1 %vm5527_vm3, %v21027_v55  ;;  %v12741_v25 = vadd.f32 %v14920_v21, %v12265_v56  ;;  %v12790_v6 = vmul.f32 0.25, %v12726_v22  ;;  %v12791_v52 = vmul.f32 0.25, %v12727_v61  ;;  %v12792_v55 = vmul.f32 0.25, %v12728_v32 }
 0x62d   : > { %v12793_v40 = vmul.f32 0.25, %v12729_v28  ;;  %v12794_v5 = vmul.f32 0.25, %v12730_v39  ;;  %v12795_v20 = vmul.f32 0.25, %v12731_v38  ;;  %v12796_v12 = vmul.f32 0.25, %v12732_v26 }
 0x62e   : > { %v12797_v18 = vmul.f32 0.25, %v12733_v23  ;;  %v12798_v15 = vmul.f32 0.25, %v12734_v44  ;;  %v12799_v41 = vmul.f32 0.25, %v12735_v58  ;;  %v12800_v59 = vmul.f32 0.25, %v12736_v49 }
 0x62f   : > { %v12801_v46 = vmul.f32 0.25, %v12737_v31  ;;  %v12802_v42 = vmul.f32 0.25, %v12738_v30  ;;  %v12803_v16 = vmul.f32 0.25, %v12739_v19  ;;  %v12804_v2 = vmul.f32 0.25, %v12740_v45 }
 0x630   : > { %v12805_v29 = vmul.f32 0.25, %v12741_v25  ;;  %v12854_v28 = vpack.c.bf16 %v12790_v6, %v12790_v6  ;;  %v12855_v39 = vpack.c.bf16 %v12791_v52, %v12791_v52  ;;  %v12856_v38 = vpack.c.bf16 %v12792_v55, %v12792_v55 }
 0x631   : > { %v12857_v26 = vpack.c.bf16 %v12793_v40, %v12793_v40  ;;  %v12858_v44 = vpack.c.bf16 %v12794_v5, %v12794_v5  ;;  %v12859_v58 = vpack.c.bf16 %v12795_v20, %v12795_v20  ;;  %v12860_v49 = vpack.c.bf16 %v12796_v12, %v12796_v12  ;;  %v15208_v5 = vld [vmem:[%s16947_s18 + $0x38] sm:$0xff]  }
 0x632   : > { %v12861_v23 = vpack.c.bf16 %v12797_v18, %v12797_v18  ;;  %v12863_v47 = vpack.c.bf16 %v12799_v41, %v12799_v41  ;;  %v12864_v30 = vpack.c.bf16 %v12800_v59, %v12800_v59  ;;  %v12865_v45 = vpack.c.bf16 %v12801_v46, %v12801_v46 }
 0x633   : > { %16083 = vmatmul.mubr.msk.bf16.gmra.mrb[12].mxu1 %vm5527_vm3, %v21078_v54  ;;  %v12862_v54 = vpack.c.bf16 %v12798_v15, %v12798_v15  ;;  %v12866_v19 = vpack.c.bf16 %v12802_v42, %v12802_v42  ;;  %v12867_v3 = vpack.c.bf16 %v12803_v16, %v12803_v16  ;;  %v12868_v60 = vpack.c.bf16 %v12804_v2, %v12804_v2 }
 0x634   : > { %16086 = vmatprep.mubr.msk.bf16.mxu1 %vm5527_vm3, %v21085_v24  ;;  %v12869_v25 = vpack.c.bf16 %v12805_v29, %v12805_v29  ;;  %v12990_v24 = vunpack.c.l.b16 %v12854_v28  ;;  %v12991_v52 = vunpack.c.l.b16 %v12855_v39  ;;  %v12992_v6 = vunpack.c.l.b16 %v12856_v38 }
 0x635   : > { %v12993_v40 = vunpack.c.l.b16 %v12857_v26  ;;  %v12994_v56 = vunpack.c.l.b16 %v12858_v44  ;;  %v12995_v7 = vunpack.c.l.b16 %v12859_v58  ;;  %v12996_v11 = vunpack.c.l.b16 %v12860_v49 }
 0x636   : > { %v12997_v17 = vunpack.c.l.b16 %v12861_v23  ;;  %v12998_v63 = vunpack.c.l.b16 %v12862_v54  ;;  %v12999_v9 = vunpack.c.l.b16 %v12863_v47  ;;  %v13000_v0 = vunpack.c.l.b16 %v12864_v30 }
 0x637   : > { %v13001_v48 = vunpack.c.l.b16 %v12865_v45  ;;  %v13002_v14 = vunpack.c.l.b16 %v12866_v19  ;;  %v13003_v57 = vunpack.c.l.b16 %v12867_v3  ;;  %v13004_v43 = vunpack.c.l.b16 %v12868_v60 }
 0x638   : > { %v13005_v53 = vunpack.c.l.b16 %v12869_v25  ;;  %v13054_v51 = vrot.slane %v12991_v52, 7  ;;  %v13057_v62 = vrot.slane %v12992_v6, 6  ;;  %v13060_v35 = vrot.slane %v12993_v40, 5 }
 0x639   : > { %v13063_v37 = vrot.slane %v12994_v56, 4  ;;  %v13066_v21 = vrot.slane %v12995_v7, 3  ;;  %v13069_v22 = vrot.slane %v12996_v11, 2  ;;  %v13072_v61 = vrot.slane %v12997_v17, 1 }
 0x63a   : > { %v13056_v32 = vsel %vm13055_vm0, %v13054_v51, %v12990_v24  ;;  %v13075_v31 = vrot.slane %v12999_v9, 7  ;;  %v13079_v55 = vrot.slane %v13001_v48, 5  ;;  %v13081_v12 = vrot.slane %v13002_v14, 4 }
 0x63b   : > { %16087 = vmatmul.mubr.msk.bf16.gmra.mrb[16].mxu1 %vm5527_vm3, %v21087_v50  ;;  %v13077_v50 = vrot.slane %v13000_v0, 6  ;;  %v13059_v20 = vsel %vm13058_vm4, %v13057_v62, %v13056_v32  ;;  %v13083_v18 = vrot.slane %v13003_v57, 3  ;;  %v13085_v15 = vrot.slane %v13004_v43, 2 }
 0x63c   : > { %16090 = vmatprep.mubr.msk.bf16.mxu1 %vm5527_vm3, %v21089_v4  ;;  %v13062_v4 = vsel %vm13061_vm12, %v13060_v35, %v13059_v20  ;;  %v13076_v41 = vsel %vm13055_vm0, %v13075_v31, %v12998_v63  ;;  %v13087_v59 = vrot.slane %v13005_v53, 1  ;;  %v15165_v46 = vunpack.c.h.bf16 %v21201_v8 }
 0x63d   : > { %v13065_v42 = vsel %vm13064_vm13, %v13063_v37, %v13062_v4  ;;  %v13078_v16 = vsel %vm13058_vm4, %v13077_v50, %v13076_v41  ;;  %v15168_v2 = vunpack.c.l.bf16 %v15208_v5  ;;  %v15169_v29 = vunpack.c.h.bf16 %v15208_v5 }
 0x63e   : > { %v13068_v28 = vsel %vm13067_vm14, %v13066_v21, %v13065_v42  ;;  %v13080_v39 = vsel %vm13061_vm12, %v13079_v55, %v13078_v16  ;;  %v22678_v38 = vunpack.c.l.bf16 %v21191_v34  ;;  %v22679_v26 = vunpack.c.l.bf16 %v21194_v1 }
 0x63f   : > { %v22680_v58 = vunpack.c.h.bf16 %v21191_v34  ;;  %v22681_v49 = vunpack.c.h.bf16 %v21194_v1  ;;  %v13071_v54 = vsel %vm13070_vm15, %v13069_v22, %v13068_v28  ;;  %v13082_v47 = vsel %vm13064_vm13, %v13081_v12, %v13080_v39 }
 0x640   : > { %v12170_v44 = vadd.f32 %v22679_v26, %v22678_v38  ;;  %v22682_v30 = vunpack.c.l.bf16 %v21201_v8  ;;  %v12173_v19 = vadd.f32 %v15169_v29, %v15165_v46  ;;  %v13074_v3 = vsel %vm13073_vm2, %v13072_v61, %v13071_v54 }
 0x641   : > { %v12171_v23 = vadd.f32 %v22681_v49, %v22680_v58  ;;  %v13084_v34 = vsel %vm13067_vm14, %v13083_v18, %v13082_v47 }
 0x642   : > { %v12172_v45 = vadd.f32 %v15168_v2, %v22682_v30  ;;  %v12266_v1 = vcombine.high %v12170_v44, %v12170_v44  ;;  %v12273_v60 = vrot.slane %v12170_v44, %v21207_v33  ;;  %v12317_v0 = vcombine.high %v12173_v19, %v12173_v19  ;;  %v22683_v30 = vld [vmem:[#allocation35_spill] sm:$0xff] }
 0x643   : > { %16091 = vmatmul.mubr.msk.bf16.gmra.mrb[20].mxu1 %vm5527_vm3, %v21120_v27  ;;  %v13086_v27 = vsel %vm13070_vm15, %v13085_v15, %v13084_v34  ;;  %v12283_v25 = vcombine.high %v12171_v23, %v12171_v23  ;;  %v12290_v24 = vrot.slane %v12171_v23, %v21207_v33  ;;  %v12324_v48 = vrot.slane %v12173_v19, %v21207_v33 }
 0x644   : > { %16094 = vmatprep.mubr.msk.bf16.mxu1 %vm5527_vm3, %v21124_v10  ;;  %v12300_v52 = vcombine.high %v12172_v45, %v12172_v45  ;;  %v13088_v8 = vsel %vm13073_vm2, %v13087_v59, %v13086_v27  ;;  %v12280_v6 = vrot.slane %v12266_v1, %v21207_v33  ;;  %v12281_v40 = vcombine.high %v12273_v60, %v12273_v60  ;;  %v22684_v1 = vld [vmem:[#allocation10_spill] sm:$0xff] }
 0x645   : > { %v12307_v10 = vrot.slane %v12172_v45, %v21207_v33  ;;  %v13173_v56 = vpack.c.b16 %v13088_v8, %v13074_v3  ;;  %v12297_v7 = vrot.slane %v12283_v25, %v21207_v33  ;;  %v12298_v11 = vcombine.high %v12290_v24, %v12290_v24 }
 0x646   : > { %v12314_v17 = vrot.slane %v12300_v52, %v21207_v33  ;;  %v12282_v63 = vcombine.high %v12280_v6, %v12280_v6  ;;  %v14921_v43 = vrot.slane %v12273_v60, 9  ;;  %v14922_v53 = vrot.slane %v12281_v40, 9 }
 0x647   : > { %v12315_v9 = vcombine.high %v12307_v10, %v12307_v10  ;;  %16142 = vmatprep.mubr.msk.bf16.mxu0 %vm1455_vm11, %v13173_v56  ;;  %v12299_v14 = vcombine.high %v12297_v7, %v12297_v7  ;;  %v12331_v51 = vrot.slane %v12317_v0, %v21207_v33  ;;  %v12332_v62 = vcombine.high %v12324_v48, %v12324_v48 }
 0x648   : > { %v12316_v57 = vcombine.high %v12314_v17, %v12314_v17  ;;  %v14923_v35 = vrot.slane %v12280_v6, 9  ;;  %v14924_v37 = vrot.slane %v12282_v63, 9  ;;  %v14925_v21 = vrot.slane %v12290_v24, 9 }
 0x649   : > { %v14926_v22 = vrot.slane %v12298_v11, 9  ;;  %v14927_v61 = vrot.slane %v12297_v7, 9  ;;  %v14928_v32 = vrot.slane %v12299_v14, 9  ;;  %v12333_v31 = vcombine.high %v12331_v51, %v12331_v51 }
 0x64a   : > { %v14929_v50 = vrot.slane %v12307_v10, 9  ;;  %v14930_v55 = vrot.slane %v12315_v9, 9  ;;  %v14931_v5 = vrot.slane %v12314_v17, 9  ;;  %v14932_v20 = vrot.slane %v12316_v57, 9 }
 0x64b   : > { %16095 = vmatmul.mubr.msk.bf16.gmra.mrb[24].mxu1 %vm5527_vm3, %v21147_v13  ;;  %v14933_v12 = vrot.slane %v12324_v48, 9  ;;  %v14934_v18 = vrot.slane %v12332_v62, 9  ;;  %v14935_v15 = vrot.slane %v12331_v51, 9  ;;  %v14936_v4 = vrot.slane %v12333_v31, 9 }
 0x64c   : > { %16098 = vmatprep.mubr.msk.bf16.mxu1 %vm5527_vm3, %v21188_v36  ;;  %v12742_v41 = vadd.f32 %v14921_v43, %v12273_v60  ;;  %v12743_v59 = vadd.f32 %v14922_v53, %v12281_v40  ;;  %v12744_v46 = vadd.f32 %v14923_v35, %v12280_v6  ;;  %v12745_v13 = vadd.f32 %v14924_v37, %v12282_v63 }
 0x64d   : > { %v12746_v42 = vadd.f32 %v14925_v21, %v12290_v24  ;;  %v12747_v16 = vadd.f32 %v14926_v22, %v12298_v11  ;;  %v12748_v2 = vadd.f32 %v14927_v61, %v12297_v7  ;;  %v12749_v29 = vadd.f32 %v14928_v32, %v12299_v14  ;;  %v22685_v32 = vld [vmem:[#allocation11_spill] sm:$0xff] }
 0x64e   : > { %v12750_v28 = vadd.f32 %v14929_v50, %v12307_v10  ;;  %v12751_v39 = vadd.f32 %v14930_v55, %v12315_v9  ;;  %v12752_v36 = vadd.f32 %v14931_v5, %v12314_v17  ;;  %v12753_v38 = vadd.f32 %v14932_v20, %v12316_v57  ;;  %v22686_v20 = vld [vmem:[#allocation42_spill] sm:$0xff] }
 0x64f   : > { %v12754_v26 = vadd.f32 %v14933_v12, %v12324_v48  ;;  %v12755_v44 = vadd.f32 %v14934_v18, %v12332_v62  ;;  %v12756_v58 = vadd.f32 %v14935_v15, %v12331_v51  ;;  %v12757_v49 = vadd.f32 %v14936_v4, %v12333_v31  ;;  %v22687_v12 = vld [vmem:[#allocation44_spill] sm:$0xff] }
 0x650   : > { %v12806_v23 = vmul.f32 0.25, %v12742_v41  ;;  %v12807_v54 = vmul.f32 0.25, %v12743_v59  ;;  %v12808_v47 = vmul.f32 0.25, %v12744_v46  ;;  %v12809_v45 = vmul.f32 0.25, %v12745_v13 }
 0x651   : > { %v12810_v19 = vmul.f32 0.25, %v12746_v42  ;;  %v12811_v3 = vmul.f32 0.25, %v12747_v16  ;;  %v12812_v34 = vmul.f32 0.25, %v12748_v2  ;;  %v12813_v60 = vmul.f32 0.25, %v12749_v29 }
 0x652   : > { %v12814_v27 = vmul.f32 0.25, %v12750_v28  ;;  %v12815_v25 = vmul.f32 0.25, %v12751_v39  ;;  %v12816_v24 = vmul.f32 0.25, %v12752_v36  ;;  %v12817_v52 = vmul.f32 0.25, %v12753_v38 }
 0x653   : > { %16099 = vmatmul.mubr.msk.bf16.gmra.mrb[28].mxu1 %vm5527_vm3, %v22683_v30  ;;  %v12818_v8 = vmul.f32 0.25, %v12754_v26  ;;  %v12819_v6 = vmul.f32 0.25, %v12755_v44  ;;  %v12820_v40 = vmul.f32 0.25, %v12756_v58  ;;  %v12821_v10 = vmul.f32 0.25, %v12757_v49  ;;  %v15209_v58 = vld [vmem:[%s16947_s18 + $0x40] sm:$0xff]   ;;  %v15210_v30 = vld [vmem:[%s16947_s18 + $0x48] sm:$0xff]  }
 0x654   : > { %16102 = vmatprep.mubr.msk.bf16.mxu1 %vm5527_vm3, %v22684_v1  ;;  %v12870_v56 = vpack.c.bf16 %v12806_v23, %v12806_v23  ;;  %v12871_v7 = vpack.c.bf16 %v12807_v54, %v12807_v54  ;;  %v12872_v11 = vpack.c.bf16 %v12808_v47, %v12808_v47  ;;  %v12873_v17 = vpack.c.bf16 %v12809_v45, %v12809_v45  ;;  %v15211_v1 = vld [vmem:[%s16947_s18 + $0x50] sm:$0xff]  }
 0x655   : > { %v12874_v63 = vpack.c.bf16 %v12810_v19, %v12810_v19  ;;  %v12875_v9 = vpack.c.bf16 %v12811_v3, %v12811_v3  ;;  %v12876_v0 = vpack.c.bf16 %v12812_v34, %v12812_v34  ;;  %v12877_v48 = vpack.c.bf16 %v12813_v60, %v12813_v60 }
 0x656   : > { %v12878_v14 = vpack.c.bf16 %v12814_v27, %v12814_v27  ;;  %v12879_v57 = vpack.c.bf16 %v12815_v25, %v12815_v25  ;;  %v12880_v43 = vpack.c.bf16 %v12816_v24, %v12816_v24  ;;  %v12881_v53 = vpack.c.bf16 %v12817_v52, %v12817_v52  ;;  %v15212_v52 = vld [vmem:[%s16947_s18 + $0x58] sm:$0xff]  }
 0x657   : > { %v12882_v51 = vpack.c.bf16 %v12818_v8, %v12818_v8  ;;  %v12883_v62 = vpack.c.bf16 %v12819_v6, %v12819_v6  ;;  %v12884_v35 = vpack.c.bf16 %v12820_v40, %v12820_v40  ;;  %v12885_v37 = vpack.c.bf16 %v12821_v10, %v12821_v10  ;;  %v22689_v8 = vld [vmem:[#allocation48_spill] sm:$0xff]  ;;  %v22690_v6 = vld [vmem:[#allocation49_spill] sm:$0xff] }
 0x658   : > { %v13006_v21 = vunpack.c.l.b16 %v12870_v56  ;;  %v13007_v22 = vunpack.c.l.b16 %v12871_v7  ;;  %v13008_v61 = vunpack.c.l.b16 %v12872_v11  ;;  %v13009_v31 = vunpack.c.l.b16 %v12873_v17  ;;  %v22692_v17 = vld [vmem:[#allocation50_spill] sm:$0xff] }
 0x659   : > { %v13010_v50 = vunpack.c.l.b16 %v12874_v63  ;;  %v13011_v55 = vunpack.c.l.b16 %v12875_v9  ;;  %v13012_v5 = vunpack.c.l.b16 %v12876_v0  ;;  %v22688_v18 = vcombine.low %v22686_v20, %v22687_v12  ;;  %v22693_v63 = vld [vmem:[#allocation51_spill] sm:$0xff] }
 0x65a   : > { %v13013_v15 = vunpack.c.l.b16 %v12877_v48  ;;  %v13014_v4 = vunpack.c.l.b16 %v12878_v14  ;;  %v13015_v41 = vunpack.c.l.b16 %v12879_v57  ;;  %v13016_v59 = vunpack.c.l.b16 %v12880_v43  ;;  %v21312_v43 = vld [vmem:[%s16947_s18 + $0x60] sm:$0xff]  }
 0x65b   : > { %16103 = vmatmul.mubr.msk.bf16.gmra.mrb[32].mxu1 %vm5527_vm3, %v22685_v32  ;;  %v13017_v46 = vunpack.c.l.b16 %v12881_v53  ;;  %v13018_v13 = vunpack.c.l.b16 %v12882_v51  ;;  %v13019_v42 = vunpack.c.l.b16 %v12883_v62  ;;  %v13020_v16 = vunpack.c.l.b16 %v12884_v35 }
 0x65c   : > { %16108 = vmatprep.mubr.msk.bf16.mxu1 %vm5527_vm3, %v22688_v18  ;;  %v13021_v2 = vunpack.c.l.b16 %v12885_v37  ;;  %v13089_v29 = vrot.slane %v13007_v22, 7  ;;  %v13091_v28 = vrot.slane %v13008_v61, 6  ;;  %v13093_v39 = vrot.slane %v13009_v31, 5 }
 0x65d   : > { %v13095_v36 = vrot.slane %v13010_v50, 4  ;;  %v13097_v38 = vrot.slane %v13011_v55, 3  ;;  %v13099_v26 = vrot.slane %v13012_v5, 2  ;;  %v13101_v44 = vrot.slane %v13013_v15, 1 }
 0x65e   : > { %v13090_v49 = vsel %vm13055_vm0, %v13089_v29, %v13006_v21  ;;  %v13103_v23 = vrot.slane %v13015_v41, 7  ;;  %v13105_v54 = vrot.slane %v13016_v59, 6  ;;  %v13107_v47 = vrot.slane %v13017_v46, 5  ;;  %v22696_v29 = vld [vmem:[#allocation53_spill] sm:$0xff] }
 0x65f   : > { %v13092_v45 = vsel %vm13058_vm4, %v13091_v28, %v13090_v49  ;;  %v13109_v19 = vrot.slane %v13018_v13, 4  ;;  %v13111_v3 = vrot.slane %v13019_v42, 3  ;;  %v13113_v34 = vrot.slane %v13020_v16, 2 }
 0x660   : > { %v13094_v60 = vsel %vm13061_vm12, %v13093_v39, %v13092_v45  ;;  %v13104_v27 = vsel %vm13055_vm0, %v13103_v23, %v13014_v4  ;;  %v13115_v25 = vrot.slane %v13021_v2, 1  ;;  %v15172_v24 = vunpack.c.l.bf16 %v15209_v58  ;;  %v22695_v2 = vld [vmem:[#allocation52_spill] sm:$0xff] }
 0x661   : > { %v22691_v40 = vcombine.low %v22689_v8, %v22690_v6  ;;  %v13096_v10 = vsel %vm13064_vm13, %v13095_v36, %v13094_v60  ;;  %v13106_v56 = vsel %vm13058_vm4, %v13105_v54, %v13104_v27  ;;  %v15173_v7 = vunpack.c.h.bf16 %v15209_v58  ;;  %v22699_v58 = vld [vmem:[#allocation57_spill] sm:$0xff] }
 0x662   : > { %v15176_v11 = vunpack.c.l.bf16 %v15210_v30  ;;  %v22694_v9 = vcombine.low %v22692_v17, %v22693_v63  ;;  %v13098_v0 = vsel %vm13067_vm14, %v13097_v38, %v13096_v10  ;;  %v13108_v48 = vsel %vm13061_vm12, %v13107_v47, %v13106_v56 }
 0x663   : > { %16109 = vmatmul.mubr.msk.bf16.vlgmr.msra.gmra.mrb[4].mxu1 %vm5527_vm3, %v22691_v40  ;;  %v15177_v14 = vunpack.c.h.bf16 %v15210_v30  ;;  %v15180_v57 = vunpack.c.l.bf16 %v15211_v1  ;;  %v13100_v53 = vsel %vm13070_vm15, %v13099_v26, %v13098_v0  ;;  %v13110_v51 = vsel %vm13064_vm13, %v13109_v19, %v13108_v48 }
 0x664   : > { %16112 = vmatprep.mubr.msk.bf16.mxu1 %vm5527_vm3, %v22694_v9  ;;  %v15181_v62 = vunpack.c.h.bf16 %v15211_v1  ;;  %v15184_v35 = vunpack.c.l.bf16 %v15212_v52  ;;  %v13102_v37 = vsel %vm13073_vm2, %v13101_v44, %v13100_v53  ;;  %v13112_v21 = vsel %vm13067_vm14, %v13111_v3, %v13110_v51  ;;  %v22698_v44 = vld [vmem:[#allocation54_spill] sm:$0xff]  ;;  %v22701_v53 = vld [vmem:[#allocation59_spill] sm:$0xff]  ;;  %v22702_v51 = vld [vmem:[#allocation60_spill] sm:$0xff] }
 0x665   : > { %v15185_v22 = vunpack.c.h.bf16 %v15212_v52  ;;  %v12174_v61 = vadd.f32 %v15176_v11, %v15172_v24  ;;  %v13114_v32 = vsel %vm13070_vm15, %v13113_v34, %v13112_v21  ;;  %v12175_v31 = vadd.f32 %v15177_v14, %v15173_v7 }
 0x666   : > { %v12176_v50 = vadd.f32 %v15184_v35, %v15180_v57  ;;  %v15188_v55 = vunpack.c.l.bf16 %v21312_v43  ;;  %v13116_v5 = vsel %vm13073_vm2, %v13115_v25, %v13114_v32  ;;  %v22697_v28 = vcombine.low %v22695_v2, %v22696_v29  ;;  %v22705_v32 = vld [vmem:[#allocation63_spill] sm:$0xff] }
 0x667   : > { %v12177_v20 = vadd.f32 %v15185_v22, %v15181_v62  ;;  %v12334_v12 = vcombine.high %v12174_v61, %v12174_v61  ;;  %v12341_v18 = vrot.slane %v12174_v61, %v21207_v33  ;;  %v13174_v15 = vpack.c.b16 %v13116_v5, %v13102_v37  ;;  %v22704_v61 = vld [vmem:[#allocation62_spill] sm:$0xff] }
 0x668   : > { %v12351_v4 = vcombine.high %v12175_v31, %v12175_v31  ;;  %v12358_v41 = vrot.slane %v12175_v31, %v21207_v33  ;;  %v12368_v59 = vcombine.high %v12176_v50, %v12176_v50  ;;  %v12375_v42 = vrot.slane %v12176_v50, %v21207_v33 }
 0x669   : > { %v12348_v46 = vrot.slane %v12334_v12, %v21207_v33  ;;  %v12349_v13 = vcombine.high %v12341_v18, %v12341_v18  ;;  %v12385_v16 = vcombine.high %v12177_v20, %v12177_v20  ;;  %16143 = vmatmul.mubr.msk.bf16.vlgmr.msra.gmra.mrb[32].mxu0 %vm1455_vm11, %v13174_v15  ;;  %v14937_v26 = vrot.slane %v12341_v18, 9 }
 0x66a   : > { %v12365_v39 = vrot.slane %v12351_v4, %v21207_v33  ;;  %v12366_v36 = vcombine.high %v12358_v41, %v12358_v41  ;;  %v12382_v38 = vrot.slane %v12368_v59, %v21207_v33  ;;  %v22700_v49 = vcombine.low %v22698_v44, %v22699_v58 }
 0x66b   : > { %16113 = vmatmul.mubr.msk.bf16.gmra.mrb[8].mxu1 %vm5527_vm3, %v22697_v28  ;;  %v12350_v23 = vcombine.high %v12348_v46, %v12348_v46  ;;  %v12383_v54 = vcombine.high %v12375_v42, %v12375_v42  ;;  %v12392_v47 = vrot.slane %v12177_v20, %v21207_v33  ;;  %v12399_v30 = vrot.slane %v12385_v16, %v21207_v33 }
 0x66c   : > { %16116 = vmatprep.mubr.msk.bf16.mxu1 %vm5527_vm3, %v22700_v49  ;;  %v12367_v45 = vcombine.high %v12365_v39, %v12365_v39  ;;  %v12384_v19 = vcombine.high %v12382_v38, %v12382_v38  ;;  %v14938_v3 = vrot.slane %v12349_v13, 9  ;;  %v14939_v34 = vrot.slane %v12348_v46, 9 }
 0x66d   : > { %v12400_v1 = vcombine.high %v12392_v47, %v12392_v47  ;;  %v12401_v60 = vcombine.high %v12399_v30, %v12399_v30  ;;  %v14940_v27 = vrot.slane %v12350_v23, 9  ;;  %v14941_v25 = vrot.slane %v12358_v41, 9 }
 0x66e   : > { %v14942_v24 = vrot.slane %v12366_v36, 9  ;;  %v14943_v52 = vrot.slane %v12365_v39, 9  ;;  %v14944_v8 = vrot.slane %v12367_v45, 9  ;;  %v14945_v6 = vrot.slane %v12375_v42, 9 }
 0x66f   : > { %v14946_v40 = vrot.slane %v12383_v54, 9  ;;  %v14947_v10 = vrot.slane %v12382_v38, 9  ;;  %v14948_v56 = vrot.slane %v12384_v19, 9  ;;  %v14949_v7 = vrot.slane %v12392_v47, 9 }
 0x670   : > { %v14950_v11 = vrot.slane %v12400_v1, 9  ;;  %v14951_v17 = vrot.slane %v12399_v30, 9  ;;  %v14952_v63 = vrot.slane %v12401_v60, 9  ;;  %v12758_v9 = vadd.f32 %v14937_v26, %v12341_v18 }
 0x671   : > { %v12759_v0 = vadd.f32 %v14938_v3, %v12349_v13  ;;  %v12760_v48 = vadd.f32 %v14939_v34, %v12348_v46  ;;  %v12761_v14 = vadd.f32 %v14940_v27, %v12350_v23  ;;  %v12762_v57 = vadd.f32 %v14941_v25, %v12358_v41  ;;  %v22708_v3 = vld [vmem:[#allocation65_spill] sm:$0xff] }
 0x672   : > { %v22703_v62 = vcombine.low %v22701_v53, %v22702_v51  ;;  %v12763_v35 = vadd.f32 %v14942_v24, %v12366_v36  ;;  %v12764_v37 = vadd.f32 %v14943_v52, %v12365_v39  ;;  %v12765_v21 = vadd.f32 %v14944_v8, %v12367_v45  ;;  %v22710_v24 = vld [vmem:[#allocation67_spill] sm:$0xff]  ;;  %v22711_v52 = vld [vmem:[#allocation68_spill] sm:$0xff] }
 0x673   : > { %v12766_v22 = vadd.f32 %v14945_v6, %v12375_v42  ;;  %v22706_v31 = vcombine.low %v22704_v61, %v22705_v32  ;;  %v12767_v50 = vadd.f32 %v14946_v40, %v12383_v54  ;;  %v12768_v5 = vadd.f32 %v14947_v10, %v12382_v38 }
 0x674   : > { %16117 = vmatmul.mubr.msk.bf16.gmra.mrb[12].mxu1 %vm5527_vm3, %v22703_v62  ;;  %v12769_v20 = vadd.f32 %v14948_v56, %v12384_v19  ;;  %v12770_v12 = vadd.f32 %v14949_v7, %v12392_v47  ;;  %v12771_v18 = vadd.f32 %v14950_v11, %v12400_v1  ;;  %v12772_v15 = vadd.f32 %v14951_v17, %v12399_v30  ;;  %v22707_v19 = vld [vmem:[#allocation64_spill] sm:$0xff] }
 0x675   : > { %16120 = vmatprep.mubr.msk.bf16.mxu1 %vm5527_vm3, %v22706_v31  ;;  %v12773_v4 = vadd.f32 %v14952_v63, %v12401_v60  ;;  %v12822_v41 = vmul.f32 0.25, %v12758_v9  ;;  %v12823_v59 = vmul.f32 0.25, %v12759_v0  ;;  %v12824_v46 = vmul.f32 0.25, %v12760_v48 }
 0x676   : > { %v12825_v13 = vmul.f32 0.25, %v12761_v14  ;;  %v12826_v16 = vmul.f32 0.25, %v12762_v57  ;;  %v12827_v2 = vmul.f32 0.25, %v12763_v35  ;;  %v12828_v29 = vmul.f32 0.25, %v12764_v37 }
 0x677   : > { %v12829_v42 = vmul.f32 0.25, %v12765_v21  ;;  %v12830_v28 = vmul.f32 0.25, %v12766_v22  ;;  %v12831_v39 = vmul.f32 0.25, %v12767_v50  ;;  %v12832_v36 = vmul.f32 0.25, %v12768_v5 }
 0x678   : > { %v12833_v26 = vmul.f32 0.25, %v12769_v20  ;;  %v12834_v44 = vmul.f32 0.25, %v12770_v12  ;;  %v12835_v58 = vmul.f32 0.25, %v12771_v18  ;;  %v12836_v38 = vmul.f32 0.25, %v12772_v15  ;;  %v22713_v15 = vld [vmem:[#allocation69_spill] sm:$0xff] }
 0x679   : > { %v12837_v49 = vmul.f32 0.25, %v12773_v4  ;;  %v12886_v23 = vpack.c.bf16 %v12822_v41, %v12822_v41  ;;  %v12887_v54 = vpack.c.bf16 %v12823_v59, %v12823_v59  ;;  %v12888_v47 = vpack.c.bf16 %v12824_v46, %v12824_v46  ;;  %v22714_v4 = vld [vmem:[#allocation70_spill] sm:$0xff] }
 0x67a   : > { %v12889_v30 = vpack.c.bf16 %v12825_v13, %v12825_v13  ;;  %v12890_v45 = vpack.c.bf16 %v12826_v16, %v12826_v16  ;;  %v22709_v34 = vcombine.low %v22707_v19, %v22708_v3  ;;  %v12891_v1 = vpack.c.bf16 %v12827_v2, %v12827_v2  ;;  %v22716_v2 = vld [vmem:[#allocation73_spill] sm:$0xff] }
 0x67b   : > { %v12892_v60 = vpack.c.bf16 %v12828_v29, %v12828_v29  ;;  %v12893_v27 = vpack.c.bf16 %v12829_v42, %v12829_v42  ;;  %v12894_v25 = vpack.c.bf16 %v12830_v28, %v12830_v28  ;;  %v22712_v8 = vcombine.low %v22710_v24, %v22711_v52  ;;  %v22717_v29 = vld [vmem:[#allocation74_spill] sm:$0xff]  ;;  %v15216_v3 = vld [vmem:[%s16947_s18 + $0x78] sm:$0xff]  }
 0x67c   : > { %16121 = vmatmul.mubr.msk.bf16.gmra.mrb[16].mxu1 %vm5527_vm3, %v22709_v34  ;;  %v12895_v6 = vpack.c.bf16 %v12831_v39, %v12831_v39  ;;  %v12896_v40 = vpack.c.bf16 %v12832_v36, %v12832_v36  ;;  %v12897_v10 = vpack.c.bf16 %v12833_v26, %v12833_v26  ;;  %v12898_v56 = vpack.c.bf16 %v12834_v44, %v12834_v44  ;;  %v15214_v44 = vld [vmem:[%s16947_s18 + $0x68] sm:$0xff]  }
 0x67d   : > { %16124 = vmatprep.mubr.msk.bf16.mxu1 %vm5527_vm3, %v22712_v8  ;;  %v12899_v7 = vpack.c.bf16 %v12835_v58, %v12835_v58  ;;  %v12900_v11 = vpack.c.bf16 %v12836_v38, %v12836_v38  ;;  %v12901_v17 = vpack.c.bf16 %v12837_v49, %v12837_v49  ;;  %v13022_v63 = vunpack.c.l.b16 %v12886_v23 }
 0x67e   : > { %v13023_v9 = vunpack.c.l.b16 %v12887_v54  ;;  %v13024_v0 = vunpack.c.l.b16 %v12888_v47  ;;  %v13025_v48 = vunpack.c.l.b16 %v12889_v30  ;;  %v13026_v14 = vunpack.c.l.b16 %v12890_v45  ;;  %v15215_v54 = vld [vmem:[%s16947_s18 + $0x70] sm:$0xff]  }
 0x67f   : > { %v13027_v57 = vunpack.c.l.b16 %v12891_v1  ;;  %v13028_v53 = vunpack.c.l.b16 %v12892_v60  ;;  %v13029_v51 = vunpack.c.l.b16 %v12893_v27  ;;  %v13030_v62 = vunpack.c.l.b16 %v12894_v25 }
 0x680   : > { %v13031_v35 = vunpack.c.l.b16 %v12895_v6  ;;  %v13032_v37 = vunpack.c.l.b16 %v12896_v40  ;;  %v13033_v21 = vunpack.c.l.b16 %v12897_v10  ;;  %v13034_v22 = vunpack.c.l.b16 %v12898_v56 }
 0x681   : > { %v13035_v61 = vunpack.c.l.b16 %v12899_v7  ;;  %v13036_v32 = vunpack.c.l.b16 %v12900_v11  ;;  %v13037_v31 = vunpack.c.l.b16 %v12901_v17  ;;  %v13117_v50 = vrot.slane %v13023_v9, 7  ;;  %v22720_v9 = vld [vmem:[#allocation76_spill] sm:$0xff] }
 0x682   : > { %v13119_v5 = vrot.slane %v13024_v0, 6  ;;  %v13121_v20 = vrot.slane %v13025_v48, 5  ;;  %v13123_v12 = vrot.slane %v13026_v14, 4  ;;  %v13125_v18 = vrot.slane %v13027_v57, 3 }
 0x683   : > { %v22715_v41 = vcombine.low %v22713_v15, %v22714_v4  ;;  %v13118_v59 = vsel %vm13055_vm0, %v13117_v50, %v13022_v63  ;;  %v13127_v46 = vrot.slane %v13028_v53, 2  ;;  %v13129_v13 = vrot.slane %v13029_v51, 1  ;;  %v22719_v63 = vld [vmem:[#allocation75_spill] sm:$0xff]  ;;  %v22722_v53 = vld [vmem:[#allocation77_spill] sm:$0xff]  ;;  %v22723_v51 = vld [vmem:[#allocation78_spill] sm:$0xff] }
 0x684   : > { %v13131_v16 = vrot.slane %v13031_v35, 7  ;;  %v22718_v42 = vcombine.low %v22716_v2, %v22717_v29  ;;  %v13120_v28 = vsel %vm13058_vm4, %v13119_v5, %v13118_v59  ;;  %v13133_v39 = vrot.slane %v13032_v37, 6 }
 0x685   : > { %16125 = vmatmul.mubr.msk.bf16.gmra.mrb[20].mxu1 %vm5527_vm3, %v22715_v41  ;;  %v13135_v36 = vrot.slane %v13033_v21, 5  ;;  %v13137_v26 = vrot.slane %v13034_v22, 4  ;;  %v13122_v58 = vsel %vm13061_vm12, %v13121_v20, %v13120_v28  ;;  %v13139_v49 = vrot.slane %v13035_v61, 3 }
 0x686   : > { %16128 = vmatprep.mubr.msk.bf16.mxu1 %vm5527_vm3, %v22718_v42  ;;  %v13132_v38 = vsel %vm13055_vm0, %v13131_v16, %v13030_v62  ;;  %v13141_v23 = vrot.slane %v13036_v32, 2  ;;  %v13124_v47 = vsel %vm13064_vm13, %v13123_v12, %v13122_v58  ;;  %v13143_v45 = vrot.slane %v13037_v31, 1 }
 0x687   : > { %v13134_v30 = vsel %vm13058_vm4, %v13133_v39, %v13132_v38  ;;  %v15189_v19 = vunpack.c.h.bf16 %v21312_v43  ;;  %v13126_v34 = vsel %vm13067_vm14, %v13125_v18, %v13124_v47  ;;  %v15192_v60 = vunpack.c.l.bf16 %v15214_v44  ;;  %v22729_v47 = vld [vmem:[#allocation82_spill] sm:$0xff] }
 0x688   : > { %v13136_v1 = vsel %vm13061_vm12, %v13135_v36, %v13134_v30  ;;  %v15193_v27 = vunpack.c.h.bf16 %v15214_v44  ;;  %v13128_v25 = vsel %vm13070_vm15, %v13127_v46, %v13126_v34  ;;  %v15196_v52 = vunpack.c.l.bf16 %v15215_v54  ;;  %v22725_v36 = vld [vmem:[#allocation79_spill] sm:$0xff] }
 0x689   : > { %v13138_v24 = vsel %vm13064_vm13, %v13137_v26, %v13136_v1  ;;  %v15197_v8 = vunpack.c.h.bf16 %v15215_v54  ;;  %v13130_v6 = vsel %vm13073_vm2, %v13129_v13, %v13128_v25  ;;  %v15200_v10 = vunpack.c.l.bf16 %v15216_v3  ;;  %v22726_v26 = vld [vmem:[#allocation80_spill] sm:$0xff]  ;;  %v22728_v54 = vld [vmem:[#allocation81_spill] sm:$0xff] }
 0x68a   : > { %v13140_v40 = vsel %vm13067_vm14, %v13139_v49, %v13138_v24  ;;  %v15201_v56 = vunpack.c.h.bf16 %v15216_v3  ;;  %v12178_v11 = vadd.f32 %v15192_v60, %v15188_v55  ;;  %v12179_v17 = vadd.f32 %v15193_v27, %v15189_v19 }
 0x68b   : > { %v13142_v7 = vsel %vm13070_vm15, %v13141_v23, %v13140_v40  ;;  %v22721_v0 = vcombine.low %v22719_v63, %v22720_v9  ;;  %v12180_v14 = vadd.f32 %v15200_v10, %v15196_v52  ;;  %v22724_v62 = vcombine.low %v22722_v53, %v22723_v51 }
 0x68c   : > { %v13144_v48 = vsel %vm13073_vm2, %v13143_v45, %v13142_v7  ;;  %v12181_v57 = vadd.f32 %v15201_v56, %v15197_v8  ;;  %v12402_v37 = vcombine.high %v12178_v11, %v12178_v11  ;;  %v12409_v43 = vrot.slane %v12178_v11, %v21207_v33 }
 0x68d   : > { %16129 = vmatmul.mubr.msk.bf16.gmra.mrb[24].mxu1 %vm5527_vm3, %v22721_v0  ;;  %v13175_v35 = vpack.c.b16 %v13144_v48, %v13130_v6  ;;  %v12419_v55 = vcombine.high %v12179_v17, %v12179_v17  ;;  %v12426_v21 = vrot.slane %v12179_v17, %v21207_v33  ;;  %v12436_v22 = vcombine.high %v12180_v14, %v12180_v14 }
 0x68e   : > { %16132 = vmatprep.mubr.msk.bf16.mxu1 %vm5527_vm3, %v22724_v62  ;;  %v12443_v61 = vrot.slane %v12180_v14, %v21207_v33  ;;  %v12453_v32 = vcombine.high %v12181_v57, %v12181_v57  ;;  %v12416_v31 = vrot.slane %v12402_v37, %v21207_v33  ;;  %v12417_v50 = vcombine.high %v12409_v43, %v12409_v43  ;;  %v22731_v37 = vld [vmem:[#allocation34_spill] sm:$0xff] }
 0x68f   : > { %16146 = vmatprep.mubr.msk.bf16.mxu0 %vm1455_vm11, %v13175_v35  ;;  %v12433_v5 = vrot.slane %v12419_v55, %v21207_v33  ;;  %v12460_v20 = vrot.slane %v12181_v57, %v21207_v33  ;;  %v12434_v12 = vcombine.high %v12426_v21, %v12426_v21  ;;  %v12450_v18 = vrot.slane %v12436_v22, %v21207_v33  ;;  %v22732_v55 = vld [vmem:[#allocation33_spill] sm:$0xff] }
 0x690   : > { %v12451_v15 = vcombine.high %v12443_v61, %v12443_v61  ;;  %v12467_v4 = vrot.slane %v12453_v32, %v21207_v33  ;;  %v12418_v41 = vcombine.high %v12416_v31, %v12416_v31  ;;  %v14954_v16 = vrot.slane %v12417_v50, 9 }
 0x691   : > { %v12435_v59 = vcombine.high %v12433_v5, %v12433_v5  ;;  %v12452_v46 = vcombine.high %v12450_v18, %v12450_v18  ;;  %v12468_v13 = vcombine.high %v12460_v20, %v12460_v20  ;;  %v14955_v2 = vrot.slane %v12416_v31, 9 }
 0x692   : > { %v12469_v29 = vcombine.high %v12467_v4, %v12467_v4  ;;  %v14956_v42 = vrot.slane %v12418_v41, 9  ;;  %v14957_v28 = vrot.slane %v12426_v21, 9  ;;  %v14958_v39 = vrot.slane %v12434_v12, 9 }
 0x693   : > { %v22727_v44 = vcombine.low %v22725_v36, %v22726_v26  ;;  %v14953_v58 = vrot.slane %v12409_v43, 9  ;;  %v14959_v38 = vrot.slane %v12433_v5, 9  ;;  %v14962_v49 = vrot.slane %v12451_v15, 9 }
 0x694   : > { %v14963_v23 = vrot.slane %v12450_v18, 9  ;;  %v22730_v30 = vcombine.low %v22728_v54, %v22729_v47  ;;  %v14960_v45 = vrot.slane %v12435_v59, 9  ;;  %v14961_v19 = vrot.slane %v12443_v61, 9 }
 0x695   : > { %16133 = vmatmul.mubr.msk.bf16.gmra.mrb[28].mxu1 %vm5527_vm3, %v22727_v44  ;;  %v14964_v3 = vrot.slane %v12452_v46, 9  ;;  %v14965_v34 = vrot.slane %v12460_v20, 9  ;;  %v14966_v1 = vrot.slane %v12468_v13, 9  ;;  %v14967_v60 = vrot.slane %v12467_v4, 9 }
 0x696   : > { %16136 = vmatprep.mubr.msk.bf16.mxu1 %vm5527_vm3, %v22730_v30  ;;  %v12775_v27 = vadd.f32 %v14954_v16, %v12417_v50  ;;  %v12776_v25 = vadd.f32 %v14955_v2, %v12416_v31  ;;  %v14968_v24 = vrot.slane %v12469_v29, 9  ;;  %v12777_v52 = vadd.f32 %v14956_v42, %v12418_v41 }
 0x697   : > { %v12778_v8 = vadd.f32 %v14957_v28, %v12426_v21  ;;  %v12779_v6 = vadd.f32 %v14958_v39, %v12434_v12  ;;  %v12774_v40 = vadd.f32 %v14953_v58, %v12409_v43  ;;  %v12780_v10 = vadd.f32 %v14959_v38, %v12433_v5 }
 0x698   : > { %v12783_v56 = vadd.f32 %v14962_v49, %v12451_v15  ;;  %v12784_v7 = vadd.f32 %v14963_v23, %v12450_v18  ;;  %v12781_v11 = vadd.f32 %v14960_v45, %v12435_v59  ;;  %v12782_v17 = vadd.f32 %v14961_v19, %v12443_v61 }
 0x699   : > { %v12785_v63 = vadd.f32 %v14964_v3, %v12452_v46  ;;  %v12786_v9 = vadd.f32 %v14965_v34, %v12460_v20  ;;  %v12787_v0 = vadd.f32 %v14966_v1, %v12468_v13  ;;  %v12788_v48 = vadd.f32 %v14967_v60, %v12467_v4 }
 0x69a   : > { %v12839_v14 = vmul.f32 0.25, %v12775_v27  ;;  %v12840_v57 = vmul.f32 0.25, %v12776_v25  ;;  %v12789_v53 = vadd.f32 %v14968_v24, %v12469_v29  ;;  %v12841_v51 = vmul.f32 0.25, %v12777_v52 }
 0x69b   : > { %v12842_v62 = vmul.f32 0.25, %v12778_v8  ;;  %v12843_v35 = vmul.f32 0.25, %v12779_v6  ;;  %v22733_v21 = vcombine.low %v22731_v37, %v22732_v55  ;;  %v12838_v43 = vmul.f32 0.25, %v12774_v40 }
 0x69c   : > { %v12844_v22 = vmul.f32 0.25, %v12780_v10  ;;  %v12847_v32 = vmul.f32 0.25, %v12783_v56  ;;  %v12848_v31 = vmul.f32 0.25, %v12784_v7  ;;  %v12845_v61 = vmul.f32 0.25, %v12781_v11 }
 0x69d   : > { %16137 = vmatmul.mubr.msk.bf16.gmra.mrb[32].mxu1 %vm5527_vm3, %v22733_v21  ;;  %v12846_v50 = vmul.f32 0.25, %v12782_v17  ;;  %v12849_v5 = vmul.f32 0.25, %v12785_v63  ;;  %v12850_v20 = vmul.f32 0.25, %v12786_v9  ;;  %v12851_v12 = vmul.f32 0.25, %v12787_v0 }
 0x69e   : > { %v12852_v18 = vmul.f32 0.25, %v12788_v48  ;;  %v12903_v15 = vpack.c.bf16 %v12839_v14, %v12839_v14  ;;  %v12904_v4 = vpack.c.bf16 %v12840_v57, %v12840_v57  ;;  %v12853_v41 = vmul.f32 0.25, %v12789_v53 }
 0x69f   : > { %v12905_v59 = vpack.c.bf16 %v12841_v51, %v12841_v51  ;;  %v12906_v46 = vpack.c.bf16 %v12842_v62, %v12842_v62  ;;  %v12907_v13 = vpack.c.bf16 %v12843_v35, %v12843_v35  ;;  %v12902_v16 = vpack.c.bf16 %v12838_v43, %v12838_v43 }
 0x6a0   : > { %v12908_v2 = vpack.c.bf16 %v12844_v22, %v12844_v22  ;;  %v12911_v29 = vpack.c.bf16 %v12847_v32, %v12847_v32  ;;  %v12912_v42 = vpack.c.bf16 %v12848_v31, %v12848_v31  ;;  %v12909_v28 = vpack.c.bf16 %v12845_v61, %v12845_v61 }
 0x6a1   : > { %v12910_v39 = vpack.c.bf16 %v12846_v50, %v12846_v50  ;;  %v12913_v36 = vpack.c.bf16 %v12849_v5, %v12849_v5  ;;  %v12914_v26 = vpack.c.bf16 %v12850_v20, %v12850_v20  ;;  %v12915_v44 = vpack.c.bf16 %v12851_v12, %v12851_v12 }
 0x6a2   : > { %v12916_v58 = vpack.c.bf16 %v12852_v18, %v12852_v18  ;;  %v13039_v38 = vunpack.c.l.b16 %v12903_v15  ;;  %v13040_v49 = vunpack.c.l.b16 %v12904_v4  ;;  %v12917_v23 = vpack.c.bf16 %v12853_v41, %v12853_v41 }
 0x6a3   : > { %v13041_v54 = vunpack.c.l.b16 %v12905_v59  ;;  %v13042_v47 = vunpack.c.l.b16 %v12906_v46  ;;  %v13043_v30 = vunpack.c.l.b16 %v12907_v13  ;;  %v13038_v45 = vunpack.c.l.b16 %v12902_v16 }
 0x6a4   : > { %v13044_v19 = vunpack.c.l.b16 %v12908_v2  ;;  %v13047_v3 = vunpack.c.l.b16 %v12911_v29  ;;  %v13048_v34 = vunpack.c.l.b16 %v12912_v42  ;;  %v13045_v1 = vunpack.c.l.b16 %v12909_v28 }
 0x6a5   : > { %v13046_v60 = vunpack.c.l.b16 %v12910_v39  ;;  %v13049_v27 = vunpack.c.l.b16 %v12913_v36  ;;  %v13050_v25 = vunpack.c.l.b16 %v12914_v26  ;;  %v13051_v24 = vunpack.c.l.b16 %v12915_v44 }
 0x6a6   : > { %v13145_v52 = vrot.slane %v13039_v38, 7  ;;  %v13147_v8 = vrot.slane %v13040_v49, 6  ;;  %v13149_v6 = vrot.slane %v13041_v54, 5  ;;  %v13052_v40 = vunpack.c.l.b16 %v12916_v58 }
 0x6a7   : > { %v13053_v10 = vunpack.c.l.b16 %v12917_v23  ;;  %v13151_v56 = vrot.slane %v13042_v47, 4  ;;  %v13153_v7 = vrot.slane %v13043_v30, 3  ;;  %v13159_v17 = vrot.slane %v13047_v3, 7 }
 0x6a8   : > { %v13146_v11 = vsel %vm13055_vm0, %v13145_v52, %v13038_v45  ;;  %v13161_v63 = vrot.slane %v13048_v34, 6  ;;  %v13163_v9 = vrot.slane %v13049_v27, 5  ;;  %v13155_v48 = vrot.slane %v13044_v19, 2 }
 0x6a9   : > { %v13148_v0 = vsel %vm13058_vm4, %v13147_v8, %v13146_v11  ;;  %v13165_v14 = vrot.slane %v13050_v25, 4  ;;  %v13157_v53 = vrot.slane %v13045_v1, 1  ;;  %v13160_v51 = vsel %vm13055_vm0, %v13159_v17, %v13046_v60 }
 0x6aa   : > { %v13150_v57 = vsel %vm13061_vm12, %v13149_v6, %v13148_v0  ;;  %v13167_v62 = vrot.slane %v13051_v24, 3  ;;  %v13162_v37 = vsel %vm13058_vm4, %v13161_v63, %v13160_v51  ;;  %v13169_v55 = vrot.slane %v13052_v40, 2 }
 0x6ab   : > { %v13152_v35 = vsel %vm13064_vm13, %v13151_v56, %v13150_v57  ;;  %v13164_v43 = vsel %vm13061_vm12, %v13163_v9, %v13162_v37  ;;  %v13171_v22 = vrot.slane %v13053_v10, 1 }
 0x6ac   : > { %v13154_v21 = vsel %vm13067_vm14, %v13153_v7, %v13152_v35  ;;  %v13166_v31 = vsel %vm13064_vm13, %v13165_v14, %v13164_v43 }
 0x6ad   : > { %v13156_v32 = vsel %vm13070_vm15, %v13155_v48, %v13154_v21  ;;  %v13168_v50 = vsel %vm13067_vm14, %v13167_v62, %v13166_v31 }
 0x6ae   : > { %v13158_v61 = vsel %vm13073_vm2, %v13157_v53, %v13156_v32  ;;  %v13170_v5 = vsel %vm13070_vm15, %v13169_v55, %v13168_v50 }
 0x6af   : > { %v13172_v20 = vsel %vm13073_vm2, %v13171_v22, %v13170_v5 }
 0x6b0   : > { %v13176_v12 = vpack.c.b16 %v13172_v20, %v13158_v61 }
 0x6b2   : > { %16147 = vmatmul.mubr.msk.bf16.gmra.mrb[36].mxu0 %vm1455_vm11, %v13176_v12 }
 0x736   : > { %v21426_v18 = vpop.f32.mrb[4].mxu1 }
 0x737   : > { %v21428_v15 = vpop.f32.mrb[5].mxu1  ;;  %v11069_v16 = vsel %vm5527_vm3, %v21426_v18, 0.0 }
 0x738   : > { %v21430_v4 = vpop.f32.mrb[6].mxu1  ;;  %v11066_v59 = vsel %vm5527_vm3, %v21428_v15, 0.0 }
 0x739   : > { %v21432_v41 = vpop.f32.mrb[7].mxu1  ;;  %v11071_v29 = vsel %vm5527_vm3, %v21430_v4, 0.0 }
 0x73a   : > { %v11067_v46 = vsel %vm5527_vm3, %v21432_v41, 0.0 }
 0x73b   : > { %v11068_v13 = vadd.f32 %v11067_v46, %v11066_v59 }
 0x73d   : > { %v11070_v2 = vadd.f32 %v11069_v16, %v11068_v13 }
 0x73e   : > { %v21442_v42 = vpop.f32.mrb[8].mxu1 }
 0x73f   : > { %v21444_v28 = vpop.f32.mrb[9].mxu1  ;;  %v11072_v39 = vadd.f32 %v11071_v29, %v11070_v2  ;;  %v11077_v23 = vsel %vm5527_vm3, %v21442_v42, 0.0 }
 0x740   : > { %v11073_v36 = vsel %vm5527_vm3, %v21444_v28, 0.0  ;;  %v21448_v26 = vpop.f32.mrb[10].mxu1 }
 0x741   : > { %v11074_v44 = vadd.f32 %v11073_v36, %v11072_v39  ;;  %v21450_v58 = vpop.f32.mrb[11].mxu1  ;;  %v11079_v47 = vsel %vm5527_vm3, %v21448_v26, 0.0 }
 0x742   : > { %v11075_v38 = vsel %vm5527_vm3, %v21450_v58, 0.0 }
 0x743   : > { %v11076_v49 = vadd.f32 %v11075_v38, %v11074_v44 }
 0x745   : > { %v11078_v54 = vadd.f32 %v11077_v23, %v11076_v49 }
 0x747   : > { %v21458_v30 = vpop.f32.mrb[12].mxu1  ;;  %v11080_v19 = vadd.f32 %v11079_v47, %v11078_v54 }
 0x748   : > { %v21460_v45 = vpop.f32.mrb[13].mxu1  ;;  %v11085_v24 = vsel %vm5527_vm3, %v21458_v30, 0.0 }
 0x749   : > { %v11081_v3 = vsel %vm5527_vm3, %v21460_v45, 0.0  ;;  %v21464_v34 = vpop.f32.mrb[14].mxu1 }
 0x74a   : > { %v11082_v1 = vadd.f32 %v11081_v3, %v11080_v19  ;;  %v21466_v60 = vpop.f32.mrb[15].mxu1  ;;  %v11087_v8 = vsel %vm5527_vm3, %v21464_v34, 0.0 }
 0x74b   : > { %v11083_v27 = vsel %vm5527_vm3, %v21466_v60, 0.0 }
 0x74c   : > { %v11084_v25 = vadd.f32 %v11083_v27, %v11082_v1 }
 0x74e   : > { %v11086_v52 = vadd.f32 %v11085_v24, %v11084_v25 }
 0x74f   : > { %v21474_v6 = vpop.f32.mrb[16].mxu1 }
 0x750   : > { %v21476_v40 = vpop.f32.mrb[17].mxu1  ;;  %v11088_v10 = vadd.f32 %v11087_v8, %v11086_v52  ;;  %v11093_v0 = vsel %vm5527_vm3, %v21474_v6, 0.0 }
 0x751   : > { %v11089_v56 = vsel %vm5527_vm3, %v21476_v40, 0.0  ;;  %v21480_v7 = vpop.f32.mrb[18].mxu1 }
 0x752   : > { %v11090_v11 = vadd.f32 %v11089_v56, %v11088_v10  ;;  %v21482_v17 = vpop.f32.mrb[19].mxu1  ;;  %v11095_v14 = vsel %vm5527_vm3, %v21480_v7, 0.0 }
 0x753   : > { %v11091_v63 = vsel %vm5527_vm3, %v21482_v17, 0.0 }
 0x754   : > { %v11092_v9 = vadd.f32 %v11091_v63, %v11090_v11 }
 0x756   : > { %v11094_v48 = vadd.f32 %v11093_v0, %v11092_v9 }
 0x758   : > { %v21490_v57 = vpop.f32.mrb[20].mxu1  ;;  %v11096_v51 = vadd.f32 %v11095_v14, %v11094_v48 }
 0x759   : > { %v21492_v53 = vpop.f32.mrb[21].mxu1  ;;  %v11101_v22 = vsel %vm5527_vm3, %v21490_v57, 0.0 }
 0x75a   : > { %v11097_v62 = vsel %vm5527_vm3, %v21492_v53, 0.0  ;;  %v21496_v35 = vpop.f32.mrb[22].mxu1 }
 0x75b   : > { %v11098_v37 = vadd.f32 %v11097_v62, %v11096_v51  ;;  %v21498_v55 = vpop.f32.mrb[23].mxu1  ;;  %v11103_v31 = vsel %vm5527_vm3, %v21496_v35, 0.0 }
 0x75c   : > { %v11099_v21 = vsel %vm5527_vm3, %v21498_v55, 0.0 }
 0x75d   : > { %v11100_v43 = vadd.f32 %v11099_v21, %v11098_v37 }
 0x75f   : > { %v11102_v32 = vadd.f32 %v11101_v22, %v11100_v43 }
 0x760   : > { %v21506_v61 = vpop.f32.mrb[24].mxu1 }
 0x761   : > { %v21508_v50 = vpop.f32.mrb[25].mxu1  ;;  %v11104_v5 = vadd.f32 %v11103_v31, %v11102_v32  ;;  %v11109_v2 = vsel %vm5527_vm3, %v21506_v61, 0.0 }
 0x762   : > { %v11105_v20 = vsel %vm5527_vm3, %v21508_v50, 0.0  ;;  %v21512_v12 = vpop.f32.mrb[26].mxu1 }
 0x763   : > { %v11106_v59 = vadd.f32 %v11105_v20, %v11104_v5  ;;  %v10990_v46 = vpop.f32.mrb[27].mxu1  ;;  %v11111_v39 = vsel %vm5527_vm3, %v21512_v12, 0.0 }
 0x764   : > { %v11107_v13 = vsel %vm5527_vm3, %v10990_v46, 0.0 }
 0x765   : > { %v11108_v16 = vadd.f32 %v11107_v13, %v11106_v59 }
 0x767   : > { %v11110_v29 = vadd.f32 %v11109_v2, %v11108_v16 }
 0x768   : > { %v16134_v36 = vpop.f32.mrb[28].mxu1 }
 0x769   : > { %v11003_v44 = vpop.f32.mrb[29].mxu1  ;;  %v11112_v38 = vadd.f32 %v11111_v39, %v11110_v29  ;;  %v11117_v1 = vsel %vm5527_vm3, %v16134_v36, 0.0 }
 0x76a   : > { %v11113_v49 = vsel %vm5527_vm3, %v11003_v44, 0.0  ;;  %v16135_v23 = vpop.f32.mrb[30].mxu1 }
 0x76b   : > { %v11114_v54 = vadd.f32 %v11113_v49, %v11112_v38  ;;  %v11006_v47 = vpop.f32.mrb[31].mxu1  ;;  %v11119_v25 = vsel %vm5527_vm3, %v16135_v23, 0.0 }
 0x76c   : > { %v11115_v19 = vsel %vm5527_vm3, %v11006_v47, 0.0 }
 0x76d   : > { %v11116_v3 = vadd.f32 %v11115_v19, %v11114_v54 }
 0x76f   : > { %v11118_v27 = vadd.f32 %v11117_v1, %v11116_v3 }
 0x770   : > { %v16138_v24 = vpop.f32.mrb[32].mxu1 }
 0x771   : > { %v11019_v52 = vpop.f32.mrb[33].mxu1  ;;  %v11120_v8 = vadd.f32 %v11119_v25, %v11118_v27  ;;  %v11125_v48 = vsel %vm5527_vm3, %v16138_v24, 0.0 }
 0x772   : > { %v11121_v10 = vsel %vm5527_vm3, %v11019_v52, 0.0  ;;  %v16139_v56 = vpop.f32.mrb[34].mxu1 }
 0x773   : > { %v11122_v11 = vadd.f32 %v11121_v10, %v11120_v8  ;;  %v11022_v63 = vpop.f32.mrb[35].mxu1  ;;  %v11127_v51 = vsel %vm5527_vm3, %v16139_v56, 0.0 }
 0x774   : > { %v11123_v9 = vsel %vm5527_vm3, %v11022_v63, 0.0 }
 0x775   : > { %v11124_v0 = vadd.f32 %v11123_v9, %v11122_v11 }
 0x777   : > { %v11126_v14 = vadd.f32 %v11125_v48, %v11124_v0 }
 0x779   : > { %v11128_v62 = vadd.f32 %v11127_v51, %v11126_v14 }
 0x77b   : > { %v11129_v37 = vrot.slane %v11128_v62, 4 }
 0x77d   : > { %v11130_v21 = vadd.f32 %v11129_v37, %v11128_v62 }
 0x77f   : > { %v11131_v43 = vrot.slane %v11130_v21, 2 }
 0x781   : > { %v11132_v22 = vadd.f32 %v11131_v43, %v11130_v21 }
 0x783   : > { %v11133_v32 = vrot.slane %v11132_v22, 1 }
 0x785   : > { %v11134_v31 = vadd.f32 %v11133_v32, %v11132_v22 }
 0x787   : > { %v11135_v5 = vmul.f32 0.00390625, %v11134_v31 }
 0x789   : > { %v21528_v20 = vsub.f32 %v21428_v15, %v11135_v5  ;;  %v21531_v59 = vsub.f32 %v21432_v41, %v11135_v5  ;;  %v21534_v13 = vsub.f32 %v21426_v18, %v11135_v5  ;;  %v21537_v16 = vsub.f32 %v21430_v4, %v11135_v5  ;;  %v21551_v41 = vpop.f32.mrb[32].mxu0 }
 0x78a   : > { %v21540_v2 = vsub.f32 %v21444_v28, %v11135_v5  ;;  %v21543_v29 = vsub.f32 %v21450_v58, %v11135_v5  ;;  %v21546_v39 = vsub.f32 %v21442_v42, %v11135_v5  ;;  %v21549_v15 = vsub.f32 %v21448_v26, %v11135_v5 }
 0x78b   : > { %v21554_v18 = vsub.f32 %v21460_v45, %v11135_v5  ;;  %v21557_v4 = vsub.f32 %v21466_v60, %v11135_v5  ;;  %v21560_v28 = vsub.f32 %v21458_v30, %v11135_v5  ;;  %v21563_v58 = vsub.f32 %v21464_v34, %v11135_v5 }
 0x78c   : > { %v21566_v42 = vsub.f32 %v21476_v40, %v11135_v5  ;;  %v21569_v26 = vsub.f32 %v21482_v17, %v11135_v5  ;;  %v21572_v38 = vsub.f32 %v21474_v6, %v11135_v5  ;;  %v21575_v45 = vsub.f32 %v21480_v7, %v11135_v5 }
 0x78d   : > { %v21578_v60 = vsub.f32 %v21492_v53, %v11135_v5  ;;  %v21581_v30 = vsub.f32 %v21498_v55, %v11135_v5  ;;  %v21584_v34 = vsub.f32 %v21490_v57, %v11135_v5  ;;  %v21587_v40 = vsub.f32 %v21496_v35, %v11135_v5 }
 0x78e   : > { %v21590_v17 = vsub.f32 %v21508_v50, %v11135_v5  ;;  %v21592_v6 = vsub.f32 %v10990_v46, %v11135_v5  ;;  %v21595_v7 = vsub.f32 %v21506_v61, %v11135_v5  ;;  %v21598_v53 = vsub.f32 %v21512_v12, %v11135_v5 }
 0x78f   : > { %22734 = vst [vmem:[#allocation12_spill] sm:$0xff] %v21578_v60  ;;  %22735 = vst [vmem:[#allocation14_spill] sm:$0xff] %v21581_v30  ;;  %v21600_v49 = vsub.f32 %v11003_v44, %v11135_v5  ;;  %v21602_v55 = vsub.f32 %v11006_v47, %v11135_v5  ;;  %v21604_v57 = vsub.f32 %v16134_v36, %v11135_v5 }
 0x790   : > { %22736 = vst [vmem:[#allocation15_spill] sm:$0xff] %v21584_v34  ;;  %22737 = vst [vmem:[#allocation16_spill] sm:$0xff] %v21587_v40  ;;  %v21606_v54 = vsub.f32 %v16135_v23, %v11135_v5  ;;  %v21608_v35 = vsub.f32 %v11019_v52, %v11135_v5  ;;  %v21610_v50 = vsub.f32 %v11022_v63, %v11135_v5 }
 0x791   : > { %22738 = vst [vmem:[#allocation17_spill] sm:$0xff] %v21590_v17  ;;  %22739 = vst [vmem:[#allocation5_spill] sm:$0xff] %v21592_v6  ;;  %v21612_v46 = vsub.f32 %v16138_v24, %v11135_v5  ;;  %v21614_v19 = vsub.f32 %v16139_v56, %v11135_v5  ;;  %v11168_v61 = vmul.f32 %v21528_v20, %v21528_v20  ;;  %v21629_v24 = vpop.f32.mrb[33].mxu0 }
 0x792   : > { %22740 = vst [vmem:[#allocation18_spill] sm:$0xff] %v21595_v7  ;;  %22741 = vst [vmem:[#allocation6_spill] sm:$0xff] %v21598_v53  ;;  %v11169_v12 = vmul.f32 %v21531_v59, %v21531_v59  ;;  %v11170_v36 = vmul.f32 %v21534_v13, %v21534_v13  ;;  %v11171_v44 = vmul.f32 %v21537_v16, %v21537_v16 }
 0x793   : > { %v11200_v23 = vsel %vm5527_vm3, %v11168_v61, 0.0  ;;  %v11172_v1 = vmul.f32 %v21540_v2, %v21540_v2  ;;  %v11173_v52 = vmul.f32 %v21543_v29, %v21543_v29  ;;  %v11174_v56 = vmul.f32 %v21546_v39, %v21546_v39 }
 0x794   : > { %v11201_v47 = vsel %vm5527_vm3, %v11169_v12, 0.0  ;;  %v11203_v27 = vsel %vm5527_vm3, %v11170_v36, 0.0  ;;  %v11205_v8 = vsel %vm5527_vm3, %v11171_v44, 0.0  ;;  %v11175_v9 = vmul.f32 %v21549_v15, %v21549_v15 }
 0x795   : > { %v11202_v3 = vadd.f32 %v11201_v47, %v11200_v23  ;;  %v11207_v11 = vsel %vm5527_vm3, %v11172_v1, 0.0  ;;  %v11209_v0 = vsel %vm5527_vm3, %v11173_v52, 0.0  ;;  %v11176_v14 = vmul.f32 %v21554_v18, %v21554_v18 }
 0x796   : > { %v11211_v51 = vsel %vm5527_vm3, %v11174_v56, 0.0  ;;  %v11177_v37 = vmul.f32 %v21557_v4, %v21557_v4  ;;  %v11213_v21 = vsel %vm5527_vm3, %v11175_v9, 0.0  ;;  %v11178_v22 = vmul.f32 %v21560_v28, %v21560_v28 }
 0x797   : > { %v11204_v25 = vadd.f32 %v11203_v27, %v11202_v3  ;;  %v11215_v32 = vsel %vm5527_vm3, %v11176_v14, 0.0  ;;  %v11179_v5 = vmul.f32 %v21563_v58, %v21563_v58  ;;  %v11180_v36 = vmul.f32 %v21566_v42, %v21566_v42 }
 0x798   : > { %v11217_v61 = vsel %vm5527_vm3, %v11177_v37, 0.0  ;;  %v11219_v44 = vsel %vm5527_vm3, %v11178_v22, 0.0  ;;  %v11181_v47 = vmul.f32 %v21569_v26, %v21569_v26  ;;  %v11182_v27 = vmul.f32 %v21572_v38, %v21572_v38 }
 0x799   : > { %v11206_v10 = vadd.f32 %v11205_v8, %v11204_v25  ;;  %v11221_v3 = vsel %vm5527_vm3, %v11179_v5, 0.0  ;;  %v11223_v25 = vsel %vm5527_vm3, %v11180_v36, 0.0  ;;  %v11183_v8 = vmul.f32 %v21575_v45, %v21575_v45 }
 0x79b   : > { %v11208_v63 = vadd.f32 %v11207_v11, %v11206_v10  ;;  %v11225_v10 = vsel %vm5527_vm3, %v11181_v47, 0.0  ;;  %v11184_v11 = vmul.f32 %v21578_v60, %v21578_v60 }
 0x79d   : > { %v11210_v48 = vadd.f32 %v11209_v0, %v11208_v63  ;;  %v11227_v63 = vsel %vm5527_vm3, %v11182_v27, 0.0  ;;  %v11185_v0 = vmul.f32 %v21581_v30, %v21581_v30 }
 0x79f   : > { %v11212_v62 = vadd.f32 %v11211_v51, %v11210_v48  ;;  %v11229_v48 = vsel %vm5527_vm3, %v11183_v8, 0.0  ;;  %v11186_v51 = vmul.f32 %v21584_v34, %v21584_v34  ;;  %v11233_v22 = vsel %vm5527_vm3, %v11185_v0, 0.0 }
 0x7a1   : > { %v11214_v43 = vadd.f32 %v11213_v21, %v11212_v62  ;;  %v11231_v62 = vsel %vm5527_vm3, %v11184_v11, 0.0  ;;  %v16145_v21 = vpop.f32.mrb[34].mxu0  ;;  %v11235_v5 = vsel %vm5527_vm3, %v11186_v51, 0.0 }
 0x7a3   : > { %v11216_v31 = vadd.f32 %v11215_v32, %v11214_v43  ;;  %v11187_v43 = vmul.f32 %v21587_v40, %v21587_v40 }
 0x7a5   : > { %v11218_v12 = vadd.f32 %v11217_v61, %v11216_v31  ;;  %v11188_v31 = vmul.f32 %v21590_v17, %v21590_v17  ;;  %v11237_v36 = vsel %vm5527_vm3, %v11187_v43, 0.0  ;;  %v11196_v43 = vmul.f32 %v21608_v35, %v21608_v35 }
 0x7a7   : > { %v11220_v23 = vadd.f32 %v11219_v44, %v11218_v12  ;;  %v11189_v12 = vmul.f32 %v21592_v6, %v21592_v6  ;;  %v11239_v47 = vsel %vm5527_vm3, %v11188_v31, 0.0  ;;  %v11197_v31 = vmul.f32 %v21610_v50, %v21610_v50 }
 0x7a9   : > { %v11222_v1 = vadd.f32 %v11221_v3, %v11220_v23  ;;  %v11190_v23 = vmul.f32 %v21595_v7, %v21595_v7  ;;  %v11241_v27 = vsel %vm5527_vm3, %v11189_v12, 0.0  ;;  %v11198_v12 = vmul.f32 %v21612_v46, %v21612_v46 }
 0x7ab   : > { %v11224_v52 = vadd.f32 %v11223_v25, %v11222_v1  ;;  %v11191_v1 = vmul.f32 %v21598_v53, %v21598_v53  ;;  %v11243_v8 = vsel %vm5527_vm3, %v11190_v23, 0.0  ;;  %v11199_v23 = vmul.f32 %v21614_v19, %v21614_v19 }
 0x7ad   : > { %v11226_v56 = vadd.f32 %v11225_v10, %v11224_v52  ;;  %v11192_v52 = vmul.f32 %v21600_v49, %v21600_v49  ;;  %v11245_v11 = vsel %vm5527_vm3, %v11191_v1, 0.0  ;;  %v11259_v1 = vsel %vm5527_vm3, %v11198_v12, 0.0 }
 0x7af   : > { %v11228_v9 = vadd.f32 %v11227_v63, %v11226_v56  ;;  %v11193_v56 = vmul.f32 %v21602_v55, %v21602_v55  ;;  %v11247_v0 = vsel %vm5527_vm3, %v11192_v52, 0.0 }
 0x7b1   : > { %v11230_v14 = vadd.f32 %v11229_v48, %v11228_v9  ;;  %v11194_v9 = vmul.f32 %v21604_v57, %v21604_v57  ;;  %v11249_v51 = vsel %vm5527_vm3, %v11193_v56, 0.0 }
 0x7b3   : > { %v11232_v37 = vadd.f32 %v11231_v62, %v11230_v14  ;;  %v11195_v14 = vmul.f32 %v21606_v54, %v21606_v54  ;;  %v13229_v62 = vpop.f32.mrb[35].mxu0 }
 0x7b5   : > { %v11234_v32 = vadd.f32 %v11233_v22, %v11232_v37  ;;  %v11251_v22 = vsel %vm5527_vm3, %v11194_v9, 0.0 }
 0x7b7   : > { %v11236_v61 = vadd.f32 %v11235_v5, %v11234_v32  ;;  %v11253_v5 = vsel %vm5527_vm3, %v11195_v14, 0.0 }
 0x7b9   : > { %v11238_v44 = vadd.f32 %v11237_v36, %v11236_v61  ;;  %v11255_v36 = vsel %vm5527_vm3, %v11196_v43, 0.0 }
 0x7bb   : > { %v11240_v3 = vadd.f32 %v11239_v47, %v11238_v44  ;;  %v11257_v47 = vsel %vm5527_vm3, %v11197_v31, 0.0 }
 0x7bd   : > { %v11242_v25 = vadd.f32 %v11241_v27, %v11240_v3 }
 0x7bf   : > { %v11244_v10 = vadd.f32 %v11243_v8, %v11242_v25  ;;  %v11261_v25 = vsel %vm5527_vm3, %v11199_v23, 0.0 }
 0x7c1   : > { %v11246_v63 = vadd.f32 %v11245_v11, %v11244_v10  ;;  %v14969_v11 = vld [vmem:[%s22225_s8] ss:$0 sm:$0xff] }
 0x7c2   : > { %v13235_v9 = vadd.f32 %v21551_v41, %v14969_v11  ;;  %v13238_v14 = vadd.f32 %v16145_v21, %v14969_v11 }
 0x7c3   : > { %v11248_v48 = vadd.f32 %v11247_v0, %v11246_v63  ;;  %v13227_v0 = vadd.f32 %v14969_v11, %v21629_v24 }
 0x7c4   : > { %v13299_v43 = vcombine.high %v13235_v9, %v13235_v9  ;;  %v13316_v31 = vcombine.high %v13238_v14, %v13238_v14 }
 0x7c5   : > { %v11250_v37 = vadd.f32 %v11249_v51, %v11248_v48  ;;  %v13230_v51 = vadd.f32 %v14969_v11, %v13229_v62  ;;  %v21726_v41 = vrot.slane %v13227_v0, %v21207_v33  ;;  %v21732_v62 = vrot.slane %v13238_v14, %v21207_v33 }
 0x7c6   : > { %v21723_v23 = vrot.slane %v13299_v43, %v21207_v33 }
 0x7c7   : > { %v11252_v32 = vadd.f32 %v11251_v22, %v11250_v37  ;;  %v13265_v22 = vcombine.high %v13227_v0, %v13227_v0 }
 0x7c9   : > { %v11254_v61 = vadd.f32 %v11253_v5, %v11252_v32  ;;  %v16148_v5 = vpop.f32.mrb[36].mxu0  ;;  %v21729_v24 = vrot.slane %v13265_v22, %v21207_v33 }
 0x7ca   : > { %v13251_v12 = vadd.f32 %v16148_v5, %v14969_v11  ;;  %v21767_v11 = vcombine.high %v21732_v62, %v21732_v62 }
 0x7cb   : > { %v11256_v44 = vadd.f32 %v11255_v36, %v11254_v61  ;;  %v13282_v61 = vcombine.high %v13230_v51, %v13230_v51 }
 0x7cc   : > { %v13367_v21 = vcombine.high %v13251_v12, %v13251_v12 }
 0x7cd   : > { %v11258_v3 = vadd.f32 %v11257_v47, %v11256_v44  ;;  %v21720_v44 = vrot.slane %v13235_v9, %v21207_v33  ;;  %v21735_v47 = vrot.slane %v13316_v31, %v21207_v33 }
 0x7cf   : > { %v11260_v27 = vadd.f32 %v11259_v1, %v11258_v3  ;;  %v21738_v3 = vrot.slane %v13230_v51, %v21207_v33  ;;  %v21741_v1 = vrot.slane %v13282_v61, %v21207_v33  ;;  %v21853_v61 = vld [vmem:[%s21817_s12] ss:$0 sm:$0xff] }
 0x7d1   : > { %v11262_v52 = vadd.f32 %v11261_v25, %v11260_v27  ;;  %v21745_v27 = vcombine.high %v21720_v44, %v21720_v44  ;;  %v21748_v25 = vrot.slane %v13251_v12, %v21207_v33  ;;  %v21781_v14 = vcombine.high %v21741_v1, %v21741_v1 }
 0x7d3   : > { %v11263_v8 = vrot.slane %v11262_v52, 4  ;;  %22742 = vst [vmem:[#allocation20_spill] sm:$0xff] %v21748_v25  ;;  %v21787_v43 = vcombine.high %v21748_v25, %v21748_v25 }
 0x7d5   : > { %v11264_v10 = vadd.f32 %v11263_v8, %v11262_v52  ;;  %v21751_v52 = vrot.slane %v13367_v21, %v21207_v33  ;;  %v21755_v8 = vcombine.high %v21723_v23, %v21723_v23  ;;  %22744 = vst [vmem:[#allocation13_spill] sm:$0xff] %v21787_v43 }
 0x7d7   : > { %v11265_v56 = vrot.slane %v11264_v10, 2  ;;  %22743 = vst [vmem:[#allocation21_spill] sm:$0xff] %v21751_v52  ;;  %v21791_v22 = vcombine.high %v21751_v52, %v21751_v52 }
 0x7d9   : > { %v11266_v63 = vadd.f32 %v11265_v56, %v11264_v10  ;;  %v21759_v10 = vcombine.high %v21726_v41, %v21726_v41  ;;  %v21763_v56 = vcombine.high %v21729_v24, %v21729_v24  ;;  %22745 = vst [vmem:[#allocation7_spill] sm:$0xff] %v21791_v22 }
 0x7db   : > { %v11267_v48 = vrot.slane %v11266_v63, 1 }
 0x7dd   : > { %v11268_v37 = vadd.f32 %v11267_v48, %v11266_v63  ;;  %v21771_v63 = vcombine.high %v21735_v47, %v21735_v47  ;;  %v21777_v48 = vcombine.high %v21738_v3, %v21738_v3 }
 0x7df   : > { %v11269_v32 = vmul.f32 0.00390625, %v11268_v37 }
 0x7e1   : > { %v11270_v36 = vadd.f32 1e-05, %v11269_v32 }
 0x7e3   : > { %16779 = vrsqrt.f32 %v11270_v36  ;;  %v21820_v36 = vld [vmem:[%s21797_s28] ss:$0 sm:$0xff] }
 0x7ed   : > { %v21811_v9 = vpop.eup %16779 }
 0x7ee   : > { %v21828_v31 = vmul.f32 %v21811_v9, %v21602_v55  ;;  %v21832_v21 = vmul.f32 %v21811_v9, %v21604_v57  ;;  %v11299_v12 = vmul.f32 %v21811_v9, %v21606_v54  ;;  %v11300_v0 = vmul.f32 %v21811_v9, %v21608_v35 }
 0x7ef   : > { %v11301_v51 = vmul.f32 %v21811_v9, %v21610_v50  ;;  %v11302_v32 = vmul.f32 %v21811_v9, %v21612_v46  ;;  %v11303_v55 = vmul.f32 %v21811_v9, %v21614_v19  ;;  %v11280_v37 = vmul.f32 %v21811_v9, %v21554_v18  ;;  %v21859_v46 = vpop.f32.mrb[37].mxu0 }
 0x7f0   : > { %22746 = vst [vmem:[#allocation8_spill] sm:$0xff] %v21828_v31  ;;  %22747 = vst [vmem:[#allocation9_spill] sm:$0xff] %v21832_v21  ;;  %v21847_v57 = vmul.f32 %v21820_v36, %v11299_v12  ;;  %v21850_v54 = vmul.f32 %v21820_v36, %v11300_v0  ;;  %v11281_v35 = vmul.f32 %v21811_v9, %v21557_v4 }
 0x7f1   : > { %v11282_v50 = vmul.f32 %v21811_v9, %v21560_v28  ;;  %22750 = vst [vmem:[#allocation23_spill] sm:$0xff] %v21859_v46  ;;  %v11340_v19 = vmul.f32 %v21820_v36, %v11301_v51  ;;  %v21863_v18 = vmul.f32 %v21820_v36, %v11302_v32  ;;  %v11342_v12 = vmul.f32 %v21820_v36, %v11303_v55 }
 0x7f2   : > { %22748 = vst [vmem:[#allocation19_spill] sm:$0xff] %v21847_v57  ;;  %22749 = vst [vmem:[#allocation22_spill] sm:$0xff] %v21850_v54  ;;  %v11283_v0 = vmul.f32 %v21811_v9, %v21563_v58  ;;  %v11319_v5 = vmul.f32 %v21820_v36, %v11280_v37  ;;  %v11320_v53 = vmul.f32 %v21820_v36, %v11281_v35 }
 0x7f3   : > { %22751 = vst [vmem:[#allocation24_spill] sm:$0xff] %v21863_v18  ;;  %v11321_v4 = vmul.f32 %v21820_v36, %v11282_v50  ;;  %v11272_v28 = vmul.f32 %v21811_v9, %v21528_v20  ;;  %v11379_v7 = vadd.f32 %v21853_v61, %v11340_v19  ;;  %v11381_v51 = vadd.f32 %v21853_v61, %v11342_v12 }
 0x7f4   : > { %v11322_v32 = vmul.f32 %v21820_v36, %v11283_v0  ;;  %v11273_v55 = vmul.f32 %v21811_v9, %v21531_v59  ;;  %v11358_v58 = vadd.f32 %v21853_v61, %v11319_v5  ;;  %v11359_v37 = vadd.f32 %v21853_v61, %v11320_v53 }
 0x7f5   : > { %v11360_v35 = vadd.f32 %v21853_v61, %v11321_v4  ;;  %v11274_v50 = vmul.f32 %v21811_v9, %v21534_v13  ;;  %v11411_v6 = vmax.f32 %v11379_v7, 0.0  ;;  %v11413_v20 = vmax.f32 %v11381_v51, 0.0 }
 0x7f6   : > { %v11361_v19 = vadd.f32 %v21853_v61, %v11322_v32  ;;  %v11275_v12 = vmul.f32 %v21811_v9, %v21537_v16  ;;  %v11390_v0 = vmax.f32 %v11358_v58, 0.0  ;;  %v11391_v17 = vmax.f32 %v11359_v37, 0.0 }
 0x7f7   : > { %v11392_v18 = vmax.f32 %v11360_v35, 0.0  ;;  %v11311_v59 = vmul.f32 %v21820_v36, %v11272_v28  ;;  %v11493_v5 = vadd.f32 %v11413_v20, %v11411_v6  ;;  %v11312_v53 = vmul.f32 %v21820_v36, %v11273_v55 }
 0x7f8   : > { %v11393_v54 = vmax.f32 %v11361_v19, 0.0  ;;  %v11313_v4 = vmul.f32 %v21820_v36, %v11274_v50  ;;  %v11314_v13 = vmul.f32 %v21820_v36, %v11275_v12  ;;  %v21895_v16 = vmul.f32 %v21811_v9, %v21566_v42 }
 0x7f9   : > { %v11482_v46 = vadd.f32 %v11392_v18, %v11390_v0  ;;  %v21891_v7 = vadd.f32 %v21853_v61, %v11311_v59  ;;  %v11765_v51 = vcombine.high %v11493_v5, %v11493_v5  ;;  %v21898_v32 = vrot.slane %v11493_v5, %v21207_v33 }
 0x7fa   : > { %v11483_v6 = vadd.f32 %v11393_v54, %v11391_v17  ;;  %v21901_v28 = vadd.f32 %v21853_v61, %v11312_v53  ;;  %v21905_v58 = vadd.f32 %v21853_v61, %v11313_v4  ;;  %v21908_v37 = vadd.f32 %v21853_v61, %v11314_v13 }
 0x7fb   : > { %22752 = vst [vmem:[#allocation25_spill] sm:$0xff] %v21898_v32  ;;  %v11578_v55 = vcombine.high %v11482_v46, %v11482_v46  ;;  %v11585_v18 = vrot.slane %v11482_v46, %v21207_v33  ;;  %v21911_v42 = vrot.slane %v11765_v51, %v21207_v33  ;;  %v11382_v17 = vmax.f32 %v21891_v7, 0.0 }
 0x7fc   : > { %v11595_v35 = vcombine.high %v11483_v6, %v11483_v6  ;;  %v11602_v50 = vrot.slane %v11483_v6, %v21207_v33  ;;  %v11383_v46 = vmax.f32 %v21901_v28, 0.0  ;;  %v11384_v5 = vmax.f32 %v21905_v58, 0.0 }
 0x7fd   : > { %22753 = vst [vmem:[#allocation26_spill] sm:$0xff] %v21911_v42  ;;  %v11592_v54 = vrot.slane %v11578_v55, %v21207_v33  ;;  %v11593_v20 = vcombine.high %v11585_v18, %v11585_v18  ;;  %v14857_v19 = vrot.slane %v11585_v18, 9 }
 0x7fe   : > { %v11609_v12 = vrot.slane %v11595_v35, %v21207_v33  ;;  %v11610_v0 = vcombine.high %v11602_v50, %v11602_v50  ;;  %v14861_v59 = vrot.slane %v11602_v50, 9 }
 0x7ff   : > { %v11594_v53 = vcombine.high %v11592_v54, %v11592_v54  ;;  %v14858_v4 = vrot.slane %v11593_v20, 9  ;;  %v14859_v13 = vrot.slane %v11592_v54, 9  ;;  %v12054_v51 = vadd.f32 %v14857_v19, %v11585_v18 }
 0x800   : > { %v11611_v42 = vcombine.high %v11609_v12, %v11609_v12  ;;  %v14862_v6 = vrot.slane %v11610_v0, 9  ;;  %v14863_v32 = vrot.slane %v11609_v12, 9  ;;  %v12058_v7 = vadd.f32 %v14861_v59, %v11602_v50 }
 0x801   : > { %v14860_v43 = vrot.slane %v11594_v53, 9  ;;  %v12055_v55 = vadd.f32 %v14858_v4, %v11593_v20  ;;  %v12056_v22 = vadd.f32 %v14859_v13, %v11592_v54  ;;  %v12118_v25 = vmul.f32 0.25, %v12054_v51  ;;  %v21931_v13 = vpop.f32.mrb[38].mxu0 }
 0x802   : > { %v14864_v52 = vrot.slane %v11611_v42, 9  ;;  %v12059_v28 = vadd.f32 %v14862_v6, %v11610_v0  ;;  %v12060_v40 = vadd.f32 %v14863_v32, %v11609_v12  ;;  %v12122_v35 = vmul.f32 0.25, %v12058_v7 }
 0x803   : > { %v12057_v34 = vadd.f32 %v14860_v43, %v11594_v53  ;;  %v12119_v30 = vmul.f32 0.25, %v12055_v55  ;;  %v12120_v60 = vmul.f32 0.25, %v12056_v22  ;;  %v13513_v58 = vadd.f32 %v21720_v44, %v12118_v25 }
 0x804   : > { %v12061_v57 = vadd.f32 %v14864_v52, %v11611_v42  ;;  %v12123_v21 = vmul.f32 0.25, %v12059_v28  ;;  %v12124_v18 = vmul.f32 0.25, %v12060_v40  ;;  %v13517_v19 = vadd.f32 %v21723_v23, %v12122_v35 }
 0x805   : > { %v12121_v31 = vmul.f32 0.25, %v12057_v34  ;;  %v22754_v50 = vrot.slane %v21720_v44, 1  ;;  %v13515_v54 = vadd.f32 %v21745_v27, %v12120_v60  ;;  %v15090_v59 = vpack.c.bf16 %v13513_v58, %v13513_v58 }
 0x806   : > { %v12125_v0 = vmul.f32 0.25, %v12061_v57  ;;  %v22755_v32 = vrot.slane %v21723_v23, 1  ;;  %v13519_v22 = vadd.f32 %v21755_v8, %v12124_v18  ;;  %v15094_v12 = vpack.c.bf16 %v13517_v19, %v13517_v19 }
 0x807   : > { %v13514_v20 = vadd.f32 %v22754_v50, %v12119_v30  ;;  %v22756_v25 = vrot.slane %v21745_v27, 1  ;;  %v15092_v42 = vpack.c.bf16 %v13515_v54, %v13515_v54  ;;  %v13833_v53 = vunpack.c.l.b16 %v15090_v59 }
 0x808   : > { %v13518_v43 = vadd.f32 %v22755_v32, %v12123_v21  ;;  %v22757_v34 = vrot.slane %v21755_v8, 1  ;;  %v15096_v4 = vpack.c.bf16 %v13519_v22, %v13519_v22  ;;  %v13837_v60 = vunpack.c.l.b16 %v15094_v12 }
 0x809   : > { %v13516_v52 = vadd.f32 %v22756_v25, %v12121_v31  ;;  %v15091_v40 = vpack.c.bf16 %v13514_v20, %v13514_v20  ;;  %v13835_v21 = vunpack.c.l.b16 %v15092_v42  ;;  %v11385_v51 = vmax.f32 %v21908_v37, 0.0 }
 0x80a   : > { %v13520_v44 = vadd.f32 %v22757_v34, %v12125_v0  ;;  %v15095_v30 = vpack.c.bf16 %v13518_v43, %v13518_v43  ;;  %v13839_v27 = vunpack.c.l.b16 %v15096_v4  ;;  %v13915_v31 = vrot.slane %v13837_v60, 4 }
 0x80b   : > { %v15093_v57 = vpack.c.bf16 %v13516_v52, %v13516_v52  ;;  %v13834_v23 = vunpack.c.l.b16 %v15091_v40  ;;  %v13911_v35 = vrot.slane %v13835_v21, 6  ;;  %v11478_v58 = vadd.f32 %v11384_v5, %v11382_v17 }
 0x80c   : > { %v15097_v6 = vpack.c.bf16 %v13520_v44, %v13520_v44  ;;  %v13838_v7 = vunpack.c.l.b16 %v15095_v30  ;;  %v13919_v19 = vrot.slane %v13839_v27, 2  ;;  %v11479_v50 = vadd.f32 %v11385_v51, %v11383_v46 }
 0x80d   : > { %v13836_v55 = vunpack.c.l.b16 %v15093_v57  ;;  %v13909_v28 = vrot.slane %v13834_v23, 7  ;;  %v11510_v59 = vcombine.high %v11478_v58, %v11478_v58  ;;  %v11517_v0 = vrot.slane %v11478_v58, %v21207_v33 }
 0x80e   : > { %v13840_v8 = vunpack.c.l.b16 %v15097_v6  ;;  %v13917_v18 = vrot.slane %v13838_v7, 3  ;;  %v11527_v43 = vcombine.high %v11479_v50, %v11479_v50  ;;  %v11534_v22 = vrot.slane %v11479_v50, %v21207_v33 }
 0x80f   : > { %v13910_v20 = vsel %vm13055_vm0, %v13909_v28, %v13833_v53  ;;  %v13913_v54 = vrot.slane %v13836_v55, 5  ;;  %v11524_v17 = vrot.slane %v11510_v59, %v21207_v33  ;;  %v11525_v5 = vcombine.high %v11517_v0, %v11517_v0 }
 0x810   : > { %v13912_v37 = vsel %vm13058_vm4, %v13911_v35, %v13910_v20  ;;  %v13921_v32 = vrot.slane %v13840_v8, 1  ;;  %v14841_v25 = vrot.slane %v11517_v0, 9  ;;  %v11541_v52 = vrot.slane %v11527_v43, %v21207_v33 }
 0x811   : > { %v13914_v12 = vsel %vm13061_vm12, %v13913_v54, %v13912_v37  ;;  %v11542_v40 = vcombine.high %v11534_v22, %v11534_v22  ;;  %v14845_v42 = vrot.slane %v11534_v22, 9  ;;  %v11526_v34 = vcombine.high %v11524_v17, %v11524_v17 }
 0x812   : > { %v13916_v46 = vsel %vm13064_vm13, %v13915_v31, %v13914_v12  ;;  %v14842_v44 = vrot.slane %v11525_v5, 9  ;;  %v14843_v30 = vrot.slane %v11524_v17, 9  ;;  %v11543_v60 = vcombine.high %v11541_v52, %v11541_v52 }
 0x813   : > { %v13918_v53 = vsel %vm13067_vm14, %v13917_v18, %v13916_v46  ;;  %v14846_v57 = vrot.slane %v11542_v40, 9  ;;  %v14847_v23 = vrot.slane %v11541_v52, 9  ;;  %v14844_v51 = vrot.slane %v11526_v34, 9 }
 0x814   : > { %v13920_v4 = vsel %vm13070_vm15, %v13919_v19, %v13918_v53  ;;  %v12038_v6 = vadd.f32 %v14841_v25, %v11517_v0  ;;  %v12039_v7 = vadd.f32 %v14842_v44, %v11525_v5  ;;  %v14848_v31 = vrot.slane %v11543_v60, 9 }
 0x815   : > { %v13922_v21 = vsel %vm13073_vm2, %v13921_v32, %v13920_v4  ;;  %v12040_v55 = vadd.f32 %v14843_v30, %v11524_v17  ;;  %v12042_v28 = vadd.f32 %v14845_v42, %v11534_v22  ;;  %v12041_v35 = vadd.f32 %v14844_v51, %v11526_v34 }
 0x816   : > { %v13995_v27 = vpack.c.b16 %v13922_v21, %v13922_v21  ;;  %v12043_v58 = vadd.f32 %v14846_v57, %v11542_v40  ;;  %v12044_v8 = vadd.f32 %v14847_v23, %v11541_v52  ;;  %v12102_v18 = vmul.f32 0.25, %v12038_v6 }
 0x817   : > { %v12045_v19 = vadd.f32 %v14848_v31, %v11543_v60  ;;  %v12103_v50 = vmul.f32 0.25, %v12039_v7  ;;  %v12104_v20 = vmul.f32 0.25, %v12040_v55  ;;  %v12106_v54 = vmul.f32 0.25, %v12042_v28 }
 0x818   : > { %14011 = vst.msk [vmem:[%s21948_s10 + $0x8] sm:$0xf] %vm5876_vm6, %v13995_v27  ;;  %v12105_v59 = vmul.f32 0.25, %v12041_v35  ;;  %v12107_v37 = vmul.f32 0.25, %v12043_v58  ;;  %v12108_v32 = vmul.f32 0.25, %v12044_v8  ;;  %v13497_v0 = vadd.f32 %v21726_v41, %v12102_v18 }
 0x819   : > { %v12109_v43 = vmul.f32 0.25, %v12045_v19  ;;  %v22758_v12 = vrot.slane %v21726_v41, 1  ;;  %v13499_v22 = vadd.f32 %v21759_v10, %v12104_v20  ;;  %v13501_v5 = vadd.f32 %v21729_v24, %v12106_v54 }
 0x81a   : > { %v22759_v25 = vrot.slane %v21759_v10, 1  ;;  %v22760_v52 = vrot.slane %v21729_v24, 1  ;;  %v13503_v42 = vadd.f32 %v21763_v56, %v12108_v32  ;;  %v15074_v53 = vpack.c.bf16 %v13497_v0, %v13497_v0 }
 0x81b   : > { %v13498_v17 = vadd.f32 %v22758_v12, %v12103_v50  ;;  %v22761_v34 = vrot.slane %v21763_v56, 1  ;;  %v15076_v4 = vpack.c.bf16 %v13499_v22, %v13499_v22  ;;  %v15078_v41 = vpack.c.bf16 %v13501_v5, %v13501_v5 }
 0x81c   : > { %v13500_v46 = vadd.f32 %v22759_v25, %v12105_v59  ;;  %v13502_v40 = vadd.f32 %v22760_v52, %v12107_v37  ;;  %v15080_v23 = vpack.c.bf16 %v13503_v42, %v13503_v42  ;;  %v13817_v21 = vunpack.c.l.b16 %v15074_v53 }
 0x81d   : > { %v13504_v44 = vadd.f32 %v22761_v34, %v12109_v43  ;;  %v15075_v30 = vpack.c.bf16 %v13498_v17, %v13498_v17  ;;  %v13819_v10 = vunpack.c.l.b16 %v15076_v4  ;;  %v13821_v7 = vunpack.c.l.b16 %v15078_v41 }
 0x81e   : > { %v15077_v60 = vpack.c.bf16 %v13500_v46, %v13500_v46  ;;  %v15079_v57 = vpack.c.bf16 %v13502_v40, %v13502_v40  ;;  %v13823_v31 = vunpack.c.l.b16 %v15080_v23  ;;  %v11285_v55 = vmul.f32 %v21811_v9, %v21569_v26  ;;  %v21989_v46 = vpop.f32.mrb[39].mxu0 }
 0x81f   : > { %v15081_v51 = vpack.c.bf16 %v13504_v44, %v13504_v44  ;;  %v13818_v6 = vunpack.c.l.b16 %v15075_v30  ;;  %v13883_v35 = vrot.slane %v13819_v10, 6  ;;  %v13887_v58 = vrot.slane %v13821_v7, 4 }
 0x820   : > { %v13820_v27 = vunpack.c.l.b16 %v15077_v60  ;;  %v13822_v24 = vunpack.c.l.b16 %v15079_v57  ;;  %v13891_v19 = vrot.slane %v13823_v31, 2  ;;  %v11286_v50 = vmul.f32 %v21811_v9, %v21572_v38 }
 0x821   : > { %v13824_v28 = vunpack.c.l.b16 %v15081_v51  ;;  %v13881_v56 = vrot.slane %v13818_v6, 7  ;;  %v11287_v59 = vmul.f32 %v21811_v9, %v21575_v45  ;;  %v11323_v37 = vmul.f32 %v21820_v36, %v21895_v16 }
 0x822   : > { %v13885_v8 = vrot.slane %v13820_v27, 5  ;;  %v13889_v18 = vrot.slane %v13822_v24, 3  ;;  %v11324_v32 = vmul.f32 %v21820_v36, %v11285_v55  ;;  %v11325_v0 = vmul.f32 %v21820_v36, %v11286_v50 }
 0x823   : > { %v13882_v20 = vsel %vm13055_vm0, %v13881_v56, %v13817_v21  ;;  %v13893_v54 = vrot.slane %v13824_v28, 1  ;;  %v11276_v43 = vmul.f32 %v21811_v9, %v21540_v2  ;;  %v11326_v12 = vmul.f32 %v21820_v36, %v11287_v59 }
 0x824   : > { %v13884_v26 = vsel %vm13058_vm4, %v13883_v35, %v13882_v20  ;;  %v11362_v17 = vadd.f32 %v21853_v61, %v11323_v37  ;;  %v11277_v45 = vmul.f32 %v21811_v9, %v21543_v29  ;;  %v11363_v22 = vadd.f32 %v21853_v61, %v11324_v32 }
 0x825   : > { %v13886_v38 = vsel %vm13061_vm12, %v13885_v8, %v13884_v26  ;;  %v11364_v5 = vadd.f32 %v21853_v61, %v11325_v0  ;;  %v11278_v25 = vmul.f32 %v21811_v9, %v21546_v39  ;;  %v11365_v52 = vadd.f32 %v21853_v61, %v11326_v12 }
 0x826   : > { %v13888_v16 = vsel %vm13064_vm13, %v13887_v58, %v13886_v38  ;;  %v11394_v40 = vmax.f32 %v11362_v17, 0.0  ;;  %v11279_v42 = vmul.f32 %v21811_v9, %v21549_v15  ;;  %v11395_v53 = vmax.f32 %v11363_v22, 0.0 }
 0x827   : > { %v13890_v2 = vsel %vm13067_vm14, %v13889_v18, %v13888_v16  ;;  %v11396_v34 = vmax.f32 %v11364_v5, 0.0  ;;  %v11315_v44 = vmul.f32 %v21820_v36, %v11276_v43  ;;  %v11397_v39 = vmax.f32 %v11365_v52, 0.0 }
 0x828   : > { %v13892_v29 = vsel %vm13070_vm15, %v13891_v19, %v13890_v2  ;;  %v11316_v4 = vmul.f32 %v21820_v36, %v11277_v45  ;;  %v11317_v41 = vmul.f32 %v21820_v36, %v11278_v25  ;;  %v11318_v23 = vmul.f32 %v21820_v36, %v11279_v42 }
 0x829   : > { %v13894_v30 = vsel %vm13073_vm2, %v13893_v54, %v13892_v29  ;;  %v11484_v57 = vadd.f32 %v11396_v34, %v11394_v40  ;;  %v11354_v15 = vadd.f32 %v21853_v61, %v11315_v44  ;;  %v11485_v21 = vadd.f32 %v11397_v39, %v11395_v53 }
 0x82a   : > { %v13993_v60 = vpack.c.b16 %v13894_v30, %v13894_v30  ;;  %v22003_v51 = vadd.f32 %v21853_v61, %v11316_v4  ;;  %v11356_v6 = vadd.f32 %v21853_v61, %v11317_v41  ;;  %v22008_v10 = vmul.f32 %v21811_v9, %v21600_v49 }
 0x82b   : > { %v11612_v7 = vcombine.high %v11484_v57, %v11484_v57  ;;  %v11619_v27 = vrot.slane %v11484_v57, %v21207_v33  ;;  %v11357_v24 = vadd.f32 %v21853_v61, %v11318_v23  ;;  %v11386_v31 = vmax.f32 %v11354_v15, 0.0 }
 0x82c   : > { %14009 = vst.msk [vmem:[%s21948_s10] sm:$0xf] %vm5876_vm6, %v13993_v60  ;;  %v11629_v55 = vcombine.high %v11485_v21, %v11485_v21  ;;  %v11636_v28 = vrot.slane %v11485_v21, %v21207_v33  ;;  %v11387_v56 = vmax.f32 %v22003_v51, 0.0  ;;  %v11388_v35 = vmax.f32 %v11356_v6, 0.0 }
 0x82d   : > { %v11626_v58 = vrot.slane %v11612_v7, %v21207_v33  ;;  %v11627_v8 = vcombine.high %v11619_v27, %v11619_v27  ;;  %v14865_v18 = vrot.slane %v11619_v27, 9  ;;  %v11389_v49 = vmax.f32 %v11357_v24, 0.0 }
 0x82e   : > { %v11643_v19 = vrot.slane %v11629_v55, %v21207_v33  ;;  %v11644_v50 = vcombine.high %v11636_v28, %v11636_v28  ;;  %v14869_v20 = vrot.slane %v11636_v28, 9  ;;  %v11480_v54 = vadd.f32 %v11388_v35, %v11386_v31 }
 0x82f   : > { %v11628_v59 = vcombine.high %v11626_v58, %v11626_v58  ;;  %v14866_v37 = vrot.slane %v11627_v8, 9  ;;  %v14867_v26 = vrot.slane %v11626_v58, 9  ;;  %v12062_v32 = vadd.f32 %v14865_v18, %v11619_v27 }
 0x830   : > { %v11645_v0 = vcombine.high %v11643_v19, %v11643_v19  ;;  %v14870_v43 = vrot.slane %v11644_v50, 9  ;;  %v14871_v38 = vrot.slane %v11643_v19, 9  ;;  %v12066_v12 = vadd.f32 %v14869_v20, %v11636_v28 }
 0x831   : > { %v14868_v17 = vrot.slane %v11628_v59, 9  ;;  %v12063_v45 = vadd.f32 %v14866_v37, %v11627_v8  ;;  %v12064_v16 = vadd.f32 %v14867_v26, %v11626_v58  ;;  %v12126_v22 = vmul.f32 0.25, %v12062_v32 }
 0x832   : > { %v14872_v5 = vrot.slane %v11645_v0, 9  ;;  %v12067_v25 = vadd.f32 %v14870_v43, %v11644_v50  ;;  %v12068_v2 = vadd.f32 %v14871_v38, %v11643_v19  ;;  %v12130_v52 = vmul.f32 0.25, %v12066_v12 }
 0x833   : > { %v12065_v40 = vadd.f32 %v14868_v17, %v11628_v59  ;;  %v12127_v42 = vmul.f32 0.25, %v12063_v45  ;;  %v12128_v29 = vmul.f32 0.25, %v12064_v16  ;;  %v13521_v53 = vadd.f32 %v21732_v62, %v12126_v22 }
 0x834   : > { %v12069_v34 = vadd.f32 %v14872_v5, %v11645_v0  ;;  %v12131_v44 = vmul.f32 0.25, %v12067_v25  ;;  %v12132_v30 = vmul.f32 0.25, %v12068_v2  ;;  %v13525_v39 = vadd.f32 %v21735_v47, %v12130_v52 }
 0x835   : > { %v12129_v4 = vmul.f32 0.25, %v12065_v40  ;;  %v22762_v41 = vrot.slane %v21732_v62, 1  ;;  %v13523_v57 = vadd.f32 %v21767_v11, %v12128_v29  ;;  %v15098_v23 = vpack.c.bf16 %v13521_v53, %v13521_v53 }
 0x836   : > { %v12133_v15 = vmul.f32 0.25, %v12069_v34  ;;  %v22763_v21 = vrot.slane %v21735_v47, 1  ;;  %v13527_v6 = vadd.f32 %v21771_v63, %v12132_v30  ;;  %v15102_v7 = vpack.c.bf16 %v13525_v39, %v13525_v39 }
 0x837   : > { %v13522_v60 = vadd.f32 %v22762_v41, %v12127_v42  ;;  %v22764_v27 = vrot.slane %v21767_v11, 1  ;;  %v15100_v55 = vpack.c.bf16 %v13523_v57, %v13523_v57  ;;  %v13841_v28 = vunpack.c.l.b16 %v15098_v23 }
 0x838   : > { %v13526_v51 = vadd.f32 %v22763_v21, %v12131_v44  ;;  %v22765_v35 = vrot.slane %v21771_v63, 1  ;;  %v15104_v8 = vpack.c.bf16 %v13527_v6, %v13527_v6  ;;  %v13845_v18 = vunpack.c.l.b16 %v15102_v7 }
 0x839   : > { %v13524_v24 = vadd.f32 %v22764_v27, %v12129_v4  ;;  %v15099_v31 = vpack.c.bf16 %v13522_v60, %v13522_v60  ;;  %v13843_v20 = vunpack.c.l.b16 %v15100_v55  ;;  %v11481_v47 = vadd.f32 %v11389_v49, %v11387_v56 }
 0x83a   : > { %v13528_v62 = vadd.f32 %v22765_v35, %v12133_v15  ;;  %v15103_v58 = vpack.c.bf16 %v13526_v51, %v13526_v51  ;;  %v13847_v26 = vunpack.c.l.b16 %v15104_v8  ;;  %v13929_v32 = vrot.slane %v13845_v18, 4 }
 0x83b   : > { %v15101_v19 = vpack.c.bf16 %v13524_v24, %v13524_v24  ;;  %v13842_v50 = vunpack.c.l.b16 %v15099_v31  ;;  %v13925_v43 = vrot.slane %v13843_v20, 6  ;;  %v11544_v38 = vcombine.high %v11480_v54, %v11480_v54 }
 0x83c   : > { %v15105_v59 = vpack.c.bf16 %v13528_v62, %v13528_v62  ;;  %v13846_v37 = vunpack.c.l.b16 %v15103_v58  ;;  %v13933_v45 = vrot.slane %v13847_v26, 2  ;;  %v11551_v63 = vrot.slane %v11480_v54, %v21207_v33 }
 0x83d   : > { %v13844_v0 = vunpack.c.l.b16 %v15101_v19  ;;  %v13923_v11 = vrot.slane %v13842_v50, 7  ;;  %v11558_v5 = vrot.slane %v11544_v38, %v21207_v33  ;;  %v11561_v25 = vcombine.high %v11481_v47, %v11481_v47 }
 0x83e   : > { %v13848_v12 = vunpack.c.l.b16 %v15105_v59  ;;  %v13931_v17 = vrot.slane %v13846_v37, 3  ;;  %v11559_v2 = vcombine.high %v11551_v63, %v11551_v63  ;;  %v11568_v52 = vrot.slane %v11481_v47, %v21207_v33 }
 0x83f   : > { %v13924_v16 = vsel %vm13055_vm0, %v13923_v11, %v13841_v28  ;;  %v13927_v22 = vrot.slane %v13844_v0, 5  ;;  %v11560_v42 = vcombine.high %v11558_v5, %v11558_v5  ;;  %v11575_v29 = vrot.slane %v11561_v25, %v21207_v33 }
 0x840   : > { %v13926_v56 = vsel %vm13058_vm4, %v13925_v43, %v13924_v16  ;;  %v13935_v49 = vrot.slane %v13848_v12, 1  ;;  %v14849_v53 = vrot.slane %v11551_v63, 9  ;;  %v11576_v34 = vcombine.high %v11568_v52, %v11568_v52 }
 0x841   : > { %v13928_v40 = vsel %vm13061_vm12, %v13927_v22, %v13926_v56  ;;  %v14850_v44 = vrot.slane %v11559_v2, 9  ;;  %v14851_v30 = vrot.slane %v11558_v5, 9  ;;  %v11577_v4 = vcombine.high %v11575_v29, %v11575_v29 }
 0x842   : > { %v13930_v54 = vsel %vm13064_vm13, %v13929_v32, %v13928_v40  ;;  %v14852_v41 = vrot.slane %v11560_v42, 9  ;;  %v14853_v60 = vrot.slane %v11568_v52, 9  ;;  %v14854_v23 = vrot.slane %v11576_v34, 9 }
 0x843   : > { %v13932_v39 = vsel %vm13067_vm14, %v13931_v17, %v13930_v54  ;;  %v14855_v15 = vrot.slane %v11575_v29, 9  ;;  %v12046_v21 = vadd.f32 %v14849_v53, %v11551_v63  ;;  %v14856_v6 = vrot.slane %v11577_v4, 9 }
 0x844   : > { %v13934_v57 = vsel %vm13070_vm15, %v13933_v45, %v13932_v39  ;;  %v12047_v7 = vadd.f32 %v14850_v44, %v11559_v2  ;;  %v12048_v27 = vadd.f32 %v14851_v30, %v11558_v5  ;;  %v12049_v31 = vadd.f32 %v14852_v41, %v11560_v42 }
 0x845   : > { %v13936_v51 = vsel %vm13073_vm2, %v13935_v49, %v13934_v57  ;;  %v12050_v55 = vadd.f32 %v14853_v60, %v11568_v52  ;;  %v12051_v28 = vadd.f32 %v14854_v23, %v11576_v34  ;;  %v12052_v35 = vadd.f32 %v14855_v15, %v11575_v29  ;;  %v22770_v15 = vld [vmem:[#allocation8_spill] sm:$0xff] }
 0x846   : > { %v13996_v24 = vpack.c.b16 %v13936_v51, %v13936_v51  ;;  %v12053_v62 = vadd.f32 %v14856_v6, %v11577_v4  ;;  %v12110_v58 = vmul.f32 0.25, %v12046_v21  ;;  %v12111_v8 = vmul.f32 0.25, %v12047_v7  ;;  %v22771_v6 = vld [vmem:[#allocation9_spill] sm:$0xff] }
 0x847   : > { %v12112_v18 = vmul.f32 0.25, %v12048_v27  ;;  %v12113_v19 = vmul.f32 0.25, %v12049_v31  ;;  %v12114_v50 = vmul.f32 0.25, %v12050_v55  ;;  %v12115_v20 = vmul.f32 0.25, %v12051_v28  ;;  %v22773_v28 = vld [vmem:[#allocation12_spill] sm:$0xff] }
 0x848   : > { %14012 = vst.msk [vmem:[%s21948_s10 + $0xc] sm:$0xf] %vm5876_vm6, %v13996_v24  ;;  %v12116_v47 = vmul.f32 0.25, %v12052_v35  ;;  %v12117_v59 = vmul.f32 0.25, %v12053_v62  ;;  %v13505_v37 = vadd.f32 %v21738_v3, %v12110_v58  ;;  %v22766_v26 = vrot.slane %v21738_v3, 1  ;;  %v22772_v24 = vld [vmem:[#allocation19_spill] sm:$0xff] }
 0x849   : > { %v13507_v0 = vadd.f32 %v21777_v48, %v12112_v18  ;;  %v22767_v11 = vrot.slane %v21777_v48, 1  ;;  %v13509_v38 = vadd.f32 %v21741_v1, %v12114_v50  ;;  %v22768_v12 = vrot.slane %v21741_v1, 1  ;;  %v22774_v62 = vld [vmem:[#allocation14_spill] sm:$0xff] }
 0x84a   : > { %v13506_v32 = vadd.f32 %v22766_v26, %v12111_v8  ;;  %v13511_v45 = vadd.f32 %v21781_v14, %v12116_v47  ;;  %v22769_v63 = vrot.slane %v21781_v14, 1  ;;  %v15082_v22 = vpack.c.bf16 %v13505_v37, %v13505_v37  ;;  %v22776_v26 = vld [vmem:[#allocation16_spill] sm:$0xff] }
 0x84b   : > { %v13508_v43 = vadd.f32 %v22767_v11, %v12113_v19  ;;  %v13510_v17 = vadd.f32 %v22768_v12, %v12115_v20  ;;  %v15084_v25 = vpack.c.bf16 %v13507_v0, %v13507_v0  ;;  %v15086_v56 = vpack.c.bf16 %v13509_v38, %v13509_v38 }
 0x84c   : > { %v13512_v16 = vadd.f32 %v22769_v63, %v12117_v59  ;;  %v15083_v5 = vpack.c.bf16 %v13506_v32, %v13506_v32  ;;  %v15088_v2 = vpack.c.bf16 %v13511_v45, %v13511_v45  ;;  %v13825_v48 = vunpack.c.l.b16 %v15082_v22  ;;  %v22775_v59 = vld [vmem:[#allocation15_spill] sm:$0xff] }
 0x84d   : > { %v15085_v3 = vpack.c.bf16 %v13508_v43, %v13508_v43  ;;  %v15087_v49 = vpack.c.bf16 %v13510_v17, %v13510_v17  ;;  %v13827_v42 = vunpack.c.l.b16 %v15084_v25  ;;  %v13829_v53 = vunpack.c.l.b16 %v15086_v56 }
 0x84e   : > { %v15089_v52 = vpack.c.bf16 %v13512_v16, %v13512_v16  ;;  %v13826_v40 = vunpack.c.l.b16 %v15083_v5  ;;  %v13831_v54 = vunpack.c.l.b16 %v15088_v2  ;;  %v11335_v14 = vmul.f32 %v21820_v36, %v22008_v10 }
 0x84f   : > { %v13828_v29 = vunpack.c.l.b16 %v15085_v3  ;;  %v13830_v1 = vunpack.c.l.b16 %v15087_v49  ;;  %v13897_v30 = vrot.slane %v13827_v42, 6  ;;  %v13901_v4 = vrot.slane %v13829_v53, 4 }
 0x850   : > { %v13832_v34 = vunpack.c.l.b16 %v15089_v52  ;;  %v13895_v44 = vrot.slane %v13826_v40, 7  ;;  %v13905_v57 = vrot.slane %v13831_v54, 2  ;;  %v11336_v21 = vmul.f32 %v21820_v36, %v22770_v15 }
 0x851   : > { %v13899_v39 = vrot.slane %v13828_v29, 5  ;;  %v13903_v41 = vrot.slane %v13830_v1, 3  ;;  %v11337_v7 = vmul.f32 %v21820_v36, %v22771_v6  ;;  %v11374_v27 = vadd.f32 %v21853_v61, %v11335_v14 }
 0x852   : > { %v13896_v60 = vsel %vm13055_vm0, %v13895_v44, %v13825_v48  ;;  %v13907_v23 = vrot.slane %v13832_v34, 1  ;;  %v11377_v10 = vadd.f32 %v21853_v61, %v22772_v24  ;;  %v11375_v55 = vadd.f32 %v21853_v61, %v11336_v21 }
 0x853   : > { %v13898_v51 = vsel %vm13058_vm4, %v13897_v30, %v13896_v60  ;;  %v11288_v35 = vmul.f32 %v21811_v9, %v22773_v28  ;;  %v11289_v58 = vmul.f32 %v21811_v9, %v22774_v62  ;;  %v11376_v18 = vadd.f32 %v21853_v61, %v11337_v7 }
 0x854   : > { %v13900_v31 = vsel %vm13061_vm12, %v13899_v39, %v13898_v51  ;;  %v11406_v19 = vmax.f32 %v11374_v27, 0.0  ;;  %v11409_v50 = vmax.f32 %v11377_v10, 0.0  ;;  %v11407_v47 = vmax.f32 %v11375_v55, 0.0 }
 0x855   : > { %v13902_v8 = vsel %vm13064_vm13, %v13901_v4, %v13900_v31  ;;  %v11290_v37 = vmul.f32 %v21811_v9, %v22775_v59  ;;  %v11291_v32 = vmul.f32 %v21811_v9, %v22776_v26  ;;  %v11408_v11 = vmax.f32 %v11376_v18, 0.0 }
 0x856   : > { %v13904_v20 = vsel %vm13067_vm14, %v13903_v41, %v13902_v8  ;;  %v11327_v43 = vmul.f32 %v21820_v36, %v11288_v35  ;;  %v11328_v38 = vmul.f32 %v21820_v36, %v11289_v58  ;;  %v11491_v17 = vadd.f32 %v11409_v50, %v11407_v47  ;;  %v22777_v35 = vld [vmem:[#allocation21_spill] sm:$0xff] }
 0x857   : > { %v13906_v0 = vsel %vm13070_vm15, %v13905_v57, %v13904_v20  ;;  %v11329_v45 = vmul.f32 %v21820_v36, %v11290_v37  ;;  %v11330_v63 = vmul.f32 %v21820_v36, %v11291_v32  ;;  %v11490_v22 = vadd.f32 %v11408_v11, %v11406_v19  ;;  %v22778_v19 = vld [vmem:[#allocation20_spill] sm:$0xff]  ;;  %v22780_v37 = vld [vmem:[#allocation7_spill] sm:$0xff] }
 0x858   : > { %v13908_v12 = vsel %vm13073_vm2, %v13907_v23, %v13906_v0  ;;  %v22086_v5 = vadd.f32 %v21853_v61, %v11327_v43  ;;  %v22089_v25 = vadd.f32 %v21853_v61, %v11328_v38  ;;  %v11731_v3 = vcombine.high %v11491_v17, %v11491_v17  ;;  %v22782_v38 = vld [vmem:[#allocation13_spill] sm:$0xff] }
 0x859   : > { %v13994_v16 = vpack.c.b16 %v13908_v12, %v13908_v12  ;;  %v11738_v56 = vrot.slane %v11491_v17, %v21207_v33  ;;  %v22093_v49 = vadd.f32 %v21853_v61, %v11329_v45  ;;  %v22096_v2 = vadd.f32 %v21853_v61, %v11330_v63 }
 0x85a   : > { %v11714_v36 = vcombine.high %v11490_v22, %v11490_v22  ;;  %v11721_v52 = vrot.slane %v11490_v22, %v21207_v33  ;;  %v11398_v48 = vmax.f32 %v22086_v5, 0.0  ;;  %v11399_v40 = vmax.f32 %v22089_v25, 0.0 }
 0x85b   : > { %14010 = vst.msk [vmem:[%s21948_s10 + $0x4] sm:$0xf] %vm5876_vm6, %v13994_v16  ;;  %v11745_v42 = vrot.slane %v11731_v3, %v21207_v33  ;;  %v11746_v29 = vcombine.high %v11738_v56, %v11738_v56  ;;  %v14893_v53 = vrot.slane %v11738_v56, 9  ;;  %v11400_v1 = vmax.f32 %v22093_v49, 0.0 }
 0x85c   : > { %v11728_v54 = vrot.slane %v11714_v36, %v21207_v33  ;;  %v11729_v34 = vcombine.high %v11721_v52, %v11721_v52  ;;  %v14889_v61 = vrot.slane %v11721_v52, 9  ;;  %v11401_v44 = vmax.f32 %v22096_v2, 0.0 }
 0x85d   : > { %v11747_v14 = vcombine.high %v11745_v42, %v11745_v42  ;;  %v14894_v30 = vrot.slane %v11746_v29, 9  ;;  %v14895_v39 = vrot.slane %v11745_v42, 9  ;;  %v12090_v4 = vadd.f32 %v14893_v53, %v11738_v56 }
 0x85e   : > { %v11730_v41 = vcombine.high %v11728_v54, %v11728_v54  ;;  %v14890_v60 = vrot.slane %v11729_v34, 9  ;;  %v14891_v57 = vrot.slane %v11728_v54, 9  ;;  %v12086_v23 = vadd.f32 %v14889_v61, %v11721_v52 }
 0x85f   : > { %v14896_v15 = vrot.slane %v11747_v14, 9  ;;  %v12091_v21 = vadd.f32 %v14894_v30, %v11746_v29  ;;  %v12092_v51 = vadd.f32 %v14895_v39, %v11745_v42  ;;  %v12154_v6 = vmul.f32 0.25, %v12090_v4 }
 0x860   : > { %v14892_v7 = vrot.slane %v11730_v41, 9  ;;  %v12087_v27 = vadd.f32 %v14890_v60, %v11729_v34  ;;  %v12088_v24 = vadd.f32 %v14891_v57, %v11728_v54  ;;  %v12150_v10 = vmul.f32 0.25, %v12086_v23 }
 0x861   : > { %v12093_v31 = vadd.f32 %v14896_v15, %v11747_v14  ;;  %v12155_v55 = vmul.f32 0.25, %v12091_v21  ;;  %v12156_v28 = vmul.f32 0.25, %v12092_v51  ;;  %v13549_v62 = vadd.f32 %v22777_v35, %v12154_v6 }
 0x862   : > { %v12089_v58 = vadd.f32 %v14892_v7, %v11730_v41  ;;  %v12151_v8 = vmul.f32 0.25, %v12087_v27  ;;  %v12152_v18 = vmul.f32 0.25, %v12088_v24  ;;  %v13545_v50 = vadd.f32 %v22778_v19, %v12150_v10 }
 0x863   : > { %v12157_v20 = vmul.f32 0.25, %v12093_v31  ;;  %v22779_v47 = vrot.slane %v22777_v35, 1  ;;  %v13551_v26 = vadd.f32 %v22780_v37, %v12156_v28  ;;  %v15126_v32 = vpack.c.bf16 %v13549_v62, %v13549_v62 }
 0x864   : > { %v12153_v0 = vmul.f32 0.25, %v12089_v58  ;;  %v22781_v11 = vrot.slane %v22778_v19, 1  ;;  %v13547_v12 = vadd.f32 %v22782_v38, %v12152_v18  ;;  %v15122_v17 = vpack.c.bf16 %v13545_v50, %v13545_v50 }
 0x865   : > { %v13550_v59 = vadd.f32 %v22779_v47, %v12155_v55  ;;  %v22783_v45 = vrot.slane %v22780_v37, 1  ;;  %v15128_v22 = vpack.c.bf16 %v13551_v26, %v13551_v26  ;;  %v13869_v5 = vunpack.c.l.b16 %v15126_v32 }
 0x866   : > { %v13546_v43 = vadd.f32 %v22781_v11, %v12151_v8  ;;  %v22784_v25 = vrot.slane %v22782_v38, 1  ;;  %v15124_v49 = vpack.c.bf16 %v13547_v12, %v13547_v12  ;;  %v13865_v2 = vunpack.c.l.b16 %v15122_v17 }
 0x867   : > { %v13552_v63 = vadd.f32 %v22783_v45, %v12157_v20  ;;  %v15127_v16 = vpack.c.bf16 %v13550_v59, %v13550_v59  ;;  %v13871_v42 = vunpack.c.l.b16 %v15128_v22  ;;  %v13971_v29 = vrot.slane %v13869_v5, 4 }
 0x868   : > { %v13548_v3 = vadd.f32 %v22784_v25, %v12153_v0  ;;  %v15123_v56 = vpack.c.bf16 %v13546_v43, %v13546_v43  ;;  %v13867_v34 = vunpack.c.l.b16 %v15124_v49  ;;  %v11486_v61 = vadd.f32 %v11400_v1, %v11398_v48  ;;  %v22126_v48 = vld [vmem:[%s22225_s8] ss:$0 sm:$0xff] }
 0x869   : > { %v15129_v36 = vpack.c.bf16 %v13552_v63, %v13552_v63  ;;  %v13870_v52 = vunpack.c.l.b16 %v15127_v16  ;;  %v13975_v39 = vrot.slane %v13871_v42, 2  ;;  %v11487_v4 = vadd.f32 %v11401_v44, %v11399_v40  ;;  %v22785_v40 = vld [vmem:[#allocation23_spill] sm:$0xff] }
 0x86a   : > { %v15125_v53 = vpack.c.bf16 %v13548_v3, %v13548_v3  ;;  %v13866_v54 = vunpack.c.l.b16 %v15123_v56  ;;  %v13967_v57 = vrot.slane %v13867_v34, 6  ;;  %v11646_v23 = vcombine.high %v11486_v61, %v11486_v61  ;;  %v22787_v34 = vld [vmem:[#allocation24_spill] sm:$0xff] }
 0x86b   : > { %v13872_v14 = vunpack.c.l.b16 %v15129_v36  ;;  %v13973_v30 = vrot.slane %v13870_v52, 3  ;;  %v11653_v21 = vrot.slane %v11486_v61, %v21207_v33  ;;  %v11663_v51 = vcombine.high %v11487_v4, %v11487_v4 }
 0x86c   : > { %v13868_v41 = vunpack.c.l.b16 %v15125_v53  ;;  %v13965_v60 = vrot.slane %v13866_v54, 7  ;;  %v11670_v6 = vrot.slane %v11487_v4, %v21207_v33  ;;  %v11660_v24 = vrot.slane %v11646_v23, %v21207_v33  ;;  %v22786_v53 = vld [vmem:[#allocation22_spill] sm:$0xff] }
 0x86d   : > { %v13977_v15 = vrot.slane %v13872_v14, 1  ;;  %v13243_v1 = vadd.f32 %v22126_v48, %v22785_v40  ;;  %v11661_v10 = vcombine.high %v11653_v21, %v11653_v21  ;;  %v11677_v31 = vrot.slane %v11663_v51, %v21207_v33  ;;  %v22789_v4 = vld [vmem:[#allocation26_spill] sm:$0xff] }
 0x86e   : > { %v13966_v7 = vsel %vm13055_vm0, %v13965_v60, %v13865_v2  ;;  %v13969_v27 = vrot.slane %v13868_v41, 5  ;;  %v11678_v55 = vcombine.high %v11670_v6, %v11670_v6  ;;  %v11662_v35 = vcombine.high %v11660_v24, %v11660_v24 }
 0x86f   : > { %v13968_v44 = vsel %vm13058_vm4, %v13967_v57, %v13966_v7  ;;  %v14873_v62 = vrot.slane %v11653_v21, 9  ;;  %v14875_v58 = vrot.slane %v11660_v24, 9  ;;  %v11679_v18 = vcombine.high %v11677_v31, %v11677_v31 }
 0x870   : > { %v13970_v28 = vsel %vm13061_vm12, %v13969_v27, %v13968_v44  ;;  %v14874_v19 = vrot.slane %v11661_v10, 9  ;;  %v14877_v50 = vrot.slane %v11670_v6, 9  ;;  %v14876_v47 = vrot.slane %v11662_v35, 9 }
 0x871   : > { %v13972_v8 = vsel %vm13064_vm13, %v13971_v29, %v13970_v28  ;;  %v14878_v59 = vrot.slane %v11678_v55, 9  ;;  %v14879_v37 = vrot.slane %v11677_v31, 9  ;;  %v14880_v32 = vrot.slane %v11679_v18, 9  ;;  %v22141_v29 = vld [vmem:[%s21817_s12] ss:$0 sm:$0xff] }
 0x872   : > { %v13974_v20 = vsel %vm13067_vm14, %v13973_v30, %v13972_v8  ;;  %v12070_v0 = vadd.f32 %v14873_v62, %v11653_v21  ;;  %v12071_v11 = vadd.f32 %v14874_v19, %v11661_v10  ;;  %v12072_v38 = vadd.f32 %v14875_v58, %v11660_v24  ;;  %v22788_v30 = vld [vmem:[#allocation25_spill] sm:$0xff] }
 0x873   : > { %v13976_v26 = vsel %vm13070_vm15, %v13975_v39, %v13974_v20  ;;  %v12073_v12 = vadd.f32 %v14876_v47, %v11662_v35  ;;  %v12074_v17 = vadd.f32 %v14877_v50, %v11670_v6  ;;  %v12075_v63 = vadd.f32 %v14878_v59, %v11678_v55 }
 0x874   : > { %v13978_v43 = vsel %vm13073_vm2, %v13977_v15, %v13976_v26  ;;  %v12076_v16 = vadd.f32 %v14879_v37, %v11677_v31  ;;  %v12077_v22 = vadd.f32 %v14880_v32, %v11679_v18  ;;  %v12134_v5 = vmul.f32 0.25, %v12070_v0 }
 0x875   : > { %v13999_v45 = vpack.c.b16 %v13978_v43, %v13978_v43  ;;  %v12135_v25 = vmul.f32 0.25, %v12071_v11  ;;  %v12136_v3 = vmul.f32 0.25, %v12072_v38  ;;  %v12137_v56 = vmul.f32 0.25, %v12073_v12 }
 0x876   : > { %v12138_v49 = vmul.f32 0.25, %v12074_v17  ;;  %v12139_v2 = vmul.f32 0.25, %v12075_v63  ;;  %v12140_v36 = vmul.f32 0.25, %v12076_v16  ;;  %v13333_v52 = vcombine.high %v13243_v1, %v13243_v1 }
 0x877   : > { %14015 = vst.msk [vmem:[%s21948_s10 + $0x18] sm:$0xf] %vm5876_vm6, %v13999_v45  ;;  %v13340_v42 = vrot.slane %v13243_v1, %v21207_v33  ;;  %v11378_v54 = vadd.f32 %v22141_v29, %v22786_v53  ;;  %v11380_v61 = vadd.f32 %v22141_v29, %v22787_v34  ;;  %v12141_v14 = vmul.f32 0.25, %v12077_v22 }
 0x878   : > { %v11780_v39 = vcombine.high %v22788_v30, %v22788_v30  ;;  %v22151_v41 = vcombine.high %v22789_v4, %v22789_v4  ;;  %v14901_v60 = vrot.slane %v22788_v30, 9  ;;  %v13347_v57 = vrot.slane %v13333_v52, %v21207_v33 }
 0x879   : > { %v13348_v23 = vcombine.high %v13340_v42, %v13340_v42  ;;  %v13417_v15 = vrot.slane %v13340_v42, 1  ;;  %v14903_v21 = vrot.slane %v22789_v4, 9  ;;  %v13529_v51 = vadd.f32 %v13340_v42, %v12134_v5 }
 0x87a   : > { %v11410_v6 = vmax.f32 %v11378_v54, 0.0  ;;  %v11412_v7 = vmax.f32 %v11380_v61, 0.0  ;;  %v14902_v27 = vrot.slane %v11780_v39, 9  ;;  %v13349_v24 = vcombine.high %v13347_v57, %v13347_v57 }
 0x87b   : > { %v13418_v40 = vrot.slane %v13348_v23, 1  ;;  %v13419_v1 = vrot.slane %v13347_v57, 1  ;;  %v13530_v44 = vadd.f32 %v13417_v15, %v12135_v25  ;;  %v13531_v10 = vadd.f32 %v13348_v23, %v12136_v3 }
 0x87c   : > { %v13533_v31 = vadd.f32 %v13347_v57, %v12138_v49  ;;  %v11492_v55 = vadd.f32 %v11412_v7, %v11410_v6  ;;  %v14904_v28 = vrot.slane %v22151_v41, 9  ;;  %v13420_v35 = vrot.slane %v13349_v24, 1 }
 0x87d   : > { %v13532_v62 = vadd.f32 %v13418_v40, %v12137_v56  ;;  %v13534_v58 = vadd.f32 %v13419_v1, %v12139_v2  ;;  %v13535_v8 = vadd.f32 %v13349_v24, %v12140_v36  ;;  %v15106_v18 = vpack.c.bf16 %v13529_v51, %v13529_v51 }
 0x87e   : > { %v15107_v19 = vpack.c.bf16 %v13530_v44, %v13530_v44  ;;  %v15108_v50 = vpack.c.bf16 %v13531_v10, %v13531_v10  ;;  %v15110_v20 = vpack.c.bf16 %v13533_v31, %v13533_v31  ;;  %v13536_v47 = vadd.f32 %v13420_v35, %v12141_v14 }
 0x87f   : > { %v15109_v59 = vpack.c.bf16 %v13532_v62, %v13532_v62  ;;  %v15111_v37 = vpack.c.bf16 %v13534_v58, %v13534_v58  ;;  %v15112_v26 = vpack.c.bf16 %v13535_v8, %v13535_v8  ;;  %v11748_v43 = vcombine.high %v11492_v55, %v11492_v55 }
 0x880   : > { %v13850_v32 = vunpack.c.l.b16 %v15107_v19  ;;  %v13851_v0 = vunpack.c.l.b16 %v15108_v50  ;;  %v13853_v11 = vunpack.c.l.b16 %v15110_v20  ;;  %v15113_v38 = vpack.c.bf16 %v13536_v47, %v13536_v47  ;;  %v22791_v50 = vld [vmem:[#allocation5_spill] sm:$0xff] }
 0x881   : > { %v13852_v12 = vunpack.c.l.b16 %v15109_v59  ;;  %v13854_v17 = vunpack.c.l.b16 %v15111_v37  ;;  %v13855_v45 = vunpack.c.l.b16 %v15112_v26  ;;  %v13849_v63 = vunpack.c.l.b16 %v15106_v18  ;;  %v22790_v18 = vld [vmem:[#allocation17_spill] sm:$0xff]  ;;  %v22793_v26 = vld [vmem:[#allocation6_spill] sm:$0xff] }
 0x882   : > { %v13937_v16 = vrot.slane %v13850_v32, 7  ;;  %v13939_v22 = vrot.slane %v13851_v0, 6  ;;  %v11755_v5 = vrot.slane %v11492_v55, %v21207_v33  ;;  %v13856_v25 = vunpack.c.l.b16 %v15113_v38  ;;  %v16815_v0 = vld [vmem:[%s21797_s28] ss:$0 sm:$0xff] }
 0x883   : > { %v13941_v3 = vrot.slane %v13852_v12, 5  ;;  %v13943_v56 = vrot.slane %v13853_v11, 4  ;;  %v13945_v49 = vrot.slane %v13854_v17, 3  ;;  %v11762_v36 = vrot.slane %v11748_v43, %v21207_v33 }
 0x884   : > { %v13938_v2 = vsel %vm13055_vm0, %v13937_v16, %v13849_v63  ;;  %v11763_v52 = vcombine.high %v11755_v5, %v11755_v5  ;;  %v14897_v42 = vrot.slane %v11755_v5, 9  ;;  %v13947_v54 = vrot.slane %v13855_v45, 2 }
 0x885   : > { %v13940_v53 = vsel %vm13058_vm4, %v13939_v22, %v13938_v2  ;;  %v12098_v34 = vadd.f32 %v14901_v60, %v22788_v30  ;;  %v12099_v61 = vadd.f32 %v14902_v27, %v11780_v39  ;;  %v11764_v57 = vcombine.high %v11762_v36, %v11762_v36 }
 0x886   : > { %v13942_v14 = vsel %vm13061_vm12, %v13941_v3, %v13940_v53  ;;  %v14898_v23 = vrot.slane %v11763_v52, 9  ;;  %v14899_v15 = vrot.slane %v11762_v36, 9  ;;  %v13949_v6 = vrot.slane %v13856_v25, 1 }
 0x887   : > { %v13944_v51 = vsel %vm13064_vm13, %v13943_v56, %v13942_v14  ;;  %v12094_v7 = vadd.f32 %v14897_v42, %v11755_v5  ;;  %v12100_v24 = vadd.f32 %v14903_v21, %v22789_v4  ;;  %v14900_v1 = vrot.slane %v11764_v57, 9 }
 0x888   : > { %v13946_v40 = vsel %vm13067_vm14, %v13945_v49, %v13944_v51  ;;  %v12095_v44 = vadd.f32 %v14898_v23, %v11763_v52  ;;  %v12096_v10 = vadd.f32 %v14899_v15, %v11762_v36  ;;  %v12101_v39 = vadd.f32 %v14904_v28, %v22151_v41  ;;  %v22792_v28 = vld [vmem:[#allocation18_spill] sm:$0xff] }
 0x889   : > { %v13948_v30 = vsel %vm13070_vm15, %v13947_v54, %v13946_v40  ;;  %v12158_v60 = vmul.f32 0.25, %v12094_v7  ;;  %v12097_v31 = vadd.f32 %v14900_v1, %v11764_v57  ;;  %v12162_v55 = vmul.f32 0.25, %v12098_v34 }
 0x88a   : > { %v13950_v27 = vsel %vm13073_vm2, %v13949_v6, %v13948_v30  ;;  %v12163_v35 = vmul.f32 0.25, %v12099_v61  ;;  %v12159_v58 = vmul.f32 0.25, %v12095_v44  ;;  %v12160_v4 = vmul.f32 0.25, %v12096_v10 }
 0x88b   : > { %v13997_v62 = vpack.c.b16 %v13950_v27, %v13950_v27  ;;  %v13254_v21 = vadd.f32 %v22126_v48, %v21931_v13  ;;  %v12164_v8 = vmul.f32 0.25, %v12100_v24  ;;  %v11292_v19 = vmul.f32 %v21811_v9, %v22790_v18 }
 0x88c   : > { %v11293_v41 = vmul.f32 %v21811_v9, %v22791_v50  ;;  %v11294_v20 = vmul.f32 %v21811_v9, %v22792_v28  ;;  %v12165_v47 = vmul.f32 0.25, %v12101_v39  ;;  %v11295_v32 = vmul.f32 %v21811_v9, %v22793_v26 }
 0x88d   : > { %14013 = vst.msk [vmem:[%s21948_s10 + $0x10] sm:$0xf] %vm5876_vm6, %v13997_v62  ;;  %v13384_v59 = vcombine.high %v13254_v21, %v13254_v21  ;;  %v13391_v37 = vrot.slane %v13254_v21, %v21207_v33  ;;  %v12161_v13 = vmul.f32 0.25, %v12097_v31  ;;  %v11331_v11 = vmul.f32 %v16815_v0, %v11292_v19 }
 0x88e   : > { %v11332_v43 = vmul.f32 %v16815_v0, %v11293_v41  ;;  %v11333_v38 = vmul.f32 %v16815_v0, %v11294_v20  ;;  %v11334_v16 = vmul.f32 %v16815_v0, %v11295_v32  ;;  %v13246_v25 = vadd.f32 %v22126_v48, %v21989_v46 }
 0x88f   : > { %v13398_v12 = vrot.slane %v13384_v59, %v21207_v33  ;;  %v13399_v17 = vcombine.high %v13391_v37, %v13391_v37  ;;  %v13429_v45 = vrot.slane %v13391_v37, 1  ;;  %v13553_v63 = vadd.f32 %v13391_v37, %v12158_v60 }
 0x890   : > { %v11370_v22 = vadd.f32 %v22141_v29, %v11331_v11  ;;  %v11371_v5 = vadd.f32 %v22141_v29, %v11332_v43  ;;  %v11372_v42 = vadd.f32 %v22141_v29, %v11333_v38  ;;  %v11373_v15 = vadd.f32 %v22141_v29, %v11334_v16 }
 0x891   : > { %v13400_v3 = vcombine.high %v13398_v12, %v13398_v12  ;;  %v13430_v9 = vrot.slane %v13399_v17, 1  ;;  %v13431_v56 = vrot.slane %v13398_v12, 1  ;;  %v13554_v49 = vadd.f32 %v13429_v45, %v12159_v58 }
 0x892   : > { %v13555_v2 = vadd.f32 %v13399_v17, %v12160_v4  ;;  %v13557_v36 = vadd.f32 %v13398_v12, %v12162_v55  ;;  %v15130_v52 = vpack.c.bf16 %v13553_v63, %v13553_v63  ;;  %v11402_v31 = vmax.f32 %v11370_v22, 0.0 }
 0x893   : > { %v13432_v53 = vrot.slane %v13400_v3, 1  ;;  %v13556_v54 = vadd.f32 %v13430_v9, %v12161_v13  ;;  %v13558_v34 = vadd.f32 %v13431_v56, %v12163_v35  ;;  %v13559_v61 = vadd.f32 %v13400_v3, %v12164_v8 }
 0x894   : > { %v15131_v14 = vpack.c.bf16 %v13554_v49, %v13554_v49  ;;  %v15132_v57 = vpack.c.bf16 %v13555_v2, %v13555_v2  ;;  %v15134_v23 = vpack.c.bf16 %v13557_v36, %v13557_v36  ;;  %v13873_v7 = vunpack.c.l.b16 %v15130_v52 }
 0x895   : > { %v13560_v51 = vadd.f32 %v13432_v53, %v12165_v47  ;;  %v15133_v46 = vpack.c.bf16 %v13556_v54, %v13556_v54  ;;  %v15135_v48 = vpack.c.bf16 %v13558_v34, %v13558_v34  ;;  %v15136_v6 = vpack.c.bf16 %v13559_v61, %v13559_v61 }
 0x896   : > { %v13874_v24 = vunpack.c.l.b16 %v15131_v14  ;;  %v13875_v40 = vunpack.c.l.b16 %v15132_v57  ;;  %v13877_v1 = vunpack.c.l.b16 %v15134_v23  ;;  %v11403_v55 = vmax.f32 %v11371_v5, 0.0 }
 0x897   : > { %v15137_v44 = vpack.c.bf16 %v13560_v51, %v13560_v51  ;;  %v13876_v10 = vunpack.c.l.b16 %v15133_v46  ;;  %v13878_v30 = vunpack.c.l.b16 %v15135_v48  ;;  %v13879_v39 = vunpack.c.l.b16 %v15136_v6 }
 0x898   : > { %v13979_v60 = vrot.slane %v13874_v24, 7  ;;  %v13981_v27 = vrot.slane %v13875_v40, 6  ;;  %v13985_v58 = vrot.slane %v13877_v1, 4  ;;  %v11404_v4 = vmax.f32 %v11372_v42, 0.0 }
 0x899   : > { %v13880_v35 = vunpack.c.l.b16 %v15137_v44  ;;  %v13983_v62 = vrot.slane %v13876_v10, 5  ;;  %v11405_v21 = vmax.f32 %v11373_v15, 0.0  ;;  %v13350_v8 = vcombine.high %v13246_v25, %v13246_v25 }
 0x89a   : > { %v13980_v29 = vsel %vm13055_vm0, %v13979_v60, %v13873_v7  ;;  %v13987_v19 = vrot.slane %v13878_v30, 3  ;;  %v13989_v50 = vrot.slane %v13879_v39, 2  ;;  %v13357_v41 = vrot.slane %v13246_v25, %v21207_v33 }
 0x89b   : > { %v13982_v18 = vsel %vm13058_vm4, %v13981_v27, %v13980_v29  ;;  %v11488_v20 = vadd.f32 %v11404_v4, %v11402_v31  ;;  %v11489_v47 = vadd.f32 %v11405_v21, %v11403_v55  ;;  %v13364_v59 = vrot.slane %v13350_v8, %v21207_v33 }
 0x89c   : > { %v13984_v28 = vsel %vm13061_vm12, %v13983_v62, %v13982_v18  ;;  %v13991_v26 = vrot.slane %v13880_v35, 1  ;;  %v13365_v32 = vcombine.high %v13357_v41, %v13357_v41  ;;  %v13421_v13 = vrot.slane %v13357_v41, 1 }
 0x89d   : > { %v13986_v37 = vsel %vm13064_vm13, %v13985_v58, %v13984_v28  ;;  %v11680_v11 = vcombine.high %v11488_v20, %v11488_v20  ;;  %v11687_v43 = vrot.slane %v11488_v20, %v21207_v33  ;;  %v11697_v38 = vcombine.high %v11489_v47, %v11489_v47 }
 0x89e   : > { %v13988_v0 = vsel %vm13067_vm14, %v13987_v19, %v13986_v37  ;;  %v11704_v17 = vrot.slane %v11489_v47, %v21207_v33  ;;  %v13366_v45 = vcombine.high %v13364_v59, %v13364_v59  ;;  %v13422_v63 = vrot.slane %v13365_v32, 1 }
 0x89f   : > { %v13990_v12 = vsel %vm13070_vm15, %v13989_v50, %v13988_v0  ;;  %v11694_v22 = vrot.slane %v11680_v11, %v21207_v33  ;;  %v11695_v5 = vcombine.high %v11687_v43, %v11687_v43  ;;  %v11711_v25 = vrot.slane %v11697_v38, %v21207_v33 }
 0x8a0   : > { %v13992_v16 = vsel %vm13073_vm2, %v13991_v26, %v13990_v12  ;;  %v11712_v9 = vcombine.high %v11704_v17, %v11704_v17  ;;  %v14881_v56 = vrot.slane %v11687_v43, 9  ;;  %v14885_v49 = vrot.slane %v11704_v17, 9 }
 0x8a1   : > { %v14000_v3 = vpack.c.b16 %v13992_v16, %v13992_v16  ;;  %v11696_v2 = vcombine.high %v11694_v22, %v11694_v22  ;;  %v11713_v36 = vcombine.high %v11711_v25, %v11711_v25  ;;  %v14882_v52 = vrot.slane %v11695_v5, 9 }
 0x8a2   : > { %v14883_v42 = vrot.slane %v11694_v22, 9  ;;  %v14886_v53 = vrot.slane %v11712_v9, 9  ;;  %v14887_v54 = vrot.slane %v11711_v25, 9  ;;  %v12078_v34 = vadd.f32 %v14881_v56, %v11687_v43 }
 0x8a3   : > { %14016 = vst.msk [vmem:[%s21948_s10 + $0x1c] sm:$0xf] %vm5876_vm6, %v14000_v3  ;;  %v12082_v61 = vadd.f32 %v14885_v49, %v11704_v17  ;;  %v14884_v14 = vrot.slane %v11696_v2, 9  ;;  %v14888_v57 = vrot.slane %v11713_v36, 9  ;;  %v12079_v23 = vadd.f32 %v14882_v52, %v11695_v5 }
 0x8a4   : > { %v12080_v15 = vadd.f32 %v14883_v42, %v11694_v22  ;;  %v12083_v51 = vadd.f32 %v14886_v53, %v11712_v9  ;;  %v12084_v33 = vadd.f32 %v14887_v54, %v11711_v25  ;;  %v12142_v46 = vmul.f32 0.25, %v12078_v34 }
 0x8a5   : > { %v12146_v48 = vmul.f32 0.25, %v12082_v61  ;;  %v12081_v6 = vadd.f32 %v14884_v14, %v11696_v2  ;;  %v12085_v7 = vadd.f32 %v14888_v57, %v11713_v36  ;;  %v12143_v24 = vmul.f32 0.25, %v12079_v23 }
 0x8a6   : > { %v12144_v40 = vmul.f32 0.25, %v12080_v15  ;;  %v12147_v1 = vmul.f32 0.25, %v12083_v51  ;;  %v12148_v44 = vmul.f32 0.25, %v12084_v33  ;;  %v13423_v10 = vrot.slane %v13364_v59, 1 }
 0x8a7   : > { %v13424_v30 = vrot.slane %v13366_v45, 1  ;;  %v12145_v39 = vmul.f32 0.25, %v12081_v6  ;;  %v12149_v60 = vmul.f32 0.25, %v12085_v7  ;;  %v13537_v27 = vadd.f32 %v13357_v41, %v12142_v46 }
 0x8a8   : > { %v13538_v31 = vadd.f32 %v13421_v13, %v12143_v24  ;;  %v13539_v55 = vadd.f32 %v13365_v32, %v12144_v40  ;;  %v13541_v35 = vadd.f32 %v13364_v59, %v12146_v48  ;;  %v13542_v62 = vadd.f32 %v13423_v10, %v12147_v1 }
 0x8a9   : > { %v13543_v58 = vadd.f32 %v13366_v45, %v12148_v44  ;;  %v13540_v29 = vadd.f32 %v13422_v63, %v12145_v39  ;;  %v13544_v4 = vadd.f32 %v13424_v30, %v12149_v60  ;;  %v15114_v21 = vpack.c.bf16 %v13537_v27, %v13537_v27 }
 0x8aa   : > { %v15115_v8 = vpack.c.bf16 %v13538_v31, %v13538_v31  ;;  %v15116_v18 = vpack.c.bf16 %v13539_v55, %v13539_v55  ;;  %v15118_v19 = vpack.c.bf16 %v13541_v35, %v13541_v35  ;;  %v15119_v50 = vpack.c.bf16 %v13542_v62, %v13542_v62 }
 0x8ab   : > { %v15120_v28 = vpack.c.bf16 %v13543_v58, %v13543_v58  ;;  %v15117_v20 = vpack.c.bf16 %v13540_v29, %v13540_v29  ;;  %v15121_v47 = vpack.c.bf16 %v13544_v4, %v13544_v4  ;;  %v13857_v11 = vunpack.c.l.b16 %v15114_v21 }
 0x8ac   : > { %v13858_v37 = vunpack.c.l.b16 %v15115_v8  ;;  %v13859_v26 = vunpack.c.l.b16 %v15116_v18  ;;  %v13861_v0 = vunpack.c.l.b16 %v15118_v19  ;;  %v13862_v13 = vunpack.c.l.b16 %v15119_v50 }
 0x8ad   : > { %v13860_v41 = vunpack.c.l.b16 %v15117_v20  ;;  %v13863_v59 = vunpack.c.l.b16 %v15120_v28  ;;  %v13864_v38 = vunpack.c.l.b16 %v15121_v47 }
 0x8ae   : > { %v13951_v32 = vrot.slane %v13858_v37, 7  ;;  %v13953_v43 = vrot.slane %v13859_v26, 6  ;;  %v13957_v63 = vrot.slane %v13861_v0, 4  ;;  %v13959_v22 = vrot.slane %v13862_v13, 3 }
 0x8af   : > { %v13955_v17 = vrot.slane %v13860_v41, 5  ;;  %v13961_v25 = vrot.slane %v13863_v59, 2  ;;  %v13963_v9 = vrot.slane %v13864_v38, 1 }
 0x8b0   : > { %v13952_v12 = vsel %vm13055_vm0, %v13951_v32, %v13857_v11 }
 0x8b1   : > { %v13954_v45 = vsel %vm13058_vm4, %v13953_v43, %v13952_v12 }
 0x8b2   : > { %v13956_v16 = vsel %vm13061_vm12, %v13955_v17, %v13954_v45 }
 0x8b3   : > { %v13958_v5 = vsel %vm13064_vm13, %v13957_v63, %v13956_v16 }
 0x8b4   : > { %v13960_v3 = vsel %vm13067_vm14, %v13959_v22, %v13958_v5 }
 0x8b5   : > { %v13962_v56 = vsel %vm13070_vm15, %v13961_v25, %v13960_v3 }
 0x8b6   : > { %v13964_v49 = vsel %vm13073_vm2, %v13963_v9, %v13962_v56 }
 0x8b7   : > { %v13998_v2 = vpack.c.b16 %v13964_v49, %v13964_v49 }
 0x8b9   : > { %14014 = vst.msk [vmem:[%s21948_s10 + $0x14] sm:$0xf] %vm5876_vm6, %v13998_v2 }
 0x8ba PF: > { %s19_s30 = sadd.s32 1, %s16822_s30  }
 0x8bb   : > { %p16_p4 = scmp.ge.s32.totalorder %s19_s30, 4  }
 0x8bd   :  { %18 = sbr.rel (!%p16_p4) target bundleno = 1 (0x1), region = 120 }

</bundles_post_ra>
